<compile_context>
chip_gen: v7x
topology: tpu7x:2x2x1
jax: 0.10.0
libtpu: 0.0.40
codegen_flags: <defaults>
</compile_context>

<pallas_src>
import functools
import math
from typing import NamedTuple, Tuple

import jax
import jax.numpy as jnp
from jax.experimental import pallas as pl
from jax.experimental.pallas import tpu as pltpu


# ----------------------------------------------------------------------------
# Per-chip tiling / VMEM budget
# ----------------------------------------------------------------------------
def _device_kind():
    try:
        return jax.devices()[0].device_kind.lower()
    except Exception:
        return ""


_KIND = _device_kind()
if "v7" in _KIND or "tpu7" in _KIND:
    _ROW_TARGET, _VMEM_LIMIT = 256, 40 << 20          # 64 MiB physical VMEM
elif "v5" in _KIND or "v6" in _KIND:
    _ROW_TARGET, _VMEM_LIMIT = 1024, 64 << 20         # 128 MiB physical VMEM
else:
    _ROW_TARGET, _VMEM_LIMIT = 512, 32 << 20


def _round_up(x, n):
    return ((x + n - 1) // n) * n


def _row_tiles(m, target=_ROW_TARGET):
    """Pick (tile_rows, padded_rows, grid) — always 8-aligned, never one giant
    block, never a tiny step-overhead-dominated tile."""
    if m <= target:
        tm = _round_up(m, 8)
        return tm, tm, 1
    n = -(-m // target)                      # number of tiles
    tm = _round_up(-(-m // n), 8)            # balanced tile, 8-aligned
    return tm, n * tm, n


# ----------------------------------------------------------------------------
# Generic fused row-wise kernel:  [pre-LN] -> [matmul+bias] -> [relu]
#                                 -> [+residual] -> [post-LN]
# ----------------------------------------------------------------------------
def _ln_f32(x, g, b, eps=1e-5):
    mu = jnp.mean(x, axis=-1, keepdims=True)
    xc = x - mu
    var = jnp.mean(xc * xc, axis=-1, keepdims=True)
    return xc * jax.lax.rsqrt(var + eps) * g + b


def _make_fused_kernel(pre_ln, has_w, has_bias, relu, res_mode, post_ln):
    # res_mode: 0 = no residual, 1 = reuse the (pre-LN) input, 2 = extra ref.
    def kernel(*refs):
        *ins, o_ref = refs
        it = iter(ins)
        x0 = next(it)[...].astype(jnp.float32)
        y = x0
        if pre_ln:
            g = next(it)[...].astype(jnp.float32)
            b = next(it)[...].astype(jnp.float32)
            y = _ln_f32(y, g, b)
        if has_w:
            w = next(it)[...].astype(jnp.bfloat16)
            y = jnp.dot(y.astype(jnp.bfloat16), w,
                        preferred_element_type=jnp.float32)
            if has_bias:
                y = y + next(it)[...].astype(jnp.float32)
        if relu:
            y = jnp.maximum(y, 0.0)
        if res_mode == 1:
            y = y + x0
        elif res_mode == 2:
            y = y + next(it)[...].astype(jnp.float32)
        if post_ln:
            g = next(it)[...].astype(jnp.float32)
            b = next(it)[...].astype(jnp.float32)
            y = _ln_f32(y, g, b)
        o_ref[...] = y.astype(o_ref.dtype)

    return kernel


def fused_op(x, *, pre_ln=None, matmul=None, relu=False, residual=None,
             post_ln=None, out_dtype=jnp.float32):
    """y = post_ln( relu( pre_ln(x) @ W + b ) + residual ) — all optional,
    executed in a single pallas_call, row-tiled / padded to 8-aligned tiles."""
    res_is_x = residual is x
    lead = x.shape[:-1]
    din = x.shape[-1]
    x2 = x.reshape(-1, din)
    m = x2.shape[0]
    tm, m_pad, grid_m = _row_tiles(m)
    pad = m_pad - m
    if pad:
        x2 = jnp.pad(x2, ((0, pad), (0, 0)))

    args = [x2]
    specs = [pl.BlockSpec((tm, din), lambda i: (i, 0))]

    def add_row_vec(v, n):
        args.append(jnp.asarray(v, jnp.float32).reshape(1, n))
        specs.append(pl.BlockSpec((1, n), lambda i: (0, 0)))

    if pre_ln is not None:
        add_row_vec(pre_ln[0], din)
        add_row_vec(pre_ln[1], din)

    has_w = matmul is not None
    has_bias = False
    if has_w:
        w, bias = matmul
        k, nout = w.shape
        assert k == din
        args.append(w)
        specs.append(pl.BlockSpec((k, nout), lambda i: (0, 0)))
        if bias is not None:
            has_bias = True
            add_row_vec(bias, nout)
    else:
        nout = din

    if residual is None:
        res_mode = 0
    elif res_is_x:
        assert nout == din
        res_mode = 1
    else:
        res_mode = 2
        r2 = residual.reshape(-1, nout)
        if pad:
            r2 = jnp.pad(r2, ((0, pad), (0, 0)))
        args.append(r2)
        specs.append(pl.BlockSpec((tm, nout), lambda i: (i, 0)))

    if post_ln is not None:
        add_row_vec(post_ln[0], nout)
        add_row_vec(post_ln[1], nout)

    kernel = _make_fused_kernel(pre_ln is not None, has_w, has_bias, relu,
                                res_mode, post_ln is not None)
    out = pl.pallas_call(
        kernel,
        out_shape=jax.ShapeDtypeStruct((m_pad, nout), out_dtype),
        grid=(grid_m,),
        in_specs=specs,
        out_specs=pl.BlockSpec((tm, nout), lambda i: (i, 0)),
        compiler_params=pltpu.CompilerParams(
            dimension_semantics=("parallel",),
            vmem_limit_bytes=_VMEM_LIMIT),
    )(*args)
    if pad:
        out = out[:m]
    return out.reshape(lead + (nout,))


# ----------------------------------------------------------------------------
# Stacked synthetic text resblocks: x <- x + W_l(LN(x)), one pallas_call per
# group of layers.  txt stays resident in a VMEM scratch across the layer axis.
# ----------------------------------------------------------------------------
def _resblock_stack_kernel(x_ref, w_ref, b_ref, g_ref, bb_ref, o_ref, acc_ref):
    l = pl.program_id(1)

    @pl.when(l == 0)
    def _():
        acc_ref[...] = x_ref[...].astype(jnp.float32)

    x = acc_ref[...]
    y = _ln_f32(x, g_ref[0].astype(jnp.float32), bb_ref[0].astype(jnp.float32))
    y = jnp.dot(y.astype(jnp.bfloat16), w_ref[0],
                preferred_element_type=jnp.float32) + b_ref[0]
    acc_ref[...] = x + y

    @pl.when(l == pl.num_programs(1) - 1)
    def _():
        o_ref[...] = acc_ref[...].astype(o_ref.dtype)


def text_resblock_stack(txt, stacks, layer_lo, layer_hi):
    """txt: (B, L, d) f32 -> (B, L, d) f32 after layers [layer_lo, layer_hi)."""
    B, L, d = txt.shape
    m = B * L
    x2 = txt.reshape(m, d)
    tm, m_pad, grid_m = _row_tiles(m)
    if m_pad != m:
        x2 = jnp.pad(x2, ((0, m_pad - m), (0, 0)))
    nl = layer_hi - layer_lo

    out = pl.pallas_call(
        _resblock_stack_kernel,
        out_shape=jax.ShapeDtypeStruct((m_pad, d), jnp.float32),
        grid=(grid_m, nl),
        in_specs=[
            pl.BlockSpec((tm, d), lambda i, l: (i, 0)),
            pl.BlockSpec((1, d, d), lambda i, l, off=layer_lo: (l + off, 0, 0)),
            pl.BlockSpec((1, 1, d), lambda i, l, off=layer_lo: (l + off, 0, 0)),
            pl.BlockSpec((1, 1, d), lambda i, l, off=layer_lo: (l + off, 0, 0)),
            pl.BlockSpec((1, 1, d), lambda i, l, off=layer_lo: (l + off, 0, 0)),
        ],
        out_specs=pl.BlockSpec((tm, d), lambda i, l: (i, 0)),
        scratch_shapes=[pltpu.VMEM((tm, d), jnp.float32)],
        compiler_params=pltpu.CompilerParams(
            dimension_semantics=("parallel", "arbitrary"),
            vmem_limit_bytes=_VMEM_LIMIT),
    )(x2, stacks["w"], stacks["b"], stacks["g"], stacks["beta"])
    if m_pad != m:
        out = out[:m]
    return out.reshape(B, L, d)


# ----------------------------------------------------------------------------
# Fully fused VLSA adapter: pre-LN -> QKV -> MHA -> out-proj -> +residual,
# one pallas_call per fusion stage, gridded (parallel) over the batch axis.
# ----------------------------------------------------------------------------
def _make_vlsa_kernel(lv, nhead):
    def kernel(v_ref, t_ref, g_ref, b_ref, wi_ref, bi_ref, wo_ref, bo_ref,
               vo_ref, to_ref):
        v = v_ref[0].astype(jnp.float32)                     # (Lv, E)
        t = t_ref[0].astype(jnp.float32)                     # (Lt, E)
        x = jnp.concatenate([v, t], axis=0)                  # (L, E)
        E = x.shape[-1]
        hd = E // nhead
        scale = 1.0 / math.sqrt(hd)

        y = _ln_f32(x, g_ref[...].astype(jnp.float32),
                    b_ref[...].astype(jnp.float32))
        qkv = jnp.dot(y.astype(jnp.bfloat16), wi_ref[...],
                      preferred_element_type=jnp.float32) + bi_ref[...]

        heads = []
        for h in range(nhead):                               # static unroll
            q_h = (qkv[:, h * hd:(h + 1) * hd] * scale).astype(jnp.bfloat16)
            k_h = qkv[:, E + h * hd: E + (h + 1) * hd].astype(jnp.bfloat16)
            v_h = qkv[:, 2 * E + h * hd: 2 * E + (h + 1) * hd].astype(jnp.bfloat16)
            # TODO(synk): for long sequences block over q/k with online softmax
            # instead of materializing the full (L, L) score tile.
            s = jax.lax.dot_general(q_h, k_h, (((1,), (1,)), ((), ())),
                                    preferred_element_type=jnp.float32)
            s = s - jnp.max(s, axis=-1, keepdims=True)
            p = jnp.exp(s)
            p = p * pl.reciprocal(jnp.sum(p, axis=-1, keepdims=True),
                                  approx=True)
            heads.append(jnp.dot(p.astype(jnp.bfloat16), v_h,
                                 preferred_element_type=jnp.float32))
        att = jnp.concatenate(heads, axis=-1)                # (L, E)
        out = jnp.dot(att.astype(jnp.bfloat16), wo_ref[...],
                      preferred_element_type=jnp.float32) + bo_ref[...] + x
        vo_ref[0] = out[:lv].astype(vo_ref.dtype)
        to_ref[0] = out[lv:].astype(to_ref.dtype)

    return kernel


def vlsa_adapter(v, t, fp, nhead):
    """v: (B, Lv, E), t: (B, Lt, E) f32 -> same shapes, one fused kernel."""
    B, Lv, E = v.shape
    Lt = t.shape[1]
    kernel = _make_vlsa_kernel(Lv, nhead)
    out_v, out_t = pl.pallas_call(
        kernel,
        out_shape=(jax.ShapeDtypeStruct((B, Lv, E), jnp.float32),
                   jax.ShapeDtypeStruct((B, Lt, E), jnp.float32)),
        grid=(B,),
        in_specs=[
            pl.BlockSpec((1, Lv, E), lambda b: (b, 0, 0)),
            pl.BlockSpec((1, Lt, E), lambda b: (b, 0, 0)),
            pl.BlockSpec((1, E), lambda b: (0, 0)),
            pl.BlockSpec((1, E), lambda b: (0, 0)),
            pl.BlockSpec((E, 3 * E), lambda b: (0, 0)),
            pl.BlockSpec((1, 3 * E), lambda b: (0, 0)),
            pl.BlockSpec((E, E), lambda b: (0, 0)),
            pl.BlockSpec((1, E), lambda b: (0, 0)),
        ],
        out_specs=(pl.BlockSpec((1, Lv, E), lambda b: (b, 0, 0)),
                   pl.BlockSpec((1, Lt, E), lambda b: (b, 0, 0))),
        compiler_params=pltpu.CompilerParams(
            dimension_semantics=("parallel",),
            vmem_limit_bytes=_VMEM_LIMIT),
    )(v, t, fp["ln_g"], fp["ln_b"], fp["in_wt"], fp["in_b"],
      fp["out_wt"], fp["out_b"])
    return out_v, out_t


# ----------------------------------------------------------------------------
# kernel==stride convolutions as patch-matmuls (NHWC, weights prebuilt as mats)
# ----------------------------------------------------------------------------
def conv_s2d(x, wmat, s, relu=False, out_dtype=jnp.bfloat16):
    """Conv2d, kernel==stride==s, no bias. x: (B,H,W,C), wmat: (s*s*C, Cout)."""
    b, h, w, c = x.shape
    ho, wo = h // s, w // s
    if s == 1:
        patches = x.reshape(b * h * w, c)
    else:
        # TODO(synk): patch extraction is an XLA reshape+transpose (one extra
        # HBM copy); fold it into the kernel for production image sizes.
        patches = x.reshape(b, ho, s, wo, s, c).transpose(0, 1, 3, 2, 4, 5)
        patches = patches.reshape(b * ho * wo, s * s * c)
    cout = wmat.shape[1]
    out = fused_op(patches, matmul=(wmat, None), relu=relu, out_dtype=out_dtype)
    return out.reshape(b, ho, wo, cout)


def conv_transpose_s2d(x, wmat, s, out_dtype=jnp.bfloat16):
    """ConvTranspose2d, kernel==stride==s, no bias. x:(B,H,W,C), wmat:(C, s*s*Cout)."""
    b, h, w, c = x.shape
    cout = wmat.shape[1] // (s * s)
    out = fused_op(x.reshape(b * h * w, c), matmul=(wmat, None),
                   out_dtype=out_dtype)
    out = out.reshape(b, h, w, s, s, cout).transpose(0, 1, 3, 2, 4, 5)
    return out.reshape(b, h * s, w * s, cout)


# ----------------------------------------------------------------------------
# Deterministic parameter init (kernel-ready layouts: transposed + bf16)
# ----------------------------------------------------------------------------
class Config(NamedTuple):
    d_img: Tuple[int, ...]
    d_txt: int
    d_model: int
    nhead: int
    num_stages: int
    strides: Tuple[int, ...]
    num_layers: int
    fusion_stage: int


def _normal(key, shape, std):
    return std * jax.random.normal(key, shape, dtype=jnp.float32)


def _kaiming(key, shape):
    fan_out = shape[0] * shape[2] * shape[3]
    return math.sqrt(2.0 / fan_out) * jax.random.normal(key, shape,
                                                        dtype=jnp.float32)


def _conv_wmat(w):
    # Conv2d weight (Cout, Cin, s, s) -> (s*s*Cin, Cout), bf16, NHWC-patch order
    cout, cin, s, _ = w.shape
    return w.transpose(2, 3, 1, 0).reshape(s * s * cin, cout).astype(jnp.bfloat16)


def _convT_wmat(w):
    # ConvTranspose2d weight (Cin, Cout, s, s) -> (Cin, s*s*Cout), bf16
    cin, cout, s, _ = w.shape
    return w.transpose(0, 2, 3, 1).reshape(cin, s * s * cout).astype(jnp.bfloat16)


def _lin_wmat(w):
    # nn.Linear weight (out, in) -> (in, out), bf16
    return w.T.astype(jnp.bfloat16)


def init_bridger(key, cfg):
    keys = iter(jax.random.split(key, 64))
    E = cfg.d_model
    stages = []
    for i in range(cfg.num_stages):
        s = cfg.strides[i]
        stg = {}
        if i < cfg.num_stages - 1:
            stg["zoom_in_w"] = _conv_wmat(_kaiming(next(keys), (E, cfg.d_img[i], s, s)))
            stg["zoom_out_w"] = _convT_wmat(_kaiming(next(keys), (E, cfg.d_img[i], s, s)))
        else:
            stg["zoom_in_w"] = _convT_wmat(_kaiming(next(keys), (cfg.d_img[i], E, s, s)))
            stg["zoom_out_w"] = _conv_wmat(_kaiming(next(keys), (cfg.d_img[i], E, s, s)))
        stg["lin1_wt"] = _lin_wmat(_normal(next(keys), (E, cfg.d_txt), 0.02))
        stg["lin1_b"] = jnp.zeros((E,), jnp.float32)
        stg["lin2_wt"] = _lin_wmat(_normal(next(keys), (cfg.d_txt, E), 0.02))
        stg["lin2_b"] = jnp.zeros((cfg.d_txt,), jnp.float32)
        stg["ln_v_g"] = jnp.ones((E,), jnp.float32)
        stg["ln_v_b"] = jnp.zeros((E,), jnp.float32)
        stg["ln_t_g"] = jnp.ones((E,), jnp.float32)
        stg["ln_t_b"] = jnp.zeros((E,), jnp.float32)
        stg["fusion"] = {
            "ln_g": jnp.ones((1, E), jnp.float32),
            "ln_b": jnp.zeros((1, E), jnp.float32),
            "in_wt": _lin_wmat(_normal(next(keys), (3 * E, E), 0.02)),
            "in_b": jnp.zeros((1, 3 * E), jnp.float32),
            "out_wt": _lin_wmat(_normal(next(keys), (E, E), 0.02)),
            "out_b": jnp.zeros((1, E), jnp.float32),
        }
        stages.append(stg)
    return {
        "stages": stages,
        "last_conv_w": _conv_wmat(
            _kaiming(next(keys), (512, E, cfg.strides[-1], cfg.strides[-1]))),
        "last_linear_wt": _lin_wmat(_normal(next(keys), (cfg.d_txt, E), 0.02)),
        "last_linear_b": jnp.zeros((cfg.d_txt,), jnp.float32),
    }


def init_backbone(key, cfg, ctx_len, vocab):
    # TODO(synk): synthetic deterministic stand-in for the external CLIP backbone
    # (ResNet stem / bottlenecks / BatchNorm / AttentionPool2d / text transformer).
    keys = iter(jax.random.split(key, 64))
    d_img, d_txt = cfg.d_img, cfg.d_txt
    bk = {
        "conv1_w": _conv_wmat(_kaiming(next(keys), (8, 3, 2, 2))),
        "conv2_w": _conv_wmat(_kaiming(next(keys), (8, 8, 1, 1))),
        "conv3_w": _conv_wmat(_kaiming(next(keys), (16, 8, 1, 1))),
        "layer1_w": _conv_wmat(_kaiming(next(keys), (16, 16, 1, 1))),
        "layer2_w": _conv_wmat(_kaiming(next(keys), (d_img[0], 16, 2, 2))),
        "layer3_w": _conv_wmat(_kaiming(next(keys), (d_img[1], d_img[0], 2, 2))),
        "layer4_w": _conv_wmat(_kaiming(next(keys), (d_img[2], d_img[1], 2, 2))),
        "attnpool_w": _conv_wmat(_kaiming(next(keys), (512, d_img[2], 1, 1))),
        "tok_emb": _normal(next(keys), (vocab, d_txt), 0.02),
        "pos_emb": _normal(next(keys), (ctx_len, d_txt), 0.01),
        "ln_final_g": jnp.ones((d_txt,), jnp.float32),
        "ln_final_b": jnp.zeros((d_txt,), jnp.float32),
        "text_proj": _normal(next(keys), (d_txt, d_txt), 0.02).astype(jnp.bfloat16),
    }
    # Stacked synthetic text resblocks (one fused pallas_call per group of 4).
    bk["resblock_stack"] = {
        "w": jnp.stack([_lin_wmat(_normal(next(keys), (d_txt, d_txt), 0.02))
                        for _ in range(cfg.num_layers)]),
        "b": jnp.zeros((cfg.num_layers, 1, d_txt), jnp.float32),
        "g": jnp.ones((cfg.num_layers, 1, d_txt), jnp.float32),
        "beta": jnp.zeros((cfg.num_layers, 1, d_txt), jnp.float32),
    }
    return bk


# ----------------------------------------------------------------------------
# Bridger_SA_RN_fwd forward (channels-last / batch-major internally)
# ----------------------------------------------------------------------------
def bridger_forward(params, backbone, vis, text, rgbd, cfg):
    nhead, strides = cfg.nhead, cfg.strides
    num_stages, fusion_stage = cfg.num_stages, cfg.fusion_stage
    num_layers = cfg.num_layers
    assert num_layers % 4 == 0

    # --- visual stem (synthetic; BatchNorm stand-ins are identity) ---
    x = vis.astype(jnp.float32).transpose(0, 2, 3, 1)            # NCHW -> NHWC
    x = conv_s2d(x, backbone["conv1_w"], 2, relu=True)
    x = conv_s2d(x, backbone["conv2_w"], 1, relu=True)
    x = conv_s2d(x, backbone["conv3_w"], 1, relu=True)
    B, H, W, C = x.shape
    x = x.reshape(B, H // 2, 2, W // 2, 2, C).mean(axis=(2, 4))  # avgpool(2)
    vis_f = conv_s2d(x, backbone["layer1_w"], 1)
    vis_layer_mats = [backbone["layer2_w"], backbone["layer3_w"],
                      backbone["layer4_w"]]

    # --- text embedding, batch-major (B, L, d_txt) ---
    txt = backbone["tok_emb"][text] + backbone["pos_emb"][:text.shape[1]]
    rgbd_bm = jnp.transpose(rgbd, (1, 0, 2))                     # (HW,B,C)->(B,HW,C)

    rb = backbone["resblock_stack"]
    vis_outs, forward_out = [], []
    last_v = last_t = None

    for stage_i in range(num_layers // 4):
        # 4 consecutive text resblocks fused into ONE pallas_call.
        txt = text_resblock_stack(txt, rb, 4 * stage_i, 4 * stage_i + 4)
        vis_f = conv_s2d(vis_f, vis_layer_mats[stage_i], 2, relu=True)

        if stage_i >= num_stages - fusion_stage:
            stg = params["stages"][stage_i]
            s = strides[stage_i]
            # zoom_in
            if stage_i < num_stages - 1:
                v_img = conv_s2d(vis_f, stg["zoom_in_w"], s)
            else:
                v_img = conv_transpose_s2d(vis_f, stg["zoom_in_w"], s)
            Bv, Hv, Wv, Cv = v_img.shape
            v_tok = v_img.reshape(Bv, Hv * Wv, Cv)               # (B, HW, E)
            # linear1 / residual / LayerNorm, fused
            if stage_i == 0:
                v = fused_op(v_tok, residual=rgbd_bm,
                             post_ln=(stg["ln_v_g"], stg["ln_v_b"]))
                t = fused_op(txt, matmul=(stg["lin1_wt"], stg["lin1_b"]),
                             post_ln=(stg["ln_t_g"], stg["ln_t_b"]))
            else:
                v = fused_op(v_tok, residual=last_v,
                             post_ln=(stg["ln_v_g"], stg["ln_v_b"]))
                t = fused_op(txt, matmul=(stg["lin1_wt"], stg["lin1_b"]),
                             residual=last_t,
                             post_ln=(stg["ln_t_g"], stg["ln_t_b"]))
            v, t = vlsa_adapter(v, t, stg["fusion"], nhead)
            last_v, last_t = v, t
            v_img = v.reshape(Bv, Hv, Wv, Cv)
            if stage_i == 2:
                forward_out.append(v_img)
                forward_out.append(t)
            # zoom_out
            if stage_i < num_stages - 1:
                v_back = conv_transpose_s2d(v_img, stg["zoom_out_w"], s)
            else:
                v_back = conv_s2d(v_img, stg["zoom_out_w"], s)
            vis_f = vis_f + v_back.astype(vis_f.dtype)
            # linear2 + txt residual, fused
            txt = fused_op(t, matmul=(stg["lin2_wt"], stg["lin2_b"]),
                           residual=txt)
        if stage_i + 1 < num_stages:
            vis_outs.append(vis_f)

    # attnpool stand-in (1x1 conv) + bridger tail
    vis_pooled = conv_s2d(vis_f, backbone["attnpool_w"], 1)
    forward_vis = conv_s2d(forward_out[0], params["last_conv_w"], strides[-1])
    vis_pooled = vis_pooled + forward_vis.astype(vis_pooled.dtype)
    txt = fused_op(forward_out[1],
                   matmul=(params["last_linear_wt"], params["last_linear_b"]),
                   residual=txt)
    vis_outs.append(vis_pooled)

    txt = fused_op(txt, post_ln=(backbone["ln_final_g"], backbone["ln_final_b"]))
    eot = jnp.argmax(text, axis=-1)
    state_in = txt[jnp.arange(txt.shape[0]), eot]                # (B, d_txt)
    state = fused_op(state_in, matmul=(backbone["text_proj"], None))

    # back to PyTorch NCHW / f32 convention at the module boundary
    vis_outs = [o.astype(jnp.float32).transpose(0, 3, 1, 2) for o in vis_outs]
    return vis_outs, txt, state


# ----------------------------------------------------------------------------
if __name__ == "__main__":
    cfg = Config(d_img=(32, 64, 128), d_txt=32, d_model=32, nhead=8,
                 num_stages=3, strides=(2, 1, 2), num_layers=12, fusion_stage=3)
    B, Hin, Win, Lseq, vocab = 2, 32, 32, 8, 100

    root = jax.random.PRNGKey(0)
    k_p, k_b, k_v, k_t, k_r = jax.random.split(root, 5)

    params = init_bridger(k_p, cfg)
    backbone = init_backbone(k_b, cfg, ctx_len=Lseq, vocab=vocab)

    vis = jax.random.normal(k_v, (B, 3, Hin, Win), dtype=jnp.float32)
    text = jax.random.randint(k_t, (B, Lseq), 0, vocab, dtype=jnp.int32)
    # fused token grid after zoom-in is 2x2 -> 4 tokens of width d_model
    rgbd = jax.random.normal(k_r, (4, B, cfg.d_model), dtype=jnp.float32)

    fwd = jax.jit(functools.partial(bridger_forward, cfg=cfg))
    vis_outs, txt_out, state = fwd(params, backbone, vis, text, rgbd)
    jax.block_until_ready((vis_outs, txt_out, state))
    print("KERNEL_OK")
</pallas_src>

<mosaic_0001>
module attributes {stable_mosaic.version = 11 : i64} {
  func.func @kernel(%arg0: i32, %arg1: memref<512x12xf32, #tpu.memory_space<vmem>>, %arg2: memref<12x8xbf16, #tpu.memory_space<vmem>>, %arg3: memref<512x8xbf16, #tpu.memory_space<vmem>>) attributes {dimension_semantics = [#tpu.dimension_semantics<parallel>], iteration_bounds = array<i64: 1>, scalar_prefetch = 0 : i64, scratch_operands = 0 : i64, tpu.core_type = #tpu.core_type<tc>, window_params = [{transform_indices = @transform_0, window_bounds = array<i64: 512, 12>}, {pipeline_mode = #tpu.pipeline_mode<synchronous>, transform_indices = @transform_1, window_bounds = array<i64: 12, 8>}, {transform_indices = @transform_2, window_bounds = array<i64: 512, 8>}]} {
    %c0 = arith.constant 0 : index
    %c0_0 = arith.constant 0 : index
    %0 = vector.load %arg1[%c0, %c0_0] : memref<512x12xf32, #tpu.memory_space<vmem>>, vector<512x12xf32>
    %c0_1 = arith.constant 0 : index
    %c0_2 = arith.constant 0 : index
    %1 = vector.load %arg2[%c0_1, %c0_2] : memref<12x8xbf16, #tpu.memory_space<vmem>>, vector<12x8xbf16>
    %2 = arith.truncf %0 : vector<512x12xf32> to vector<512x12xbf16>
    %cst = arith.constant dense<0.000000e+00> : vector<512x8xf32>
    %3 = tpu.matmul %2, %1, %cst {dimension_numbers = #tpu.dot_dimension_numbers<[1], [0], [0], [1], [0, 0, 1, 1], [], []>} : vector<512x12xbf16>, vector<12x8xbf16>, vector<512x8xf32> -> vector<512x8xf32>
    %cst_3 = arith.constant 0.000000e+00 : f32
    %4 = vector.broadcast %cst_3 : f32 to vector<512x8xf32>
    %5 = arith.maximumf %3, %4 : vector<512x8xf32>
    %6 = arith.truncf %5 : vector<512x8xf32> to vector<512x8xbf16>
    %c0_4 = arith.constant 0 : index
    %c0_5 = arith.constant 0 : index
    %7 = vector.load %arg3[%c0_4, %c0_5] : memref<512x8xbf16, #tpu.memory_space<vmem>>, vector<512x8xbf16>
    tpu.vector_store %arg3[%c0_4, %c0_5], %6 {strides = array<i32>} : memref<512x8xbf16, #tpu.memory_space<vmem>>, vector<512x8xbf16>,
    return
  }
  func.func @transform_0(%arg0: i32) -> (i32, i32) {
    %c0_i32 = arith.constant 0 : i32
    %c0_i32_0 = arith.constant 0 : i32
    return %arg0, %c0_i32 : i32, i32
  }
  func.func @transform_1(%arg0: i32) -> (i32, i32) {
    %c0_i32 = arith.constant 0 : i32
    %c0_i32_0 = arith.constant 0 : i32
    %c0_i32_1 = arith.constant 0 : i32
    return %c0_i32, %c0_i32_0 : i32, i32
  }
  func.func @transform_2(%arg0: i32) -> (i32, i32) {
    %c0_i32 = arith.constant 0 : i32
    %c0_i32_0 = arith.constant 0 : i32
    return %arg0, %c0_i32 : i32, i32
  }
}

module attributes {stable_mosaic.version = 11 : i64} {
  func.func @kernel(%arg0: i32, %arg1: memref<512x8xbf16, #tpu.memory_space<vmem>>, %arg2: memref<8x8xbf16, #tpu.memory_space<vmem>>, %arg3: memref<512x8xbf16, #tpu.memory_space<vmem>>) attributes {dimension_semantics = [#tpu.dimension_semantics<parallel>], iteration_bounds = array<i64: 1>, scalar_prefetch = 0 : i64, scratch_operands = 0 : i64, tpu.core_type = #tpu.core_type<tc>, window_params = [{transform_indices = @transform_0, window_bounds = array<i64: 512, 8>}, {pipeline_mode = #tpu.pipeline_mode<synchronous>, transform_indices = @transform_1, window_bounds = array<i64: 8, 8>}, {transform_indices = @transform_2, window_bounds = array<i64: 512, 8>}]} {
    %c0 = arith.constant 0 : index
    %c0_0 = arith.constant 0 : index
    %0 = vector.load %arg1[%c0, %c0_0] : memref<512x8xbf16, #tpu.memory_space<vmem>>, vector<512x8xbf16>
    %1 = arith.extf %0 : vector<512x8xbf16> to vector<512x8xf32>
    %c0_1 = arith.constant 0 : index
    %c0_2 = arith.constant 0 : index
    %2 = vector.load %arg2[%c0_1, %c0_2] : memref<8x8xbf16, #tpu.memory_space<vmem>>, vector<8x8xbf16>
    %3 = arith.truncf %1 : vector<512x8xf32> to vector<512x8xbf16>
    %cst = arith.constant dense<0.000000e+00> : vector<512x8xf32>
    %4 = tpu.matmul %3, %2, %cst {dimension_numbers = #tpu.dot_dimension_numbers<[1], [0], [0], [1], [0, 0, 1, 1], [], []>} : vector<512x8xbf16>, vector<8x8xbf16>, vector<512x8xf32> -> vector<512x8xf32>
    %cst_3 = arith.constant 0.000000e+00 : f32
    %5 = vector.broadcast %cst_3 : f32 to vector<512x8xf32>
    %6 = arith.maximumf %4, %5 : vector<512x8xf32>
    %7 = arith.truncf %6 : vector<512x8xf32> to vector<512x8xbf16>
    %c0_4 = arith.constant 0 : index
    %c0_5 = arith.constant 0 : index
    %8 = vector.load %arg3[%c0_4, %c0_5] : memref<512x8xbf16, #tpu.memory_space<vmem>>, vector<512x8xbf16>
    tpu.vector_store %arg3[%c0_4, %c0_5], %7 {strides = array<i32>} : memref<512x8xbf16, #tpu.memory_space<vmem>>, vector<512x8xbf16>,
    return
  }
  func.func @transform_0(%arg0: i32) -> (i32, i32) {
    %c0_i32 = arith.constant 0 : i32
    %c0_i32_0 = arith.constant 0 : i32
    return %arg0, %c0_i32 : i32, i32
  }
  func.func @transform_1(%arg0: i32) -> (i32, i32) {
    %c0_i32 = arith.constant 0 : i32
    %c0_i32_0 = arith.constant 0 : i32
    %c0_i32_1 = arith.constant 0 : i32
    return %c0_i32, %c0_i32_0 : i32, i32
  }
  func.func @transform_2(%arg0: i32) -> (i32, i32) {
    %c0_i32 = arith.constant 0 : i32
    %c0_i32_0 = arith.constant 0 : i32
    return %arg0, %c0_i32 : i32, i32
  }
}

module attributes {stable_mosaic.version = 11 : i64} {
  func.func @kernel(%arg0: i32, %arg1: memref<512x8xbf16, #tpu.memory_space<vmem>>, %arg2: memref<8x16xbf16, #tpu.memory_space<vmem>>, %arg3: memref<512x16xbf16, #tpu.memory_space<vmem>>) attributes {dimension_semantics = [#tpu.dimension_semantics<parallel>], iteration_bounds = array<i64: 1>, scalar_prefetch = 0 : i64, scratch_operands = 0 : i64, tpu.core_type = #tpu.core_type<tc>, window_params = [{transform_indices = @transform_0, window_bounds = array<i64: 512, 8>}, {pipeline_mode = #tpu.pipeline_mode<synchronous>, transform_indices = @transform_1, window_bounds = array<i64: 8, 16>}, {transform_indices = @transform_2, window_bounds = array<i64: 512, 16>}]} {
    %c0 = arith.constant 0 : index
    %c0_0 = arith.constant 0 : index
    %0 = vector.load %arg1[%c0, %c0_0] : memref<512x8xbf16, #tpu.memory_space<vmem>>, vector<512x8xbf16>
    %1 = arith.extf %0 : vector<512x8xbf16> to vector<512x8xf32>
    %c0_1 = arith.constant 0 : index
    %c0_2 = arith.constant 0 : index
    %2 = vector.load %arg2[%c0_1, %c0_2] : memref<8x16xbf16, #tpu.memory_space<vmem>>, vector<8x16xbf16>
    %3 = arith.truncf %1 : vector<512x8xf32> to vector<512x8xbf16>
    %cst = arith.constant dense<0.000000e+00> : vector<512x16xf32>
    %4 = tpu.matmul %3, %2, %cst {dimension_numbers = #tpu.dot_dimension_numbers<[1], [0], [0], [1], [0, 0, 1, 1], [], []>} : vector<512x8xbf16>, vector<8x16xbf16>, vector<512x16xf32> -> vector<512x16xf32>
    %cst_3 = arith.constant 0.000000e+00 : f32
    %5 = vector.broadcast %cst_3 : f32 to vector<512x16xf32>
    %6 = arith.maximumf %4, %5 : vector<512x16xf32>
    %7 = arith.truncf %6 : vector<512x16xf32> to vector<512x16xbf16>
    %c0_4 = arith.constant 0 : index
    %c0_5 = arith.constant 0 : index
    %8 = vector.load %arg3[%c0_4, %c0_5] : memref<512x16xbf16, #tpu.memory_space<vmem>>, vector<512x16xbf16>
    tpu.vector_store %arg3[%c0_4, %c0_5], %7 {strides = array<i32>} : memref<512x16xbf16, #tpu.memory_space<vmem>>, vector<512x16xbf16>,
    return
  }
  func.func @transform_0(%arg0: i32) -> (i32, i32) {
    %c0_i32 = arith.constant 0 : i32
    %c0_i32_0 = arith.constant 0 : i32
    return %arg0, %c0_i32 : i32, i32
  }
  func.func @transform_1(%arg0: i32) -> (i32, i32) {
    %c0_i32 = arith.constant 0 : i32
    %c0_i32_0 = arith.constant 0 : i32
    %c0_i32_1 = arith.constant 0 : i32
    return %c0_i32, %c0_i32_0 : i32, i32
  }
  func.func @transform_2(%arg0: i32) -> (i32, i32) {
    %c0_i32 = arith.constant 0 : i32
    %c0_i32_0 = arith.constant 0 : i32
    return %arg0, %c0_i32 : i32, i32
  }
}

module attributes {stable_mosaic.version = 11 : i64} {
  func.func @kernel(%arg0: i32, %arg1: memref<128x16xbf16, #tpu.memory_space<vmem>>, %arg2: memref<16x16xbf16, #tpu.memory_space<vmem>>, %arg3: memref<128x16xbf16, #tpu.memory_space<vmem>>) attributes {dimension_semantics = [#tpu.dimension_semantics<parallel>], iteration_bounds = array<i64: 1>, scalar_prefetch = 0 : i64, scratch_operands = 0 : i64, tpu.core_type = #tpu.core_type<tc>, window_params = [{transform_indices = @transform_0, window_bounds = array<i64: 128, 16>}, {pipeline_mode = #tpu.pipeline_mode<synchronous>, transform_indices = @transform_1, window_bounds = array<i64: 16, 16>}, {transform_indices = @transform_2, window_bounds = array<i64: 128, 16>}]} {
    %c0 = arith.constant 0 : index
    %c0_0 = arith.constant 0 : index
    %0 = vector.load %arg1[%c0, %c0_0] : memref<128x16xbf16, #tpu.memory_space<vmem>>, vector<128x16xbf16>
    %1 = arith.extf %0 : vector<128x16xbf16> to vector<128x16xf32>
    %c0_1 = arith.constant 0 : index
    %c0_2 = arith.constant 0 : index
    %2 = vector.load %arg2[%c0_1, %c0_2] : memref<16x16xbf16, #tpu.memory_space<vmem>>, vector<16x16xbf16>
    %3 = arith.truncf %1 : vector<128x16xf32> to vector<128x16xbf16>
    %cst = arith.constant dense<0.000000e+00> : vector<128x16xf32>
    %4 = tpu.matmul %3, %2, %cst {dimension_numbers = #tpu.dot_dimension_numbers<[1], [0], [0], [1], [0, 0, 1, 1], [], []>} : vector<128x16xbf16>, vector<16x16xbf16>, vector<128x16xf32> -> vector<128x16xf32>
    %5 = arith.truncf %4 : vector<128x16xf32> to vector<128x16xbf16>
    %c0_3 = arith.constant 0 : index
    %c0_4 = arith.constant 0 : index
    %6 = vector.load %arg3[%c0_3, %c0_4] : memref<128x16xbf16, #tpu.memory_space<vmem>>, vector<128x16xbf16>
    tpu.vector_store %arg3[%c0_3, %c0_4], %5 {strides = array<i32>} : memref<128x16xbf16, #tpu.memory_space<vmem>>, vector<128x16xbf16>,
    return
  }
  func.func @transform_0(%arg0: i32) -> (i32, i32) {
    %c0_i32 = arith.constant 0 : i32
    %c0_i32_0 = arith.constant 0 : i32
    return %arg0, %c0_i32 : i32, i32
  }
  func.func @transform_1(%arg0: i32) -> (i32, i32) {
    %c0_i32 = arith.constant 0 : i32
    %c0_i32_0 = arith.constant 0 : i32
    %c0_i32_1 = arith.constant 0 : i32
    return %c0_i32, %c0_i32_0 : i32, i32
  }
  func.func @transform_2(%arg0: i32) -> (i32, i32) {
    %c0_i32 = arith.constant 0 : i32
    %c0_i32_0 = arith.constant 0 : i32
    return %arg0, %c0_i32 : i32, i32
  }
}

module attributes {stable_mosaic.version = 11 : i64} {
  func.func @kernel(%arg0: i32, %arg1: memref<32x64xbf16, #tpu.memory_space<vmem>>, %arg2: memref<64x32xbf16, #tpu.memory_space<vmem>>, %arg3: memref<32x32xbf16, #tpu.memory_space<vmem>>) attributes {dimension_semantics = [#tpu.dimension_semantics<parallel>], iteration_bounds = array<i64: 1>, scalar_prefetch = 0 : i64, scratch_operands = 0 : i64, tpu.core_type = #tpu.core_type<tc>, window_params = [{transform_indices = @transform_0, window_bounds = array<i64: 32, 64>}, {pipeline_mode = #tpu.pipeline_mode<synchronous>, transform_indices = @transform_1, window_bounds = array<i64: 64, 32>}, {transform_indices = @transform_2, window_bounds = array<i64: 32, 32>}]} {
    %c0 = arith.constant 0 : index
    %c0_0 = arith.constant 0 : index
    %0 = vector.load %arg1[%c0, %c0_0] : memref<32x64xbf16, #tpu.memory_space<vmem>>, vector<32x64xbf16>
    %1 = arith.extf %0 : vector<32x64xbf16> to vector<32x64xf32>
    %c0_1 = arith.constant 0 : index
    %c0_2 = arith.constant 0 : index
    %2 = vector.load %arg2[%c0_1, %c0_2] : memref<64x32xbf16, #tpu.memory_space<vmem>>, vector<64x32xbf16>
    %3 = arith.truncf %1 : vector<32x64xf32> to vector<32x64xbf16>
    %cst = arith.constant dense<0.000000e+00> : vector<32x32xf32>
    %4 = tpu.matmul %3, %2, %cst {dimension_numbers = #tpu.dot_dimension_numbers<[1], [0], [0], [1], [0, 0, 1, 1], [], []>} : vector<32x64xbf16>, vector<64x32xbf16>, vector<32x32xf32> -> vector<32x32xf32>
    %cst_3 = arith.constant 0.000000e+00 : f32
    %5 = vector.broadcast %cst_3 : f32 to vector<32x32xf32>
    %6 = arith.maximumf %4, %5 : vector<32x32xf32>
    %7 = arith.truncf %6 : vector<32x32xf32> to vector<32x32xbf16>
    %c0_4 = arith.constant 0 : index
    %c0_5 = arith.constant 0 : index
    %8 = vector.load %arg3[%c0_4, %c0_5] : memref<32x32xbf16, #tpu.memory_space<vmem>>, vector<32x32xbf16>
    tpu.vector_store %arg3[%c0_4, %c0_5], %7 {strides = array<i32>} : memref<32x32xbf16, #tpu.memory_space<vmem>>, vector<32x32xbf16>,
    return
  }
  func.func @transform_0(%arg0: i32) -> (i32, i32) {
    %c0_i32 = arith.constant 0 : i32
    %c0_i32_0 = arith.constant 0 : i32
    return %arg0, %c0_i32 : i32, i32
  }
  func.func @transform_1(%arg0: i32) -> (i32, i32) {
    %c0_i32 = arith.constant 0 : i32
    %c0_i32_0 = arith.constant 0 : i32
    %c0_i32_1 = arith.constant 0 : i32
    return %c0_i32, %c0_i32_0 : i32, i32
  }
  func.func @transform_2(%arg0: i32) -> (i32, i32) {
    %c0_i32 = arith.constant 0 : i32
    %c0_i32_0 = arith.constant 0 : i32
    return %arg0, %c0_i32 : i32, i32
  }
}

module attributes {stable_mosaic.version = 11 : i64} {
  func.func @kernel(%arg0: i32, %arg1: memref<8x128xbf16, #tpu.memory_space<vmem>>, %arg2: memref<128x32xbf16, #tpu.memory_space<vmem>>, %arg3: memref<8x32xbf16, #tpu.memory_space<vmem>>) attributes {dimension_semantics = [#tpu.dimension_semantics<parallel>], iteration_bounds = array<i64: 1>, scalar_prefetch = 0 : i64, scratch_operands = 0 : i64, tpu.core_type = #tpu.core_type<tc>, window_params = [{transform_indices = @transform_0, window_bounds = array<i64: 8, 128>}, {pipeline_mode = #tpu.pipeline_mode<synchronous>, transform_indices = @transform_1, window_bounds = array<i64: 128, 32>}, {transform_indices = @transform_2, window_bounds = array<i64: 8, 32>}]} {
    %c0 = arith.constant 0 : index
    %c0_0 = arith.constant 0 : index
    %0 = vector.load %arg1[%c0, %c0_0] : memref<8x128xbf16, #tpu.memory_space<vmem>>, vector<8x128xbf16>
    %1 = arith.extf %0 : vector<8x128xbf16> to vector<8x128xf32>
    %c0_1 = arith.constant 0 : index
    %c0_2 = arith.constant 0 : index
    %2 = vector.load %arg2[%c0_1, %c0_2] : memref<128x32xbf16, #tpu.memory_space<vmem>>, vector<128x32xbf16>
    %3 = arith.truncf %1 : vector<8x128xf32> to vector<8x128xbf16>
    %cst = arith.constant dense<0.000000e+00> : vector<8x32xf32>
    %4 = tpu.matmul %3, %2, %cst {dimension_numbers = #tpu.dot_dimension_numbers<[1], [0], [0], [1], [0, 0, 1, 1], [], []>} : vector<8x128xbf16>, vector<128x32xbf16>, vector<8x32xf32> -> vector<8x32xf32>
    %5 = arith.truncf %4 : vector<8x32xf32> to vector<8x32xbf16>
    %c0_3 = arith.constant 0 : index
    %c0_4 = arith.constant 0 : index
    %6 = vector.load %arg3[%c0_3, %c0_4] : memref<8x32xbf16, #tpu.memory_space<vmem>>, vector<8x32xbf16>
    tpu.vector_store %arg3[%c0_3, %c0_4], %5 {strides = array<i32>} : memref<8x32xbf16, #tpu.memory_space<vmem>>, vector<8x32xbf16>,
    return
  }
  func.func @transform_0(%arg0: i32) -> (i32, i32) {
    %c0_i32 = arith.constant 0 : i32
    %c0_i32_0 = arith.constant 0 : i32
    return %arg0, %c0_i32 : i32, i32
  }
  func.func @transform_1(%arg0: i32) -> (i32, i32) {
    %c0_i32 = arith.constant 0 : i32
    %c0_i32_0 = arith.constant 0 : i32
    %c0_i32_1 = arith.constant 0 : i32
    return %c0_i32, %c0_i32_0 : i32, i32
  }
  func.func @transform_2(%arg0: i32) -> (i32, i32) {
    %c0_i32 = arith.constant 0 : i32
    %c0_i32_0 = arith.constant 0 : i32
    return %arg0, %c0_i32 : i32, i32
  }
}

module attributes {stable_mosaic.version = 11 : i64} {
  func.func @kernel(%arg0: i32, %arg1: memref<8x32xbf16, #tpu.memory_space<vmem>>, %arg2: memref<8x32xf32, #tpu.memory_space<vmem>>, %arg3: memref<1x32xf32, #tpu.memory_space<vmem>>, %arg4: memref<1x32xf32, #tpu.memory_space<vmem>>, %arg5: memref<8x32xf32, #tpu.memory_space<vmem>>) attributes {dimension_semantics = [#tpu.dimension_semantics<parallel>], iteration_bounds = array<i64: 1>, scalar_prefetch = 0 : i64, scratch_operands = 0 : i64, tpu.core_type = #tpu.core_type<tc>, window_params = [{transform_indices = @transform_0, window_bounds = array<i64: 8, 32>}, {transform_indices = @transform_1, window_bounds = array<i64: 8, 32>}, {pipeline_mode = #tpu.pipeline_mode<synchronous>, transform_indices = @transform_2, window_bounds = array<i64: 1, 32>}, {pipeline_mode = #tpu.pipeline_mode<synchronous>, transform_indices = @transform_3, window_bounds = array<i64: 1, 32>}, {transform_indices = @transform_4, window_bounds = array<i64: 8, 32>}]} {
    %c0 = arith.constant 0 : index
    %c0_0 = arith.constant 0 : index
    %0 = vector.load %arg1[%c0, %c0_0] : memref<8x32xbf16, #tpu.memory_space<vmem>>, vector<8x32xbf16>
    %1 = arith.extf %0 : vector<8x32xbf16> to vector<8x32xf32>
    %c0_1 = arith.constant 0 : index
    %c0_2 = arith.constant 0 : index
    %2 = vector.load %arg2[%c0_1, %c0_2] : memref<8x32xf32, #tpu.memory_space<vmem>>, vector<8x32xf32>
    %3 = arith.addf %1, %2 : vector<8x32xf32>
    %c0_3 = arith.constant 0 : index
    %c0_4 = arith.constant 0 : index
    %4 = vector.load %arg3[%c0_3, %c0_4] : memref<1x32xf32, #tpu.memory_space<vmem>>, vector<1x32xf32>
    %c0_5 = arith.constant 0 : index
    %c0_6 = arith.constant 0 : index
    %5 = vector.load %arg4[%c0_5, %c0_6] : memref<1x32xf32, #tpu.memory_space<vmem>>, vector<1x32xf32>
    %cst = arith.constant dense<0.000000e+00> : vector<8xf32>
    %6 = vector.multi_reduction <add>, %3, %cst [1] : vector<8x32xf32> to vector<8xf32>
    %7 = vector.shape_cast %6 : vector<8xf32> to vector<8x1xf32>
    %cst_7 = arith.constant 3.200000e+01 : f32
    %8 = vector.broadcast %cst_7 : f32 to vector<8x1xf32>
    %9 = arith.divf %7, %8 : vector<8x1xf32>
    %10 = vector.broadcast %9 : vector<8x1xf32> to vector<8x32xf32>
    %11 = arith.subf %3, %10 : vector<8x32xf32>
    %12 = arith.mulf %11, %11 : vector<8x32xf32>
    %cst_8 = arith.constant dense<0.000000e+00> : vector<8xf32>
    %13 = vector.multi_reduction <add>, %12, %cst_8 [1] : vector<8x32xf32> to vector<8xf32>
    %14 = vector.shape_cast %13 : vector<8xf32> to vector<8x1xf32>
    %cst_9 = arith.constant 3.200000e+01 : f32
    %15 = vector.broadcast %cst_9 : f32 to vector<8x1xf32>
    %16 = arith.divf %14, %15 : vector<8x1xf32>
    %cst_10 = arith.constant 9.99999974E-6 : f32
    %17 = vector.broadcast %cst_10 : f32 to vector<8x1xf32>
    %18 = arith.addf %16, %17 : vector<8x1xf32>
    %19 = math.rsqrt %18 : vector<8x1xf32>
    %20 = vector.broadcast %19 : vector<8x1xf32> to vector<8x32xf32>
    %21 = arith.mulf %11, %20 : vector<8x32xf32>
    %22 = vector.broadcast %4 : vector<1x32xf32> to vector<8x32xf32>
    %23 = arith.mulf %21, %22 : vector<8x32xf32>
    %24 = vector.broadcast %5 : vector<1x32xf32> to vector<8x32xf32>
    %25 = arith.addf %23, %24 : vector<8x32xf32>
    %c0_11 = arith.constant 0 : index
    %c0_12 = arith.constant 0 : index
    %26 = vector.load %arg5[%c0_11, %c0_12] : memref<8x32xf32, #tpu.memory_space<vmem>>, vector<8x32xf32>
    tpu.vector_store %arg5[%c0_11, %c0_12], %25 {strides = array<i32>} : memref<8x32xf32, #tpu.memory_space<vmem>>, vector<8x32xf32>,
    return
  }
  func.func @transform_0(%arg0: i32) -> (i32, i32) {
    %c0_i32 = arith.constant 0 : i32
    %c0_i32_0 = arith.constant 0 : i32
    return %arg0, %c0_i32 : i32, i32
  }
  func.func @transform_1(%arg0: i32) -> (i32, i32) {
    %c0_i32 = arith.constant 0 : i32
    %c0_i32_0 = arith.constant 0 : i32
    return %arg0, %c0_i32 : i32, i32
  }
  func.func @transform_2(%arg0: i32) -> (i32, i32) {
    %c0_i32 = arith.constant 0 : i32
    %c0_i32_0 = arith.constant 0 : i32
    %c0_i32_1 = arith.constant 0 : i32
    return %c0_i32, %c0_i32_0 : i32, i32
  }
  func.func @transform_3(%arg0: i32) -> (i32, i32) {
    %c0_i32 = arith.constant 0 : i32
    %c0_i32_0 = arith.constant 0 : i32
    %c0_i32_1 = arith.constant 0 : i32
    return %c0_i32, %c0_i32_0 : i32, i32
  }
  func.func @transform_4(%arg0: i32) -> (i32, i32) {
    %c0_i32 = arith.constant 0 : i32
    %c0_i32_0 = arith.constant 0 : i32
    return %arg0, %c0_i32 : i32, i32
  }
}

module attributes {stable_mosaic.version = 11 : i64} {
  func.func @kernel(%arg0: i32, %arg1: memref<16x32xf32, #tpu.memory_space<vmem>>, %arg2: memref<32x32xbf16, #tpu.memory_space<vmem>>, %arg3: memref<1x32xf32, #tpu.memory_space<vmem>>, %arg4: memref<1x32xf32, #tpu.memory_space<vmem>>, %arg5: memref<1x32xf32, #tpu.memory_space<vmem>>, %arg6: memref<16x32xf32, #tpu.memory_space<vmem>>) attributes {dimension_semantics = [#tpu.dimension_semantics<parallel>], iteration_bounds = array<i64: 1>, scalar_prefetch = 0 : i64, scratch_operands = 0 : i64, tpu.core_type = #tpu.core_type<tc>, window_params = [{transform_indices = @transform_0, window_bounds = array<i64: 16, 32>}, {pipeline_mode = #tpu.pipeline_mode<synchronous>, transform_indices = @transform_1, window_bounds = array<i64: 32, 32>}, {pipeline_mode = #tpu.pipeline_mode<synchronous>, transform_indices = @transform_2, window_bounds = array<i64: 1, 32>}, {pipeline_mode = #tpu.pipeline_mode<synchronous>, transform_indices = @transform_3, window_bounds = array<i64: 1, 32>}, {pipeline_mode = #tpu.pipeline_mode<synchronous>, transform_indices = @transform_4, window_bounds = array<i64: 1, 32>}, {transform_indices = @transform_5, window_bounds = array<i64: 16, 32>}]} {
    %c0 = arith.constant 0 : index
    %c0_0 = arith.constant 0 : index
    %0 = vector.load %arg1[%c0, %c0_0] : memref<16x32xf32, #tpu.memory_space<vmem>>, vector<16x32xf32>
    %c0_1 = arith.constant 0 : index
    %c0_2 = arith.constant 0 : index
    %1 = vector.load %arg2[%c0_1, %c0_2] : memref<32x32xbf16, #tpu.memory_space<vmem>>, vector<32x32xbf16>
    %2 = arith.truncf %0 : vector<16x32xf32> to vector<16x32xbf16>
    %cst = arith.constant dense<0.000000e+00> : vector<16x32xf32>
    %3 = tpu.matmul %2, %1, %cst {dimension_numbers = #tpu.dot_dimension_numbers<[1], [0], [0], [1], [0, 0, 1, 1], [], []>} : vector<16x32xbf16>, vector<32x32xbf16>, vector<16x32xf32> -> vector<16x32xf32>
    %c0_3 = arith.constant 0 : index
    %c0_4 = arith.constant 0 : index
    %4 = vector.load %arg3[%c0_3, %c0_4] : memref<1x32xf32, #tpu.memory_space<vmem>>, vector<1x32xf32>
    %5 = vector.broadcast %4 : vector<1x32xf32> to vector<16x32xf32>
    %6 = arith.addf %3, %5 : vector<16x32xf32>
    %c0_5 = arith.constant 0 : index
    %c0_6 = arith.constant 0 : index
    %7 = vector.load %arg4[%c0_5, %c0_6] : memref<1x32xf32, #tpu.memory_space<vmem>>, vector<1x32xf32>
    %c0_7 = arith.constant 0 : index
    %c0_8 = arith.constant 0 : index
    %8 = vector.load %arg5[%c0_7, %c0_8] : memref<1x32xf32, #tpu.memory_space<vmem>>, vector<1x32xf32>
    %cst_9 = arith.constant dense<0.000000e+00> : vector<16xf32>
    %9 = vector.multi_reduction <add>, %6, %cst_9 [1] : vector<16x32xf32> to vector<16xf32>
    %10 = vector.shape_cast %9 : vector<16xf32> to vector<16x1xf32>
    %cst_10 = arith.constant 3.200000e+01 : f32
    %11 = vector.broadcast %cst_10 : f32 to vector<16x1xf32>
    %12 = arith.divf %10, %11 : vector<16x1xf32>
    %13 = vector.broadcast %12 : vector<16x1xf32> to vector<16x32xf32>
    %14 = arith.subf %6, %13 : vector<16x32xf32>
    %15 = arith.mulf %14, %14 : vector<16x32xf32>
    %cst_11 = arith.constant dense<0.000000e+00> : vector<16xf32>
    %16 = vector.multi_reduction <add>, %15, %cst_11 [1] : vector<16x32xf32> to vector<16xf32>
    %17 = vector.shape_cast %16 : vector<16xf32> to vector<16x1xf32>
    %cst_12 = arith.constant 3.200000e+01 : f32
    %18 = vector.broadcast %cst_12 : f32 to vector<16x1xf32>
    %19 = arith.divf %17, %18 : vector<16x1xf32>
    %cst_13 = arith.constant 9.99999974E-6 : f32
    %20 = vector.broadcast %cst_13 : f32 to vector<16x1xf32>
    %21 = arith.addf %19, %20 : vector<16x1xf32>
    %22 = math.rsqrt %21 : vector<16x1xf32>
    %23 = vector.broadcast %22 : vector<16x1xf32> to vector<16x32xf32>
    %24 = arith.mulf %14, %23 : vector<16x32xf32>
    %25 = vector.broadcast %7 : vector<1x32xf32> to vector<16x32xf32>
    %26 = arith.mulf %24, %25 : vector<16x32xf32>
    %27 = vector.broadcast %8 : vector<1x32xf32> to vector<16x32xf32>
    %28 = arith.addf %26, %27 : vector<16x32xf32>
    %c0_14 = arith.constant 0 : index
    %c0_15 = arith.constant 0 : index
    %29 = vector.load %arg6[%c0_14, %c0_15] : memref<16x32xf32, #tpu.memory_space<vmem>>, vector<16x32xf32>
    tpu.vector_store %arg6[%c0_14, %c0_15], %28 {strides = array<i32>} : memref<16x32xf32, #tpu.memory_space<vmem>>, vector<16x32xf32>,
    return
  }
  func.func @transform_0(%arg0: i32) -> (i32, i32) {
    %c0_i32 = arith.constant 0 : i32
    %c0_i32_0 = arith.constant 0 : i32
    return %arg0, %c0_i32 : i32, i32
  }
  func.func @transform_1(%arg0: i32) -> (i32, i32) {
    %c0_i32 = arith.constant 0 : i32
    %c0_i32_0 = arith.constant 0 : i32
    %c0_i32_1 = arith.constant 0 : i32
    return %c0_i32, %c0_i32_0 : i32, i32
  }
  func.func @transform_2(%arg0: i32) -> (i32, i32) {
    %c0_i32 = arith.constant 0 : i32
    %c0_i32_0 = arith.constant 0 : i32
    %c0_i32_1 = arith.constant 0 : i32
    return %c0_i32, %c0_i32_0 : i32, i32
  }
  func.func @transform_3(%arg0: i32) -> (i32, i32) {
    %c0_i32 = arith.constant 0 : i32
    %c0_i32_0 = arith.constant 0 : i32
    %c0_i32_1 = arith.constant 0 : i32
    return %c0_i32, %c0_i32_0 : i32, i32
  }
  func.func @transform_4(%arg0: i32) -> (i32, i32) {
    %c0_i32 = arith.constant 0 : i32
    %c0_i32_0 = arith.constant 0 : i32
    %c0_i32_1 = arith.constant 0 : i32
    return %c0_i32, %c0_i32_0 : i32, i32
  }
  func.func @transform_5(%arg0: i32) -> (i32, i32) {
    %c0_i32 = arith.constant 0 : i32
    %c0_i32_0 = arith.constant 0 : i32
    return %arg0, %c0_i32 : i32, i32
  }
}

module attributes {stable_mosaic.version = 11 : i64} {
  func.func @_resblock_stack_kernel(%arg0: i32, %arg1: i32, %arg2: memref<16x32xf32, #tpu.memory_space<vmem>>, %arg3: memref<1x32x32xbf16, #tpu.memory_space<vmem>>, %arg4: memref<1x1x32xf32, #tpu.memory_space<vmem>>, %arg5: memref<1x1x32xf32, #tpu.memory_space<vmem>>, %arg6: memref<1x1x32xf32, #tpu.memory_space<vmem>>, %arg7: memref<16x32xf32, #tpu.memory_space<vmem>>, %arg8: memref<16x32xf32, #tpu.memory_space<vmem>>) attributes {dimension_semantics = [#tpu.dimension_semantics<parallel>, #tpu.dimension_semantics<arbitrary>], iteration_bounds = array<i64: 1, 4>, scalar_prefetch = 0 : i64, scratch_operands = 1 : i64, tpu.core_type = #tpu.core_type<tc>, window_params = [{transform_indices = @transform_0, window_bounds = array<i64: 16, 32>}, {transform_indices = @transform_1, window_bounds = array<i64: 1, 32, 32>}, {transform_indices = @transform_2, window_bounds = array<i64: 1, 1, 32>}, {transform_indices = @transform_3, window_bounds = array<i64: 1, 1, 32>}, {transform_indices = @transform_4, window_bounds = array<i64: 1, 1, 32>}, {transform_indices = @transform_5, window_bounds = array<i64: 16, 32>}]} {
    %c0_i32 = arith.constant 0 : i32
    %0 = arith.cmpi eq, %arg1, %c0_i32 : i32
    %1 = arith.extui %0 : i1 to i32
    %c0_i32_0 = arith.constant 0 : i32
    %2 = arith.cmpi ne, %1, %c0_i32_0 : i32
    scf.if %2 {
      %c0_22 = arith.constant 0 : index
      %c0_23 = arith.constant 0 : index
      %41 = vector.load %arg2[%c0_22, %c0_23] : memref<16x32xf32, #tpu.memory_space<vmem>>, vector<16x32xf32>
      %c0_24 = arith.constant 0 : index
      %c0_25 = arith.constant 0 : index
      %42 = vector.load %arg8[%c0_24, %c0_25] : memref<16x32xf32, #tpu.memory_space<vmem>>, vector<16x32xf32>
      tpu.vector_store %arg8[%c0_24, %c0_25], %41 {strides = array<i32>} : memref<16x32xf32, #tpu.memory_space<vmem>>, vector<16x32xf32>,
    } else {
    }
    %c0 = arith.constant 0 : index
    %c0_1 = arith.constant 0 : index
    %3 = vector.load %arg8[%c0, %c0_1] : memref<16x32xf32, #tpu.memory_space<vmem>>, vector<16x32xf32>
    %c0_2 = arith.constant 0 : index
    %c0_3 = arith.constant 0 : index
    %c0_4 = arith.constant 0 : index
    %4 = vector.load %arg5[%c0_2, %c0_3, %c0_4] : memref<1x1x32xf32, #tpu.memory_space<vmem>>, vector<1x1x32xf32>
    %5 = vector.shape_cast %4 : vector<1x1x32xf32> to vector<1x32xf32>
    %c0_5 = arith.constant 0 : index
    %c0_6 = arith.constant 0 : index
    %c0_7 = arith.constant 0 : index
    %6 = vector.load %arg6[%c0_5, %c0_6, %c0_7] : memref<1x1x32xf32, #tpu.memory_space<vmem>>, vector<1x1x32xf32>
    %7 = vector.shape_cast %6 : vector<1x1x32xf32> to vector<1x32xf32>
    %cst = arith.constant dense<0.000000e+00> : vector<16xf32>
    %8 = vector.multi_reduction <add>, %3, %cst [1] : vector<16x32xf32> to vector<16xf32>
    %9 = vector.shape_cast %8 : vector<16xf32> to vector<16x1xf32>
    %cst_8 = arith.constant 3.200000e+01 : f32
    %10 = vector.broadcast %cst_8 : f32 to vector<16x1xf32>
    %11 = arith.divf %9, %10 : vector<16x1xf32>
    %12 = vector.broadcast %11 : vector<16x1xf32> to vector<16x32xf32>
    %13 = arith.subf %3, %12 : vector<16x32xf32>
    %14 = arith.mulf %13, %13 : vector<16x32xf32>
    %cst_9 = arith.constant dense<0.000000e+00> : vector<16xf32>
    %15 = vector.multi_reduction <add>, %14, %cst_9 [1] : vector<16x32xf32> to vector<16xf32>
    %16 = vector.shape_cast %15 : vector<16xf32> to vector<16x1xf32>
    %cst_10 = arith.constant 3.200000e+01 : f32
    %17 = vector.broadcast %cst_10 : f32 to vector<16x1xf32>
    %18 = arith.divf %16, %17 : vector<16x1xf32>
    %cst_11 = arith.constant 9.99999974E-6 : f32
    %19 = vector.broadcast %cst_11 : f32 to vector<16x1xf32>
    %20 = arith.addf %18, %19 : vector<16x1xf32>
    %21 = math.rsqrt %20 : vector<16x1xf32>
    %22 = vector.broadcast %21 : vector<16x1xf32> to vector<16x32xf32>
    %23 = arith.mulf %13, %22 : vector<16x32xf32>
    %24 = vector.broadcast %5 : vector<1x32xf32> to vector<16x32xf32>
    %25 = arith.mulf %23, %24 : vector<16x32xf32>
    %26 = vector.broadcast %7 : vector<1x32xf32> to vector<16x32xf32>
    %27 = arith.addf %25, %26 : vector<16x32xf32>
    %28 = arith.truncf %27 : vector<16x32xf32> to vector<16x32xbf16>
    %c0_12 = arith.constant 0 : index
    %c0_13 = arith.constant 0 : index
    %c0_14 = arith.constant 0 : index
    %29 = vector.load %arg3[%c0_12, %c0_13, %c0_14] : memref<1x32x32xbf16, #tpu.memory_space<vmem>>, vector<1x32x32xbf16>
    %30 = vector.shape_cast %29 : vector<1x32x32xbf16> to vector<32x32xbf16>
    %cst_15 = arith.constant dense<0.000000e+00> : vector<16x32xf32>
    %31 = tpu.matmul %28, %30, %cst_15 {dimension_numbers = #tpu.dot_dimension_numbers<[1], [0], [0], [1], [0, 0, 1, 1], [], []>} : vector<16x32xbf16>, vector<32x32xbf16>, vector<16x32xf32> -> vector<16x32xf32>
    %c0_16 = arith.constant 0 : index
    %c0_17 = arith.constant 0 : index
    %c0_18 = arith.constant 0 : index
    %32 = vector.load %arg4[%c0_16, %c0_17, %c0_18] : memref<1x1x32xf32, #tpu.memory_space<vmem>>, vector<1x1x32xf32>
    %33 = vector.shape_cast %32 : vector<1x1x32xf32> to vector<1x32xf32>
    %34 = vector.broadcast %33 : vector<1x32xf32> to vector<16x32xf32>
    %35 = arith.addf %31, %34 : vector<16x32xf32>
    %36 = arith.addf %3, %35 : vector<16x32xf32>
    %c0_19 = arith.constant 0 : index
    %c0_20 = arith.constant 0 : index
    %37 = vector.load %arg8[%c0_19, %c0_20] : memref<16x32xf32, #tpu.memory_space<vmem>>, vector<16x32xf32>
    tpu.vector_store %arg8[%c0_19, %c0_20], %36 {strides = array<i32>} : memref<16x32xf32, #tpu.memory_space<vmem>>, vector<16x32xf32>,
    %c3_i32 = arith.constant 3 : i32
    %38 = arith.cmpi eq, %arg1, %c3_i32 : i32
    %39 = arith.extui %38 : i1 to i32
    %c0_i32_21 = arith.constant 0 : i32
    %40 = arith.cmpi ne, %39, %c0_i32_21 : i32
    scf.if %40 {
      %c0_22 = arith.constant 0 : index
      %c0_23 = arith.constant 0 : index
      %41 = vector.load %arg8[%c0_22, %c0_23] : memref<16x32xf32, #tpu.memory_space<vmem>>, vector<16x32xf32>
      %c0_24 = arith.constant 0 : index
      %c0_25 = arith.constant 0 : index
      %42 = vector.load %arg7[%c0_24, %c0_25] : memref<16x32xf32, #tpu.memory_space<vmem>>, vector<16x32xf32>
      tpu.vector_store %arg7[%c0_24, %c0_25], %41 {strides = array<i32>} : memref<16x32xf32, #tpu.memory_space<vmem>>, vector<16x32xf32>,
    } else {
    }
    return
  }
  func.func @transform_0(%arg0: i32, %arg1: i32) -> (i32, i32) {
    %c0_i32 = arith.constant 0 : i32
    %c0_i32_0 = arith.constant 0 : i32
    return %arg0, %c0_i32 : i32, i32
  }
  func.func @transform_1(%arg0: i32, %arg1: i32) -> (i32, i32, i32) {
    %c0_i32 = arith.constant 0 : i32
    %0 = arith.addi %arg1, %c0_i32 : i32
    %c0_i32_0 = arith.constant 0 : i32
    %c0_i32_1 = arith.constant 0 : i32
    %c0_i32_2 = arith.constant 0 : i32
    return %0, %c0_i32_0, %c0_i32_1 : i32, i32, i32
  }
  func.func @transform_2(%arg0: i32, %arg1: i32) -> (i32, i32, i32) {
    %c0_i32 = arith.constant 0 : i32
    %0 = arith.addi %arg1, %c0_i32 : i32
    %c0_i32_0 = arith.constant 0 : i32
    %c0_i32_1 = arith.constant 0 : i32
    %c0_i32_2 = arith.constant 0 : i32
    return %0, %c0_i32_0, %c0_i32_1 : i32, i32, i32
  }
  func.func @transform_3(%arg0: i32, %arg1: i32) -> (i32, i32, i32) {
    %c0_i32 = arith.constant 0 : i32
    %0 = arith.addi %arg1, %c0_i32 : i32
    %c0_i32_0 = arith.constant 0 : i32
    %c0_i32_1 = arith.constant 0 : i32
    %c0_i32_2 = arith.constant 0 : i32
    return %0, %c0_i32_0, %c0_i32_1 : i32, i32, i32
  }
  func.func @transform_4(%arg0: i32, %arg1: i32) -> (i32, i32, i32) {
    %c0_i32 = arith.constant 0 : i32
    %0 = arith.addi %arg1, %c0_i32 : i32
    %c0_i32_0 = arith.constant 0 : i32
    %c0_i32_1 = arith.constant 0 : i32
    %c0_i32_2 = arith.constant 0 : i32
    return %0, %c0_i32_0, %c0_i32_1 : i32, i32, i32
  }
  func.func @transform_5(%arg0: i32, %arg1: i32) -> (i32, i32) {
    %c0_i32 = arith.constant 0 : i32
    %c0_i32_0 = arith.constant 0 : i32
    return %arg0, %c0_i32 : i32, i32
  }
}

module attributes {stable_mosaic.version = 11 : i64} {
  func.func @kernel(%arg0: i32, %arg1: memref<1x4x32xf32, #tpu.memory_space<vmem>>, %arg2: memref<1x8x32xf32, #tpu.memory_space<vmem>>, %arg3: memref<1x32xf32, #tpu.memory_space<vmem>>, %arg4: memref<1x32xf32, #tpu.memory_space<vmem>>, %arg5: memref<32x96xbf16, #tpu.memory_space<vmem>>, %arg6: memref<1x96xf32, #tpu.memory_space<vmem>>, %arg7: memref<32x32xbf16, #tpu.memory_space<vmem>>, %arg8: memref<1x32xf32, #tpu.memory_space<vmem>>, %arg9: memref<1x4x32xf32, #tpu.memory_space<vmem>>, %arg10: memref<1x8x32xf32, #tpu.memory_space<vmem>>) attributes {dimension_semantics = [#tpu.dimension_semantics<parallel>], iteration_bounds = array<i64: 2>, scalar_prefetch = 0 : i64, scratch_operands = 0 : i64, tpu.core_type = #tpu.core_type<tc>, window_params = [{transform_indices = @transform_0, window_bounds = array<i64: 1, 4, 32>}, {transform_indices = @transform_1, window_bounds = array<i64: 1, 8, 32>}, {pipeline_mode = #tpu.pipeline_mode<synchronous>, transform_indices = @transform_2, window_bounds = array<i64: 1, 32>}, {pipeline_mode = #tpu.pipeline_mode<synchronous>, transform_indices = @transform_3, window_bounds = array<i64: 1, 32>}, {pipeline_mode = #tpu.pipeline_mode<synchronous>, transform_indices = @transform_4, window_bounds = array<i64: 32, 96>}, {pipeline_mode = #tpu.pipeline_mode<synchronous>, transform_indices = @transform_5, window_bounds = array<i64: 1, 96>}, {pipeline_mode = #tpu.pipeline_mode<synchronous>, transform_indices = @transform_6, window_bounds = array<i64: 32, 32>}, {pipeline_mode = #tpu.pipeline_mode<synchronous>, transform_indices = @transform_7, window_bounds = array<i64: 1, 32>}, {transform_indices = @transform_8, window_bounds = array<i64: 1, 4, 32>}, {transform_indices = @transform_9, window_bounds = array<i64: 1, 8, 32>}]} {
    %c0 = arith.constant 0 : index
    %c0_0 = arith.constant 0 : index
    %c0_1 = arith.constant 0 : index
    %0 = vector.load %arg1[%c0, %c0_0, %c0_1] : memref<1x4x32xf32, #tpu.memory_space<vmem>>, vector<1x4x32xf32>
    %1 = vector.shape_cast %0 : vector<1x4x32xf32> to vector<4x32xf32>
    %c0_2 = arith.constant 0 : index
    %c0_3 = arith.constant 0 : index
    %c0_4 = arith.constant 0 : index
    %2 = vector.load %arg2[%c0_2, %c0_3, %c0_4] : memref<1x8x32xf32, #tpu.memory_space<vmem>>, vector<1x8x32xf32>
    %3 = vector.shape_cast %2 : vector<1x8x32xf32> to vector<8x32xf32>
    %4 = tpu.concatenate %1, %3 in 0 : vector<4x32xf32>, vector<8x32xf32> -> vector<12x32xf32>
    %c0_5 = arith.constant 0 : index
    %c0_6 = arith.constant 0 : index
    %5 = vector.load %arg3[%c0_5, %c0_6] : memref<1x32xf32, #tpu.memory_space<vmem>>, vector<1x32xf32>
    %c0_7 = arith.constant 0 : index
    %c0_8 = arith.constant 0 : index
    %6 = vector.load %arg4[%c0_7, %c0_8] : memref<1x32xf32, #tpu.memory_space<vmem>>, vector<1x32xf32>
    %cst = arith.constant dense<0.000000e+00> : vector<12xf32>
    %7 = vector.multi_reduction <add>, %4, %cst [1] : vector<12x32xf32> to vector<12xf32>
    %8 = vector.shape_cast %7 : vector<12xf32> to vector<12x1xf32>
    %cst_9 = arith.constant 3.200000e+01 : f32
    %9 = vector.broadcast %cst_9 : f32 to vector<12x1xf32>
    %10 = arith.divf %8, %9 : vector<12x1xf32>
    %11 = vector.broadcast %10 : vector<12x1xf32> to vector<12x32xf32>
    %12 = arith.subf %4, %11 : vector<12x32xf32>
    %13 = arith.mulf %12, %12 : vector<12x32xf32>
    %cst_10 = arith.constant dense<0.000000e+00> : vector<12xf32>
    %14 = vector.multi_reduction <add>, %13, %cst_10 [1] : vector<12x32xf32> to vector<12xf32>
    %15 = vector.shape_cast %14 : vector<12xf32> to vector<12x1xf32>
    %cst_11 = arith.constant 3.200000e+01 : f32
    %16 = vector.broadcast %cst_11 : f32 to vector<12x1xf32>
    %17 = arith.divf %15, %16 : vector<12x1xf32>
    %cst_12 = arith.constant 9.99999974E-6 : f32
    %18 = vector.broadcast %cst_12 : f32 to vector<12x1xf32>
    %19 = arith.addf %17, %18 : vector<12x1xf32>
    %20 = math.rsqrt %19 : vector<12x1xf32>
    %21 = vector.broadcast %20 : vector<12x1xf32> to vector<12x32xf32>
    %22 = arith.mulf %12, %21 : vector<12x32xf32>
    %23 = vector.broadcast %5 : vector<1x32xf32> to vector<12x32xf32>
    %24 = arith.mulf %22, %23 : vector<12x32xf32>
    %25 = vector.broadcast %6 : vector<1x32xf32> to vector<12x32xf32>
    %26 = arith.addf %24, %25 : vector<12x32xf32>
    %27 = arith.truncf %26 : vector<12x32xf32> to vector<12x32xbf16>
    %c0_13 = arith.constant 0 : index
    %c0_14 = arith.constant 0 : index
    %28 = vector.load %arg5[%c0_13, %c0_14] : memref<32x96xbf16, #tpu.memory_space<vmem>>, vector<32x96xbf16>
    %cst_15 = arith.constant dense<0.000000e+00> : vector<12x96xf32>
    %29 = tpu.matmul %27, %28, %cst_15 {dimension_numbers = #tpu.dot_dimension_numbers<[1], [0], [0], [1], [0, 0, 1, 1], [], []>} : vector<12x32xbf16>, vector<32x96xbf16>, vector<12x96xf32> -> vector<12x96xf32>
    %c0_16 = arith.constant 0 : index
    %c0_17 = arith.constant 0 : index
    %30 = vector.load %arg6[%c0_16, %c0_17] : memref<1x96xf32, #tpu.memory_space<vmem>>, vector<1x96xf32>
    %31 = vector.broadcast %30 : vector<1x96xf32> to vector<12x96xf32>
    %32 = arith.addf %29, %31 : vector<12x96xf32>
    %33 = vector.extract_strided_slice %32 {offsets = [0, 0], sizes = [12, 4], strides = [1, 1]} : vector<12x96xf32> to vector<12x4xf32>
    %cst_18 = arith.constant 5.000000e-01 : f32
    %34 = vector.broadcast %cst_18 : f32 to vector<12x4xf32>
    %35 = arith.mulf %33, %34 : vector<12x4xf32>
    %36 = arith.truncf %35 : vector<12x4xf32> to vector<12x4xbf16>
    %37 = vector.extract_strided_slice %32 {offsets = [0, 32], sizes = [12, 4], strides = [1, 1]} : vector<12x96xf32> to vector<12x4xf32>
    %38 = arith.truncf %37 : vector<12x4xf32> to vector<12x4xbf16>
    %39 = vector.extract_strided_slice %32 {offsets = [0, 64], sizes = [12, 4], strides = [1, 1]} : vector<12x96xf32> to vector<12x4xf32>
    %40 = arith.truncf %39 : vector<12x4xf32> to vector<12x4xbf16>
    %cst_19 = arith.constant dense<0.000000e+00> : vector<12x12xf32>
    %41 = tpu.matmul %36, %38, %cst_19 {dimension_numbers = #tpu.dot_dimension_numbers<[1], [1], [0], [0], [0, 0, 1, 0], [], []>} : vector<12x4xbf16>, vector<12x4xbf16>, vector<12x12xf32> -> vector<12x12xf32>
    %cst_20 = arith.constant dense<0xFF800000> : vector<12xf32>
    %42 = vector.multi_reduction <maximumf>, %41, %cst_20 [1] : vector<12x12xf32> to vector<12xf32>
    %43 = vector.shape_cast %42 : vector<12xf32> to vector<12x1xf32>
    %44 = vector.broadcast %43 : vector<12x1xf32> to vector<12x12xf32>
    %45 = arith.subf %41, %44 : vector<12x12xf32>
    %46 = math.exp %45 : vector<12x12xf32>
    %cst_21 = arith.constant dense<0.000000e+00> : vector<12xf32>
    %47 = vector.multi_reduction <add>, %46, %cst_21 [1] : vector<12x12xf32> to vector<12xf32>
    %48 = vector.shape_cast %47 : vector<12xf32> to vector<12x1xf32>
    %49 = tpu.reciprocal %48 {approx = true} : vector<12x1xf32> -> vector<12x1xf32>
    %50 = vector.broadcast %49 : vector<12x1xf32> to vector<12x12xf32>
    %51 = arith.mulf %46, %50 : vector<12x12xf32>
    %52 = arith.truncf %51 : vector<12x12xf32> to vector<12x12xbf16>
    %cst_22 = arith.constant dense<0.000000e+00> : vector<12x4xf32>
    %53 = tpu.matmul %52, %40, %cst_22 {dimension_numbers = #tpu.dot_dimension_numbers<[1], [0], [0], [1], [0, 0, 1, 1], [], []>} : vector<12x12xbf16>, vector<12x4xbf16>, vector<12x4xf32> -> vector<12x4xf32>
    %54 = vector.extract_strided_slice %32 {offsets = [0, 4], sizes = [12, 4], strides = [1, 1]} : vector<12x96xf32> to vector<12x4xf32>
    %cst_23 = arith.constant 5.000000e-01 : f32
    %55 = vector.broadcast %cst_23 : f32 to vector<12x4xf32>
    %56 = arith.mulf %54, %55 : vector<12x4xf32>
    %57 = arith.truncf %56 : vector<12x4xf32> to vector<12x4xbf16>
    %58 = vector.extract_strided_slice %32 {offsets = [0, 36], sizes = [12, 4], strides = [1, 1]} : vector<12x96xf32> to vector<12x4xf32>
    %59 = arith.truncf %58 : vector<12x4xf32> to vector<12x4xbf16>
    %60 = vector.extract_strided_slice %32 {offsets = [0, 68], sizes = [12, 4], strides = [1, 1]} : vector<12x96xf32> to vector<12x4xf32>
    %61 = arith.truncf %60 : vector<12x4xf32> to vector<12x4xbf16>
    %cst_24 = arith.constant dense<0.000000e+00> : vector<12x12xf32>
    %62 = tpu.matmul %57, %59, %cst_24 {dimension_numbers = #tpu.dot_dimension_numbers<[1], [1], [0], [0], [0, 0, 1, 0], [], []>} : vector<12x4xbf16>, vector<12x4xbf16>, vector<12x12xf32> -> vector<12x12xf32>
    %cst_25 = arith.constant dense<0xFF800000> : vector<12xf32>
    %63 = vector.multi_reduction <maximumf>, %62, %cst_25 [1] : vector<12x12xf32> to vector<12xf32>
    %64 = vector.shape_cast %63 : vector<12xf32> to vector<12x1xf32>
    %65 = vector.broadcast %64 : vector<12x1xf32> to vector<12x12xf32>
    %66 = arith.subf %62, %65 : vector<12x12xf32>
    %67 = math.exp %66 : vector<12x12xf32>
    %cst_26 = arith.constant dense<0.000000e+00> : vector<12xf32>
    %68 = vector.multi_reduction <add>, %67, %cst_26 [1] : vector<12x12xf32> to vector<12xf32>
    %69 = vector.shape_cast %68 : vector<12xf32> to vector<12x1xf32>
    %70 = tpu.reciprocal %69 {approx = true} : vector<12x1xf32> -> vector<12x1xf32>
    %71 = vector.broadcast %70 : vector<12x1xf32> to vector<12x12xf32>
    %72 = arith.mulf %67, %71 : vector<12x12xf32>
    %73 = arith.truncf %72 : vector<12x12xf32> to vector<12x12xbf16>
    %cst_27 = arith.constant dense<0.000000e+00> : vector<12x4xf32>
    %74 = tpu.matmul %73, %61, %cst_27 {dimension_numbers = #tpu.dot_dimension_numbers<[1], [0], [0], [1], [0, 0, 1, 1], [], []>} : vector<12x12xbf16>, vector<12x4xbf16>, vector<12x4xf32> -> vector<12x4xf32>
    %75 = vector.extract_strided_slice %32 {offsets = [0, 8], sizes = [12, 4], strides = [1, 1]} : vector<12x96xf32> to vector<12x4xf32>
    %cst_28 = arith.constant 5.000000e-01 : f32
    %76 = vector.broadcast %cst_28 : f32 to vector<12x4xf32>
    %77 = arith.mulf %75, %76 : vector<12x4xf32>
    %78 = arith.truncf %77 : vector<12x4xf32> to vector<12x4xbf16>
    %79 = vector.extract_strided_slice %32 {offsets = [0, 40], sizes = [12, 4], strides = [1, 1]} : vector<12x96xf32> to vector<12x4xf32>
    %80 = arith.truncf %79 : vector<12x4xf32> to vector<12x4xbf16>
    %81 = vector.extract_strided_slice %32 {offsets = [0, 72], sizes = [12, 4], strides = [1, 1]} : vector<12x96xf32> to vector<12x4xf32>
    %82 = arith.truncf %81 : vector<12x4xf32> to vector<12x4xbf16>
    %cst_29 = arith.constant dense<0.000000e+00> : vector<12x12xf32>
    %83 = tpu.matmul %78, %80, %cst_29 {dimension_numbers = #tpu.dot_dimension_numbers<[1], [1], [0], [0], [0, 0, 1, 0], [], []>} : vector<12x4xbf16>, vector<12x4xbf16>, vector<12x12xf32> -> vector<12x12xf32>
    %cst_30 = arith.constant dense<0xFF800000> : vector<12xf32>
    %84 = vector.multi_reduction <maximumf>, %83, %cst_30 [1] : vector<12x12xf32> to vector<12xf32>
    %85 = vector.shape_cast %84 : vector<12xf32> to vector<12x1xf32>
    %86 = vector.broadcast %85 : vector<12x1xf32> to vector<12x12xf32>
    %87 = arith.subf %83, %86 : vector<12x12xf32>
    %88 = math.exp %87 : vector<12x12xf32>
    %cst_31 = arith.constant dense<0.000000e+00> : vector<12xf32>
    %89 = vector.multi_reduction <add>, %88, %cst_31 [1] : vector<12x12xf32> to vector<12xf32>
    %90 = vector.shape_cast %89 : vector<12xf32> to vector<12x1xf32>
    %91 = tpu.reciprocal %90 {approx = true} : vector<12x1xf32> -> vector<12x1xf32>
    %92 = vector.broadcast %91 : vector<12x1xf32> to vector<12x12xf32>
    %93 = arith.mulf %88, %92 : vector<12x12xf32>
    %94 = arith.truncf %93 : vector<12x12xf32> to vector<12x12xbf16>
    %cst_32 = arith.constant dense<0.000000e+00> : vector<12x4xf32>
    %95 = tpu.matmul %94, %82, %cst_32 {dimension_numbers = #tpu.dot_dimension_numbers<[1], [0], [0], [1], [0, 0, 1, 1], [], []>} : vector<12x12xbf16>, vector<12x4xbf16>, vector<12x4xf32> -> vector<12x4xf32>
    %96 = vector.extract_strided_slice %32 {offsets = [0, 12], sizes = [12, 4], strides = [1, 1]} : vector<12x96xf32> to vector<12x4xf32>
    %cst_33 = arith.constant 5.000000e-01 : f32
    %97 = vector.broadcast %cst_33 : f32 to vector<12x4xf32>
    %98 = arith.mulf %96, %97 : vector<12x4xf32>
    %99 = arith.truncf %98 : vector<12x4xf32> to vector<12x4xbf16>
    %100 = vector.extract_strided_slice %32 {offsets = [0, 44], sizes = [12, 4], strides = [1, 1]} : vector<12x96xf32> to vector<12x4xf32>
    %101 = arith.truncf %100 : vector<12x4xf32> to vector<12x4xbf16>
    %102 = vector.extract_strided_slice %32 {offsets = [0, 76], sizes = [12, 4], strides = [1, 1]} : vector<12x96xf32> to vector<12x4xf32>
    %103 = arith.truncf %102 : vector<12x4xf32> to vector<12x4xbf16>
    %cst_34 = arith.constant dense<0.000000e+00> : vector<12x12xf32>
    %104 = tpu.matmul %99, %101, %cst_34 {dimension_numbers = #tpu.dot_dimension_numbers<[1], [1], [0], [0], [0, 0, 1, 0], [], []>} : vector<12x4xbf16>, vector<12x4xbf16>, vector<12x12xf32> -> vector<12x12xf32>
    %cst_35 = arith.constant dense<0xFF800000> : vector<12xf32>
    %105 = vector.multi_reduction <maximumf>, %104, %cst_35 [1] : vector<12x12xf32> to vector<12xf32>
    %106 = vector.shape_cast %105 : vector<12xf32> to vector<12x1xf32>
    %107 = vector.broadcast %106 : vector<12x1xf32> to vector<12x12xf32>
    %108 = arith.subf %104, %107 : vector<12x12xf32>
    %109 = math.exp %108 : vector<12x12xf32>
    %cst_36 = arith.constant dense<0.000000e+00> : vector<12xf32>
    %110 = vector.multi_reduction <add>, %109, %cst_36 [1] : vector<12x12xf32> to vector<12xf32>
    %111 = vector.shape_cast %110 : vector<12xf32> to vector<12x1xf32>
    %112 = tpu.reciprocal %111 {approx = true} : vector<12x1xf32> -> vector<12x1xf32>
    %113 = vector.broadcast %112 : vector<12x1xf32> to vector<12x12xf32>
    %114 = arith.mulf %109, %113 : vector<12x12xf32>
    %115 = arith.truncf %114 : vector<12x12xf32> to vector<12x12xbf16>
    %cst_37 = arith.constant dense<0.000000e+00> : vector<12x4xf32>
    %116 = tpu.matmul %115, %103, %cst_37 {dimension_numbers = #tpu.dot_dimension_numbers<[1], [0], [0], [1], [0, 0, 1, 1], [], []>} : vector<12x12xbf16>, vector<12x4xbf16>, vector<12x4xf32> -> vector<12x4xf32>
    %117 = vector.extract_strided_slice %32 {offsets = [0, 16], sizes = [12, 4], strides = [1, 1]} : vector<12x96xf32> to vector<12x4xf32>
    %cst_38 = arith.constant 5.000000e-01 : f32
    %118 = vector.broadcast %cst_38 : f32 to vector<12x4xf32>
    %119 = arith.mulf %117, %118 : vector<12x4xf32>
    %120 = arith.truncf %119 : vector<12x4xf32> to vector<12x4xbf16>
    %121 = vector.extract_strided_slice %32 {offsets = [0, 48], sizes = [12, 4], strides = [1, 1]} : vector<12x96xf32> to vector<12x4xf32>
    %122 = arith.truncf %121 : vector<12x4xf32> to vector<12x4xbf16>
    %123 = vector.extract_strided_slice %32 {offsets = [0, 80], sizes = [12, 4], strides = [1, 1]} : vector<12x96xf32> to vector<12x4xf32>
    %124 = arith.truncf %123 : vector<12x4xf32> to vector<12x4xbf16>
    %cst_39 = arith.constant dense<0.000000e+00> : vector<12x12xf32>
    %125 = tpu.matmul %120, %122, %cst_39 {dimension_numbers = #tpu.dot_dimension_numbers<[1], [1], [0], [0], [0, 0, 1, 0], [], []>} : vector<12x4xbf16>, vector<12x4xbf16>, vector<12x12xf32> -> vector<12x12xf32>
    %cst_40 = arith.constant dense<0xFF800000> : vector<12xf32>
    %126 = vector.multi_reduction <maximumf>, %125, %cst_40 [1] : vector<12x12xf32> to vector<12xf32>
    %127 = vector.shape_cast %126 : vector<12xf32> to vector<12x1xf32>
    %128 = vector.broadcast %127 : vector<12x1xf32> to vector<12x12xf32>
    %129 = arith.subf %125, %128 : vector<12x12xf32>
    %130 = math.exp %129 : vector<12x12xf32>
    %cst_41 = arith.constant dense<0.000000e+00> : vector<12xf32>
    %131 = vector.multi_reduction <add>, %130, %cst_41 [1] : vector<12x12xf32> to vector<12xf32>
    %132 = vector.shape_cast %131 : vector<12xf32> to vector<12x1xf32>
    %133 = tpu.reciprocal %132 {approx = true} : vector<12x1xf32> -> vector<12x1xf32>
    %134 = vector.broadcast %133 : vector<12x1xf32> to vector<12x12xf32>
    %135 = arith.mulf %130, %134 : vector<12x12xf32>
    %136 = arith.truncf %135 : vector<12x12xf32> to vector<12x12xbf16>
    %cst_42 = arith.constant dense<0.000000e+00> : vector<12x4xf32>
    %137 = tpu.matmul %136, %124, %cst_42 {dimension_numbers = #tpu.dot_dimension_numbers<[1], [0], [0], [1], [0, 0, 1, 1], [], []>} : vector<12x12xbf16>, vector<12x4xbf16>, vector<12x4xf32> -> vector<12x4xf32>
    %138 = vector.extract_strided_slice %32 {offsets = [0, 20], sizes = [12, 4], strides = [1, 1]} : vector<12x96xf32> to vector<12x4xf32>
    %cst_43 = arith.constant 5.000000e-01 : f32
    %139 = vector.broadcast %cst_43 : f32 to vector<12x4xf32>
    %140 = arith.mulf %138, %139 : vector<12x4xf32>
    %141 = arith.truncf %140 : vector<12x4xf32> to vector<12x4xbf16>
    %142 = vector.extract_strided_slice %32 {offsets = [0, 52], sizes = [12, 4], strides = [1, 1]} : vector<12x96xf32> to vector<12x4xf32>
    %143 = arith.truncf %142 : vector<12x4xf32> to vector<12x4xbf16>
    %144 = vector.extract_strided_slice %32 {offsets = [0, 84], sizes = [12, 4], strides = [1, 1]} : vector<12x96xf32> to vector<12x4xf32>
    %145 = arith.truncf %144 : vector<12x4xf32> to vector<12x4xbf16>
    %cst_44 = arith.constant dense<0.000000e+00> : vector<12x12xf32>
    %146 = tpu.matmul %141, %143, %cst_44 {dimension_numbers = #tpu.dot_dimension_numbers<[1], [1], [0], [0], [0, 0, 1, 0], [], []>} : vector<12x4xbf16>, vector<12x4xbf16>, vector<12x12xf32> -> vector<12x12xf32>
    %cst_45 = arith.constant dense<0xFF800000> : vector<12xf32>
    %147 = vector.multi_reduction <maximumf>, %146, %cst_45 [1] : vector<12x12xf32> to vector<12xf32>
    %148 = vector.shape_cast %147 : vector<12xf32> to vector<12x1xf32>
    %149 = vector.broadcast %148 : vector<12x1xf32> to vector<12x12xf32>
    %150 = arith.subf %146, %149 : vector<12x12xf32>
    %151 = math.exp %150 : vector<12x12xf32>
    %cst_46 = arith.constant dense<0.000000e+00> : vector<12xf32>
    %152 = vector.multi_reduction <add>, %151, %cst_46 [1] : vector<12x12xf32> to vector<12xf32>
    %153 = vector.shape_cast %152 : vector<12xf32> to vector<12x1xf32>
    %154 = tpu.reciprocal %153 {approx = true} : vector<12x1xf32> -> vector<12x1xf32>
    %155 = vector.broadcast %154 : vector<12x1xf32> to vector<12x12xf32>
    %156 = arith.mulf %151, %155 : vector<12x12xf32>
    %157 = arith.truncf %156 : vector<12x12xf32> to vector<12x12xbf16>
    %cst_47 = arith.constant dense<0.000000e+00> : vector<12x4xf32>
    %158 = tpu.matmul %157, %145, %cst_47 {dimension_numbers = #tpu.dot_dimension_numbers<[1], [0], [0], [1], [0, 0, 1, 1], [], []>} : vector<12x12xbf16>, vector<12x4xbf16>, vector<12x4xf32> -> vector<12x4xf32>
    %159 = vector.extract_strided_slice %32 {offsets = [0, 24], sizes = [12, 4], strides = [1, 1]} : vector<12x96xf32> to vector<12x4xf32>
    %cst_48 = arith.constant 5.000000e-01 : f32
    %160 = vector.broadcast %cst_48 : f32 to vector<12x4xf32>
    %161 = arith.mulf %159, %160 : vector<12x4xf32>
    %162 = arith.truncf %161 : vector<12x4xf32> to vector<12x4xbf16>
    %163 = vector.extract_strided_slice %32 {offsets = [0, 56], sizes = [12, 4], strides = [1, 1]} : vector<12x96xf32> to vector<12x4xf32>
    %164 = arith.truncf %163 : vector<12x4xf32> to vector<12x4xbf16>
    %165 = vector.extract_strided_slice %32 {offsets = [0, 88], sizes = [12, 4], strides = [1, 1]} : vector<12x96xf32> to vector<12x4xf32>
    %166 = arith.truncf %165 : vector<12x4xf32> to vector<12x4xbf16>
    %cst_49 = arith.constant dense<0.000000e+00> : vector<12x12xf32>
    %167 = tpu.matmul %162, %164, %cst_49 {dimension_numbers = #tpu.dot_dimension_numbers<[1], [1], [0], [0], [0, 0, 1, 0], [], []>} : vector<12x4xbf16>, vector<12x4xbf16>, vector<12x12xf32> -> vector<12x12xf32>
    %cst_50 = arith.constant dense<0xFF800000> : vector<12xf32>
    %168 = vector.multi_reduction <maximumf>, %167, %cst_50 [1] : vector<12x12xf32> to vector<12xf32>
    %169 = vector.shape_cast %168 : vector<12xf32> to vector<12x1xf32>
    %170 = vector.broadcast %169 : vector<12x1xf32> to vector<12x12xf32>
    %171 = arith.subf %167, %170 : vector<12x12xf32>
    %172 = math.exp %171 : vector<12x12xf32>
    %cst_51 = arith.constant dense<0.000000e+00> : vector<12xf32>
    %173 = vector.multi_reduction <add>, %172, %cst_51 [1] : vector<12x12xf32> to vector<12xf32>
    %174 = vector.shape_cast %173 : vector<12xf32> to vector<12x1xf32>
    %175 = tpu.reciprocal %174 {approx = true} : vector<12x1xf32> -> vector<12x1xf32>
    %176 = vector.broadcast %175 : vector<12x1xf32> to vector<12x12xf32>
    %177 = arith.mulf %172, %176 : vector<12x12xf32>
    %178 = arith.truncf %177 : vector<12x12xf32> to vector<12x12xbf16>
    %cst_52 = arith.constant dense<0.000000e+00> : vector<12x4xf32>
    %179 = tpu.matmul %178, %166, %cst_52 {dimension_numbers = #tpu.dot_dimension_numbers<[1], [0], [0], [1], [0, 0, 1, 1], [], []>} : vector<12x12xbf16>, vector<12x4xbf16>, vector<12x4xf32> -> vector<12x4xf32>
    %180 = vector.extract_strided_slice %32 {offsets = [0, 28], sizes = [12, 4], strides = [1, 1]} : vector<12x96xf32> to vector<12x4xf32>
    %cst_53 = arith.constant 5.000000e-01 : f32
    %181 = vector.broadcast %cst_53 : f32 to vector<12x4xf32>
    %182 = arith.mulf %180, %181 : vector<12x4xf32>
    %183 = arith.truncf %182 : vector<12x4xf32> to vector<12x4xbf16>
    %184 = vector.extract_strided_slice %32 {offsets = [0, 60], sizes = [12, 4], strides = [1, 1]} : vector<12x96xf32> to vector<12x4xf32>
    %185 = arith.truncf %184 : vector<12x4xf32> to vector<12x4xbf16>
    %186 = vector.extract_strided_slice %32 {offsets = [0, 92], sizes = [12, 4], strides = [1, 1]} : vector<12x96xf32> to vector<12x4xf32>
    %187 = arith.truncf %186 : vector<12x4xf32> to vector<12x4xbf16>
    %cst_54 = arith.constant dense<0.000000e+00> : vector<12x12xf32>
    %188 = tpu.matmul %183, %185, %cst_54 {dimension_numbers = #tpu.dot_dimension_numbers<[1], [1], [0], [0], [0, 0, 1, 0], [], []>} : vector<12x4xbf16>, vector<12x4xbf16>, vector<12x12xf32> -> vector<12x12xf32>
    %cst_55 = arith.constant dense<0xFF800000> : vector<12xf32>
    %189 = vector.multi_reduction <maximumf>, %188, %cst_55 [1] : vector<12x12xf32> to vector<12xf32>
    %190 = vector.shape_cast %189 : vector<12xf32> to vector<12x1xf32>
    %191 = vector.broadcast %190 : vector<12x1xf32> to vector<12x12xf32>
    %192 = arith.subf %188, %191 : vector<12x12xf32>
    %193 = math.exp %192 : vector<12x12xf32>
    %cst_56 = arith.constant dense<0.000000e+00> : vector<12xf32>
    %194 = vector.multi_reduction <add>, %193, %cst_56 [1] : vector<12x12xf32> to vector<12xf32>
    %195 = vector.shape_cast %194 : vector<12xf32> to vector<12x1xf32>
    %196 = tpu.reciprocal %195 {approx = true} : vector<12x1xf32> -> vector<12x1xf32>
    %197 = vector.broadcast %196 : vector<12x1xf32> to vector<12x12xf32>
    %198 = arith.mulf %193, %197 : vector<12x12xf32>
    %199 = arith.truncf %198 : vector<12x12xf32> to vector<12x12xbf16>
    %cst_57 = arith.constant dense<0.000000e+00> : vector<12x4xf32>
    %200 = tpu.matmul %199, %187, %cst_57 {dimension_numbers = #tpu.dot_dimension_numbers<[1], [0], [0], [1], [0, 0, 1, 1], [], []>} : vector<12x12xbf16>, vector<12x4xbf16>, vector<12x4xf32> -> vector<12x4xf32>
    %201 = tpu.concatenate %53, %74, %95, %116, %137, %158, %179, %200 in 1 : vector<12x4xf32>, vector<12x4xf32>, vector<12x4xf32>, vector<12x4xf32>, vector<12x4xf32>, vector<12x4xf32>, vector<12x4xf32>, vector<12x4xf32> -> vector<12x32xf32>
    %202 = arith.truncf %201 : vector<12x32xf32> to vector<12x32xbf16>
    %c0_58 = arith.constant 0 : index
    %c0_59 = arith.constant 0 : index
    %203 = vector.load %arg7[%c0_58, %c0_59] : memref<32x32xbf16, #tpu.memory_space<vmem>>, vector<32x32xbf16>
    %cst_60 = arith.constant dense<0.000000e+00> : vector<12x32xf32>
    %204 = tpu.matmul %202, %203, %cst_60 {dimension_numbers = #tpu.dot_dimension_numbers<[1], [0], [0], [1], [0, 0, 1, 1], [], []>} : vector<12x32xbf16>, vector<32x32xbf16>, vector<12x32xf32> -> vector<12x32xf32>
    %c0_61 = arith.constant 0 : index
    %c0_62 = arith.constant 0 : index
    %205 = vector.load %arg8[%c0_61, %c0_62] : memref<1x32xf32, #tpu.memory_space<vmem>>, vector<1x32xf32>
    %206 = vector.broadcast %205 : vector<1x32xf32> to vector<12x32xf32>
    %207 = arith.addf %204, %206 : vector<12x32xf32>
    %208 = arith.addf %207, %4 : vector<12x32xf32>
    %209 = vector.extract_strided_slice %208 {offsets = [0, 0], sizes = [4, 32], strides = [1, 1]} : vector<12x32xf32> to vector<4x32xf32>
    %c0_63 = arith.constant 0 : index
    %c0_64 = arith.constant 0 : index
    %c0_65 = arith.constant 0 : index
    %210 = vector.load %arg9[%c0_63, %c0_64, %c0_65] : memref<1x4x32xf32, #tpu.memory_space<vmem>>, vector<1x4x32xf32>
    %211 = vector.shape_cast %210 : vector<1x4x32xf32> to vector<4x32xf32>
    %212 = vector.shape_cast %209 : vector<4x32xf32> to vector<1x4x32xf32>
    tpu.vector_store %arg9[%c0_63, %c0_64, %c0_65], %212 {strides = array<i32>} : memref<1x4x32xf32, #tpu.memory_space<vmem>>, vector<1x4x32xf32>,
    %213 = vector.extract_strided_slice %208 {offsets = [4, 0], sizes = [8, 32], strides = [1, 1]} : vector<12x32xf32> to vector<8x32xf32>
    %c0_66 = arith.constant 0 : index
    %c0_67 = arith.constant 0 : index
    %c0_68 = arith.constant 0 : index
    %214 = vector.load %arg10[%c0_66, %c0_67, %c0_68] : memref<1x8x32xf32, #tpu.memory_space<vmem>>, vector<1x8x32xf32>
    %215 = vector.shape_cast %214 : vector<1x8x32xf32> to vector<8x32xf32>
    %216 = vector.shape_cast %213 : vector<8x32xf32> to vector<1x8x32xf32>
    tpu.vector_store %arg10[%c0_66, %c0_67, %c0_68], %216 {strides = array<i32>} : memref<1x8x32xf32, #tpu.memory_space<vmem>>, vector<1x8x32xf32>,
    return
  }
  func.func @transform_0(%arg0: i32) -> (i32, i32, i32) {
    %c0_i32 = arith.constant 0 : i32
    %c0_i32_0 = arith.constant 0 : i32
    %c0_i32_1 = arith.constant 0 : i32
    return %arg0, %c0_i32, %c0_i32_0 : i32, i32, i32
  }
  func.func @transform_1(%arg0: i32) -> (i32, i32, i32) {
    %c0_i32 = arith.constant 0 : i32
    %c0_i32_0 = arith.constant 0 : i32
    %c0_i32_1 = arith.constant 0 : i32
    return %arg0, %c0_i32, %c0_i32_0 : i32, i32, i32
  }
  func.func @transform_2(%arg0: i32) -> (i32, i32) {
    %c0_i32 = arith.constant 0 : i32
    %c0_i32_0 = arith.constant 0 : i32
    %c0_i32_1 = arith.constant 0 : i32
    return %c0_i32, %c0_i32_0 : i32, i32
  }
  func.func @transform_3(%arg0: i32) -> (i32, i32) {
    %c0_i32 = arith.constant 0 : i32
    %c0_i32_0 = arith.constant 0 : i32
    %c0_i32_1 = arith.constant 0 : i32
    return %c0_i32, %c0_i32_0 : i32, i32
  }
  func.func @transform_4(%arg0: i32) -> (i32, i32) {
    %c0_i32 = arith.constant 0 : i32
    %c0_i32_0 = arith.constant 0 : i32
    %c0_i32_1 = arith.constant 0 : i32
    return %c0_i32, %c0_i32_0 : i32, i32
  }
  func.func @transform_5(%arg0: i32) -> (i32, i32) {
    %c0_i32 = arith.constant 0 : i32
    %c0_i32_0 = arith.constant 0 : i32
    %c0_i32_1 = arith.constant 0 : i32
    return %c0_i32, %c0_i32_0 : i32, i32
  }
  func.func @transform_6(%arg0: i32) -> (i32, i32) {
    %c0_i32 = arith.constant 0 : i32
    %c0_i32_0 = arith.constant 0 : i32
    %c0_i32_1 = arith.constant 0 : i32
    return %c0_i32, %c0_i32_0 : i32, i32
  }
  func.func @transform_7(%arg0: i32) -> (i32, i32) {
    %c0_i32 = arith.constant 0 : i32
    %c0_i32_0 = arith.constant 0 : i32
    %c0_i32_1 = arith.constant 0 : i32
    return %c0_i32, %c0_i32_0 : i32, i32
  }
  func.func @transform_8(%arg0: i32) -> (i32, i32, i32) {
    %c0_i32 = arith.constant 0 : i32
    %c0_i32_0 = arith.constant 0 : i32
    %c0_i32_1 = arith.constant 0 : i32
    return %arg0, %c0_i32, %c0_i32_0 : i32, i32, i32
  }
  func.func @transform_9(%arg0: i32) -> (i32, i32, i32) {
    %c0_i32 = arith.constant 0 : i32
    %c0_i32_0 = arith.constant 0 : i32
    %c0_i32_1 = arith.constant 0 : i32
    return %arg0, %c0_i32, %c0_i32_0 : i32, i32, i32
  }
}

module attributes {stable_mosaic.version = 11 : i64} {
  func.func @kernel(%arg0: i32, %arg1: memref<8x32xf32, #tpu.memory_space<vmem>>, %arg2: memref<32x128xbf16, #tpu.memory_space<vmem>>, %arg3: memref<8x128xbf16, #tpu.memory_space<vmem>>) attributes {dimension_semantics = [#tpu.dimension_semantics<parallel>], iteration_bounds = array<i64: 1>, scalar_prefetch = 0 : i64, scratch_operands = 0 : i64, tpu.core_type = #tpu.core_type<tc>, window_params = [{transform_indices = @transform_0, window_bounds = array<i64: 8, 32>}, {pipeline_mode = #tpu.pipeline_mode<synchronous>, transform_indices = @transform_1, window_bounds = array<i64: 32, 128>}, {transform_indices = @transform_2, window_bounds = array<i64: 8, 128>}]} {
    %c0 = arith.constant 0 : index
    %c0_0 = arith.constant 0 : index
    %0 = vector.load %arg1[%c0, %c0_0] : memref<8x32xf32, #tpu.memory_space<vmem>>, vector<8x32xf32>
    %c0_1 = arith.constant 0 : index
    %c0_2 = arith.constant 0 : index
    %1 = vector.load %arg2[%c0_1, %c0_2] : memref<32x128xbf16, #tpu.memory_space<vmem>>, vector<32x128xbf16>
    %2 = arith.truncf %0 : vector<8x32xf32> to vector<8x32xbf16>
    %cst = arith.constant dense<0.000000e+00> : vector<8x128xf32>
    %3 = tpu.matmul %2, %1, %cst {dimension_numbers = #tpu.dot_dimension_numbers<[1], [0], [0], [1], [0, 0, 1, 1], [], []>} : vector<8x32xbf16>, vector<32x128xbf16>, vector<8x128xf32> -> vector<8x128xf32>
    %4 = arith.truncf %3 : vector<8x128xf32> to vector<8x128xbf16>
    %c0_3 = arith.constant 0 : index
    %c0_4 = arith.constant 0 : index
    %5 = vector.load %arg3[%c0_3, %c0_4] : memref<8x128xbf16, #tpu.memory_space<vmem>>, vector<8x128xbf16>
    tpu.vector_store %arg3[%c0_3, %c0_4], %4 {strides = array<i32>} : memref<8x128xbf16, #tpu.memory_space<vmem>>, vector<8x128xbf16>,
    return
  }
  func.func @transform_0(%arg0: i32) -> (i32, i32) {
    %c0_i32 = arith.constant 0 : i32
    %c0_i32_0 = arith.constant 0 : i32
    return %arg0, %c0_i32 : i32, i32
  }
  func.func @transform_1(%arg0: i32) -> (i32, i32) {
    %c0_i32 = arith.constant 0 : i32
    %c0_i32_0 = arith.constant 0 : i32
    %c0_i32_1 = arith.constant 0 : i32
    return %c0_i32, %c0_i32_0 : i32, i32
  }
  func.func @transform_2(%arg0: i32) -> (i32, i32) {
    %c0_i32 = arith.constant 0 : i32
    %c0_i32_0 = arith.constant 0 : i32
    return %arg0, %c0_i32 : i32, i32
  }
}

module attributes {stable_mosaic.version = 11 : i64} {
  func.func @kernel(%arg0: i32, %arg1: memref<8x128xbf16, #tpu.memory_space<vmem>>, %arg2: memref<128x64xbf16, #tpu.memory_space<vmem>>, %arg3: memref<8x64xbf16, #tpu.memory_space<vmem>>) attributes {dimension_semantics = [#tpu.dimension_semantics<parallel>], iteration_bounds = array<i64: 1>, scalar_prefetch = 0 : i64, scratch_operands = 0 : i64, tpu.core_type = #tpu.core_type<tc>, window_params = [{transform_indices = @transform_0, window_bounds = array<i64: 8, 128>}, {pipeline_mode = #tpu.pipeline_mode<synchronous>, transform_indices = @transform_1, window_bounds = array<i64: 128, 64>}, {transform_indices = @transform_2, window_bounds = array<i64: 8, 64>}]} {
    %c0 = arith.constant 0 : index
    %c0_0 = arith.constant 0 : index
    %0 = vector.load %arg1[%c0, %c0_0] : memref<8x128xbf16, #tpu.memory_space<vmem>>, vector<8x128xbf16>
    %1 = arith.extf %0 : vector<8x128xbf16> to vector<8x128xf32>
    %c0_1 = arith.constant 0 : index
    %c0_2 = arith.constant 0 : index
    %2 = vector.load %arg2[%c0_1, %c0_2] : memref<128x64xbf16, #tpu.memory_space<vmem>>, vector<128x64xbf16>
    %3 = arith.truncf %1 : vector<8x128xf32> to vector<8x128xbf16>
    %cst = arith.constant dense<0.000000e+00> : vector<8x64xf32>
    %4 = tpu.matmul %3, %2, %cst {dimension_numbers = #tpu.dot_dimension_numbers<[1], [0], [0], [1], [0, 0, 1, 1], [], []>} : vector<8x128xbf16>, vector<128x64xbf16>, vector<8x64xf32> -> vector<8x64xf32>
    %cst_3 = arith.constant 0.000000e+00 : f32
    %5 = vector.broadcast %cst_3 : f32 to vector<8x64xf32>
    %6 = arith.maximumf %4, %5 : vector<8x64xf32>
    %7 = arith.truncf %6 : vector<8x64xf32> to vector<8x64xbf16>
    %c0_4 = arith.constant 0 : index
    %c0_5 = arith.constant 0 : index
    %8 = vector.load %arg3[%c0_4, %c0_5] : memref<8x64xbf16, #tpu.memory_space<vmem>>, vector<8x64xbf16>
    tpu.vector_store %arg3[%c0_4, %c0_5], %7 {strides = array<i32>} : memref<8x64xbf16, #tpu.memory_space<vmem>>, vector<8x64xbf16>,
    return
  }
  func.func @transform_0(%arg0: i32) -> (i32, i32) {
    %c0_i32 = arith.constant 0 : i32
    %c0_i32_0 = arith.constant 0 : i32
    return %arg0, %c0_i32 : i32, i32
  }
  func.func @transform_1(%arg0: i32) -> (i32, i32) {
    %c0_i32 = arith.constant 0 : i32
    %c0_i32_0 = arith.constant 0 : i32
    %c0_i32_1 = arith.constant 0 : i32
    return %c0_i32, %c0_i32_0 : i32, i32
  }
  func.func @transform_2(%arg0: i32) -> (i32, i32) {
    %c0_i32 = arith.constant 0 : i32
    %c0_i32_0 = arith.constant 0 : i32
    return %arg0, %c0_i32 : i32, i32
  }
}

module attributes {stable_mosaic.version = 11 : i64} {
  func.func @kernel(%arg0: i32, %arg1: memref<8x64xbf16, #tpu.memory_space<vmem>>, %arg2: memref<64x32xbf16, #tpu.memory_space<vmem>>, %arg3: memref<8x32xbf16, #tpu.memory_space<vmem>>) attributes {dimension_semantics = [#tpu.dimension_semantics<parallel>], iteration_bounds = array<i64: 1>, scalar_prefetch = 0 : i64, scratch_operands = 0 : i64, tpu.core_type = #tpu.core_type<tc>, window_params = [{transform_indices = @transform_0, window_bounds = array<i64: 8, 64>}, {pipeline_mode = #tpu.pipeline_mode<synchronous>, transform_indices = @transform_1, window_bounds = array<i64: 64, 32>}, {transform_indices = @transform_2, window_bounds = array<i64: 8, 32>}]} {
    %c0 = arith.constant 0 : index
    %c0_0 = arith.constant 0 : index
    %0 = vector.load %arg1[%c0, %c0_0] : memref<8x64xbf16, #tpu.memory_space<vmem>>, vector<8x64xbf16>
    %1 = arith.extf %0 : vector<8x64xbf16> to vector<8x64xf32>
    %c0_1 = arith.constant 0 : index
    %c0_2 = arith.constant 0 : index
    %2 = vector.load %arg2[%c0_1, %c0_2] : memref<64x32xbf16, #tpu.memory_space<vmem>>, vector<64x32xbf16>
    %3 = arith.truncf %1 : vector<8x64xf32> to vector<8x64xbf16>
    %cst = arith.constant dense<0.000000e+00> : vector<8x32xf32>
    %4 = tpu.matmul %3, %2, %cst {dimension_numbers = #tpu.dot_dimension_numbers<[1], [0], [0], [1], [0, 0, 1, 1], [], []>} : vector<8x64xbf16>, vector<64x32xbf16>, vector<8x32xf32> -> vector<8x32xf32>
    %5 = arith.truncf %4 : vector<8x32xf32> to vector<8x32xbf16>
    %c0_3 = arith.constant 0 : index
    %c0_4 = arith.constant 0 : index
    %6 = vector.load %arg3[%c0_3, %c0_4] : memref<8x32xbf16, #tpu.memory_space<vmem>>, vector<8x32xbf16>
    tpu.vector_store %arg3[%c0_3, %c0_4], %5 {strides = array<i32>} : memref<8x32xbf16, #tpu.memory_space<vmem>>, vector<8x32xbf16>,
    return
  }
  func.func @transform_0(%arg0: i32) -> (i32, i32) {
    %c0_i32 = arith.constant 0 : i32
    %c0_i32_0 = arith.constant 0 : i32
    return %arg0, %c0_i32 : i32, i32
  }
  func.func @transform_1(%arg0: i32) -> (i32, i32) {
    %c0_i32 = arith.constant 0 : i32
    %c0_i32_0 = arith.constant 0 : i32
    %c0_i32_1 = arith.constant 0 : i32
    return %c0_i32, %c0_i32_0 : i32, i32
  }
  func.func @transform_2(%arg0: i32) -> (i32, i32) {
    %c0_i32 = arith.constant 0 : i32
    %c0_i32_0 = arith.constant 0 : i32
    return %arg0, %c0_i32 : i32, i32
  }
}

module attributes {stable_mosaic.version = 11 : i64} {
  func.func @kernel(%arg0: i32, %arg1: memref<16x32xf32, #tpu.memory_space<vmem>>, %arg2: memref<32x32xbf16, #tpu.memory_space<vmem>>, %arg3: memref<1x32xf32, #tpu.memory_space<vmem>>, %arg4: memref<16x32xf32, #tpu.memory_space<vmem>>, %arg5: memref<16x32xf32, #tpu.memory_space<vmem>>) attributes {dimension_semantics = [#tpu.dimension_semantics<parallel>], iteration_bounds = array<i64: 1>, scalar_prefetch = 0 : i64, scratch_operands = 0 : i64, tpu.core_type = #tpu.core_type<tc>, window_params = [{transform_indices = @transform_0, window_bounds = array<i64: 16, 32>}, {pipeline_mode = #tpu.pipeline_mode<synchronous>, transform_indices = @transform_1, window_bounds = array<i64: 32, 32>}, {pipeline_mode = #tpu.pipeline_mode<synchronous>, transform_indices = @transform_2, window_bounds = array<i64: 1, 32>}, {transform_indices = @transform_3, window_bounds = array<i64: 16, 32>}, {transform_indices = @transform_4, window_bounds = array<i64: 16, 32>}]} {
    %c0 = arith.constant 0 : index
    %c0_0 = arith.constant 0 : index
    %0 = vector.load %arg1[%c0, %c0_0] : memref<16x32xf32, #tpu.memory_space<vmem>>, vector<16x32xf32>
    %c0_1 = arith.constant 0 : index
    %c0_2 = arith.constant 0 : index
    %1 = vector.load %arg2[%c0_1, %c0_2] : memref<32x32xbf16, #tpu.memory_space<vmem>>, vector<32x32xbf16>
    %2 = arith.truncf %0 : vector<16x32xf32> to vector<16x32xbf16>
    %cst = arith.constant dense<0.000000e+00> : vector<16x32xf32>
    %3 = tpu.matmul %2, %1, %cst {dimension_numbers = #tpu.dot_dimension_numbers<[1], [0], [0], [1], [0, 0, 1, 1], [], []>} : vector<16x32xbf16>, vector<32x32xbf16>, vector<16x32xf32> -> vector<16x32xf32>
    %c0_3 = arith.constant 0 : index
    %c0_4 = arith.constant 0 : index
    %4 = vector.load %arg3[%c0_3, %c0_4] : memref<1x32xf32, #tpu.memory_space<vmem>>, vector<1x32xf32>
    %5 = vector.broadcast %4 : vector<1x32xf32> to vector<16x32xf32>
    %6 = arith.addf %3, %5 : vector<16x32xf32>
    %c0_5 = arith.constant 0 : index
    %c0_6 = arith.constant 0 : index
    %7 = vector.load %arg4[%c0_5, %c0_6] : memref<16x32xf32, #tpu.memory_space<vmem>>, vector<16x32xf32>
    %8 = arith.addf %6, %7 : vector<16x32xf32>
    %c0_7 = arith.constant 0 : index
    %c0_8 = arith.constant 0 : index
    %9 = vector.load %arg5[%c0_7, %c0_8] : memref<16x32xf32, #tpu.memory_space<vmem>>, vector<16x32xf32>
    tpu.vector_store %arg5[%c0_7, %c0_8], %8 {strides = array<i32>} : memref<16x32xf32, #tpu.memory_space<vmem>>, vector<16x32xf32>,
    return
  }
  func.func @transform_0(%arg0: i32) -> (i32, i32) {
    %c0_i32 = arith.constant 0 : i32
    %c0_i32_0 = arith.constant 0 : i32
    return %arg0, %c0_i32 : i32, i32
  }
  func.func @transform_1(%arg0: i32) -> (i32, i32) {
    %c0_i32 = arith.constant 0 : i32
    %c0_i32_0 = arith.constant 0 : i32
    %c0_i32_1 = arith.constant 0 : i32
    return %c0_i32, %c0_i32_0 : i32, i32
  }
  func.func @transform_2(%arg0: i32) -> (i32, i32) {
    %c0_i32 = arith.constant 0 : i32
    %c0_i32_0 = arith.constant 0 : i32
    %c0_i32_1 = arith.constant 0 : i32
    return %c0_i32, %c0_i32_0 : i32, i32
  }
  func.func @transform_3(%arg0: i32) -> (i32, i32) {
    %c0_i32 = arith.constant 0 : i32
    %c0_i32_0 = arith.constant 0 : i32
    return %arg0, %c0_i32 : i32, i32
  }
  func.func @transform_4(%arg0: i32) -> (i32, i32) {
    %c0_i32 = arith.constant 0 : i32
    %c0_i32_0 = arith.constant 0 : i32
    return %arg0, %c0_i32 : i32, i32
  }
}

module attributes {stable_mosaic.version = 11 : i64} {
  func.func @_resblock_stack_kernel(%arg0: i32, %arg1: i32, %arg2: memref<16x32xf32, #tpu.memory_space<vmem>>, %arg3: memref<1x32x32xbf16, #tpu.memory_space<vmem>>, %arg4: memref<1x1x32xf32, #tpu.memory_space<vmem>>, %arg5: memref<1x1x32xf32, #tpu.memory_space<vmem>>, %arg6: memref<1x1x32xf32, #tpu.memory_space<vmem>>, %arg7: memref<16x32xf32, #tpu.memory_space<vmem>>, %arg8: memref<16x32xf32, #tpu.memory_space<vmem>>) attributes {dimension_semantics = [#tpu.dimension_semantics<parallel>, #tpu.dimension_semantics<arbitrary>], iteration_bounds = array<i64: 1, 4>, scalar_prefetch = 0 : i64, scratch_operands = 1 : i64, tpu.core_type = #tpu.core_type<tc>, window_params = [{transform_indices = @transform_0, window_bounds = array<i64: 16, 32>}, {transform_indices = @transform_1, window_bounds = array<i64: 1, 32, 32>}, {transform_indices = @transform_2, window_bounds = array<i64: 1, 1, 32>}, {transform_indices = @transform_3, window_bounds = array<i64: 1, 1, 32>}, {transform_indices = @transform_4, window_bounds = array<i64: 1, 1, 32>}, {transform_indices = @transform_5, window_bounds = array<i64: 16, 32>}]} {
    %c0_i32 = arith.constant 0 : i32
    %0 = arith.cmpi eq, %arg1, %c0_i32 : i32
    %1 = arith.extui %0 : i1 to i32
    %c0_i32_0 = arith.constant 0 : i32
    %2 = arith.cmpi ne, %1, %c0_i32_0 : i32
    scf.if %2 {
      %c0_22 = arith.constant 0 : index
      %c0_23 = arith.constant 0 : index
      %41 = vector.load %arg2[%c0_22, %c0_23] : memref<16x32xf32, #tpu.memory_space<vmem>>, vector<16x32xf32>
      %c0_24 = arith.constant 0 : index
      %c0_25 = arith.constant 0 : index
      %42 = vector.load %arg8[%c0_24, %c0_25] : memref<16x32xf32, #tpu.memory_space<vmem>>, vector<16x32xf32>
      tpu.vector_store %arg8[%c0_24, %c0_25], %41 {strides = array<i32>} : memref<16x32xf32, #tpu.memory_space<vmem>>, vector<16x32xf32>,
    } else {
    }
    %c0 = arith.constant 0 : index
    %c0_1 = arith.constant 0 : index
    %3 = vector.load %arg8[%c0, %c0_1] : memref<16x32xf32, #tpu.memory_space<vmem>>, vector<16x32xf32>
    %c0_2 = arith.constant 0 : index
    %c0_3 = arith.constant 0 : index
    %c0_4 = arith.constant 0 : index
    %4 = vector.load %arg5[%c0_2, %c0_3, %c0_4] : memref<1x1x32xf32, #tpu.memory_space<vmem>>, vector<1x1x32xf32>
    %5 = vector.shape_cast %4 : vector<1x1x32xf32> to vector<1x32xf32>
    %c0_5 = arith.constant 0 : index
    %c0_6 = arith.constant 0 : index
    %c0_7 = arith.constant 0 : index
    %6 = vector.load %arg6[%c0_5, %c0_6, %c0_7] : memref<1x1x32xf32, #tpu.memory_space<vmem>>, vector<1x1x32xf32>
    %7 = vector.shape_cast %6 : vector<1x1x32xf32> to vector<1x32xf32>
    %cst = arith.constant dense<0.000000e+00> : vector<16xf32>
    %8 = vector.multi_reduction <add>, %3, %cst [1] : vector<16x32xf32> to vector<16xf32>
    %9 = vector.shape_cast %8 : vector<16xf32> to vector<16x1xf32>
    %cst_8 = arith.constant 3.200000e+01 : f32
    %10 = vector.broadcast %cst_8 : f32 to vector<16x1xf32>
    %11 = arith.divf %9, %10 : vector<16x1xf32>
    %12 = vector.broadcast %11 : vector<16x1xf32> to vector<16x32xf32>
    %13 = arith.subf %3, %12 : vector<16x32xf32>
    %14 = arith.mulf %13, %13 : vector<16x32xf32>
    %cst_9 = arith.constant dense<0.000000e+00> : vector<16xf32>
    %15 = vector.multi_reduction <add>, %14, %cst_9 [1] : vector<16x32xf32> to vector<16xf32>
    %16 = vector.shape_cast %15 : vector<16xf32> to vector<16x1xf32>
    %cst_10 = arith.constant 3.200000e+01 : f32
    %17 = vector.broadcast %cst_10 : f32 to vector<16x1xf32>
    %18 = arith.divf %16, %17 : vector<16x1xf32>
    %cst_11 = arith.constant 9.99999974E-6 : f32
    %19 = vector.broadcast %cst_11 : f32 to vector<16x1xf32>
    %20 = arith.addf %18, %19 : vector<16x1xf32>
    %21 = math.rsqrt %20 : vector<16x1xf32>
    %22 = vector.broadcast %21 : vector<16x1xf32> to vector<16x32xf32>
    %23 = arith.mulf %13, %22 : vector<16x32xf32>
    %24 = vector.broadcast %5 : vector<1x32xf32> to vector<16x32xf32>
    %25 = arith.mulf %23, %24 : vector<16x32xf32>
    %26 = vector.broadcast %7 : vector<1x32xf32> to vector<16x32xf32>
    %27 = arith.addf %25, %26 : vector<16x32xf32>
    %28 = arith.truncf %27 : vector<16x32xf32> to vector<16x32xbf16>
    %c0_12 = arith.constant 0 : index
    %c0_13 = arith.constant 0 : index
    %c0_14 = arith.constant 0 : index
    %29 = vector.load %arg3[%c0_12, %c0_13, %c0_14] : memref<1x32x32xbf16, #tpu.memory_space<vmem>>, vector<1x32x32xbf16>
    %30 = vector.shape_cast %29 : vector<1x32x32xbf16> to vector<32x32xbf16>
    %cst_15 = arith.constant dense<0.000000e+00> : vector<16x32xf32>
    %31 = tpu.matmul %28, %30, %cst_15 {dimension_numbers = #tpu.dot_dimension_numbers<[1], [0], [0], [1], [0, 0, 1, 1], [], []>} : vector<16x32xbf16>, vector<32x32xbf16>, vector<16x32xf32> -> vector<16x32xf32>
    %c0_16 = arith.constant 0 : index
    %c0_17 = arith.constant 0 : index
    %c0_18 = arith.constant 0 : index
    %32 = vector.load %arg4[%c0_16, %c0_17, %c0_18] : memref<1x1x32xf32, #tpu.memory_space<vmem>>, vector<1x1x32xf32>
    %33 = vector.shape_cast %32 : vector<1x1x32xf32> to vector<1x32xf32>
    %34 = vector.broadcast %33 : vector<1x32xf32> to vector<16x32xf32>
    %35 = arith.addf %31, %34 : vector<16x32xf32>
    %36 = arith.addf %3, %35 : vector<16x32xf32>
    %c0_19 = arith.constant 0 : index
    %c0_20 = arith.constant 0 : index
    %37 = vector.load %arg8[%c0_19, %c0_20] : memref<16x32xf32, #tpu.memory_space<vmem>>, vector<16x32xf32>
    tpu.vector_store %arg8[%c0_19, %c0_20], %36 {strides = array<i32>} : memref<16x32xf32, #tpu.memory_space<vmem>>, vector<16x32xf32>,
    %c3_i32 = arith.constant 3 : i32
    %38 = arith.cmpi eq, %arg1, %c3_i32 : i32
    %39 = arith.extui %38 : i1 to i32
    %c0_i32_21 = arith.constant 0 : i32
    %40 = arith.cmpi ne, %39, %c0_i32_21 : i32
    scf.if %40 {
      %c0_22 = arith.constant 0 : index
      %c0_23 = arith.constant 0 : index
      %41 = vector.load %arg8[%c0_22, %c0_23] : memref<16x32xf32, #tpu.memory_space<vmem>>, vector<16x32xf32>
      %c0_24 = arith.constant 0 : index
      %c0_25 = arith.constant 0 : index
      %42 = vector.load %arg7[%c0_24, %c0_25] : memref<16x32xf32, #tpu.memory_space<vmem>>, vector<16x32xf32>
      tpu.vector_store %arg7[%c0_24, %c0_25], %41 {strides = array<i32>} : memref<16x32xf32, #tpu.memory_space<vmem>>, vector<16x32xf32>,
    } else {
    }
    return
  }
  func.func @transform_0(%arg0: i32, %arg1: i32) -> (i32, i32) {
    %c0_i32 = arith.constant 0 : i32
    %c0_i32_0 = arith.constant 0 : i32
    return %arg0, %c0_i32 : i32, i32
  }
  func.func @transform_1(%arg0: i32, %arg1: i32) -> (i32, i32, i32) {
    %c4_i32 = arith.constant 4 : i32
    %0 = arith.addi %arg1, %c4_i32 : i32
    %c0_i32 = arith.constant 0 : i32
    %c0_i32_0 = arith.constant 0 : i32
    %c0_i32_1 = arith.constant 0 : i32
    return %0, %c0_i32, %c0_i32_0 : i32, i32, i32
  }
  func.func @transform_2(%arg0: i32, %arg1: i32) -> (i32, i32, i32) {
    %c4_i32 = arith.constant 4 : i32
    %0 = arith.addi %arg1, %c4_i32 : i32
    %c0_i32 = arith.constant 0 : i32
    %c0_i32_0 = arith.constant 0 : i32
    %c0_i32_1 = arith.constant 0 : i32
    return %0, %c0_i32, %c0_i32_0 : i32, i32, i32
  }
  func.func @transform_3(%arg0: i32, %arg1: i32) -> (i32, i32, i32) {
    %c4_i32 = arith.constant 4 : i32
    %0 = arith.addi %arg1, %c4_i32 : i32
    %c0_i32 = arith.constant 0 : i32
    %c0_i32_0 = arith.constant 0 : i32
    %c0_i32_1 = arith.constant 0 : i32
    return %0, %c0_i32, %c0_i32_0 : i32, i32, i32
  }
  func.func @transform_4(%arg0: i32, %arg1: i32) -> (i32, i32, i32) {
    %c4_i32 = arith.constant 4 : i32
    %0 = arith.addi %arg1, %c4_i32 : i32
    %c0_i32 = arith.constant 0 : i32
    %c0_i32_0 = arith.constant 0 : i32
    %c0_i32_1 = arith.constant 0 : i32
    return %0, %c0_i32, %c0_i32_0 : i32, i32, i32
  }
  func.func @transform_5(%arg0: i32, %arg1: i32) -> (i32, i32) {
    %c0_i32 = arith.constant 0 : i32
    %c0_i32_0 = arith.constant 0 : i32
    return %arg0, %c0_i32 : i32, i32
  }
}

module attributes {stable_mosaic.version = 11 : i64} {
  func.func @kernel(%arg0: i32, %arg1: memref<16x32xf32, #tpu.memory_space<vmem>>, %arg2: memref<32x32xbf16, #tpu.memory_space<vmem>>, %arg3: memref<1x32xf32, #tpu.memory_space<vmem>>, %arg4: memref<16x32xf32, #tpu.memory_space<vmem>>, %arg5: memref<1x32xf32, #tpu.memory_space<vmem>>, %arg6: memref<1x32xf32, #tpu.memory_space<vmem>>, %arg7: memref<16x32xf32, #tpu.memory_space<vmem>>) attributes {dimension_semantics = [#tpu.dimension_semantics<parallel>], iteration_bounds = array<i64: 1>, scalar_prefetch = 0 : i64, scratch_operands = 0 : i64, tpu.core_type = #tpu.core_type<tc>, window_params = [{transform_indices = @transform_0, window_bounds = array<i64: 16, 32>}, {pipeline_mode = #tpu.pipeline_mode<synchronous>, transform_indices = @transform_1, window_bounds = array<i64: 32, 32>}, {pipeline_mode = #tpu.pipeline_mode<synchronous>, transform_indices = @transform_2, window_bounds = array<i64: 1, 32>}, {transform_indices = @transform_3, window_bounds = array<i64: 16, 32>}, {pipeline_mode = #tpu.pipeline_mode<synchronous>, transform_indices = @transform_4, window_bounds = array<i64: 1, 32>}, {pipeline_mode = #tpu.pipeline_mode<synchronous>, transform_indices = @transform_5, window_bounds = array<i64: 1, 32>}, {transform_indices = @transform_6, window_bounds = array<i64: 16, 32>}]} {
    %c0 = arith.constant 0 : index
    %c0_0 = arith.constant 0 : index
    %0 = vector.load %arg1[%c0, %c0_0] : memref<16x32xf32, #tpu.memory_space<vmem>>, vector<16x32xf32>
    %c0_1 = arith.constant 0 : index
    %c0_2 = arith.constant 0 : index
    %1 = vector.load %arg2[%c0_1, %c0_2] : memref<32x32xbf16, #tpu.memory_space<vmem>>, vector<32x32xbf16>
    %2 = arith.truncf %0 : vector<16x32xf32> to vector<16x32xbf16>
    %cst = arith.constant dense<0.000000e+00> : vector<16x32xf32>
    %3 = tpu.matmul %2, %1, %cst {dimension_numbers = #tpu.dot_dimension_numbers<[1], [0], [0], [1], [0, 0, 1, 1], [], []>} : vector<16x32xbf16>, vector<32x32xbf16>, vector<16x32xf32> -> vector<16x32xf32>
    %c0_3 = arith.constant 0 : index
    %c0_4 = arith.constant 0 : index
    %4 = vector.load %arg3[%c0_3, %c0_4] : memref<1x32xf32, #tpu.memory_space<vmem>>, vector<1x32xf32>
    %5 = vector.broadcast %4 : vector<1x32xf32> to vector<16x32xf32>
    %6 = arith.addf %3, %5 : vector<16x32xf32>
    %c0_5 = arith.constant 0 : index
    %c0_6 = arith.constant 0 : index
    %7 = vector.load %arg4[%c0_5, %c0_6] : memref<16x32xf32, #tpu.memory_space<vmem>>, vector<16x32xf32>
    %8 = arith.addf %6, %7 : vector<16x32xf32>
    %c0_7 = arith.constant 0 : index
    %c0_8 = arith.constant 0 : index
    %9 = vector.load %arg5[%c0_7, %c0_8] : memref<1x32xf32, #tpu.memory_space<vmem>>, vector<1x32xf32>
    %c0_9 = arith.constant 0 : index
    %c0_10 = arith.constant 0 : index
    %10 = vector.load %arg6[%c0_9, %c0_10] : memref<1x32xf32, #tpu.memory_space<vmem>>, vector<1x32xf32>
    %cst_11 = arith.constant dense<0.000000e+00> : vector<16xf32>
    %11 = vector.multi_reduction <add>, %8, %cst_11 [1] : vector<16x32xf32> to vector<16xf32>
    %12 = vector.shape_cast %11 : vector<16xf32> to vector<16x1xf32>
    %cst_12 = arith.constant 3.200000e+01 : f32
    %13 = vector.broadcast %cst_12 : f32 to vector<16x1xf32>
    %14 = arith.divf %12, %13 : vector<16x1xf32>
    %15 = vector.broadcast %14 : vector<16x1xf32> to vector<16x32xf32>
    %16 = arith.subf %8, %15 : vector<16x32xf32>
    %17 = arith.mulf %16, %16 : vector<16x32xf32>
    %cst_13 = arith.constant dense<0.000000e+00> : vector<16xf32>
    %18 = vector.multi_reduction <add>, %17, %cst_13 [1] : vector<16x32xf32> to vector<16xf32>
    %19 = vector.shape_cast %18 : vector<16xf32> to vector<16x1xf32>
    %cst_14 = arith.constant 3.200000e+01 : f32
    %20 = vector.broadcast %cst_14 : f32 to vector<16x1xf32>
    %21 = arith.divf %19, %20 : vector<16x1xf32>
    %cst_15 = arith.constant 9.99999974E-6 : f32
    %22 = vector.broadcast %cst_15 : f32 to vector<16x1xf32>
    %23 = arith.addf %21, %22 : vector<16x1xf32>
    %24 = math.rsqrt %23 : vector<16x1xf32>
    %25 = vector.broadcast %24 : vector<16x1xf32> to vector<16x32xf32>
    %26 = arith.mulf %16, %25 : vector<16x32xf32>
    %27 = vector.broadcast %9 : vector<1x32xf32> to vector<16x32xf32>
    %28 = arith.mulf %26, %27 : vector<16x32xf32>
    %29 = vector.broadcast %10 : vector<1x32xf32> to vector<16x32xf32>
    %30 = arith.addf %28, %29 : vector<16x32xf32>
    %c0_16 = arith.constant 0 : index
    %c0_17 = arith.constant 0 : index
    %31 = vector.load %arg7[%c0_16, %c0_17] : memref<16x32xf32, #tpu.memory_space<vmem>>, vector<16x32xf32>
    tpu.vector_store %arg7[%c0_16, %c0_17], %30 {strides = array<i32>} : memref<16x32xf32, #tpu.memory_space<vmem>>, vector<16x32xf32>,
    return
  }
  func.func @transform_0(%arg0: i32) -> (i32, i32) {
    %c0_i32 = arith.constant 0 : i32
    %c0_i32_0 = arith.constant 0 : i32
    return %arg0, %c0_i32 : i32, i32
  }
  func.func @transform_1(%arg0: i32) -> (i32, i32) {
    %c0_i32 = arith.constant 0 : i32
    %c0_i32_0 = arith.constant 0 : i32
    %c0_i32_1 = arith.constant 0 : i32
    return %c0_i32, %c0_i32_0 : i32, i32
  }
  func.func @transform_2(%arg0: i32) -> (i32, i32) {
    %c0_i32 = arith.constant 0 : i32
    %c0_i32_0 = arith.constant 0 : i32
    %c0_i32_1 = arith.constant 0 : i32
    return %c0_i32, %c0_i32_0 : i32, i32
  }
  func.func @transform_3(%arg0: i32) -> (i32, i32) {
    %c0_i32 = arith.constant 0 : i32
    %c0_i32_0 = arith.constant 0 : i32
    return %arg0, %c0_i32 : i32, i32
  }
  func.func @transform_4(%arg0: i32) -> (i32, i32) {
    %c0_i32 = arith.constant 0 : i32
    %c0_i32_0 = arith.constant 0 : i32
    %c0_i32_1 = arith.constant 0 : i32
    return %c0_i32, %c0_i32_0 : i32, i32
  }
  func.func @transform_5(%arg0: i32) -> (i32, i32) {
    %c0_i32 = arith.constant 0 : i32
    %c0_i32_0 = arith.constant 0 : i32
    %c0_i32_1 = arith.constant 0 : i32
    return %c0_i32, %c0_i32_0 : i32, i32
  }
  func.func @transform_6(%arg0: i32) -> (i32, i32) {
    %c0_i32 = arith.constant 0 : i32
    %c0_i32_0 = arith.constant 0 : i32
    return %arg0, %c0_i32 : i32, i32
  }
}

module attributes {stable_mosaic.version = 11 : i64} {
  func.func @kernel(%arg0: i32, %arg1: memref<8x32xf32, #tpu.memory_space<vmem>>, %arg2: memref<32x64xbf16, #tpu.memory_space<vmem>>, %arg3: memref<8x64xbf16, #tpu.memory_space<vmem>>) attributes {dimension_semantics = [#tpu.dimension_semantics<parallel>], iteration_bounds = array<i64: 1>, scalar_prefetch = 0 : i64, scratch_operands = 0 : i64, tpu.core_type = #tpu.core_type<tc>, window_params = [{transform_indices = @transform_0, window_bounds = array<i64: 8, 32>}, {pipeline_mode = #tpu.pipeline_mode<synchronous>, transform_indices = @transform_1, window_bounds = array<i64: 32, 64>}, {transform_indices = @transform_2, window_bounds = array<i64: 8, 64>}]} {
    %c0 = arith.constant 0 : index
    %c0_0 = arith.constant 0 : index
    %0 = vector.load %arg1[%c0, %c0_0] : memref<8x32xf32, #tpu.memory_space<vmem>>, vector<8x32xf32>
    %c0_1 = arith.constant 0 : index
    %c0_2 = arith.constant 0 : index
    %1 = vector.load %arg2[%c0_1, %c0_2] : memref<32x64xbf16, #tpu.memory_space<vmem>>, vector<32x64xbf16>
    %2 = arith.truncf %0 : vector<8x32xf32> to vector<8x32xbf16>
    %cst = arith.constant dense<0.000000e+00> : vector<8x64xf32>
    %3 = tpu.matmul %2, %1, %cst {dimension_numbers = #tpu.dot_dimension_numbers<[1], [0], [0], [1], [0, 0, 1, 1], [], []>} : vector<8x32xbf16>, vector<32x64xbf16>, vector<8x64xf32> -> vector<8x64xf32>
    %4 = arith.truncf %3 : vector<8x64xf32> to vector<8x64xbf16>
    %c0_3 = arith.constant 0 : index
    %c0_4 = arith.constant 0 : index
    %5 = vector.load %arg3[%c0_3, %c0_4] : memref<8x64xbf16, #tpu.memory_space<vmem>>, vector<8x64xbf16>
    tpu.vector_store %arg3[%c0_3, %c0_4], %4 {strides = array<i32>} : memref<8x64xbf16, #tpu.memory_space<vmem>>, vector<8x64xbf16>,
    return
  }
  func.func @transform_0(%arg0: i32) -> (i32, i32) {
    %c0_i32 = arith.constant 0 : i32
    %c0_i32_0 = arith.constant 0 : i32
    return %arg0, %c0_i32 : i32, i32
  }
  func.func @transform_1(%arg0: i32) -> (i32, i32) {
    %c0_i32 = arith.constant 0 : i32
    %c0_i32_0 = arith.constant 0 : i32
    %c0_i32_1 = arith.constant 0 : i32
    return %c0_i32, %c0_i32_0 : i32, i32
  }
  func.func @transform_2(%arg0: i32) -> (i32, i32) {
    %c0_i32 = arith.constant 0 : i32
    %c0_i32_0 = arith.constant 0 : i32
    return %arg0, %c0_i32 : i32, i32
  }
}

module attributes {stable_mosaic.version = 11 : i64} {
  func.func @kernel(%arg0: i32, %arg1: memref<1x4x32xf32, #tpu.memory_space<vmem>>, %arg2: memref<1x8x32xf32, #tpu.memory_space<vmem>>, %arg3: memref<1x32xf32, #tpu.memory_space<vmem>>, %arg4: memref<1x32xf32, #tpu.memory_space<vmem>>, %arg5: memref<32x96xbf16, #tpu.memory_space<vmem>>, %arg6: memref<1x96xf32, #tpu.memory_space<vmem>>, %arg7: memref<32x32xbf16, #tpu.memory_space<vmem>>, %arg8: memref<1x32xf32, #tpu.memory_space<vmem>>, %arg9: memref<1x4x32xf32, #tpu.memory_space<vmem>>, %arg10: memref<1x8x32xf32, #tpu.memory_space<vmem>>) attributes {dimension_semantics = [#tpu.dimension_semantics<parallel>], iteration_bounds = array<i64: 2>, scalar_prefetch = 0 : i64, scratch_operands = 0 : i64, tpu.core_type = #tpu.core_type<tc>, window_params = [{transform_indices = @transform_0, window_bounds = array<i64: 1, 4, 32>}, {transform_indices = @transform_1, window_bounds = array<i64: 1, 8, 32>}, {pipeline_mode = #tpu.pipeline_mode<synchronous>, transform_indices = @transform_2, window_bounds = array<i64: 1, 32>}, {pipeline_mode = #tpu.pipeline_mode<synchronous>, transform_indices = @transform_3, window_bounds = array<i64: 1, 32>}, {pipeline_mode = #tpu.pipeline_mode<synchronous>, transform_indices = @transform_4, window_bounds = array<i64: 32, 96>}, {pipeline_mode = #tpu.pipeline_mode<synchronous>, transform_indices = @transform_5, window_bounds = array<i64: 1, 96>}, {pipeline_mode = #tpu.pipeline_mode<synchronous>, transform_indices = @transform_6, window_bounds = array<i64: 32, 32>}, {pipeline_mode = #tpu.pipeline_mode<synchronous>, transform_indices = @transform_7, window_bounds = array<i64: 1, 32>}, {transform_indices = @transform_8, window_bounds = array<i64: 1, 4, 32>}, {transform_indices = @transform_9, window_bounds = array<i64: 1, 8, 32>}]} {
    %c0 = arith.constant 0 : index
    %c0_0 = arith.constant 0 : index
    %c0_1 = arith.constant 0 : index
    %0 = vector.load %arg1[%c0, %c0_0, %c0_1] : memref<1x4x32xf32, #tpu.memory_space<vmem>>, vector<1x4x32xf32>
    %1 = vector.shape_cast %0 : vector<1x4x32xf32> to vector<4x32xf32>
    %c0_2 = arith.constant 0 : index
    %c0_3 = arith.constant 0 : index
    %c0_4 = arith.constant 0 : index
    %2 = vector.load %arg2[%c0_2, %c0_3, %c0_4] : memref<1x8x32xf32, #tpu.memory_space<vmem>>, vector<1x8x32xf32>
    %3 = vector.shape_cast %2 : vector<1x8x32xf32> to vector<8x32xf32>
    %4 = tpu.concatenate %1, %3 in 0 : vector<4x32xf32>, vector<8x32xf32> -> vector<12x32xf32>
    %c0_5 = arith.constant 0 : index
    %c0_6 = arith.constant 0 : index
    %5 = vector.load %arg3[%c0_5, %c0_6] : memref<1x32xf32, #tpu.memory_space<vmem>>, vector<1x32xf32>
    %c0_7 = arith.constant 0 : index
    %c0_8 = arith.constant 0 : index
    %6 = vector.load %arg4[%c0_7, %c0_8] : memref<1x32xf32, #tpu.memory_space<vmem>>, vector<1x32xf32>
    %cst = arith.constant dense<0.000000e+00> : vector<12xf32>
    %7 = vector.multi_reduction <add>, %4, %cst [1] : vector<12x32xf32> to vector<12xf32>
    %8 = vector.shape_cast %7 : vector<12xf32> to vector<12x1xf32>
    %cst_9 = arith.constant 3.200000e+01 : f32
    %9 = vector.broadcast %cst_9 : f32 to vector<12x1xf32>
    %10 = arith.divf %8, %9 : vector<12x1xf32>
    %11 = vector.broadcast %10 : vector<12x1xf32> to vector<12x32xf32>
    %12 = arith.subf %4, %11 : vector<12x32xf32>
    %13 = arith.mulf %12, %12 : vector<12x32xf32>
    %cst_10 = arith.constant dense<0.000000e+00> : vector<12xf32>
    %14 = vector.multi_reduction <add>, %13, %cst_10 [1] : vector<12x32xf32> to vector<12xf32>
    %15 = vector.shape_cast %14 : vector<12xf32> to vector<12x1xf32>
    %cst_11 = arith.constant 3.200000e+01 : f32
    %16 = vector.broadcast %cst_11 : f32 to vector<12x1xf32>
    %17 = arith.divf %15, %16 : vector<12x1xf32>
    %cst_12 = arith.constant 9.99999974E-6 : f32
    %18 = vector.broadcast %cst_12 : f32 to vector<12x1xf32>
    %19 = arith.addf %17, %18 : vector<12x1xf32>
    %20 = math.rsqrt %19 : vector<12x1xf32>
    %21 = vector.broadcast %20 : vector<12x1xf32> to vector<12x32xf32>
    %22 = arith.mulf %12, %21 : vector<12x32xf32>
    %23 = vector.broadcast %5 : vector<1x32xf32> to vector<12x32xf32>
    %24 = arith.mulf %22, %23 : vector<12x32xf32>
    %25 = vector.broadcast %6 : vector<1x32xf32> to vector<12x32xf32>
    %26 = arith.addf %24, %25 : vector<12x32xf32>
    %27 = arith.truncf %26 : vector<12x32xf32> to vector<12x32xbf16>
    %c0_13 = arith.constant 0 : index
    %c0_14 = arith.constant 0 : index
    %28 = vector.load %arg5[%c0_13, %c0_14] : memref<32x96xbf16, #tpu.memory_space<vmem>>, vector<32x96xbf16>
    %cst_15 = arith.constant dense<0.000000e+00> : vector<12x96xf32>
    %29 = tpu.matmul %27, %28, %cst_15 {dimension_numbers = #tpu.dot_dimension_numbers<[1], [0], [0], [1], [0, 0, 1, 1], [], []>} : vector<12x32xbf16>, vector<32x96xbf16>, vector<12x96xf32> -> vector<12x96xf32>
    %c0_16 = arith.constant 0 : index
    %c0_17 = arith.constant 0 : index
    %30 = vector.load %arg6[%c0_16, %c0_17] : memref<1x96xf32, #tpu.memory_space<vmem>>, vector<1x96xf32>
    %31 = vector.broadcast %30 : vector<1x96xf32> to vector<12x96xf32>
    %32 = arith.addf %29, %31 : vector<12x96xf32>
    %33 = vector.extract_strided_slice %32 {offsets = [0, 0], sizes = [12, 4], strides = [1, 1]} : vector<12x96xf32> to vector<12x4xf32>
    %cst_18 = arith.constant 5.000000e-01 : f32
    %34 = vector.broadcast %cst_18 : f32 to vector<12x4xf32>
    %35 = arith.mulf %33, %34 : vector<12x4xf32>
    %36 = arith.truncf %35 : vector<12x4xf32> to vector<12x4xbf16>
    %37 = vector.extract_strided_slice %32 {offsets = [0, 32], sizes = [12, 4], strides = [1, 1]} : vector<12x96xf32> to vector<12x4xf32>
    %38 = arith.truncf %37 : vector<12x4xf32> to vector<12x4xbf16>
    %39 = vector.extract_strided_slice %32 {offsets = [0, 64], sizes = [12, 4], strides = [1, 1]} : vector<12x96xf32> to vector<12x4xf32>
    %40 = arith.truncf %39 : vector<12x4xf32> to vector<12x4xbf16>
    %cst_19 = arith.constant dense<0.000000e+00> : vector<12x12xf32>
    %41 = tpu.matmul %36, %38, %cst_19 {dimension_numbers = #tpu.dot_dimension_numbers<[1], [1], [0], [0], [0, 0, 1, 0], [], []>} : vector<12x4xbf16>, vector<12x4xbf16>, vector<12x12xf32> -> vector<12x12xf32>
    %cst_20 = arith.constant dense<0xFF800000> : vector<12xf32>
    %42 = vector.multi_reduction <maximumf>, %41, %cst_20 [1] : vector<12x12xf32> to vector<12xf32>
    %43 = vector.shape_cast %42 : vector<12xf32> to vector<12x1xf32>
    %44 = vector.broadcast %43 : vector<12x1xf32> to vector<12x12xf32>
    %45 = arith.subf %41, %44 : vector<12x12xf32>
    %46 = math.exp %45 : vector<12x12xf32>
    %cst_21 = arith.constant dense<0.000000e+00> : vector<12xf32>
    %47 = vector.multi_reduction <add>, %46, %cst_21 [1] : vector<12x12xf32> to vector<12xf32>
    %48 = vector.shape_cast %47 : vector<12xf32> to vector<12x1xf32>
    %49 = tpu.reciprocal %48 {approx = true} : vector<12x1xf32> -> vector<12x1xf32>
    %50 = vector.broadcast %49 : vector<12x1xf32> to vector<12x12xf32>
    %51 = arith.mulf %46, %50 : vector<12x12xf32>
    %52 = arith.truncf %51 : vector<12x12xf32> to vector<12x12xbf16>
    %cst_22 = arith.constant dense<0.000000e+00> : vector<12x4xf32>
    %53 = tpu.matmul %52, %40, %cst_22 {dimension_numbers = #tpu.dot_dimension_numbers<[1], [0], [0], [1], [0, 0, 1, 1], [], []>} : vector<12x12xbf16>, vector<12x4xbf16>, vector<12x4xf32> -> vector<12x4xf32>
    %54 = vector.extract_strided_slice %32 {offsets = [0, 4], sizes = [12, 4], strides = [1, 1]} : vector<12x96xf32> to vector<12x4xf32>
    %cst_23 = arith.constant 5.000000e-01 : f32
    %55 = vector.broadcast %cst_23 : f32 to vector<12x4xf32>
    %56 = arith.mulf %54, %55 : vector<12x4xf32>
    %57 = arith.truncf %56 : vector<12x4xf32> to vector<12x4xbf16>
    %58 = vector.extract_strided_slice %32 {offsets = [0, 36], sizes = [12, 4], strides = [1, 1]} : vector<12x96xf32> to vector<12x4xf32>
    %59 = arith.truncf %58 : vector<12x4xf32> to vector<12x4xbf16>
    %60 = vector.extract_strided_slice %32 {offsets = [0, 68], sizes = [12, 4], strides = [1, 1]} : vector<12x96xf32> to vector<12x4xf32>
    %61 = arith.truncf %60 : vector<12x4xf32> to vector<12x4xbf16>
    %cst_24 = arith.constant dense<0.000000e+00> : vector<12x12xf32>
    %62 = tpu.matmul %57, %59, %cst_24 {dimension_numbers = #tpu.dot_dimension_numbers<[1], [1], [0], [0], [0, 0, 1, 0], [], []>} : vector<12x4xbf16>, vector<12x4xbf16>, vector<12x12xf32> -> vector<12x12xf32>
    %cst_25 = arith.constant dense<0xFF800000> : vector<12xf32>
    %63 = vector.multi_reduction <maximumf>, %62, %cst_25 [1] : vector<12x12xf32> to vector<12xf32>
    %64 = vector.shape_cast %63 : vector<12xf32> to vector<12x1xf32>
    %65 = vector.broadcast %64 : vector<12x1xf32> to vector<12x12xf32>
    %66 = arith.subf %62, %65 : vector<12x12xf32>
    %67 = math.exp %66 : vector<12x12xf32>
    %cst_26 = arith.constant dense<0.000000e+00> : vector<12xf32>
    %68 = vector.multi_reduction <add>, %67, %cst_26 [1] : vector<12x12xf32> to vector<12xf32>
    %69 = vector.shape_cast %68 : vector<12xf32> to vector<12x1xf32>
    %70 = tpu.reciprocal %69 {approx = true} : vector<12x1xf32> -> vector<12x1xf32>
    %71 = vector.broadcast %70 : vector<12x1xf32> to vector<12x12xf32>
    %72 = arith.mulf %67, %71 : vector<12x12xf32>
    %73 = arith.truncf %72 : vector<12x12xf32> to vector<12x12xbf16>
    %cst_27 = arith.constant dense<0.000000e+00> : vector<12x4xf32>
    %74 = tpu.matmul %73, %61, %cst_27 {dimension_numbers = #tpu.dot_dimension_numbers<[1], [0], [0], [1], [0, 0, 1, 1], [], []>} : vector<12x12xbf16>, vector<12x4xbf16>, vector<12x4xf32> -> vector<12x4xf32>
    %75 = vector.extract_strided_slice %32 {offsets = [0, 8], sizes = [12, 4], strides = [1, 1]} : vector<12x96xf32> to vector<12x4xf32>
    %cst_28 = arith.constant 5.000000e-01 : f32
    %76 = vector.broadcast %cst_28 : f32 to vector<12x4xf32>
    %77 = arith.mulf %75, %76 : vector<12x4xf32>
    %78 = arith.truncf %77 : vector<12x4xf32> to vector<12x4xbf16>
    %79 = vector.extract_strided_slice %32 {offsets = [0, 40], sizes = [12, 4], strides = [1, 1]} : vector<12x96xf32> to vector<12x4xf32>
    %80 = arith.truncf %79 : vector<12x4xf32> to vector<12x4xbf16>
    %81 = vector.extract_strided_slice %32 {offsets = [0, 72], sizes = [12, 4], strides = [1, 1]} : vector<12x96xf32> to vector<12x4xf32>
    %82 = arith.truncf %81 : vector<12x4xf32> to vector<12x4xbf16>
    %cst_29 = arith.constant dense<0.000000e+00> : vector<12x12xf32>
    %83 = tpu.matmul %78, %80, %cst_29 {dimension_numbers = #tpu.dot_dimension_numbers<[1], [1], [0], [0], [0, 0, 1, 0], [], []>} : vector<12x4xbf16>, vector<12x4xbf16>, vector<12x12xf32> -> vector<12x12xf32>
    %cst_30 = arith.constant dense<0xFF800000> : vector<12xf32>
    %84 = vector.multi_reduction <maximumf>, %83, %cst_30 [1] : vector<12x12xf32> to vector<12xf32>
    %85 = vector.shape_cast %84 : vector<12xf32> to vector<12x1xf32>
    %86 = vector.broadcast %85 : vector<12x1xf32> to vector<12x12xf32>
    %87 = arith.subf %83, %86 : vector<12x12xf32>
    %88 = math.exp %87 : vector<12x12xf32>
    %cst_31 = arith.constant dense<0.000000e+00> : vector<12xf32>
    %89 = vector.multi_reduction <add>, %88, %cst_31 [1] : vector<12x12xf32> to vector<12xf32>
    %90 = vector.shape_cast %89 : vector<12xf32> to vector<12x1xf32>
    %91 = tpu.reciprocal %90 {approx = true} : vector<12x1xf32> -> vector<12x1xf32>
    %92 = vector.broadcast %91 : vector<12x1xf32> to vector<12x12xf32>
    %93 = arith.mulf %88, %92 : vector<12x12xf32>
    %94 = arith.truncf %93 : vector<12x12xf32> to vector<12x12xbf16>
    %cst_32 = arith.constant dense<0.000000e+00> : vector<12x4xf32>
    %95 = tpu.matmul %94, %82, %cst_32 {dimension_numbers = #tpu.dot_dimension_numbers<[1], [0], [0], [1], [0, 0, 1, 1], [], []>} : vector<12x12xbf16>, vector<12x4xbf16>, vector<12x4xf32> -> vector<12x4xf32>
    %96 = vector.extract_strided_slice %32 {offsets = [0, 12], sizes = [12, 4], strides = [1, 1]} : vector<12x96xf32> to vector<12x4xf32>
    %cst_33 = arith.constant 5.000000e-01 : f32
    %97 = vector.broadcast %cst_33 : f32 to vector<12x4xf32>
    %98 = arith.mulf %96, %97 : vector<12x4xf32>
    %99 = arith.truncf %98 : vector<12x4xf32> to vector<12x4xbf16>
    %100 = vector.extract_strided_slice %32 {offsets = [0, 44], sizes = [12, 4], strides = [1, 1]} : vector<12x96xf32> to vector<12x4xf32>
    %101 = arith.truncf %100 : vector<12x4xf32> to vector<12x4xbf16>
    %102 = vector.extract_strided_slice %32 {offsets = [0, 76], sizes = [12, 4], strides = [1, 1]} : vector<12x96xf32> to vector<12x4xf32>
    %103 = arith.truncf %102 : vector<12x4xf32> to vector<12x4xbf16>
    %cst_34 = arith.constant dense<0.000000e+00> : vector<12x12xf32>
    %104 = tpu.matmul %99, %101, %cst_34 {dimension_numbers = #tpu.dot_dimension_numbers<[1], [1], [0], [0], [0, 0, 1, 0], [], []>} : vector<12x4xbf16>, vector<12x4xbf16>, vector<12x12xf32> -> vector<12x12xf32>
    %cst_35 = arith.constant dense<0xFF800000> : vector<12xf32>
    %105 = vector.multi_reduction <maximumf>, %104, %cst_35 [1] : vector<12x12xf32> to vector<12xf32>
    %106 = vector.shape_cast %105 : vector<12xf32> to vector<12x1xf32>
    %107 = vector.broadcast %106 : vector<12x1xf32> to vector<12x12xf32>
    %108 = arith.subf %104, %107 : vector<12x12xf32>
    %109 = math.exp %108 : vector<12x12xf32>
    %cst_36 = arith.constant dense<0.000000e+00> : vector<12xf32>
    %110 = vector.multi_reduction <add>, %109, %cst_36 [1] : vector<12x12xf32> to vector<12xf32>
    %111 = vector.shape_cast %110 : vector<12xf32> to vector<12x1xf32>
    %112 = tpu.reciprocal %111 {approx = true} : vector<12x1xf32> -> vector<12x1xf32>
    %113 = vector.broadcast %112 : vector<12x1xf32> to vector<12x12xf32>
    %114 = arith.mulf %109, %113 : vector<12x12xf32>
    %115 = arith.truncf %114 : vector<12x12xf32> to vector<12x12xbf16>
    %cst_37 = arith.constant dense<0.000000e+00> : vector<12x4xf32>
    %116 = tpu.matmul %115, %103, %cst_37 {dimension_numbers = #tpu.dot_dimension_numbers<[1], [0], [0], [1], [0, 0, 1, 1], [], []>} : vector<12x12xbf16>, vector<12x4xbf16>, vector<12x4xf32> -> vector<12x4xf32>
    %117 = vector.extract_strided_slice %32 {offsets = [0, 16], sizes = [12, 4], strides = [1, 1]} : vector<12x96xf32> to vector<12x4xf32>
    %cst_38 = arith.constant 5.000000e-01 : f32
    %118 = vector.broadcast %cst_38 : f32 to vector<12x4xf32>
    %119 = arith.mulf %117, %118 : vector<12x4xf32>
    %120 = arith.truncf %119 : vector<12x4xf32> to vector<12x4xbf16>
    %121 = vector.extract_strided_slice %32 {offsets = [0, 48], sizes = [12, 4], strides = [1, 1]} : vector<12x96xf32> to vector<12x4xf32>
    %122 = arith.truncf %121 : vector<12x4xf32> to vector<12x4xbf16>
    %123 = vector.extract_strided_slice %32 {offsets = [0, 80], sizes = [12, 4], strides = [1, 1]} : vector<12x96xf32> to vector<12x4xf32>
    %124 = arith.truncf %123 : vector<12x4xf32> to vector<12x4xbf16>
    %cst_39 = arith.constant dense<0.000000e+00> : vector<12x12xf32>
    %125 = tpu.matmul %120, %122, %cst_39 {dimension_numbers = #tpu.dot_dimension_numbers<[1], [1], [0], [0], [0, 0, 1, 0], [], []>} : vector<12x4xbf16>, vector<12x4xbf16>, vector<12x12xf32> -> vector<12x12xf32>
    %cst_40 = arith.constant dense<0xFF800000> : vector<12xf32>
    %126 = vector.multi_reduction <maximumf>, %125, %cst_40 [1] : vector<12x12xf32> to vector<12xf32>
    %127 = vector.shape_cast %126 : vector<12xf32> to vector<12x1xf32>
    %128 = vector.broadcast %127 : vector<12x1xf32> to vector<12x12xf32>
    %129 = arith.subf %125, %128 : vector<12x12xf32>
    %130 = math.exp %129 : vector<12x12xf32>
    %cst_41 = arith.constant dense<0.000000e+00> : vector<12xf32>
    %131 = vector.multi_reduction <add>, %130, %cst_41 [1] : vector<12x12xf32> to vector<12xf32>
    %132 = vector.shape_cast %131 : vector<12xf32> to vector<12x1xf32>
    %133 = tpu.reciprocal %132 {approx = true} : vector<12x1xf32> -> vector<12x1xf32>
    %134 = vector.broadcast %133 : vector<12x1xf32> to vector<12x12xf32>
    %135 = arith.mulf %130, %134 : vector<12x12xf32>
    %136 = arith.truncf %135 : vector<12x12xf32> to vector<12x12xbf16>
    %cst_42 = arith.constant dense<0.000000e+00> : vector<12x4xf32>
    %137 = tpu.matmul %136, %124, %cst_42 {dimension_numbers = #tpu.dot_dimension_numbers<[1], [0], [0], [1], [0, 0, 1, 1], [], []>} : vector<12x12xbf16>, vector<12x4xbf16>, vector<12x4xf32> -> vector<12x4xf32>
    %138 = vector.extract_strided_slice %32 {offsets = [0, 20], sizes = [12, 4], strides = [1, 1]} : vector<12x96xf32> to vector<12x4xf32>
    %cst_43 = arith.constant 5.000000e-01 : f32
    %139 = vector.broadcast %cst_43 : f32 to vector<12x4xf32>
    %140 = arith.mulf %138, %139 : vector<12x4xf32>
    %141 = arith.truncf %140 : vector<12x4xf32> to vector<12x4xbf16>
    %142 = vector.extract_strided_slice %32 {offsets = [0, 52], sizes = [12, 4], strides = [1, 1]} : vector<12x96xf32> to vector<12x4xf32>
    %143 = arith.truncf %142 : vector<12x4xf32> to vector<12x4xbf16>
    %144 = vector.extract_strided_slice %32 {offsets = [0, 84], sizes = [12, 4], strides = [1, 1]} : vector<12x96xf32> to vector<12x4xf32>
    %145 = arith.truncf %144 : vector<12x4xf32> to vector<12x4xbf16>
    %cst_44 = arith.constant dense<0.000000e+00> : vector<12x12xf32>
    %146 = tpu.matmul %141, %143, %cst_44 {dimension_numbers = #tpu.dot_dimension_numbers<[1], [1], [0], [0], [0, 0, 1, 0], [], []>} : vector<12x4xbf16>, vector<12x4xbf16>, vector<12x12xf32> -> vector<12x12xf32>
    %cst_45 = arith.constant dense<0xFF800000> : vector<12xf32>
    %147 = vector.multi_reduction <maximumf>, %146, %cst_45 [1] : vector<12x12xf32> to vector<12xf32>
    %148 = vector.shape_cast %147 : vector<12xf32> to vector<12x1xf32>
    %149 = vector.broadcast %148 : vector<12x1xf32> to vector<12x12xf32>
    %150 = arith.subf %146, %149 : vector<12x12xf32>
    %151 = math.exp %150 : vector<12x12xf32>
    %cst_46 = arith.constant dense<0.000000e+00> : vector<12xf32>
    %152 = vector.multi_reduction <add>, %151, %cst_46 [1] : vector<12x12xf32> to vector<12xf32>
    %153 = vector.shape_cast %152 : vector<12xf32> to vector<12x1xf32>
    %154 = tpu.reciprocal %153 {approx = true} : vector<12x1xf32> -> vector<12x1xf32>
    %155 = vector.broadcast %154 : vector<12x1xf32> to vector<12x12xf32>
    %156 = arith.mulf %151, %155 : vector<12x12xf32>
    %157 = arith.truncf %156 : vector<12x12xf32> to vector<12x12xbf16>
    %cst_47 = arith.constant dense<0.000000e+00> : vector<12x4xf32>
    %158 = tpu.matmul %157, %145, %cst_47 {dimension_numbers = #tpu.dot_dimension_numbers<[1], [0], [0], [1], [0, 0, 1, 1], [], []>} : vector<12x12xbf16>, vector<12x4xbf16>, vector<12x4xf32> -> vector<12x4xf32>
    %159 = vector.extract_strided_slice %32 {offsets = [0, 24], sizes = [12, 4], strides = [1, 1]} : vector<12x96xf32> to vector<12x4xf32>
    %cst_48 = arith.constant 5.000000e-01 : f32
    %160 = vector.broadcast %cst_48 : f32 to vector<12x4xf32>
    %161 = arith.mulf %159, %160 : vector<12x4xf32>
    %162 = arith.truncf %161 : vector<12x4xf32> to vector<12x4xbf16>
    %163 = vector.extract_strided_slice %32 {offsets = [0, 56], sizes = [12, 4], strides = [1, 1]} : vector<12x96xf32> to vector<12x4xf32>
    %164 = arith.truncf %163 : vector<12x4xf32> to vector<12x4xbf16>
    %165 = vector.extract_strided_slice %32 {offsets = [0, 88], sizes = [12, 4], strides = [1, 1]} : vector<12x96xf32> to vector<12x4xf32>
    %166 = arith.truncf %165 : vector<12x4xf32> to vector<12x4xbf16>
    %cst_49 = arith.constant dense<0.000000e+00> : vector<12x12xf32>
    %167 = tpu.matmul %162, %164, %cst_49 {dimension_numbers = #tpu.dot_dimension_numbers<[1], [1], [0], [0], [0, 0, 1, 0], [], []>} : vector<12x4xbf16>, vector<12x4xbf16>, vector<12x12xf32> -> vector<12x12xf32>
    %cst_50 = arith.constant dense<0xFF800000> : vector<12xf32>
    %168 = vector.multi_reduction <maximumf>, %167, %cst_50 [1] : vector<12x12xf32> to vector<12xf32>
    %169 = vector.shape_cast %168 : vector<12xf32> to vector<12x1xf32>
    %170 = vector.broadcast %169 : vector<12x1xf32> to vector<12x12xf32>
    %171 = arith.subf %167, %170 : vector<12x12xf32>
    %172 = math.exp %171 : vector<12x12xf32>
    %cst_51 = arith.constant dense<0.000000e+00> : vector<12xf32>
    %173 = vector.multi_reduction <add>, %172, %cst_51 [1] : vector<12x12xf32> to vector<12xf32>
    %174 = vector.shape_cast %173 : vector<12xf32> to vector<12x1xf32>
    %175 = tpu.reciprocal %174 {approx = true} : vector<12x1xf32> -> vector<12x1xf32>
    %176 = vector.broadcast %175 : vector<12x1xf32> to vector<12x12xf32>
    %177 = arith.mulf %172, %176 : vector<12x12xf32>
    %178 = arith.truncf %177 : vector<12x12xf32> to vector<12x12xbf16>
    %cst_52 = arith.constant dense<0.000000e+00> : vector<12x4xf32>
    %179 = tpu.matmul %178, %166, %cst_52 {dimension_numbers = #tpu.dot_dimension_numbers<[1], [0], [0], [1], [0, 0, 1, 1], [], []>} : vector<12x12xbf16>, vector<12x4xbf16>, vector<12x4xf32> -> vector<12x4xf32>
    %180 = vector.extract_strided_slice %32 {offsets = [0, 28], sizes = [12, 4], strides = [1, 1]} : vector<12x96xf32> to vector<12x4xf32>
    %cst_53 = arith.constant 5.000000e-01 : f32
    %181 = vector.broadcast %cst_53 : f32 to vector<12x4xf32>
    %182 = arith.mulf %180, %181 : vector<12x4xf32>
    %183 = arith.truncf %182 : vector<12x4xf32> to vector<12x4xbf16>
    %184 = vector.extract_strided_slice %32 {offsets = [0, 60], sizes = [12, 4], strides = [1, 1]} : vector<12x96xf32> to vector<12x4xf32>
    %185 = arith.truncf %184 : vector<12x4xf32> to vector<12x4xbf16>
    %186 = vector.extract_strided_slice %32 {offsets = [0, 92], sizes = [12, 4], strides = [1, 1]} : vector<12x96xf32> to vector<12x4xf32>
    %187 = arith.truncf %186 : vector<12x4xf32> to vector<12x4xbf16>
    %cst_54 = arith.constant dense<0.000000e+00> : vector<12x12xf32>
    %188 = tpu.matmul %183, %185, %cst_54 {dimension_numbers = #tpu.dot_dimension_numbers<[1], [1], [0], [0], [0, 0, 1, 0], [], []>} : vector<12x4xbf16>, vector<12x4xbf16>, vector<12x12xf32> -> vector<12x12xf32>
    %cst_55 = arith.constant dense<0xFF800000> : vector<12xf32>
    %189 = vector.multi_reduction <maximumf>, %188, %cst_55 [1] : vector<12x12xf32> to vector<12xf32>
    %190 = vector.shape_cast %189 : vector<12xf32> to vector<12x1xf32>
    %191 = vector.broadcast %190 : vector<12x1xf32> to vector<12x12xf32>
    %192 = arith.subf %188, %191 : vector<12x12xf32>
    %193 = math.exp %192 : vector<12x12xf32>
    %cst_56 = arith.constant dense<0.000000e+00> : vector<12xf32>
    %194 = vector.multi_reduction <add>, %193, %cst_56 [1] : vector<12x12xf32> to vector<12xf32>
    %195 = vector.shape_cast %194 : vector<12xf32> to vector<12x1xf32>
    %196 = tpu.reciprocal %195 {approx = true} : vector<12x1xf32> -> vector<12x1xf32>
    %197 = vector.broadcast %196 : vector<12x1xf32> to vector<12x12xf32>
    %198 = arith.mulf %193, %197 : vector<12x12xf32>
    %199 = arith.truncf %198 : vector<12x12xf32> to vector<12x12xbf16>
    %cst_57 = arith.constant dense<0.000000e+00> : vector<12x4xf32>
    %200 = tpu.matmul %199, %187, %cst_57 {dimension_numbers = #tpu.dot_dimension_numbers<[1], [0], [0], [1], [0, 0, 1, 1], [], []>} : vector<12x12xbf16>, vector<12x4xbf16>, vector<12x4xf32> -> vector<12x4xf32>
    %201 = tpu.concatenate %53, %74, %95, %116, %137, %158, %179, %200 in 1 : vector<12x4xf32>, vector<12x4xf32>, vector<12x4xf32>, vector<12x4xf32>, vector<12x4xf32>, vector<12x4xf32>, vector<12x4xf32>, vector<12x4xf32> -> vector<12x32xf32>
    %202 = arith.truncf %201 : vector<12x32xf32> to vector<12x32xbf16>
    %c0_58 = arith.constant 0 : index
    %c0_59 = arith.constant 0 : index
    %203 = vector.load %arg7[%c0_58, %c0_59] : memref<32x32xbf16, #tpu.memory_space<vmem>>, vector<32x32xbf16>
    %cst_60 = arith.constant dense<0.000000e+00> : vector<12x32xf32>
    %204 = tpu.matmul %202, %203, %cst_60 {dimension_numbers = #tpu.dot_dimension_numbers<[1], [0], [0], [1], [0, 0, 1, 1], [], []>} : vector<12x32xbf16>, vector<32x32xbf16>, vector<12x32xf32> -> vector<12x32xf32>
    %c0_61 = arith.constant 0 : index
    %c0_62 = arith.constant 0 : index
    %205 = vector.load %arg8[%c0_61, %c0_62] : memref<1x32xf32, #tpu.memory_space<vmem>>, vector<1x32xf32>
    %206 = vector.broadcast %205 : vector<1x32xf32> to vector<12x32xf32>
    %207 = arith.addf %204, %206 : vector<12x32xf32>
    %208 = arith.addf %207, %4 : vector<12x32xf32>
    %209 = vector.extract_strided_slice %208 {offsets = [0, 0], sizes = [4, 32], strides = [1, 1]} : vector<12x32xf32> to vector<4x32xf32>
    %c0_63 = arith.constant 0 : index
    %c0_64 = arith.constant 0 : index
    %c0_65 = arith.constant 0 : index
    %210 = vector.load %arg9[%c0_63, %c0_64, %c0_65] : memref<1x4x32xf32, #tpu.memory_space<vmem>>, vector<1x4x32xf32>
    %211 = vector.shape_cast %210 : vector<1x4x32xf32> to vector<4x32xf32>
    %212 = vector.shape_cast %209 : vector<4x32xf32> to vector<1x4x32xf32>
    tpu.vector_store %arg9[%c0_63, %c0_64, %c0_65], %212 {strides = array<i32>} : memref<1x4x32xf32, #tpu.memory_space<vmem>>, vector<1x4x32xf32>,
    %213 = vector.extract_strided_slice %208 {offsets = [4, 0], sizes = [8, 32], strides = [1, 1]} : vector<12x32xf32> to vector<8x32xf32>
    %c0_66 = arith.constant 0 : index
    %c0_67 = arith.constant 0 : index
    %c0_68 = arith.constant 0 : index
    %214 = vector.load %arg10[%c0_66, %c0_67, %c0_68] : memref<1x8x32xf32, #tpu.memory_space<vmem>>, vector<1x8x32xf32>
    %215 = vector.shape_cast %214 : vector<1x8x32xf32> to vector<8x32xf32>
    %216 = vector.shape_cast %213 : vector<8x32xf32> to vector<1x8x32xf32>
    tpu.vector_store %arg10[%c0_66, %c0_67, %c0_68], %216 {strides = array<i32>} : memref<1x8x32xf32, #tpu.memory_space<vmem>>, vector<1x8x32xf32>,
    return
  }
  func.func @transform_0(%arg0: i32) -> (i32, i32, i32) {
    %c0_i32 = arith.constant 0 : i32
    %c0_i32_0 = arith.constant 0 : i32
    %c0_i32_1 = arith.constant 0 : i32
    return %arg0, %c0_i32, %c0_i32_0 : i32, i32, i32
  }
  func.func @transform_1(%arg0: i32) -> (i32, i32, i32) {
    %c0_i32 = arith.constant 0 : i32
    %c0_i32_0 = arith.constant 0 : i32
    %c0_i32_1 = arith.constant 0 : i32
    return %arg0, %c0_i32, %c0_i32_0 : i32, i32, i32
  }
  func.func @transform_2(%arg0: i32) -> (i32, i32) {
    %c0_i32 = arith.constant 0 : i32
    %c0_i32_0 = arith.constant 0 : i32
    %c0_i32_1 = arith.constant 0 : i32
    return %c0_i32, %c0_i32_0 : i32, i32
  }
  func.func @transform_3(%arg0: i32) -> (i32, i32) {
    %c0_i32 = arith.constant 0 : i32
    %c0_i32_0 = arith.constant 0 : i32
    %c0_i32_1 = arith.constant 0 : i32
    return %c0_i32, %c0_i32_0 : i32, i32
  }
  func.func @transform_4(%arg0: i32) -> (i32, i32) {
    %c0_i32 = arith.constant 0 : i32
    %c0_i32_0 = arith.constant 0 : i32
    %c0_i32_1 = arith.constant 0 : i32
    return %c0_i32, %c0_i32_0 : i32, i32
  }
  func.func @transform_5(%arg0: i32) -> (i32, i32) {
    %c0_i32 = arith.constant 0 : i32
    %c0_i32_0 = arith.constant 0 : i32
    %c0_i32_1 = arith.constant 0 : i32
    return %c0_i32, %c0_i32_0 : i32, i32
  }
  func.func @transform_6(%arg0: i32) -> (i32, i32) {
    %c0_i32 = arith.constant 0 : i32
    %c0_i32_0 = arith.constant 0 : i32
    %c0_i32_1 = arith.constant 0 : i32
    return %c0_i32, %c0_i32_0 : i32, i32
  }
  func.func @transform_7(%arg0: i32) -> (i32, i32) {
    %c0_i32 = arith.constant 0 : i32
    %c0_i32_0 = arith.constant 0 : i32
    %c0_i32_1 = arith.constant 0 : i32
    return %c0_i32, %c0_i32_0 : i32, i32
  }
  func.func @transform_8(%arg0: i32) -> (i32, i32, i32) {
    %c0_i32 = arith.constant 0 : i32
    %c0_i32_0 = arith.constant 0 : i32
    %c0_i32_1 = arith.constant 0 : i32
    return %arg0, %c0_i32, %c0_i32_0 : i32, i32, i32
  }
  func.func @transform_9(%arg0: i32) -> (i32, i32, i32) {
    %c0_i32 = arith.constant 0 : i32
    %c0_i32_0 = arith.constant 0 : i32
    %c0_i32_1 = arith.constant 0 : i32
    return %arg0, %c0_i32, %c0_i32_0 : i32, i32, i32
  }
}

module attributes {stable_mosaic.version = 11 : i64} {
  func.func @kernel(%arg0: i32, %arg1: memref<8x256xbf16, #tpu.memory_space<vmem>>, %arg2: memref<256x128xbf16, #tpu.memory_space<vmem>>, %arg3: memref<8x128xbf16, #tpu.memory_space<vmem>>) attributes {dimension_semantics = [#tpu.dimension_semantics<parallel>], iteration_bounds = array<i64: 1>, scalar_prefetch = 0 : i64, scratch_operands = 0 : i64, tpu.core_type = #tpu.core_type<tc>, window_params = [{transform_indices = @transform_0, window_bounds = array<i64: 8, 256>}, {pipeline_mode = #tpu.pipeline_mode<synchronous>, transform_indices = @transform_1, window_bounds = array<i64: 256, 128>}, {transform_indices = @transform_2, window_bounds = array<i64: 8, 128>}]} {
    %c0 = arith.constant 0 : index
    %c0_0 = arith.constant 0 : index
    %0 = vector.load %arg1[%c0, %c0_0] : memref<8x256xbf16, #tpu.memory_space<vmem>>, vector<8x256xbf16>
    %1 = arith.extf %0 : vector<8x256xbf16> to vector<8x256xf32>
    %c0_1 = arith.constant 0 : index
    %c0_2 = arith.constant 0 : index
    %2 = vector.load %arg2[%c0_1, %c0_2] : memref<256x128xbf16, #tpu.memory_space<vmem>>, vector<256x128xbf16>
    %3 = arith.truncf %1 : vector<8x256xf32> to vector<8x256xbf16>
    %cst = arith.constant dense<0.000000e+00> : vector<8x128xf32>
    %4 = tpu.matmul %3, %2, %cst {dimension_numbers = #tpu.dot_dimension_numbers<[1], [0], [0], [1], [0, 0, 1, 1], [], []>} : vector<8x256xbf16>, vector<256x128xbf16>, vector<8x128xf32> -> vector<8x128xf32>
    %cst_3 = arith.constant 0.000000e+00 : f32
    %5 = vector.broadcast %cst_3 : f32 to vector<8x128xf32>
    %6 = arith.maximumf %4, %5 : vector<8x128xf32>
    %7 = arith.truncf %6 : vector<8x128xf32> to vector<8x128xbf16>
    %c0_4 = arith.constant 0 : index
    %c0_5 = arith.constant 0 : index
    %8 = vector.load %arg3[%c0_4, %c0_5] : memref<8x128xbf16, #tpu.memory_space<vmem>>, vector<8x128xbf16>
    tpu.vector_store %arg3[%c0_4, %c0_5], %7 {strides = array<i32>} : memref<8x128xbf16, #tpu.memory_space<vmem>>, vector<8x128xbf16>,
    return
  }
  func.func @transform_0(%arg0: i32) -> (i32, i32) {
    %c0_i32 = arith.constant 0 : i32
    %c0_i32_0 = arith.constant 0 : i32
    return %arg0, %c0_i32 : i32, i32
  }
  func.func @transform_1(%arg0: i32) -> (i32, i32) {
    %c0_i32 = arith.constant 0 : i32
    %c0_i32_0 = arith.constant 0 : i32
    %c0_i32_1 = arith.constant 0 : i32
    return %c0_i32, %c0_i32_0 : i32, i32
  }
  func.func @transform_2(%arg0: i32) -> (i32, i32) {
    %c0_i32 = arith.constant 0 : i32
    %c0_i32_0 = arith.constant 0 : i32
    return %arg0, %c0_i32 : i32, i32
  }
}

module attributes {stable_mosaic.version = 11 : i64} {
  func.func @kernel(%arg0: i32, %arg1: memref<8x128xbf16, #tpu.memory_space<vmem>>, %arg2: memref<128x128xbf16, #tpu.memory_space<vmem>>, %arg3: memref<8x128xbf16, #tpu.memory_space<vmem>>) attributes {dimension_semantics = [#tpu.dimension_semantics<parallel>], iteration_bounds = array<i64: 1>, scalar_prefetch = 0 : i64, scratch_operands = 0 : i64, tpu.core_type = #tpu.core_type<tc>, window_params = [{transform_indices = @transform_0, window_bounds = array<i64: 8, 128>}, {pipeline_mode = #tpu.pipeline_mode<synchronous>, transform_indices = @transform_1, window_bounds = array<i64: 128, 128>}, {transform_indices = @transform_2, window_bounds = array<i64: 8, 128>}]} {
    %c0 = arith.constant 0 : index
    %c0_0 = arith.constant 0 : index
    %0 = vector.load %arg1[%c0, %c0_0] : memref<8x128xbf16, #tpu.memory_space<vmem>>, vector<8x128xbf16>
    %1 = arith.extf %0 : vector<8x128xbf16> to vector<8x128xf32>
    %c0_1 = arith.constant 0 : index
    %c0_2 = arith.constant 0 : index
    %2 = vector.load %arg2[%c0_1, %c0_2] : memref<128x128xbf16, #tpu.memory_space<vmem>>, vector<128x128xbf16>
    %3 = arith.truncf %1 : vector<8x128xf32> to vector<8x128xbf16>
    %cst = arith.constant dense<0.000000e+00> : vector<8x128xf32>
    %4 = tpu.matmul %3, %2, %cst {dimension_numbers = #tpu.dot_dimension_numbers<[1], [0], [0], [1], [0, 0, 1, 1], [], []>} : vector<8x128xbf16>, vector<128x128xbf16>, vector<8x128xf32> -> vector<8x128xf32>
    %5 = arith.truncf %4 : vector<8x128xf32> to vector<8x128xbf16>
    %c0_3 = arith.constant 0 : index
    %c0_4 = arith.constant 0 : index
    %6 = vector.load %arg3[%c0_3, %c0_4] : memref<8x128xbf16, #tpu.memory_space<vmem>>, vector<8x128xbf16>
    tpu.vector_store %arg3[%c0_3, %c0_4], %5 {strides = array<i32>} : memref<8x128xbf16, #tpu.memory_space<vmem>>, vector<8x128xbf16>,
    return
  }
  func.func @transform_0(%arg0: i32) -> (i32, i32) {
    %c0_i32 = arith.constant 0 : i32
    %c0_i32_0 = arith.constant 0 : i32
    return %arg0, %c0_i32 : i32, i32
  }
  func.func @transform_1(%arg0: i32) -> (i32, i32) {
    %c0_i32 = arith.constant 0 : i32
    %c0_i32_0 = arith.constant 0 : i32
    %c0_i32_1 = arith.constant 0 : i32
    return %c0_i32, %c0_i32_0 : i32, i32
  }
  func.func @transform_2(%arg0: i32) -> (i32, i32) {
    %c0_i32 = arith.constant 0 : i32
    %c0_i32_0 = arith.constant 0 : i32
    return %arg0, %c0_i32 : i32, i32
  }
}

module attributes {stable_mosaic.version = 11 : i64} {
  func.func @kernel(%arg0: i32, %arg1: memref<16x32xf32, #tpu.memory_space<vmem>>, %arg2: memref<32x32xbf16, #tpu.memory_space<vmem>>, %arg3: memref<1x32xf32, #tpu.memory_space<vmem>>, %arg4: memref<16x32xf32, #tpu.memory_space<vmem>>, %arg5: memref<16x32xf32, #tpu.memory_space<vmem>>) attributes {dimension_semantics = [#tpu.dimension_semantics<parallel>], iteration_bounds = array<i64: 1>, scalar_prefetch = 0 : i64, scratch_operands = 0 : i64, tpu.core_type = #tpu.core_type<tc>, window_params = [{transform_indices = @transform_0, window_bounds = array<i64: 16, 32>}, {pipeline_mode = #tpu.pipeline_mode<synchronous>, transform_indices = @transform_1, window_bounds = array<i64: 32, 32>}, {pipeline_mode = #tpu.pipeline_mode<synchronous>, transform_indices = @transform_2, window_bounds = array<i64: 1, 32>}, {transform_indices = @transform_3, window_bounds = array<i64: 16, 32>}, {transform_indices = @transform_4, window_bounds = array<i64: 16, 32>}]} {
    %c0 = arith.constant 0 : index
    %c0_0 = arith.constant 0 : index
    %0 = vector.load %arg1[%c0, %c0_0] : memref<16x32xf32, #tpu.memory_space<vmem>>, vector<16x32xf32>
    %c0_1 = arith.constant 0 : index
    %c0_2 = arith.constant 0 : index
    %1 = vector.load %arg2[%c0_1, %c0_2] : memref<32x32xbf16, #tpu.memory_space<vmem>>, vector<32x32xbf16>
    %2 = arith.truncf %0 : vector<16x32xf32> to vector<16x32xbf16>
    %cst = arith.constant dense<0.000000e+00> : vector<16x32xf32>
    %3 = tpu.matmul %2, %1, %cst {dimension_numbers = #tpu.dot_dimension_numbers<[1], [0], [0], [1], [0, 0, 1, 1], [], []>} : vector<16x32xbf16>, vector<32x32xbf16>, vector<16x32xf32> -> vector<16x32xf32>
    %c0_3 = arith.constant 0 : index
    %c0_4 = arith.constant 0 : index
    %4 = vector.load %arg3[%c0_3, %c0_4] : memref<1x32xf32, #tpu.memory_space<vmem>>, vector<1x32xf32>
    %5 = vector.broadcast %4 : vector<1x32xf32> to vector<16x32xf32>
    %6 = arith.addf %3, %5 : vector<16x32xf32>
    %c0_5 = arith.constant 0 : index
    %c0_6 = arith.constant 0 : index
    %7 = vector.load %arg4[%c0_5, %c0_6] : memref<16x32xf32, #tpu.memory_space<vmem>>, vector<16x32xf32>
    %8 = arith.addf %6, %7 : vector<16x32xf32>
    %c0_7 = arith.constant 0 : index
    %c0_8 = arith.constant 0 : index
    %9 = vector.load %arg5[%c0_7, %c0_8] : memref<16x32xf32, #tpu.memory_space<vmem>>, vector<16x32xf32>
    tpu.vector_store %arg5[%c0_7, %c0_8], %8 {strides = array<i32>} : memref<16x32xf32, #tpu.memory_space<vmem>>, vector<16x32xf32>,
    return
  }
  func.func @transform_0(%arg0: i32) -> (i32, i32) {
    %c0_i32 = arith.constant 0 : i32
    %c0_i32_0 = arith.constant 0 : i32
    return %arg0, %c0_i32 : i32, i32
  }
  func.func @transform_1(%arg0: i32) -> (i32, i32) {
    %c0_i32 = arith.constant 0 : i32
    %c0_i32_0 = arith.constant 0 : i32
    %c0_i32_1 = arith.constant 0 : i32
    return %c0_i32, %c0_i32_0 : i32, i32
  }
  func.func @transform_2(%arg0: i32) -> (i32, i32) {
    %c0_i32 = arith.constant 0 : i32
    %c0_i32_0 = arith.constant 0 : i32
    %c0_i32_1 = arith.constant 0 : i32
    return %c0_i32, %c0_i32_0 : i32, i32
  }
  func.func @transform_3(%arg0: i32) -> (i32, i32) {
    %c0_i32 = arith.constant 0 : i32
    %c0_i32_0 = arith.constant 0 : i32
    return %arg0, %c0_i32 : i32, i32
  }
  func.func @transform_4(%arg0: i32) -> (i32, i32) {
    %c0_i32 = arith.constant 0 : i32
    %c0_i32_0 = arith.constant 0 : i32
    return %arg0, %c0_i32 : i32, i32
  }
}

module attributes {stable_mosaic.version = 11 : i64} {
  func.func @_resblock_stack_kernel(%arg0: i32, %arg1: i32, %arg2: memref<16x32xf32, #tpu.memory_space<vmem>>, %arg3: memref<1x32x32xbf16, #tpu.memory_space<vmem>>, %arg4: memref<1x1x32xf32, #tpu.memory_space<vmem>>, %arg5: memref<1x1x32xf32, #tpu.memory_space<vmem>>, %arg6: memref<1x1x32xf32, #tpu.memory_space<vmem>>, %arg7: memref<16x32xf32, #tpu.memory_space<vmem>>, %arg8: memref<16x32xf32, #tpu.memory_space<vmem>>) attributes {dimension_semantics = [#tpu.dimension_semantics<parallel>, #tpu.dimension_semantics<arbitrary>], iteration_bounds = array<i64: 1, 4>, scalar_prefetch = 0 : i64, scratch_operands = 1 : i64, tpu.core_type = #tpu.core_type<tc>, window_params = [{transform_indices = @transform_0, window_bounds = array<i64: 16, 32>}, {transform_indices = @transform_1, window_bounds = array<i64: 1, 32, 32>}, {transform_indices = @transform_2, window_bounds = array<i64: 1, 1, 32>}, {transform_indices = @transform_3, window_bounds = array<i64: 1, 1, 32>}, {transform_indices = @transform_4, window_bounds = array<i64: 1, 1, 32>}, {transform_indices = @transform_5, window_bounds = array<i64: 16, 32>}]} {
    %c0_i32 = arith.constant 0 : i32
    %0 = arith.cmpi eq, %arg1, %c0_i32 : i32
    %1 = arith.extui %0 : i1 to i32
    %c0_i32_0 = arith.constant 0 : i32
    %2 = arith.cmpi ne, %1, %c0_i32_0 : i32
    scf.if %2 {
      %c0_22 = arith.constant 0 : index
      %c0_23 = arith.constant 0 : index
      %41 = vector.load %arg2[%c0_22, %c0_23] : memref<16x32xf32, #tpu.memory_space<vmem>>, vector<16x32xf32>
      %c0_24 = arith.constant 0 : index
      %c0_25 = arith.constant 0 : index
      %42 = vector.load %arg8[%c0_24, %c0_25] : memref<16x32xf32, #tpu.memory_space<vmem>>, vector<16x32xf32>
      tpu.vector_store %arg8[%c0_24, %c0_25], %41 {strides = array<i32>} : memref<16x32xf32, #tpu.memory_space<vmem>>, vector<16x32xf32>,
    } else {
    }
    %c0 = arith.constant 0 : index
    %c0_1 = arith.constant 0 : index
    %3 = vector.load %arg8[%c0, %c0_1] : memref<16x32xf32, #tpu.memory_space<vmem>>, vector<16x32xf32>
    %c0_2 = arith.constant 0 : index
    %c0_3 = arith.constant 0 : index
    %c0_4 = arith.constant 0 : index
    %4 = vector.load %arg5[%c0_2, %c0_3, %c0_4] : memref<1x1x32xf32, #tpu.memory_space<vmem>>, vector<1x1x32xf32>
    %5 = vector.shape_cast %4 : vector<1x1x32xf32> to vector<1x32xf32>
    %c0_5 = arith.constant 0 : index
    %c0_6 = arith.constant 0 : index
    %c0_7 = arith.constant 0 : index
    %6 = vector.load %arg6[%c0_5, %c0_6, %c0_7] : memref<1x1x32xf32, #tpu.memory_space<vmem>>, vector<1x1x32xf32>
    %7 = vector.shape_cast %6 : vector<1x1x32xf32> to vector<1x32xf32>
    %cst = arith.constant dense<0.000000e+00> : vector<16xf32>
    %8 = vector.multi_reduction <add>, %3, %cst [1] : vector<16x32xf32> to vector<16xf32>
    %9 = vector.shape_cast %8 : vector<16xf32> to vector<16x1xf32>
    %cst_8 = arith.constant 3.200000e+01 : f32
    %10 = vector.broadcast %cst_8 : f32 to vector<16x1xf32>
    %11 = arith.divf %9, %10 : vector<16x1xf32>
    %12 = vector.broadcast %11 : vector<16x1xf32> to vector<16x32xf32>
    %13 = arith.subf %3, %12 : vector<16x32xf32>
    %14 = arith.mulf %13, %13 : vector<16x32xf32>
    %cst_9 = arith.constant dense<0.000000e+00> : vector<16xf32>
    %15 = vector.multi_reduction <add>, %14, %cst_9 [1] : vector<16x32xf32> to vector<16xf32>
    %16 = vector.shape_cast %15 : vector<16xf32> to vector<16x1xf32>
    %cst_10 = arith.constant 3.200000e+01 : f32
    %17 = vector.broadcast %cst_10 : f32 to vector<16x1xf32>
    %18 = arith.divf %16, %17 : vector<16x1xf32>
    %cst_11 = arith.constant 9.99999974E-6 : f32
    %19 = vector.broadcast %cst_11 : f32 to vector<16x1xf32>
    %20 = arith.addf %18, %19 : vector<16x1xf32>
    %21 = math.rsqrt %20 : vector<16x1xf32>
    %22 = vector.broadcast %21 : vector<16x1xf32> to vector<16x32xf32>
    %23 = arith.mulf %13, %22 : vector<16x32xf32>
    %24 = vector.broadcast %5 : vector<1x32xf32> to vector<16x32xf32>
    %25 = arith.mulf %23, %24 : vector<16x32xf32>
    %26 = vector.broadcast %7 : vector<1x32xf32> to vector<16x32xf32>
    %27 = arith.addf %25, %26 : vector<16x32xf32>
    %28 = arith.truncf %27 : vector<16x32xf32> to vector<16x32xbf16>
    %c0_12 = arith.constant 0 : index
    %c0_13 = arith.constant 0 : index
    %c0_14 = arith.constant 0 : index
    %29 = vector.load %arg3[%c0_12, %c0_13, %c0_14] : memref<1x32x32xbf16, #tpu.memory_space<vmem>>, vector<1x32x32xbf16>
    %30 = vector.shape_cast %29 : vector<1x32x32xbf16> to vector<32x32xbf16>
    %cst_15 = arith.constant dense<0.000000e+00> : vector<16x32xf32>
    %31 = tpu.matmul %28, %30, %cst_15 {dimension_numbers = #tpu.dot_dimension_numbers<[1], [0], [0], [1], [0, 0, 1, 1], [], []>} : vector<16x32xbf16>, vector<32x32xbf16>, vector<16x32xf32> -> vector<16x32xf32>
    %c0_16 = arith.constant 0 : index
    %c0_17 = arith.constant 0 : index
    %c0_18 = arith.constant 0 : index
    %32 = vector.load %arg4[%c0_16, %c0_17, %c0_18] : memref<1x1x32xf32, #tpu.memory_space<vmem>>, vector<1x1x32xf32>
    %33 = vector.shape_cast %32 : vector<1x1x32xf32> to vector<1x32xf32>
    %34 = vector.broadcast %33 : vector<1x32xf32> to vector<16x32xf32>
    %35 = arith.addf %31, %34 : vector<16x32xf32>
    %36 = arith.addf %3, %35 : vector<16x32xf32>
    %c0_19 = arith.constant 0 : index
    %c0_20 = arith.constant 0 : index
    %37 = vector.load %arg8[%c0_19, %c0_20] : memref<16x32xf32, #tpu.memory_space<vmem>>, vector<16x32xf32>
    tpu.vector_store %arg8[%c0_19, %c0_20], %36 {strides = array<i32>} : memref<16x32xf32, #tpu.memory_space<vmem>>, vector<16x32xf32>,
    %c3_i32 = arith.constant 3 : i32
    %38 = arith.cmpi eq, %arg1, %c3_i32 : i32
    %39 = arith.extui %38 : i1 to i32
    %c0_i32_21 = arith.constant 0 : i32
    %40 = arith.cmpi ne, %39, %c0_i32_21 : i32
    scf.if %40 {
      %c0_22 = arith.constant 0 : index
      %c0_23 = arith.constant 0 : index
      %41 = vector.load %arg8[%c0_22, %c0_23] : memref<16x32xf32, #tpu.memory_space<vmem>>, vector<16x32xf32>
      %c0_24 = arith.constant 0 : index
      %c0_25 = arith.constant 0 : index
      %42 = vector.load %arg7[%c0_24, %c0_25] : memref<16x32xf32, #tpu.memory_space<vmem>>, vector<16x32xf32>
      tpu.vector_store %arg7[%c0_24, %c0_25], %41 {strides = array<i32>} : memref<16x32xf32, #tpu.memory_space<vmem>>, vector<16x32xf32>,
    } else {
    }
    return
  }
  func.func @transform_0(%arg0: i32, %arg1: i32) -> (i32, i32) {
    %c0_i32 = arith.constant 0 : i32
    %c0_i32_0 = arith.constant 0 : i32
    return %arg0, %c0_i32 : i32, i32
  }
  func.func @transform_1(%arg0: i32, %arg1: i32) -> (i32, i32, i32) {
    %c8_i32 = arith.constant 8 : i32
    %0 = arith.addi %arg1, %c8_i32 : i32
    %c0_i32 = arith.constant 0 : i32
    %c0_i32_0 = arith.constant 0 : i32
    %c0_i32_1 = arith.constant 0 : i32
    return %0, %c0_i32, %c0_i32_0 : i32, i32, i32
  }
  func.func @transform_2(%arg0: i32, %arg1: i32) -> (i32, i32, i32) {
    %c8_i32 = arith.constant 8 : i32
    %0 = arith.addi %arg1, %c8_i32 : i32
    %c0_i32 = arith.constant 0 : i32
    %c0_i32_0 = arith.constant 0 : i32
    %c0_i32_1 = arith.constant 0 : i32
    return %0, %c0_i32, %c0_i32_0 : i32, i32, i32
  }
  func.func @transform_3(%arg0: i32, %arg1: i32) -> (i32, i32, i32) {
    %c8_i32 = arith.constant 8 : i32
    %0 = arith.addi %arg1, %c8_i32 : i32
    %c0_i32 = arith.constant 0 : i32
    %c0_i32_0 = arith.constant 0 : i32
    %c0_i32_1 = arith.constant 0 : i32
    return %0, %c0_i32, %c0_i32_0 : i32, i32, i32
  }
  func.func @transform_4(%arg0: i32, %arg1: i32) -> (i32, i32, i32) {
    %c8_i32 = arith.constant 8 : i32
    %0 = arith.addi %arg1, %c8_i32 : i32
    %c0_i32 = arith.constant 0 : i32
    %c0_i32_0 = arith.constant 0 : i32
    %c0_i32_1 = arith.constant 0 : i32
    return %0, %c0_i32, %c0_i32_0 : i32, i32, i32
  }
  func.func @transform_5(%arg0: i32, %arg1: i32) -> (i32, i32) {
    %c0_i32 = arith.constant 0 : i32
    %c0_i32_0 = arith.constant 0 : i32
    return %arg0, %c0_i32 : i32, i32
  }
}

module attributes {stable_mosaic.version = 11 : i64} {
  func.func @kernel(%arg0: i32, %arg1: memref<1x4x32xf32, #tpu.memory_space<vmem>>, %arg2: memref<1x8x32xf32, #tpu.memory_space<vmem>>, %arg3: memref<1x32xf32, #tpu.memory_space<vmem>>, %arg4: memref<1x32xf32, #tpu.memory_space<vmem>>, %arg5: memref<32x96xbf16, #tpu.memory_space<vmem>>, %arg6: memref<1x96xf32, #tpu.memory_space<vmem>>, %arg7: memref<32x32xbf16, #tpu.memory_space<vmem>>, %arg8: memref<1x32xf32, #tpu.memory_space<vmem>>, %arg9: memref<1x4x32xf32, #tpu.memory_space<vmem>>, %arg10: memref<1x8x32xf32, #tpu.memory_space<vmem>>) attributes {dimension_semantics = [#tpu.dimension_semantics<parallel>], iteration_bounds = array<i64: 2>, scalar_prefetch = 0 : i64, scratch_operands = 0 : i64, tpu.core_type = #tpu.core_type<tc>, window_params = [{transform_indices = @transform_0, window_bounds = array<i64: 1, 4, 32>}, {transform_indices = @transform_1, window_bounds = array<i64: 1, 8, 32>}, {pipeline_mode = #tpu.pipeline_mode<synchronous>, transform_indices = @transform_2, window_bounds = array<i64: 1, 32>}, {pipeline_mode = #tpu.pipeline_mode<synchronous>, transform_indices = @transform_3, window_bounds = array<i64: 1, 32>}, {pipeline_mode = #tpu.pipeline_mode<synchronous>, transform_indices = @transform_4, window_bounds = array<i64: 32, 96>}, {pipeline_mode = #tpu.pipeline_mode<synchronous>, transform_indices = @transform_5, window_bounds = array<i64: 1, 96>}, {pipeline_mode = #tpu.pipeline_mode<synchronous>, transform_indices = @transform_6, window_bounds = array<i64: 32, 32>}, {pipeline_mode = #tpu.pipeline_mode<synchronous>, transform_indices = @transform_7, window_bounds = array<i64: 1, 32>}, {transform_indices = @transform_8, window_bounds = array<i64: 1, 4, 32>}, {transform_indices = @transform_9, window_bounds = array<i64: 1, 8, 32>}]} {
    %c0 = arith.constant 0 : index
    %c0_0 = arith.constant 0 : index
    %c0_1 = arith.constant 0 : index
    %0 = vector.load %arg1[%c0, %c0_0, %c0_1] : memref<1x4x32xf32, #tpu.memory_space<vmem>>, vector<1x4x32xf32>
    %1 = vector.shape_cast %0 : vector<1x4x32xf32> to vector<4x32xf32>
    %c0_2 = arith.constant 0 : index
    %c0_3 = arith.constant 0 : index
    %c0_4 = arith.constant 0 : index
    %2 = vector.load %arg2[%c0_2, %c0_3, %c0_4] : memref<1x8x32xf32, #tpu.memory_space<vmem>>, vector<1x8x32xf32>
    %3 = vector.shape_cast %2 : vector<1x8x32xf32> to vector<8x32xf32>
    %4 = tpu.concatenate %1, %3 in 0 : vector<4x32xf32>, vector<8x32xf32> -> vector<12x32xf32>
    %c0_5 = arith.constant 0 : index
    %c0_6 = arith.constant 0 : index
    %5 = vector.load %arg3[%c0_5, %c0_6] : memref<1x32xf32, #tpu.memory_space<vmem>>, vector<1x32xf32>
    %c0_7 = arith.constant 0 : index
    %c0_8 = arith.constant 0 : index
    %6 = vector.load %arg4[%c0_7, %c0_8] : memref<1x32xf32, #tpu.memory_space<vmem>>, vector<1x32xf32>
    %cst = arith.constant dense<0.000000e+00> : vector<12xf32>
    %7 = vector.multi_reduction <add>, %4, %cst [1] : vector<12x32xf32> to vector<12xf32>
    %8 = vector.shape_cast %7 : vector<12xf32> to vector<12x1xf32>
    %cst_9 = arith.constant 3.200000e+01 : f32
    %9 = vector.broadcast %cst_9 : f32 to vector<12x1xf32>
    %10 = arith.divf %8, %9 : vector<12x1xf32>
    %11 = vector.broadcast %10 : vector<12x1xf32> to vector<12x32xf32>
    %12 = arith.subf %4, %11 : vector<12x32xf32>
    %13 = arith.mulf %12, %12 : vector<12x32xf32>
    %cst_10 = arith.constant dense<0.000000e+00> : vector<12xf32>
    %14 = vector.multi_reduction <add>, %13, %cst_10 [1] : vector<12x32xf32> to vector<12xf32>
    %15 = vector.shape_cast %14 : vector<12xf32> to vector<12x1xf32>
    %cst_11 = arith.constant 3.200000e+01 : f32
    %16 = vector.broadcast %cst_11 : f32 to vector<12x1xf32>
    %17 = arith.divf %15, %16 : vector<12x1xf32>
    %cst_12 = arith.constant 9.99999974E-6 : f32
    %18 = vector.broadcast %cst_12 : f32 to vector<12x1xf32>
    %19 = arith.addf %17, %18 : vector<12x1xf32>
    %20 = math.rsqrt %19 : vector<12x1xf32>
    %21 = vector.broadcast %20 : vector<12x1xf32> to vector<12x32xf32>
    %22 = arith.mulf %12, %21 : vector<12x32xf32>
    %23 = vector.broadcast %5 : vector<1x32xf32> to vector<12x32xf32>
    %24 = arith.mulf %22, %23 : vector<12x32xf32>
    %25 = vector.broadcast %6 : vector<1x32xf32> to vector<12x32xf32>
    %26 = arith.addf %24, %25 : vector<12x32xf32>
    %27 = arith.truncf %26 : vector<12x32xf32> to vector<12x32xbf16>
    %c0_13 = arith.constant 0 : index
    %c0_14 = arith.constant 0 : index
    %28 = vector.load %arg5[%c0_13, %c0_14] : memref<32x96xbf16, #tpu.memory_space<vmem>>, vector<32x96xbf16>
    %cst_15 = arith.constant dense<0.000000e+00> : vector<12x96xf32>
    %29 = tpu.matmul %27, %28, %cst_15 {dimension_numbers = #tpu.dot_dimension_numbers<[1], [0], [0], [1], [0, 0, 1, 1], [], []>} : vector<12x32xbf16>, vector<32x96xbf16>, vector<12x96xf32> -> vector<12x96xf32>
    %c0_16 = arith.constant 0 : index
    %c0_17 = arith.constant 0 : index
    %30 = vector.load %arg6[%c0_16, %c0_17] : memref<1x96xf32, #tpu.memory_space<vmem>>, vector<1x96xf32>
    %31 = vector.broadcast %30 : vector<1x96xf32> to vector<12x96xf32>
    %32 = arith.addf %29, %31 : vector<12x96xf32>
    %33 = vector.extract_strided_slice %32 {offsets = [0, 0], sizes = [12, 4], strides = [1, 1]} : vector<12x96xf32> to vector<12x4xf32>
    %cst_18 = arith.constant 5.000000e-01 : f32
    %34 = vector.broadcast %cst_18 : f32 to vector<12x4xf32>
    %35 = arith.mulf %33, %34 : vector<12x4xf32>
    %36 = arith.truncf %35 : vector<12x4xf32> to vector<12x4xbf16>
    %37 = vector.extract_strided_slice %32 {offsets = [0, 32], sizes = [12, 4], strides = [1, 1]} : vector<12x96xf32> to vector<12x4xf32>
    %38 = arith.truncf %37 : vector<12x4xf32> to vector<12x4xbf16>
    %39 = vector.extract_strided_slice %32 {offsets = [0, 64], sizes = [12, 4], strides = [1, 1]} : vector<12x96xf32> to vector<12x4xf32>
    %40 = arith.truncf %39 : vector<12x4xf32> to vector<12x4xbf16>
    %cst_19 = arith.constant dense<0.000000e+00> : vector<12x12xf32>
    %41 = tpu.matmul %36, %38, %cst_19 {dimension_numbers = #tpu.dot_dimension_numbers<[1], [1], [0], [0], [0, 0, 1, 0], [], []>} : vector<12x4xbf16>, vector<12x4xbf16>, vector<12x12xf32> -> vector<12x12xf32>
    %cst_20 = arith.constant dense<0xFF800000> : vector<12xf32>
    %42 = vector.multi_reduction <maximumf>, %41, %cst_20 [1] : vector<12x12xf32> to vector<12xf32>
    %43 = vector.shape_cast %42 : vector<12xf32> to vector<12x1xf32>
    %44 = vector.broadcast %43 : vector<12x1xf32> to vector<12x12xf32>
    %45 = arith.subf %41, %44 : vector<12x12xf32>
    %46 = math.exp %45 : vector<12x12xf32>
    %cst_21 = arith.constant dense<0.000000e+00> : vector<12xf32>
    %47 = vector.multi_reduction <add>, %46, %cst_21 [1] : vector<12x12xf32> to vector<12xf32>
    %48 = vector.shape_cast %47 : vector<12xf32> to vector<12x1xf32>
    %49 = tpu.reciprocal %48 {approx = true} : vector<12x1xf32> -> vector<12x1xf32>
    %50 = vector.broadcast %49 : vector<12x1xf32> to vector<12x12xf32>
    %51 = arith.mulf %46, %50 : vector<12x12xf32>
    %52 = arith.truncf %51 : vector<12x12xf32> to vector<12x12xbf16>
    %cst_22 = arith.constant dense<0.000000e+00> : vector<12x4xf32>
    %53 = tpu.matmul %52, %40, %cst_22 {dimension_numbers = #tpu.dot_dimension_numbers<[1], [0], [0], [1], [0, 0, 1, 1], [], []>} : vector<12x12xbf16>, vector<12x4xbf16>, vector<12x4xf32> -> vector<12x4xf32>
    %54 = vector.extract_strided_slice %32 {offsets = [0, 4], sizes = [12, 4], strides = [1, 1]} : vector<12x96xf32> to vector<12x4xf32>
    %cst_23 = arith.constant 5.000000e-01 : f32
    %55 = vector.broadcast %cst_23 : f32 to vector<12x4xf32>
    %56 = arith.mulf %54, %55 : vector<12x4xf32>
    %57 = arith.truncf %56 : vector<12x4xf32> to vector<12x4xbf16>
    %58 = vector.extract_strided_slice %32 {offsets = [0, 36], sizes = [12, 4], strides = [1, 1]} : vector<12x96xf32> to vector<12x4xf32>
    %59 = arith.truncf %58 : vector<12x4xf32> to vector<12x4xbf16>
    %60 = vector.extract_strided_slice %32 {offsets = [0, 68], sizes = [12, 4], strides = [1, 1]} : vector<12x96xf32> to vector<12x4xf32>
    %61 = arith.truncf %60 : vector<12x4xf32> to vector<12x4xbf16>
    %cst_24 = arith.constant dense<0.000000e+00> : vector<12x12xf32>
    %62 = tpu.matmul %57, %59, %cst_24 {dimension_numbers = #tpu.dot_dimension_numbers<[1], [1], [0], [0], [0, 0, 1, 0], [], []>} : vector<12x4xbf16>, vector<12x4xbf16>, vector<12x12xf32> -> vector<12x12xf32>
    %cst_25 = arith.constant dense<0xFF800000> : vector<12xf32>
    %63 = vector.multi_reduction <maximumf>, %62, %cst_25 [1] : vector<12x12xf32> to vector<12xf32>
    %64 = vector.shape_cast %63 : vector<12xf32> to vector<12x1xf32>
    %65 = vector.broadcast %64 : vector<12x1xf32> to vector<12x12xf32>
    %66 = arith.subf %62, %65 : vector<12x12xf32>
    %67 = math.exp %66 : vector<12x12xf32>
    %cst_26 = arith.constant dense<0.000000e+00> : vector<12xf32>
    %68 = vector.multi_reduction <add>, %67, %cst_26 [1] : vector<12x12xf32> to vector<12xf32>
    %69 = vector.shape_cast %68 : vector<12xf32> to vector<12x1xf32>
    %70 = tpu.reciprocal %69 {approx = true} : vector<12x1xf32> -> vector<12x1xf32>
    %71 = vector.broadcast %70 : vector<12x1xf32> to vector<12x12xf32>
    %72 = arith.mulf %67, %71 : vector<12x12xf32>
    %73 = arith.truncf %72 : vector<12x12xf32> to vector<12x12xbf16>
    %cst_27 = arith.constant dense<0.000000e+00> : vector<12x4xf32>
    %74 = tpu.matmul %73, %61, %cst_27 {dimension_numbers = #tpu.dot_dimension_numbers<[1], [0], [0], [1], [0, 0, 1, 1], [], []>} : vector<12x12xbf16>, vector<12x4xbf16>, vector<12x4xf32> -> vector<12x4xf32>
    %75 = vector.extract_strided_slice %32 {offsets = [0, 8], sizes = [12, 4], strides = [1, 1]} : vector<12x96xf32> to vector<12x4xf32>
    %cst_28 = arith.constant 5.000000e-01 : f32
    %76 = vector.broadcast %cst_28 : f32 to vector<12x4xf32>
    %77 = arith.mulf %75, %76 : vector<12x4xf32>
    %78 = arith.truncf %77 : vector<12x4xf32> to vector<12x4xbf16>
    %79 = vector.extract_strided_slice %32 {offsets = [0, 40], sizes = [12, 4], strides = [1, 1]} : vector<12x96xf32> to vector<12x4xf32>
    %80 = arith.truncf %79 : vector<12x4xf32> to vector<12x4xbf16>
    %81 = vector.extract_strided_slice %32 {offsets = [0, 72], sizes = [12, 4], strides = [1, 1]} : vector<12x96xf32> to vector<12x4xf32>
    %82 = arith.truncf %81 : vector<12x4xf32> to vector<12x4xbf16>
    %cst_29 = arith.constant dense<0.000000e+00> : vector<12x12xf32>
    %83 = tpu.matmul %78, %80, %cst_29 {dimension_numbers = #tpu.dot_dimension_numbers<[1], [1], [0], [0], [0, 0, 1, 0], [], []>} : vector<12x4xbf16>, vector<12x4xbf16>, vector<12x12xf32> -> vector<12x12xf32>
    %cst_30 = arith.constant dense<0xFF800000> : vector<12xf32>
    %84 = vector.multi_reduction <maximumf>, %83, %cst_30 [1] : vector<12x12xf32> to vector<12xf32>
    %85 = vector.shape_cast %84 : vector<12xf32> to vector<12x1xf32>
    %86 = vector.broadcast %85 : vector<12x1xf32> to vector<12x12xf32>
    %87 = arith.subf %83, %86 : vector<12x12xf32>
    %88 = math.exp %87 : vector<12x12xf32>
    %cst_31 = arith.constant dense<0.000000e+00> : vector<12xf32>
    %89 = vector.multi_reduction <add>, %88, %cst_31 [1] : vector<12x12xf32> to vector<12xf32>
    %90 = vector.shape_cast %89 : vector<12xf32> to vector<12x1xf32>
    %91 = tpu.reciprocal %90 {approx = true} : vector<12x1xf32> -> vector<12x1xf32>
    %92 = vector.broadcast %91 : vector<12x1xf32> to vector<12x12xf32>
    %93 = arith.mulf %88, %92 : vector<12x12xf32>
    %94 = arith.truncf %93 : vector<12x12xf32> to vector<12x12xbf16>
    %cst_32 = arith.constant dense<0.000000e+00> : vector<12x4xf32>
    %95 = tpu.matmul %94, %82, %cst_32 {dimension_numbers = #tpu.dot_dimension_numbers<[1], [0], [0], [1], [0, 0, 1, 1], [], []>} : vector<12x12xbf16>, vector<12x4xbf16>, vector<12x4xf32> -> vector<12x4xf32>
    %96 = vector.extract_strided_slice %32 {offsets = [0, 12], sizes = [12, 4], strides = [1, 1]} : vector<12x96xf32> to vector<12x4xf32>
    %cst_33 = arith.constant 5.000000e-01 : f32
    %97 = vector.broadcast %cst_33 : f32 to vector<12x4xf32>
    %98 = arith.mulf %96, %97 : vector<12x4xf32>
    %99 = arith.truncf %98 : vector<12x4xf32> to vector<12x4xbf16>
    %100 = vector.extract_strided_slice %32 {offsets = [0, 44], sizes = [12, 4], strides = [1, 1]} : vector<12x96xf32> to vector<12x4xf32>
    %101 = arith.truncf %100 : vector<12x4xf32> to vector<12x4xbf16>
    %102 = vector.extract_strided_slice %32 {offsets = [0, 76], sizes = [12, 4], strides = [1, 1]} : vector<12x96xf32> to vector<12x4xf32>
    %103 = arith.truncf %102 : vector<12x4xf32> to vector<12x4xbf16>
    %cst_34 = arith.constant dense<0.000000e+00> : vector<12x12xf32>
    %104 = tpu.matmul %99, %101, %cst_34 {dimension_numbers = #tpu.dot_dimension_numbers<[1], [1], [0], [0], [0, 0, 1, 0], [], []>} : vector<12x4xbf16>, vector<12x4xbf16>, vector<12x12xf32> -> vector<12x12xf32>
    %cst_35 = arith.constant dense<0xFF800000> : vector<12xf32>
    %105 = vector.multi_reduction <maximumf>, %104, %cst_35 [1] : vector<12x12xf32> to vector<12xf32>
    %106 = vector.shape_cast %105 : vector<12xf32> to vector<12x1xf32>
    %107 = vector.broadcast %106 : vector<12x1xf32> to vector<12x12xf32>
    %108 = arith.subf %104, %107 : vector<12x12xf32>
    %109 = math.exp %108 : vector<12x12xf32>
    %cst_36 = arith.constant dense<0.000000e+00> : vector<12xf32>
    %110 = vector.multi_reduction <add>, %109, %cst_36 [1] : vector<12x12xf32> to vector<12xf32>
    %111 = vector.shape_cast %110 : vector<12xf32> to vector<12x1xf32>
    %112 = tpu.reciprocal %111 {approx = true} : vector<12x1xf32> -> vector<12x1xf32>
    %113 = vector.broadcast %112 : vector<12x1xf32> to vector<12x12xf32>
    %114 = arith.mulf %109, %113 : vector<12x12xf32>
    %115 = arith.truncf %114 : vector<12x12xf32> to vector<12x12xbf16>
    %cst_37 = arith.constant dense<0.000000e+00> : vector<12x4xf32>
    %116 = tpu.matmul %115, %103, %cst_37 {dimension_numbers = #tpu.dot_dimension_numbers<[1], [0], [0], [1], [0, 0, 1, 1], [], []>} : vector<12x12xbf16>, vector<12x4xbf16>, vector<12x4xf32> -> vector<12x4xf32>
    %117 = vector.extract_strided_slice %32 {offsets = [0, 16], sizes = [12, 4], strides = [1, 1]} : vector<12x96xf32> to vector<12x4xf32>
    %cst_38 = arith.constant 5.000000e-01 : f32
    %118 = vector.broadcast %cst_38 : f32 to vector<12x4xf32>
    %119 = arith.mulf %117, %118 : vector<12x4xf32>
    %120 = arith.truncf %119 : vector<12x4xf32> to vector<12x4xbf16>
    %121 = vector.extract_strided_slice %32 {offsets = [0, 48], sizes = [12, 4], strides = [1, 1]} : vector<12x96xf32> to vector<12x4xf32>
    %122 = arith.truncf %121 : vector<12x4xf32> to vector<12x4xbf16>
    %123 = vector.extract_strided_slice %32 {offsets = [0, 80], sizes = [12, 4], strides = [1, 1]} : vector<12x96xf32> to vector<12x4xf32>
    %124 = arith.truncf %123 : vector<12x4xf32> to vector<12x4xbf16>
    %cst_39 = arith.constant dense<0.000000e+00> : vector<12x12xf32>
    %125 = tpu.matmul %120, %122, %cst_39 {dimension_numbers = #tpu.dot_dimension_numbers<[1], [1], [0], [0], [0, 0, 1, 0], [], []>} : vector<12x4xbf16>, vector<12x4xbf16>, vector<12x12xf32> -> vector<12x12xf32>
    %cst_40 = arith.constant dense<0xFF800000> : vector<12xf32>
    %126 = vector.multi_reduction <maximumf>, %125, %cst_40 [1] : vector<12x12xf32> to vector<12xf32>
    %127 = vector.shape_cast %126 : vector<12xf32> to vector<12x1xf32>
    %128 = vector.broadcast %127 : vector<12x1xf32> to vector<12x12xf32>
    %129 = arith.subf %125, %128 : vector<12x12xf32>
    %130 = math.exp %129 : vector<12x12xf32>
    %cst_41 = arith.constant dense<0.000000e+00> : vector<12xf32>
    %131 = vector.multi_reduction <add>, %130, %cst_41 [1] : vector<12x12xf32> to vector<12xf32>
    %132 = vector.shape_cast %131 : vector<12xf32> to vector<12x1xf32>
    %133 = tpu.reciprocal %132 {approx = true} : vector<12x1xf32> -> vector<12x1xf32>
    %134 = vector.broadcast %133 : vector<12x1xf32> to vector<12x12xf32>
    %135 = arith.mulf %130, %134 : vector<12x12xf32>
    %136 = arith.truncf %135 : vector<12x12xf32> to vector<12x12xbf16>
    %cst_42 = arith.constant dense<0.000000e+00> : vector<12x4xf32>
    %137 = tpu.matmul %136, %124, %cst_42 {dimension_numbers = #tpu.dot_dimension_numbers<[1], [0], [0], [1], [0, 0, 1, 1], [], []>} : vector<12x12xbf16>, vector<12x4xbf16>, vector<12x4xf32> -> vector<12x4xf32>
    %138 = vector.extract_strided_slice %32 {offsets = [0, 20], sizes = [12, 4], strides = [1, 1]} : vector<12x96xf32> to vector<12x4xf32>
    %cst_43 = arith.constant 5.000000e-01 : f32
    %139 = vector.broadcast %cst_43 : f32 to vector<12x4xf32>
    %140 = arith.mulf %138, %139 : vector<12x4xf32>
    %141 = arith.truncf %140 : vector<12x4xf32> to vector<12x4xbf16>
    %142 = vector.extract_strided_slice %32 {offsets = [0, 52], sizes = [12, 4], strides = [1, 1]} : vector<12x96xf32> to vector<12x4xf32>
    %143 = arith.truncf %142 : vector<12x4xf32> to vector<12x4xbf16>
    %144 = vector.extract_strided_slice %32 {offsets = [0, 84], sizes = [12, 4], strides = [1, 1]} : vector<12x96xf32> to vector<12x4xf32>
    %145 = arith.truncf %144 : vector<12x4xf32> to vector<12x4xbf16>
    %cst_44 = arith.constant dense<0.000000e+00> : vector<12x12xf32>
    %146 = tpu.matmul %141, %143, %cst_44 {dimension_numbers = #tpu.dot_dimension_numbers<[1], [1], [0], [0], [0, 0, 1, 0], [], []>} : vector<12x4xbf16>, vector<12x4xbf16>, vector<12x12xf32> -> vector<12x12xf32>
    %cst_45 = arith.constant dense<0xFF800000> : vector<12xf32>
    %147 = vector.multi_reduction <maximumf>, %146, %cst_45 [1] : vector<12x12xf32> to vector<12xf32>
    %148 = vector.shape_cast %147 : vector<12xf32> to vector<12x1xf32>
    %149 = vector.broadcast %148 : vector<12x1xf32> to vector<12x12xf32>
    %150 = arith.subf %146, %149 : vector<12x12xf32>
    %151 = math.exp %150 : vector<12x12xf32>
    %cst_46 = arith.constant dense<0.000000e+00> : vector<12xf32>
    %152 = vector.multi_reduction <add>, %151, %cst_46 [1] : vector<12x12xf32> to vector<12xf32>
    %153 = vector.shape_cast %152 : vector<12xf32> to vector<12x1xf32>
    %154 = tpu.reciprocal %153 {approx = true} : vector<12x1xf32> -> vector<12x1xf32>
    %155 = vector.broadcast %154 : vector<12x1xf32> to vector<12x12xf32>
    %156 = arith.mulf %151, %155 : vector<12x12xf32>
    %157 = arith.truncf %156 : vector<12x12xf32> to vector<12x12xbf16>
    %cst_47 = arith.constant dense<0.000000e+00> : vector<12x4xf32>
    %158 = tpu.matmul %157, %145, %cst_47 {dimension_numbers = #tpu.dot_dimension_numbers<[1], [0], [0], [1], [0, 0, 1, 1], [], []>} : vector<12x12xbf16>, vector<12x4xbf16>, vector<12x4xf32> -> vector<12x4xf32>
    %159 = vector.extract_strided_slice %32 {offsets = [0, 24], sizes = [12, 4], strides = [1, 1]} : vector<12x96xf32> to vector<12x4xf32>
    %cst_48 = arith.constant 5.000000e-01 : f32
    %160 = vector.broadcast %cst_48 : f32 to vector<12x4xf32>
    %161 = arith.mulf %159, %160 : vector<12x4xf32>
    %162 = arith.truncf %161 : vector<12x4xf32> to vector<12x4xbf16>
    %163 = vector.extract_strided_slice %32 {offsets = [0, 56], sizes = [12, 4], strides = [1, 1]} : vector<12x96xf32> to vector<12x4xf32>
    %164 = arith.truncf %163 : vector<12x4xf32> to vector<12x4xbf16>
    %165 = vector.extract_strided_slice %32 {offsets = [0, 88], sizes = [12, 4], strides = [1, 1]} : vector<12x96xf32> to vector<12x4xf32>
    %166 = arith.truncf %165 : vector<12x4xf32> to vector<12x4xbf16>
    %cst_49 = arith.constant dense<0.000000e+00> : vector<12x12xf32>
    %167 = tpu.matmul %162, %164, %cst_49 {dimension_numbers = #tpu.dot_dimension_numbers<[1], [1], [0], [0], [0, 0, 1, 0], [], []>} : vector<12x4xbf16>, vector<12x4xbf16>, vector<12x12xf32> -> vector<12x12xf32>
    %cst_50 = arith.constant dense<0xFF800000> : vector<12xf32>
    %168 = vector.multi_reduction <maximumf>, %167, %cst_50 [1] : vector<12x12xf32> to vector<12xf32>
    %169 = vector.shape_cast %168 : vector<12xf32> to vector<12x1xf32>
    %170 = vector.broadcast %169 : vector<12x1xf32> to vector<12x12xf32>
    %171 = arith.subf %167, %170 : vector<12x12xf32>
    %172 = math.exp %171 : vector<12x12xf32>
    %cst_51 = arith.constant dense<0.000000e+00> : vector<12xf32>
    %173 = vector.multi_reduction <add>, %172, %cst_51 [1] : vector<12x12xf32> to vector<12xf32>
    %174 = vector.shape_cast %173 : vector<12xf32> to vector<12x1xf32>
    %175 = tpu.reciprocal %174 {approx = true} : vector<12x1xf32> -> vector<12x1xf32>
    %176 = vector.broadcast %175 : vector<12x1xf32> to vector<12x12xf32>
    %177 = arith.mulf %172, %176 : vector<12x12xf32>
    %178 = arith.truncf %177 : vector<12x12xf32> to vector<12x12xbf16>
    %cst_52 = arith.constant dense<0.000000e+00> : vector<12x4xf32>
    %179 = tpu.matmul %178, %166, %cst_52 {dimension_numbers = #tpu.dot_dimension_numbers<[1], [0], [0], [1], [0, 0, 1, 1], [], []>} : vector<12x12xbf16>, vector<12x4xbf16>, vector<12x4xf32> -> vector<12x4xf32>
    %180 = vector.extract_strided_slice %32 {offsets = [0, 28], sizes = [12, 4], strides = [1, 1]} : vector<12x96xf32> to vector<12x4xf32>
    %cst_53 = arith.constant 5.000000e-01 : f32
    %181 = vector.broadcast %cst_53 : f32 to vector<12x4xf32>
    %182 = arith.mulf %180, %181 : vector<12x4xf32>
    %183 = arith.truncf %182 : vector<12x4xf32> to vector<12x4xbf16>
    %184 = vector.extract_strided_slice %32 {offsets = [0, 60], sizes = [12, 4], strides = [1, 1]} : vector<12x96xf32> to vector<12x4xf32>
    %185 = arith.truncf %184 : vector<12x4xf32> to vector<12x4xbf16>
    %186 = vector.extract_strided_slice %32 {offsets = [0, 92], sizes = [12, 4], strides = [1, 1]} : vector<12x96xf32> to vector<12x4xf32>
    %187 = arith.truncf %186 : vector<12x4xf32> to vector<12x4xbf16>
    %cst_54 = arith.constant dense<0.000000e+00> : vector<12x12xf32>
    %188 = tpu.matmul %183, %185, %cst_54 {dimension_numbers = #tpu.dot_dimension_numbers<[1], [1], [0], [0], [0, 0, 1, 0], [], []>} : vector<12x4xbf16>, vector<12x4xbf16>, vector<12x12xf32> -> vector<12x12xf32>
    %cst_55 = arith.constant dense<0xFF800000> : vector<12xf32>
    %189 = vector.multi_reduction <maximumf>, %188, %cst_55 [1] : vector<12x12xf32> to vector<12xf32>
    %190 = vector.shape_cast %189 : vector<12xf32> to vector<12x1xf32>
    %191 = vector.broadcast %190 : vector<12x1xf32> to vector<12x12xf32>
    %192 = arith.subf %188, %191 : vector<12x12xf32>
    %193 = math.exp %192 : vector<12x12xf32>
    %cst_56 = arith.constant dense<0.000000e+00> : vector<12xf32>
    %194 = vector.multi_reduction <add>, %193, %cst_56 [1] : vector<12x12xf32> to vector<12xf32>
    %195 = vector.shape_cast %194 : vector<12xf32> to vector<12x1xf32>
    %196 = tpu.reciprocal %195 {approx = true} : vector<12x1xf32> -> vector<12x1xf32>
    %197 = vector.broadcast %196 : vector<12x1xf32> to vector<12x12xf32>
    %198 = arith.mulf %193, %197 : vector<12x12xf32>
    %199 = arith.truncf %198 : vector<12x12xf32> to vector<12x12xbf16>
    %cst_57 = arith.constant dense<0.000000e+00> : vector<12x4xf32>
    %200 = tpu.matmul %199, %187, %cst_57 {dimension_numbers = #tpu.dot_dimension_numbers<[1], [0], [0], [1], [0, 0, 1, 1], [], []>} : vector<12x12xbf16>, vector<12x4xbf16>, vector<12x4xf32> -> vector<12x4xf32>
    %201 = tpu.concatenate %53, %74, %95, %116, %137, %158, %179, %200 in 1 : vector<12x4xf32>, vector<12x4xf32>, vector<12x4xf32>, vector<12x4xf32>, vector<12x4xf32>, vector<12x4xf32>, vector<12x4xf32>, vector<12x4xf32> -> vector<12x32xf32>
    %202 = arith.truncf %201 : vector<12x32xf32> to vector<12x32xbf16>
    %c0_58 = arith.constant 0 : index
    %c0_59 = arith.constant 0 : index
    %203 = vector.load %arg7[%c0_58, %c0_59] : memref<32x32xbf16, #tpu.memory_space<vmem>>, vector<32x32xbf16>
    %cst_60 = arith.constant dense<0.000000e+00> : vector<12x32xf32>
    %204 = tpu.matmul %202, %203, %cst_60 {dimension_numbers = #tpu.dot_dimension_numbers<[1], [0], [0], [1], [0, 0, 1, 1], [], []>} : vector<12x32xbf16>, vector<32x32xbf16>, vector<12x32xf32> -> vector<12x32xf32>
    %c0_61 = arith.constant 0 : index
    %c0_62 = arith.constant 0 : index
    %205 = vector.load %arg8[%c0_61, %c0_62] : memref<1x32xf32, #tpu.memory_space<vmem>>, vector<1x32xf32>
    %206 = vector.broadcast %205 : vector<1x32xf32> to vector<12x32xf32>
    %207 = arith.addf %204, %206 : vector<12x32xf32>
    %208 = arith.addf %207, %4 : vector<12x32xf32>
    %209 = vector.extract_strided_slice %208 {offsets = [0, 0], sizes = [4, 32], strides = [1, 1]} : vector<12x32xf32> to vector<4x32xf32>
    %c0_63 = arith.constant 0 : index
    %c0_64 = arith.constant 0 : index
    %c0_65 = arith.constant 0 : index
    %210 = vector.load %arg9[%c0_63, %c0_64, %c0_65] : memref<1x4x32xf32, #tpu.memory_space<vmem>>, vector<1x4x32xf32>
    %211 = vector.shape_cast %210 : vector<1x4x32xf32> to vector<4x32xf32>
    %212 = vector.shape_cast %209 : vector<4x32xf32> to vector<1x4x32xf32>
    tpu.vector_store %arg9[%c0_63, %c0_64, %c0_65], %212 {strides = array<i32>} : memref<1x4x32xf32, #tpu.memory_space<vmem>>, vector<1x4x32xf32>,
    %213 = vector.extract_strided_slice %208 {offsets = [4, 0], sizes = [8, 32], strides = [1, 1]} : vector<12x32xf32> to vector<8x32xf32>
    %c0_66 = arith.constant 0 : index
    %c0_67 = arith.constant 0 : index
    %c0_68 = arith.constant 0 : index
    %214 = vector.load %arg10[%c0_66, %c0_67, %c0_68] : memref<1x8x32xf32, #tpu.memory_space<vmem>>, vector<1x8x32xf32>
    %215 = vector.shape_cast %214 : vector<1x8x32xf32> to vector<8x32xf32>
    %216 = vector.shape_cast %213 : vector<8x32xf32> to vector<1x8x32xf32>
    tpu.vector_store %arg10[%c0_66, %c0_67, %c0_68], %216 {strides = array<i32>} : memref<1x8x32xf32, #tpu.memory_space<vmem>>, vector<1x8x32xf32>,
    return
  }
  func.func @transform_0(%arg0: i32) -> (i32, i32, i32) {
    %c0_i32 = arith.constant 0 : i32
    %c0_i32_0 = arith.constant 0 : i32
    %c0_i32_1 = arith.constant 0 : i32
    return %arg0, %c0_i32, %c0_i32_0 : i32, i32, i32
  }
  func.func @transform_1(%arg0: i32) -> (i32, i32, i32) {
    %c0_i32 = arith.constant 0 : i32
    %c0_i32_0 = arith.constant 0 : i32
    %c0_i32_1 = arith.constant 0 : i32
    return %arg0, %c0_i32, %c0_i32_0 : i32, i32, i32
  }
  func.func @transform_2(%arg0: i32) -> (i32, i32) {
    %c0_i32 = arith.constant 0 : i32
    %c0_i32_0 = arith.constant 0 : i32
    %c0_i32_1 = arith.constant 0 : i32
    return %c0_i32, %c0_i32_0 : i32, i32
  }
  func.func @transform_3(%arg0: i32) -> (i32, i32) {
    %c0_i32 = arith.constant 0 : i32
    %c0_i32_0 = arith.constant 0 : i32
    %c0_i32_1 = arith.constant 0 : i32
    return %c0_i32, %c0_i32_0 : i32, i32
  }
  func.func @transform_4(%arg0: i32) -> (i32, i32) {
    %c0_i32 = arith.constant 0 : i32
    %c0_i32_0 = arith.constant 0 : i32
    %c0_i32_1 = arith.constant 0 : i32
    return %c0_i32, %c0_i32_0 : i32, i32
  }
  func.func @transform_5(%arg0: i32) -> (i32, i32) {
    %c0_i32 = arith.constant 0 : i32
    %c0_i32_0 = arith.constant 0 : i32
    %c0_i32_1 = arith.constant 0 : i32
    return %c0_i32, %c0_i32_0 : i32, i32
  }
  func.func @transform_6(%arg0: i32) -> (i32, i32) {
    %c0_i32 = arith.constant 0 : i32
    %c0_i32_0 = arith.constant 0 : i32
    %c0_i32_1 = arith.constant 0 : i32
    return %c0_i32, %c0_i32_0 : i32, i32
  }
  func.func @transform_7(%arg0: i32) -> (i32, i32) {
    %c0_i32 = arith.constant 0 : i32
    %c0_i32_0 = arith.constant 0 : i32
    %c0_i32_1 = arith.constant 0 : i32
    return %c0_i32, %c0_i32_0 : i32, i32
  }
  func.func @transform_8(%arg0: i32) -> (i32, i32, i32) {
    %c0_i32 = arith.constant 0 : i32
    %c0_i32_0 = arith.constant 0 : i32
    %c0_i32_1 = arith.constant 0 : i32
    return %arg0, %c0_i32, %c0_i32_0 : i32, i32, i32
  }
  func.func @transform_9(%arg0: i32) -> (i32, i32, i32) {
    %c0_i32 = arith.constant 0 : i32
    %c0_i32_0 = arith.constant 0 : i32
    %c0_i32_1 = arith.constant 0 : i32
    return %arg0, %c0_i32, %c0_i32_0 : i32, i32, i32
  }
}

module attributes {stable_mosaic.version = 11 : i64} {
  func.func @kernel(%arg0: i32, %arg1: memref<16x32xf32, #tpu.memory_space<vmem>>, %arg2: memref<1x32xf32, #tpu.memory_space<vmem>>, %arg3: memref<1x32xf32, #tpu.memory_space<vmem>>, %arg4: memref<16x32xf32, #tpu.memory_space<vmem>>) attributes {dimension_semantics = [#tpu.dimension_semantics<parallel>], iteration_bounds = array<i64: 1>, scalar_prefetch = 0 : i64, scratch_operands = 0 : i64, tpu.core_type = #tpu.core_type<tc>, window_params = [{transform_indices = @transform_0, window_bounds = array<i64: 16, 32>}, {pipeline_mode = #tpu.pipeline_mode<synchronous>, transform_indices = @transform_1, window_bounds = array<i64: 1, 32>}, {pipeline_mode = #tpu.pipeline_mode<synchronous>, transform_indices = @transform_2, window_bounds = array<i64: 1, 32>}, {transform_indices = @transform_3, window_bounds = array<i64: 16, 32>}]} {
    %c0 = arith.constant 0 : index
    %c0_0 = arith.constant 0 : index
    %0 = vector.load %arg1[%c0, %c0_0] : memref<16x32xf32, #tpu.memory_space<vmem>>, vector<16x32xf32>
    %c0_1 = arith.constant 0 : index
    %c0_2 = arith.constant 0 : index
    %1 = vector.load %arg2[%c0_1, %c0_2] : memref<1x32xf32, #tpu.memory_space<vmem>>, vector<1x32xf32>
    %c0_3 = arith.constant 0 : index
    %c0_4 = arith.constant 0 : index
    %2 = vector.load %arg3[%c0_3, %c0_4] : memref<1x32xf32, #tpu.memory_space<vmem>>, vector<1x32xf32>
    %cst = arith.constant dense<0.000000e+00> : vector<16xf32>
    %3 = vector.multi_reduction <add>, %0, %cst [1] : vector<16x32xf32> to vector<16xf32>
    %4 = vector.shape_cast %3 : vector<16xf32> to vector<16x1xf32>
    %cst_5 = arith.constant 3.200000e+01 : f32
    %5 = vector.broadcast %cst_5 : f32 to vector<16x1xf32>
    %6 = arith.divf %4, %5 : vector<16x1xf32>
    %7 = vector.broadcast %6 : vector<16x1xf32> to vector<16x32xf32>
    %8 = arith.subf %0, %7 : vector<16x32xf32>
    %9 = arith.mulf %8, %8 : vector<16x32xf32>
    %cst_6 = arith.constant dense<0.000000e+00> : vector<16xf32>
    %10 = vector.multi_reduction <add>, %9, %cst_6 [1] : vector<16x32xf32> to vector<16xf32>
    %11 = vector.shape_cast %10 : vector<16xf32> to vector<16x1xf32>
    %cst_7 = arith.constant 3.200000e+01 : f32
    %12 = vector.broadcast %cst_7 : f32 to vector<16x1xf32>
    %13 = arith.divf %11, %12 : vector<16x1xf32>
    %cst_8 = arith.constant 9.99999974E-6 : f32
    %14 = vector.broadcast %cst_8 : f32 to vector<16x1xf32>
    %15 = arith.addf %13, %14 : vector<16x1xf32>
    %16 = math.rsqrt %15 : vector<16x1xf32>
    %17 = vector.broadcast %16 : vector<16x1xf32> to vector<16x32xf32>
    %18 = arith.mulf %8, %17 : vector<16x32xf32>
    %19 = vector.broadcast %1 : vector<1x32xf32> to vector<16x32xf32>
    %20 = arith.mulf %18, %19 : vector<16x32xf32>
    %21 = vector.broadcast %2 : vector<1x32xf32> to vector<16x32xf32>
    %22 = arith.addf %20, %21 : vector<16x32xf32>
    %c0_9 = arith.constant 0 : index
    %c0_10 = arith.constant 0 : index
    %23 = vector.load %arg4[%c0_9, %c0_10] : memref<16x32xf32, #tpu.memory_space<vmem>>, vector<16x32xf32>
    tpu.vector_store %arg4[%c0_9, %c0_10], %22 {strides = array<i32>} : memref<16x32xf32, #tpu.memory_space<vmem>>, vector<16x32xf32>,
    return
  }
  func.func @transform_0(%arg0: i32) -> (i32, i32) {
    %c0_i32 = arith.constant 0 : i32
    %c0_i32_0 = arith.constant 0 : i32
    return %arg0, %c0_i32 : i32, i32
  }
  func.func @transform_1(%arg0: i32) -> (i32, i32) {
    %c0_i32 = arith.constant 0 : i32
    %c0_i32_0 = arith.constant 0 : i32
    %c0_i32_1 = arith.constant 0 : i32
    return %c0_i32, %c0_i32_0 : i32, i32
  }
  func.func @transform_2(%arg0: i32) -> (i32, i32) {
    %c0_i32 = arith.constant 0 : i32
    %c0_i32_0 = arith.constant 0 : i32
    %c0_i32_1 = arith.constant 0 : i32
    return %c0_i32, %c0_i32_0 : i32, i32
  }
  func.func @transform_3(%arg0: i32) -> (i32, i32) {
    %c0_i32 = arith.constant 0 : i32
    %c0_i32_0 = arith.constant 0 : i32
    return %arg0, %c0_i32 : i32, i32
  }
}

module attributes {stable_mosaic.version = 11 : i64} {
  func.func @kernel(%arg0: i32, %arg1: memref<8x32xf32, #tpu.memory_space<vmem>>, %arg2: memref<32x32xbf16, #tpu.memory_space<vmem>>, %arg3: memref<8x32xf32, #tpu.memory_space<vmem>>) attributes {dimension_semantics = [#tpu.dimension_semantics<parallel>], iteration_bounds = array<i64: 1>, scalar_prefetch = 0 : i64, scratch_operands = 0 : i64, tpu.core_type = #tpu.core_type<tc>, window_params = [{transform_indices = @transform_0, window_bounds = array<i64: 8, 32>}, {pipeline_mode = #tpu.pipeline_mode<synchronous>, transform_indices = @transform_1, window_bounds = array<i64: 32, 32>}, {transform_indices = @transform_2, window_bounds = array<i64: 8, 32>}]} {
    %c0 = arith.constant 0 : index
    %c0_0 = arith.constant 0 : index
    %0 = vector.load %arg1[%c0, %c0_0] : memref<8x32xf32, #tpu.memory_space<vmem>>, vector<8x32xf32>
    %c0_1 = arith.constant 0 : index
    %c0_2 = arith.constant 0 : index
    %1 = vector.load %arg2[%c0_1, %c0_2] : memref<32x32xbf16, #tpu.memory_space<vmem>>, vector<32x32xbf16>
    %2 = arith.truncf %0 : vector<8x32xf32> to vector<8x32xbf16>
    %cst = arith.constant dense<0.000000e+00> : vector<8x32xf32>
    %3 = tpu.matmul %2, %1, %cst {dimension_numbers = #tpu.dot_dimension_numbers<[1], [0], [0], [1], [0, 0, 1, 1], [], []>} : vector<8x32xbf16>, vector<32x32xbf16>, vector<8x32xf32> -> vector<8x32xf32>
    %c0_3 = arith.constant 0 : index
    %c0_4 = arith.constant 0 : index
    %4 = vector.load %arg3[%c0_3, %c0_4] : memref<8x32xf32, #tpu.memory_space<vmem>>, vector<8x32xf32>
    tpu.vector_store %arg3[%c0_3, %c0_4], %3 {strides = array<i32>} : memref<8x32xf32, #tpu.memory_space<vmem>>, vector<8x32xf32>,
    return
  }
  func.func @transform_0(%arg0: i32) -> (i32, i32) {
    %c0_i32 = arith.constant 0 : i32
    %c0_i32_0 = arith.constant 0 : i32
    return %arg0, %c0_i32 : i32, i32
  }
  func.func @transform_1(%arg0: i32) -> (i32, i32) {
    %c0_i32 = arith.constant 0 : i32
    %c0_i32_0 = arith.constant 0 : i32
    %c0_i32_1 = arith.constant 0 : i32
    return %c0_i32, %c0_i32_0 : i32, i32
  }
  func.func @transform_2(%arg0: i32) -> (i32, i32) {
    %c0_i32 = arith.constant 0 : i32
    %c0_i32_0 = arith.constant 0 : i32
    return %arg0, %c0_i32 : i32, i32
  }
}

module attributes {stable_mosaic.version = 11 : i64} {
  func.func @kernel(%arg0: i32, %arg1: memref<8x128xf32, #tpu.memory_space<vmem>>, %arg2: memref<128x128xbf16, #tpu.memory_space<vmem>>, %arg3: memref<8x128xbf16, #tpu.memory_space<vmem>>) attributes {dimension_semantics = [#tpu.dimension_semantics<parallel>], iteration_bounds = array<i64: 1>, scalar_prefetch = 0 : i64, scratch_operands = 0 : i64, tpu.core_type = #tpu.core_type<tc>, window_params = [{transform_indices = @transform_0, window_bounds = array<i64: 8, 128>}, {pipeline_mode = #tpu.pipeline_mode<synchronous>, transform_indices = @transform_1, window_bounds = array<i64: 128, 128>}, {transform_indices = @transform_2, window_bounds = array<i64: 8, 128>}]} {
    %c0 = arith.constant 0 : index
    %c0_0 = arith.constant 0 : index
    %0 = vector.load %arg1[%c0, %c0_0] : memref<8x128xf32, #tpu.memory_space<vmem>>, vector<8x128xf32>
    %c0_1 = arith.constant 0 : index
    %c0_2 = arith.constant 0 : index
    %1 = vector.load %arg2[%c0_1, %c0_2] : memref<128x128xbf16, #tpu.memory_space<vmem>>, vector<128x128xbf16>
    %2 = arith.truncf %0 : vector<8x128xf32> to vector<8x128xbf16>
    %cst = arith.constant dense<0.000000e+00> : vector<8x128xf32>
    %3 = tpu.matmul %2, %1, %cst {dimension_numbers = #tpu.dot_dimension_numbers<[1], [0], [0], [1], [0, 0, 1, 1], [], []>} : vector<8x128xbf16>, vector<128x128xbf16>, vector<8x128xf32> -> vector<8x128xf32>
    %4 = arith.truncf %3 : vector<8x128xf32> to vector<8x128xbf16>
    %c0_3 = arith.constant 0 : index
    %c0_4 = arith.constant 0 : index
    %5 = vector.load %arg3[%c0_3, %c0_4] : memref<8x128xbf16, #tpu.memory_space<vmem>>, vector<8x128xbf16>
    tpu.vector_store %arg3[%c0_3, %c0_4], %4 {strides = array<i32>} : memref<8x128xbf16, #tpu.memory_space<vmem>>, vector<8x128xbf16>,
    return
  }
  func.func @transform_0(%arg0: i32) -> (i32, i32) {
    %c0_i32 = arith.constant 0 : i32
    %c0_i32_0 = arith.constant 0 : i32
    return %arg0, %c0_i32 : i32, i32
  }
  func.func @transform_1(%arg0: i32) -> (i32, i32) {
    %c0_i32 = arith.constant 0 : i32
    %c0_i32_0 = arith.constant 0 : i32
    %c0_i32_1 = arith.constant 0 : i32
    return %c0_i32, %c0_i32_0 : i32, i32
  }
  func.func @transform_2(%arg0: i32) -> (i32, i32) {
    %c0_i32 = arith.constant 0 : i32
    %c0_i32_0 = arith.constant 0 : i32
    return %arg0, %c0_i32 : i32, i32
  }
}

module attributes {stable_mosaic.version = 11 : i64} {
  func.func @kernel(%arg0: i32, %arg1: memref<8x128xbf16, #tpu.memory_space<vmem>>, %arg2: memref<128x512xbf16, #tpu.memory_space<vmem>>, %arg3: memref<8x512xbf16, #tpu.memory_space<vmem>>) attributes {dimension_semantics = [#tpu.dimension_semantics<parallel>], iteration_bounds = array<i64: 1>, scalar_prefetch = 0 : i64, scratch_operands = 0 : i64, tpu.core_type = #tpu.core_type<tc>, window_params = [{transform_indices = @transform_0, window_bounds = array<i64: 8, 128>}, {pipeline_mode = #tpu.pipeline_mode<synchronous>, transform_indices = @transform_1, window_bounds = array<i64: 128, 512>}, {transform_indices = @transform_2, window_bounds = array<i64: 8, 512>}]} {
    %c0 = arith.constant 0 : index
    %c0_0 = arith.constant 0 : index
    %0 = vector.load %arg1[%c0, %c0_0] : memref<8x128xbf16, #tpu.memory_space<vmem>>, vector<8x128xbf16>
    %1 = arith.extf %0 : vector<8x128xbf16> to vector<8x128xf32>
    %c0_1 = arith.constant 0 : index
    %c0_2 = arith.constant 0 : index
    %2 = vector.load %arg2[%c0_1, %c0_2] : memref<128x512xbf16, #tpu.memory_space<vmem>>, vector<128x512xbf16>
    %3 = arith.truncf %1 : vector<8x128xf32> to vector<8x128xbf16>
    %cst = arith.constant dense<0.000000e+00> : vector<8x512xf32>
    %4 = tpu.matmul %3, %2, %cst {dimension_numbers = #tpu.dot_dimension_numbers<[1], [0], [0], [1], [0, 0, 1, 1], [], []>} : vector<8x128xbf16>, vector<128x512xbf16>, vector<8x512xf32> -> vector<8x512xf32>
    %5 = arith.truncf %4 : vector<8x512xf32> to vector<8x512xbf16>
    %c0_3 = arith.constant 0 : index
    %c0_4 = arith.constant 0 : index
    %6 = vector.load %arg3[%c0_3, %c0_4] : memref<8x512xbf16, #tpu.memory_space<vmem>>, vector<8x512xbf16>
    tpu.vector_store %arg3[%c0_3, %c0_4], %5 {strides = array<i32>} : memref<8x512xbf16, #tpu.memory_space<vmem>>, vector<8x512xbf16>,
    return
  }
  func.func @transform_0(%arg0: i32) -> (i32, i32) {
    %c0_i32 = arith.constant 0 : i32
    %c0_i32_0 = arith.constant 0 : i32
    return %arg0, %c0_i32 : i32, i32
  }
  func.func @transform_1(%arg0: i32) -> (i32, i32) {
    %c0_i32 = arith.constant 0 : i32
    %c0_i32_0 = arith.constant 0 : i32
    %c0_i32_1 = arith.constant 0 : i32
    return %c0_i32, %c0_i32_0 : i32, i32
  }
  func.func @transform_2(%arg0: i32) -> (i32, i32) {
    %c0_i32 = arith.constant 0 : i32
    %c0_i32_0 = arith.constant 0 : i32
    return %arg0, %c0_i32 : i32, i32
  }
}

module attributes {stable_mosaic.version = 11 : i64} {
  func.func @kernel(%arg0: i32, %arg1: memref<8x128xf32, #tpu.memory_space<vmem>>, %arg2: memref<128x512xbf16, #tpu.memory_space<vmem>>, %arg3: memref<8x512xbf16, #tpu.memory_space<vmem>>) attributes {dimension_semantics = [#tpu.dimension_semantics<parallel>], iteration_bounds = array<i64: 1>, scalar_prefetch = 0 : i64, scratch_operands = 0 : i64, tpu.core_type = #tpu.core_type<tc>, window_params = [{transform_indices = @transform_0, window_bounds = array<i64: 8, 128>}, {pipeline_mode = #tpu.pipeline_mode<synchronous>, transform_indices = @transform_1, window_bounds = array<i64: 128, 512>}, {transform_indices = @transform_2, window_bounds = array<i64: 8, 512>}]} {
    %c0 = arith.constant 0 : index
    %c0_0 = arith.constant 0 : index
    %0 = vector.load %arg1[%c0, %c0_0] : memref<8x128xf32, #tpu.memory_space<vmem>>, vector<8x128xf32>
    %c0_1 = arith.constant 0 : index
    %c0_2 = arith.constant 0 : index
    %1 = vector.load %arg2[%c0_1, %c0_2] : memref<128x512xbf16, #tpu.memory_space<vmem>>, vector<128x512xbf16>
    %2 = arith.truncf %0 : vector<8x128xf32> to vector<8x128xbf16>
    %cst = arith.constant dense<0.000000e+00> : vector<8x512xf32>
    %3 = tpu.matmul %2, %1, %cst {dimension_numbers = #tpu.dot_dimension_numbers<[1], [0], [0], [1], [0, 0, 1, 1], [], []>} : vector<8x128xbf16>, vector<128x512xbf16>, vector<8x512xf32> -> vector<8x512xf32>
    %4 = arith.truncf %3 : vector<8x512xf32> to vector<8x512xbf16>
    %c0_3 = arith.constant 0 : index
    %c0_4 = arith.constant 0 : index
    %5 = vector.load %arg3[%c0_3, %c0_4] : memref<8x512xbf16, #tpu.memory_space<vmem>>, vector<8x512xbf16>
    tpu.vector_store %arg3[%c0_3, %c0_4], %4 {strides = array<i32>} : memref<8x512xbf16, #tpu.memory_space<vmem>>, vector<8x512xbf16>,
    return
  }
  func.func @transform_0(%arg0: i32) -> (i32, i32) {
    %c0_i32 = arith.constant 0 : i32
    %c0_i32_0 = arith.constant 0 : i32
    return %arg0, %c0_i32 : i32, i32
  }
  func.func @transform_1(%arg0: i32) -> (i32, i32) {
    %c0_i32 = arith.constant 0 : i32
    %c0_i32_0 = arith.constant 0 : i32
    %c0_i32_1 = arith.constant 0 : i32
    return %c0_i32, %c0_i32_0 : i32, i32
  }
  func.func @transform_2(%arg0: i32) -> (i32, i32) {
    %c0_i32 = arith.constant 0 : i32
    %c0_i32_0 = arith.constant 0 : i32
    return %arg0, %c0_i32 : i32, i32
  }
}

</mosaic_0001>

<bundles_post_ra>
// kernel: bridger_forward.33
= control target key start
LH: loop header
LB: loop body
LE: loop exit
PB: predicated region body
PF: predicated region fallthrough
CT: control target
= control target key end

     0   :  { %vm212_vm0 = vcmask 1045504   ;;  %vm115_vm1 = vcmask 97280   ;;  %vm825_vm2 = vcmask 60416   ;;  %s1657_s1 = inlined_call_operand.vmem [shape: bf16[12,8], index: 1, kind: input, shape index: {}]   ;;  %s1658_s0 = inlined_call_operand.vmem [shape: f32[512,12], index: 0, kind: input, shape index: {}]   ;;  %s1659_s2 = inlined_call_operand.vmem [shape: bf16[512,8], index: 2, kind: output, shape index: {}]  }
   0x1   :  { %v1158_v0 = vld [vmem:[%s1657_s1] sm:$0x3f]   ;;  %v13_v2 = vld [vmem:[%s1658_s0 + $0x8] sm:$0xff]  ;;  %v14_v7 = vld [vmem:[%s1658_s0 + $0x10] sm:$0xff] }
   0x2   :  { %v12_v1 = vld [vmem:[%s1658_s0] sm:$0xff]  ;;  %1156 = vmatprep.subr.msk.bf16.mxu0 %vm212_vm0, %v1158_v0  ;;  %1157 = vmatprep.subr.msk.bf16.mxu1 %vm212_vm0, %v1158_v0  ;;  %v214_v4 = vsel %vm212_vm0, %v1158_v0, 0  ;;  %v45_v6 = vld [vmem:[%s1658_s0 + $0x108] sm:$0xff]  ;;  %v15_v8 = vld [vmem:[%s1658_s0 + $0x18] sm:$0xff] }
   0x3   :  { %v44_v3 = vld [vmem:[%s1658_s0 + $0x100] sm:$0xff]  ;;  %v78_v5 = vpack.c.bf16 %v13_v2, %v12_v1  ;;  %1089 = vmatpush3.bf16.msra.mxu0 %v214_v4  ;;  %1155 = vmatpush3.bf16.msra.mxu1 %v214_v4  ;;  %v79_v10 = vpack.c.bf16 %v15_v8, %v14_v7  ;;  %v46_v11 = vld [vmem:[%s1658_s0 + $0x110] sm:$0xff]  ;;  %v47_v12 = vld [vmem:[%s1658_s0 + $0x118] sm:$0xff] }
   0x4   :  { %v94_v9 = vpack.c.bf16 %v45_v6, %v44_v3  ;;  %v16_v13 = vld [vmem:[%s1658_s0 + $0x20] sm:$0xff]  ;;  %v95_v14 = vpack.c.bf16 %v47_v12, %v46_v11  ;;  %v17_v15 = vld [vmem:[%s1658_s0 + $0x28] sm:$0xff]  ;;  %v18_v20 = vld [vmem:[%s1658_s0 + $0x30] sm:$0xff] }
   0x5   :  { %1090 = vmatprep.mubr.msk.bf16.mxu0 %vm115_vm1, %v78_v5  ;;  %v48_v16 = vld [vmem:[%s1658_s0 + $0x120] sm:$0xff]  ;;  %v49_v17 = vld [vmem:[%s1658_s0 + $0x128] sm:$0xff]  ;;  %v80_v18 = vpack.c.bf16 %v17_v15, %v16_v13  ;;  %v19_v21 = vld [vmem:[%s1658_s0 + $0x38] sm:$0xff] }
   0x6   :  { %1122 = vmatprep.mubr.msk.bf16.mxu1 %vm115_vm1, %v94_v9  ;;  %v96_v19 = vpack.c.bf16 %v49_v17, %v48_v16  ;;  %1091 = vmatmul.mubr.msk.bf16.vlgmr.msra.gmra.mrb[0].mxu0 %vm115_vm1, %v79_v10  ;;  %v50_v22 = vld [vmem:[%s1658_s0 + $0x130] sm:$0xff]  ;;  %v51_v23 = vld [vmem:[%s1658_s0 + $0x138] sm:$0xff]  ;;  %v20_v24 = vld [vmem:[%s1658_s0 + $0x40] sm:$0xff]  ;;  %v81_v28 = vpack.c.bf16 %v19_v21, %v18_v20 }
   0x7   :  { %1123 = vmatmul.mubr.msk.bf16.vlgmr.msra.gmra.mrb[0].mxu1 %vm115_vm1, %v95_v14  ;;  %1094 = vmatprep.mubr.msk.bf16.mxu0 %vm115_vm1, %v80_v18  ;;  %v21_v25 = vld [vmem:[%s1658_s0 + $0x48] sm:$0xff]  ;;  %v52_v26 = vld [vmem:[%s1658_s0 + $0x140] sm:$0xff]  ;;  %v97_v29 = vpack.c.bf16 %v51_v23, %v50_v22  ;;  %v22_v32 = vld [vmem:[%s1658_s0 + $0x50] sm:$0xff] }
   0x8   :  { %1126 = vmatprep.mubr.msk.bf16.mxu1 %vm115_vm1, %v96_v19  ;;  %v53_v27 = vld [vmem:[%s1658_s0 + $0x148] sm:$0xff]  ;;  %v82_v30 = vpack.c.bf16 %v21_v25, %v20_v24  ;;  %v23_v33 = vld [vmem:[%s1658_s0 + $0x58] sm:$0xff]  ;;  %v54_v34 = vld [vmem:[%s1658_s0 + $0x150] sm:$0xff] }
   0x9   :  { %v98_v31 = vpack.c.bf16 %v53_v27, %v52_v26  ;;  %v55_v35 = vld [vmem:[%s1658_s0 + $0x158] sm:$0xff]  ;;  %v24_v36 = vld [vmem:[%s1658_s0 + $0x60] sm:$0xff]  ;;  %v25_v37 = vld [vmem:[%s1658_s0 + $0x68] sm:$0xff]  ;;  %v83_v40 = vpack.c.bf16 %v23_v33, %v22_v32 }
   0xa   :  { %v56_v38 = vld [vmem:[%s1658_s0 + $0x160] sm:$0xff]  ;;  %v57_v39 = vld [vmem:[%s1658_s0 + $0x168] sm:$0xff]  ;;  %v99_v41 = vpack.c.bf16 %v55_v35, %v54_v34  ;;  %v84_v42 = vpack.c.bf16 %v25_v37, %v24_v36  ;;  %v26_v44 = vld [vmem:[%s1658_s0 + $0x70] sm:$0xff] }
   0xb   :  { %v100_v43 = vpack.c.bf16 %v57_v39, %v56_v38  ;;  %v27_v45 = vld [vmem:[%s1658_s0 + $0x78] sm:$0xff]  ;;  %v58_v46 = vld [vmem:[%s1658_s0 + $0x170] sm:$0xff]  ;;  %v28_v48 = vld [vmem:[%s1658_s0 + $0x80] sm:$0xff] }
   0xc   :  { %v59_v47 = vld [vmem:[%s1658_s0 + $0x178] sm:$0xff]  ;;  %v29_v49 = vld [vmem:[%s1658_s0 + $0x88] sm:$0xff]  ;;  %v60_v50 = vld [vmem:[%s1658_s0 + $0x180] sm:$0xff]  ;;  %v85_v52 = vpack.c.bf16 %v27_v45, %v26_v44 }
   0xd   :  { %v61_v51 = vld [vmem:[%s1658_s0 + $0x188] sm:$0xff]  ;;  %v101_v53 = vpack.c.bf16 %v59_v47, %v58_v46  ;;  %v86_v54 = vpack.c.bf16 %v29_v49, %v28_v48  ;;  %v30_v56 = vld [vmem:[%s1658_s0 + $0x90] sm:$0xff]  ;;  %v31_v57 = vld [vmem:[%s1658_s0 + $0x98] sm:$0xff] }
   0xe   :  { %1095 = vmatmul.mubr.msk.bf16.gmra.mrb[4].mxu0 %vm115_vm1, %v81_v28  ;;  %v102_v55 = vpack.c.bf16 %v61_v51, %v60_v50  ;;  %v62_v58 = vld [vmem:[%s1658_s0 + $0x190] sm:$0xff]  ;;  %v63_v59 = vld [vmem:[%s1658_s0 + $0x198] sm:$0xff]  ;;  %v32_v60 = vld [vmem:[%s1658_s0 + $0xa0] sm:$0xff]  ;;  %v87_v0 = vpack.c.bf16 %v31_v57, %v30_v56 }
   0xf   :  { %1127 = vmatmul.mubr.msk.bf16.gmra.mrb[4].mxu1 %vm115_vm1, %v97_v29  ;;  %1098 = vmatprep.mubr.msk.bf16.mxu0 %vm115_vm1, %v82_v30  ;;  %v33_v61 = vld [vmem:[%s1658_s0 + $0xa8] sm:$0xff]  ;;  %v64_v62 = vld [vmem:[%s1658_s0 + $0x1a0] sm:$0xff]  ;;  %v103_v1 = vpack.c.bf16 %v63_v59, %v62_v58  ;;  %v34_v4 = vld [vmem:[%s1658_s0 + $0xb0] sm:$0xff] }
  0x10   :  { %1130 = vmatprep.mubr.msk.bf16.mxu1 %vm115_vm1, %v98_v31  ;;  %v65_v63 = vld [vmem:[%s1658_s0 + $0x1a8] sm:$0xff]  ;;  %v88_v2 = vpack.c.bf16 %v33_v61, %v32_v60  ;;  %v35_v5 = vld [vmem:[%s1658_s0 + $0xb8] sm:$0xff]  ;;  %v66_v6 = vld [vmem:[%s1658_s0 + $0x1b0] sm:$0xff] }
  0x11   :  { %v104_v3 = vpack.c.bf16 %v65_v63, %v64_v62  ;;  %v67_v7 = vld [vmem:[%s1658_s0 + $0x1b8] sm:$0xff]  ;;  %v36_v8 = vld [vmem:[%s1658_s0 + $0xc0] sm:$0xff]  ;;  %v37_v9 = vld [vmem:[%s1658_s0 + $0xc8] sm:$0xff]  ;;  %v89_v12 = vpack.c.bf16 %v35_v5, %v34_v4 }
  0x12   :  { %v68_v10 = vld [vmem:[%s1658_s0 + $0x1c0] sm:$0xff]  ;;  %v69_v11 = vld [vmem:[%s1658_s0 + $0x1c8] sm:$0xff]  ;;  %v105_v13 = vpack.c.bf16 %v67_v7, %v66_v6  ;;  %v90_v14 = vpack.c.bf16 %v37_v9, %v36_v8  ;;  %v38_v16 = vld [vmem:[%s1658_s0 + $0xd0] sm:$0xff] }
  0x13   :  { %v106_v15 = vpack.c.bf16 %v69_v11, %v68_v10  ;;  %v39_v17 = vld [vmem:[%s1658_s0 + $0xd8] sm:$0xff]  ;;  %v70_v18 = vld [vmem:[%s1658_s0 + $0x1d0] sm:$0xff]  ;;  %v40_v20 = vld [vmem:[%s1658_s0 + $0xe0] sm:$0xff] }
  0x14   :  { %v71_v19 = vld [vmem:[%s1658_s0 + $0x1d8] sm:$0xff]  ;;  %v41_v21 = vld [vmem:[%s1658_s0 + $0xe8] sm:$0xff]  ;;  %v72_v22 = vld [vmem:[%s1658_s0 + $0x1e0] sm:$0xff]  ;;  %v91_v24 = vpack.c.bf16 %v39_v17, %v38_v16 }
  0x15   :  { %v73_v23 = vld [vmem:[%s1658_s0 + $0x1e8] sm:$0xff]  ;;  %v107_v25 = vpack.c.bf16 %v71_v19, %v70_v18  ;;  %v92_v26 = vpack.c.bf16 %v41_v21, %v40_v20  ;;  %v42_v28 = vld [vmem:[%s1658_s0 + $0xf0] sm:$0xff]  ;;  %v43_v29 = vld [vmem:[%s1658_s0 + $0xf8] sm:$0xff] }
  0x16   :  { %1099 = vmatmul.mubr.msk.bf16.gmra.mrb[8].mxu0 %vm115_vm1, %v83_v40  ;;  %v108_v27 = vpack.c.bf16 %v73_v23, %v72_v22  ;;  %v74_v30 = vld [vmem:[%s1658_s0 + $0x1f0] sm:$0xff]  ;;  %v75_v31 = vld [vmem:[%s1658_s0 + $0x1f8] sm:$0xff]  ;;  %v93_v32 = vpack.c.bf16 %v43_v29, %v42_v28 }
  0x17   :  { %1131 = vmatmul.mubr.msk.bf16.gmra.mrb[8].mxu1 %vm115_vm1, %v99_v41  ;;  %1102 = vmatprep.mubr.msk.bf16.mxu0 %vm115_vm1, %v84_v42  ;;  %v109_v33 = vpack.c.bf16 %v75_v31, %v74_v30 }
  0x18   :  { %1134 = vmatprep.mubr.msk.bf16.mxu1 %vm115_vm1, %v100_v43 }
  0x1e   :  { %1103 = vmatmul.mubr.msk.bf16.gmra.mrb[12].mxu0 %vm115_vm1, %v85_v52 }
  0x1f   :  { %1135 = vmatmul.mubr.msk.bf16.gmra.mrb[12].mxu1 %vm115_vm1, %v101_v53  ;;  %1106 = vmatprep.mubr.msk.bf16.mxu0 %vm115_vm1, %v86_v54 }
  0x20   :  { %1138 = vmatprep.mubr.msk.bf16.mxu1 %vm115_vm1, %v102_v55 }
  0x26   :  { %1107 = vmatmul.mubr.msk.bf16.gmra.mrb[16].mxu0 %vm115_vm1, %v87_v0 }
  0x27   :  { %1139 = vmatmul.mubr.msk.bf16.gmra.mrb[16].mxu1 %vm115_vm1, %v103_v1  ;;  %1110 = vmatprep.mubr.msk.bf16.mxu0 %vm115_vm1, %v88_v2 }
  0x28   :  { %1142 = vmatprep.mubr.msk.bf16.mxu1 %vm115_vm1, %v104_v3 }
  0x2e   :  { %1111 = vmatmul.mubr.msk.bf16.gmra.mrb[20].mxu0 %vm115_vm1, %v89_v12 }
  0x2f   :  { %1143 = vmatmul.mubr.msk.bf16.gmra.mrb[20].mxu1 %vm115_vm1, %v105_v13  ;;  %1114 = vmatprep.mubr.msk.bf16.mxu0 %vm115_vm1, %v90_v14 }
  0x30   :  { %1146 = vmatprep.mubr.msk.bf16.mxu1 %vm115_vm1, %v106_v15 }
  0x36   :  { %1115 = vmatmul.mubr.msk.bf16.gmra.mrb[24].mxu0 %vm115_vm1, %v91_v24 }
  0x37   :  { %1147 = vmatmul.mubr.msk.bf16.gmra.mrb[24].mxu1 %vm115_vm1, %v107_v25  ;;  %1118 = vmatprep.mubr.msk.bf16.mxu0 %vm115_vm1, %v92_v26 }
  0x38   :  { %1150 = vmatprep.mubr.msk.bf16.mxu1 %vm115_vm1, %v108_v27 }
  0x3e   :  { %1119 = vmatmul.mubr.msk.bf16.gmra.mrb[28].mxu0 %vm115_vm1, %v93_v32 }
  0x3f   :  { %1151 = vmatmul.mubr.msk.bf16.gmra.mrb[28].mxu1 %vm115_vm1, %v109_v33 }
  0xd9   :  { %v1092_v34 = vpop.f32.mrb[0].mxu0 }
  0xda   :  { %v1124_v35 = vpop.f32.mrb[0].mxu1  ;;  %v507_v36 = vmax.f32 %v1092_v34, 0.0  ;;  %v250_v38 = vpop.f32.mrb[1].mxu0 }
  0xdb   :  { %v539_v37 = vmax.f32 %v1124_v35, 0.0  ;;  %v378_v39 = vpop.f32.mrb[1].mxu1  ;;  %v505_v40 = vmax.f32 %v250_v38, 0.0  ;;  %v1093_v42 = vpop.f32.mrb[2].mxu0 }
  0xdc   :  { %v537_v41 = vmax.f32 %v378_v39, 0.0  ;;  %v1125_v43 = vpop.f32.mrb[2].mxu1  ;;  %v993_v44 = vpack.c.bf16 %v507_v36, %v507_v36  ;;  %v508_v46 = vmax.f32 %v1093_v42, 0.0  ;;  %v253_v48 = vpop.f32.mrb[3].mxu0 }
  0xdd   :  { %v1025_v45 = vpack.c.bf16 %v539_v37, %v539_v37  ;;  %v540_v47 = vmax.f32 %v1125_v43, 0.0  ;;  %v381_v49 = vpop.f32.mrb[3].mxu1  ;;  %v991_v50 = vpack.c.bf16 %v505_v40, %v505_v40  ;;  %v506_v52 = vmax.f32 %v253_v48, 0.0 }
  0xde   :  { %v1023_v51 = vpack.c.bf16 %v537_v41, %v537_v41  ;;  %v538_v53 = vmax.f32 %v381_v49, 0.0  ;;  %828 = vst.msk [vmem:[%s1659_s2 + $0x8] sm:$0xf] %vm825_vm2, %v993_v44  ;;  %v994_v54 = vpack.c.bf16 %v508_v46, %v508_v46 }
  0xdf   :  { %860 = vst.msk [vmem:[%s1659_s2 + $0x88] sm:$0xf] %vm825_vm2, %v1025_v45  ;;  %v1026_v55 = vpack.c.bf16 %v540_v47, %v540_v47  ;;  %826 = vst.msk [vmem:[%s1659_s2] sm:$0xf] %vm825_vm2, %v991_v50  ;;  %v992_v56 = vpack.c.bf16 %v506_v52, %v506_v52 }
  0xe0   :  { %858 = vst.msk [vmem:[%s1659_s2 + $0x80] sm:$0xf] %vm825_vm2, %v1023_v51  ;;  %v1024_v57 = vpack.c.bf16 %v538_v53, %v538_v53  ;;  %829 = vst.msk [vmem:[%s1659_s2 + $0xc] sm:$0xf] %vm825_vm2, %v994_v54 }
  0xe1   :  { %861 = vst.msk [vmem:[%s1659_s2 + $0x8c] sm:$0xf] %vm825_vm2, %v1026_v55  ;;  %827 = vst.msk [vmem:[%s1659_s2 + $0x4] sm:$0xf] %vm825_vm2, %v992_v56  ;;  %v1096_v58 = vpop.f32.mrb[4].mxu0 }
  0xe2   :  { %859 = vst.msk [vmem:[%s1659_s2 + $0x84] sm:$0xf] %vm825_vm2, %v1024_v57  ;;  %v1128_v59 = vpop.f32.mrb[4].mxu1  ;;  %v511_v60 = vmax.f32 %v1096_v58, 0.0  ;;  %v266_v62 = vpop.f32.mrb[5].mxu0 }
  0xe3   :  { %v543_v61 = vmax.f32 %v1128_v59, 0.0  ;;  %v394_v63 = vpop.f32.mrb[5].mxu1  ;;  %v509_v0 = vmax.f32 %v266_v62, 0.0  ;;  %v1097_v2 = vpop.f32.mrb[6].mxu0 }
  0xe4   :  { %v541_v1 = vmax.f32 %v394_v63, 0.0  ;;  %v1129_v3 = vpop.f32.mrb[6].mxu1  ;;  %v997_v4 = vpack.c.bf16 %v511_v60, %v511_v60  ;;  %v512_v6 = vmax.f32 %v1097_v2, 0.0  ;;  %v269_v8 = vpop.f32.mrb[7].mxu0 }
  0xe5   :  { %v1029_v5 = vpack.c.bf16 %v543_v61, %v543_v61  ;;  %v544_v7 = vmax.f32 %v1129_v3, 0.0  ;;  %v397_v9 = vpop.f32.mrb[7].mxu1  ;;  %v995_v10 = vpack.c.bf16 %v509_v0, %v509_v0  ;;  %v510_v12 = vmax.f32 %v269_v8, 0.0 }
  0xe6   :  { %v1027_v11 = vpack.c.bf16 %v541_v1, %v541_v1  ;;  %v542_v13 = vmax.f32 %v397_v9, 0.0  ;;  %832 = vst.msk [vmem:[%s1659_s2 + $0x18] sm:$0xf] %vm825_vm2, %v997_v4  ;;  %v998_v14 = vpack.c.bf16 %v512_v6, %v512_v6 }
  0xe7   :  { %864 = vst.msk [vmem:[%s1659_s2 + $0x98] sm:$0xf] %vm825_vm2, %v1029_v5  ;;  %v1030_v15 = vpack.c.bf16 %v544_v7, %v544_v7  ;;  %830 = vst.msk [vmem:[%s1659_s2 + $0x10] sm:$0xf] %vm825_vm2, %v995_v10  ;;  %v996_v16 = vpack.c.bf16 %v510_v12, %v510_v12 }
  0xe8   :  { %862 = vst.msk [vmem:[%s1659_s2 + $0x90] sm:$0xf] %vm825_vm2, %v1027_v11  ;;  %v1028_v17 = vpack.c.bf16 %v542_v13, %v542_v13  ;;  %833 = vst.msk [vmem:[%s1659_s2 + $0x1c] sm:$0xf] %vm825_vm2, %v998_v14 }
  0xe9   :  { %865 = vst.msk [vmem:[%s1659_s2 + $0x9c] sm:$0xf] %vm825_vm2, %v1030_v15  ;;  %831 = vst.msk [vmem:[%s1659_s2 + $0x14] sm:$0xf] %vm825_vm2, %v996_v16  ;;  %v1100_v18 = vpop.f32.mrb[8].mxu0 }
  0xea   :  { %863 = vst.msk [vmem:[%s1659_s2 + $0x94] sm:$0xf] %vm825_vm2, %v1028_v17  ;;  %v1132_v19 = vpop.f32.mrb[8].mxu1  ;;  %v515_v20 = vmax.f32 %v1100_v18, 0.0  ;;  %v282_v22 = vpop.f32.mrb[9].mxu0 }
  0xeb   :  { %v547_v21 = vmax.f32 %v1132_v19, 0.0  ;;  %v410_v23 = vpop.f32.mrb[9].mxu1  ;;  %v513_v24 = vmax.f32 %v282_v22, 0.0  ;;  %v1101_v26 = vpop.f32.mrb[10].mxu0 }
  0xec   :  { %v545_v25 = vmax.f32 %v410_v23, 0.0  ;;  %v1133_v27 = vpop.f32.mrb[10].mxu1  ;;  %v1001_v28 = vpack.c.bf16 %v515_v20, %v515_v20  ;;  %v516_v30 = vmax.f32 %v1101_v26, 0.0  ;;  %v285_v32 = vpop.f32.mrb[11].mxu0 }
  0xed   :  { %v1033_v29 = vpack.c.bf16 %v547_v21, %v547_v21  ;;  %v548_v31 = vmax.f32 %v1133_v27, 0.0  ;;  %v413_v33 = vpop.f32.mrb[11].mxu1  ;;  %v999_v34 = vpack.c.bf16 %v513_v24, %v513_v24  ;;  %v514_v36 = vmax.f32 %v285_v32, 0.0 }
  0xee   :  { %v1031_v35 = vpack.c.bf16 %v545_v25, %v545_v25  ;;  %v546_v37 = vmax.f32 %v413_v33, 0.0  ;;  %836 = vst.msk [vmem:[%s1659_s2 + $0x28] sm:$0xf] %vm825_vm2, %v1001_v28  ;;  %v1002_v38 = vpack.c.bf16 %v516_v30, %v516_v30 }
  0xef   :  { %868 = vst.msk [vmem:[%s1659_s2 + $0xa8] sm:$0xf] %vm825_vm2, %v1033_v29  ;;  %v1034_v39 = vpack.c.bf16 %v548_v31, %v548_v31  ;;  %834 = vst.msk [vmem:[%s1659_s2 + $0x20] sm:$0xf] %vm825_vm2, %v999_v34  ;;  %v1000_v40 = vpack.c.bf16 %v514_v36, %v514_v36 }
  0xf0   :  { %866 = vst.msk [vmem:[%s1659_s2 + $0xa0] sm:$0xf] %vm825_vm2, %v1031_v35  ;;  %v1032_v41 = vpack.c.bf16 %v546_v37, %v546_v37  ;;  %837 = vst.msk [vmem:[%s1659_s2 + $0x2c] sm:$0xf] %vm825_vm2, %v1002_v38 }
  0xf1   :  { %869 = vst.msk [vmem:[%s1659_s2 + $0xac] sm:$0xf] %vm825_vm2, %v1034_v39  ;;  %835 = vst.msk [vmem:[%s1659_s2 + $0x24] sm:$0xf] %vm825_vm2, %v1000_v40  ;;  %v1104_v42 = vpop.f32.mrb[12].mxu0 }
  0xf2   :  { %867 = vst.msk [vmem:[%s1659_s2 + $0xa4] sm:$0xf] %vm825_vm2, %v1032_v41  ;;  %v1136_v43 = vpop.f32.mrb[12].mxu1  ;;  %v519_v44 = vmax.f32 %v1104_v42, 0.0  ;;  %v298_v46 = vpop.f32.mrb[13].mxu0 }
  0xf3   :  { %v551_v45 = vmax.f32 %v1136_v43, 0.0  ;;  %v426_v47 = vpop.f32.mrb[13].mxu1  ;;  %v517_v48 = vmax.f32 %v298_v46, 0.0  ;;  %v1105_v50 = vpop.f32.mrb[14].mxu0 }
  0xf4   :  { %v549_v49 = vmax.f32 %v426_v47, 0.0  ;;  %v1137_v51 = vpop.f32.mrb[14].mxu1  ;;  %v1005_v52 = vpack.c.bf16 %v519_v44, %v519_v44  ;;  %v520_v54 = vmax.f32 %v1105_v50, 0.0  ;;  %v301_v56 = vpop.f32.mrb[15].mxu0 }
  0xf5   :  { %v1037_v53 = vpack.c.bf16 %v551_v45, %v551_v45  ;;  %v552_v55 = vmax.f32 %v1137_v51, 0.0  ;;  %v429_v57 = vpop.f32.mrb[15].mxu1  ;;  %v1003_v58 = vpack.c.bf16 %v517_v48, %v517_v48  ;;  %v518_v60 = vmax.f32 %v301_v56, 0.0 }
  0xf6   :  { %v1035_v59 = vpack.c.bf16 %v549_v49, %v549_v49  ;;  %v550_v61 = vmax.f32 %v429_v57, 0.0  ;;  %840 = vst.msk [vmem:[%s1659_s2 + $0x38] sm:$0xf] %vm825_vm2, %v1005_v52  ;;  %v1006_v62 = vpack.c.bf16 %v520_v54, %v520_v54 }
  0xf7   :  { %872 = vst.msk [vmem:[%s1659_s2 + $0xb8] sm:$0xf] %vm825_vm2, %v1037_v53  ;;  %v1038_v63 = vpack.c.bf16 %v552_v55, %v552_v55  ;;  %838 = vst.msk [vmem:[%s1659_s2 + $0x30] sm:$0xf] %vm825_vm2, %v1003_v58  ;;  %v1004_v0 = vpack.c.bf16 %v518_v60, %v518_v60 }
  0xf8   :  { %870 = vst.msk [vmem:[%s1659_s2 + $0xb0] sm:$0xf] %vm825_vm2, %v1035_v59  ;;  %v1036_v1 = vpack.c.bf16 %v550_v61, %v550_v61  ;;  %841 = vst.msk [vmem:[%s1659_s2 + $0x3c] sm:$0xf] %vm825_vm2, %v1006_v62 }
  0xf9   :  { %873 = vst.msk [vmem:[%s1659_s2 + $0xbc] sm:$0xf] %vm825_vm2, %v1038_v63  ;;  %839 = vst.msk [vmem:[%s1659_s2 + $0x34] sm:$0xf] %vm825_vm2, %v1004_v0  ;;  %v1108_v2 = vpop.f32.mrb[16].mxu0 }
  0xfa   :  { %871 = vst.msk [vmem:[%s1659_s2 + $0xb4] sm:$0xf] %vm825_vm2, %v1036_v1  ;;  %v1140_v3 = vpop.f32.mrb[16].mxu1  ;;  %v523_v4 = vmax.f32 %v1108_v2, 0.0  ;;  %v314_v6 = vpop.f32.mrb[17].mxu0 }
  0xfb   :  { %v555_v5 = vmax.f32 %v1140_v3, 0.0  ;;  %v442_v7 = vpop.f32.mrb[17].mxu1  ;;  %v521_v8 = vmax.f32 %v314_v6, 0.0  ;;  %v1109_v10 = vpop.f32.mrb[18].mxu0 }
  0xfc   :  { %v553_v9 = vmax.f32 %v442_v7, 0.0  ;;  %v1141_v11 = vpop.f32.mrb[18].mxu1  ;;  %v1009_v12 = vpack.c.bf16 %v523_v4, %v523_v4  ;;  %v524_v14 = vmax.f32 %v1109_v10, 0.0  ;;  %v317_v16 = vpop.f32.mrb[19].mxu0 }
  0xfd   :  { %v1041_v13 = vpack.c.bf16 %v555_v5, %v555_v5  ;;  %v556_v15 = vmax.f32 %v1141_v11, 0.0  ;;  %v445_v17 = vpop.f32.mrb[19].mxu1  ;;  %v1007_v18 = vpack.c.bf16 %v521_v8, %v521_v8  ;;  %v522_v20 = vmax.f32 %v317_v16, 0.0 }
  0xfe   :  { %v1039_v19 = vpack.c.bf16 %v553_v9, %v553_v9  ;;  %v554_v21 = vmax.f32 %v445_v17, 0.0  ;;  %844 = vst.msk [vmem:[%s1659_s2 + $0x48] sm:$0xf] %vm825_vm2, %v1009_v12  ;;  %v1010_v22 = vpack.c.bf16 %v524_v14, %v524_v14 }
  0xff   :  { %876 = vst.msk [vmem:[%s1659_s2 + $0xc8] sm:$0xf] %vm825_vm2, %v1041_v13  ;;  %v1042_v23 = vpack.c.bf16 %v556_v15, %v556_v15  ;;  %842 = vst.msk [vmem:[%s1659_s2 + $0x40] sm:$0xf] %vm825_vm2, %v1007_v18  ;;  %v1008_v24 = vpack.c.bf16 %v522_v20, %v522_v20 }
 0x100   :  { %874 = vst.msk [vmem:[%s1659_s2 + $0xc0] sm:$0xf] %vm825_vm2, %v1039_v19  ;;  %v1040_v25 = vpack.c.bf16 %v554_v21, %v554_v21  ;;  %845 = vst.msk [vmem:[%s1659_s2 + $0x4c] sm:$0xf] %vm825_vm2, %v1010_v22 }
 0x101   :  { %877 = vst.msk [vmem:[%s1659_s2 + $0xcc] sm:$0xf] %vm825_vm2, %v1042_v23  ;;  %843 = vst.msk [vmem:[%s1659_s2 + $0x44] sm:$0xf] %vm825_vm2, %v1008_v24  ;;  %v1112_v26 = vpop.f32.mrb[20].mxu0 }
 0x102   :  { %875 = vst.msk [vmem:[%s1659_s2 + $0xc4] sm:$0xf] %vm825_vm2, %v1040_v25  ;;  %v1144_v27 = vpop.f32.mrb[20].mxu1  ;;  %v527_v28 = vmax.f32 %v1112_v26, 0.0  ;;  %v330_v30 = vpop.f32.mrb[21].mxu0 }
 0x103   :  { %v559_v29 = vmax.f32 %v1144_v27, 0.0  ;;  %v458_v31 = vpop.f32.mrb[21].mxu1  ;;  %v525_v32 = vmax.f32 %v330_v30, 0.0  ;;  %v1113_v34 = vpop.f32.mrb[22].mxu0 }
 0x104   :  { %v557_v33 = vmax.f32 %v458_v31, 0.0  ;;  %v1145_v35 = vpop.f32.mrb[22].mxu1  ;;  %v1013_v36 = vpack.c.bf16 %v527_v28, %v527_v28  ;;  %v528_v38 = vmax.f32 %v1113_v34, 0.0  ;;  %v333_v40 = vpop.f32.mrb[23].mxu0 }
 0x105   :  { %v1045_v37 = vpack.c.bf16 %v559_v29, %v559_v29  ;;  %v560_v39 = vmax.f32 %v1145_v35, 0.0  ;;  %v461_v41 = vpop.f32.mrb[23].mxu1  ;;  %v1011_v42 = vpack.c.bf16 %v525_v32, %v525_v32  ;;  %v526_v44 = vmax.f32 %v333_v40, 0.0 }
 0x106   :  { %v1043_v43 = vpack.c.bf16 %v557_v33, %v557_v33  ;;  %v558_v45 = vmax.f32 %v461_v41, 0.0  ;;  %848 = vst.msk [vmem:[%s1659_s2 + $0x58] sm:$0xf] %vm825_vm2, %v1013_v36  ;;  %v1014_v46 = vpack.c.bf16 %v528_v38, %v528_v38 }
 0x107   :  { %880 = vst.msk [vmem:[%s1659_s2 + $0xd8] sm:$0xf] %vm825_vm2, %v1045_v37  ;;  %v1046_v47 = vpack.c.bf16 %v560_v39, %v560_v39  ;;  %846 = vst.msk [vmem:[%s1659_s2 + $0x50] sm:$0xf] %vm825_vm2, %v1011_v42  ;;  %v1012_v48 = vpack.c.bf16 %v526_v44, %v526_v44 }
 0x108   :  { %878 = vst.msk [vmem:[%s1659_s2 + $0xd0] sm:$0xf] %vm825_vm2, %v1043_v43  ;;  %v1044_v49 = vpack.c.bf16 %v558_v45, %v558_v45  ;;  %849 = vst.msk [vmem:[%s1659_s2 + $0x5c] sm:$0xf] %vm825_vm2, %v1014_v46 }
 0x109   :  { %881 = vst.msk [vmem:[%s1659_s2 + $0xdc] sm:$0xf] %vm825_vm2, %v1046_v47  ;;  %847 = vst.msk [vmem:[%s1659_s2 + $0x54] sm:$0xf] %vm825_vm2, %v1012_v48  ;;  %v1116_v50 = vpop.f32.mrb[24].mxu0 }
 0x10a   :  { %879 = vst.msk [vmem:[%s1659_s2 + $0xd4] sm:$0xf] %vm825_vm2, %v1044_v49  ;;  %v1148_v51 = vpop.f32.mrb[24].mxu1  ;;  %v531_v52 = vmax.f32 %v1116_v50, 0.0  ;;  %v346_v54 = vpop.f32.mrb[25].mxu0 }
 0x10b   :  { %v563_v53 = vmax.f32 %v1148_v51, 0.0  ;;  %v474_v55 = vpop.f32.mrb[25].mxu1  ;;  %v529_v56 = vmax.f32 %v346_v54, 0.0  ;;  %v1117_v58 = vpop.f32.mrb[26].mxu0 }
 0x10c   :  { %v561_v57 = vmax.f32 %v474_v55, 0.0  ;;  %v1149_v59 = vpop.f32.mrb[26].mxu1  ;;  %v1017_v60 = vpack.c.bf16 %v531_v52, %v531_v52  ;;  %v532_v62 = vmax.f32 %v1117_v58, 0.0  ;;  %v349_v0 = vpop.f32.mrb[27].mxu0 }
 0x10d   :  { %v1049_v61 = vpack.c.bf16 %v563_v53, %v563_v53  ;;  %v564_v63 = vmax.f32 %v1149_v59, 0.0  ;;  %v477_v1 = vpop.f32.mrb[27].mxu1  ;;  %v1015_v2 = vpack.c.bf16 %v529_v56, %v529_v56  ;;  %v530_v4 = vmax.f32 %v349_v0, 0.0 }
 0x10e   :  { %v1047_v3 = vpack.c.bf16 %v561_v57, %v561_v57  ;;  %v562_v5 = vmax.f32 %v477_v1, 0.0  ;;  %852 = vst.msk [vmem:[%s1659_s2 + $0x68] sm:$0xf] %vm825_vm2, %v1017_v60  ;;  %v1018_v6 = vpack.c.bf16 %v532_v62, %v532_v62 }
 0x10f   :  { %884 = vst.msk [vmem:[%s1659_s2 + $0xe8] sm:$0xf] %vm825_vm2, %v1049_v61  ;;  %v1050_v7 = vpack.c.bf16 %v564_v63, %v564_v63  ;;  %850 = vst.msk [vmem:[%s1659_s2 + $0x60] sm:$0xf] %vm825_vm2, %v1015_v2  ;;  %v1016_v8 = vpack.c.bf16 %v530_v4, %v530_v4 }
 0x110   :  { %882 = vst.msk [vmem:[%s1659_s2 + $0xe0] sm:$0xf] %vm825_vm2, %v1047_v3  ;;  %v1048_v9 = vpack.c.bf16 %v562_v5, %v562_v5  ;;  %853 = vst.msk [vmem:[%s1659_s2 + $0x6c] sm:$0xf] %vm825_vm2, %v1018_v6 }
 0x111   :  { %885 = vst.msk [vmem:[%s1659_s2 + $0xec] sm:$0xf] %vm825_vm2, %v1050_v7  ;;  %851 = vst.msk [vmem:[%s1659_s2 + $0x64] sm:$0xf] %vm825_vm2, %v1016_v8  ;;  %v1120_v10 = vpop.f32.mrb[28].mxu0 }
 0x112   :  { %883 = vst.msk [vmem:[%s1659_s2 + $0xe4] sm:$0xf] %vm825_vm2, %v1048_v9  ;;  %v1152_v11 = vpop.f32.mrb[28].mxu1  ;;  %v535_v12 = vmax.f32 %v1120_v10, 0.0  ;;  %v362_v14 = vpop.f32.mrb[29].mxu0 }
 0x113   :  { %v567_v13 = vmax.f32 %v1152_v11, 0.0  ;;  %v490_v15 = vpop.f32.mrb[29].mxu1  ;;  %v533_v16 = vmax.f32 %v362_v14, 0.0  ;;  %v1121_v18 = vpop.f32.mrb[30].mxu0 }
 0x114   :  { %v565_v17 = vmax.f32 %v490_v15, 0.0  ;;  %v1153_v19 = vpop.f32.mrb[30].mxu1  ;;  %v1021_v20 = vpack.c.bf16 %v535_v12, %v535_v12  ;;  %v536_v22 = vmax.f32 %v1121_v18, 0.0  ;;  %v365_v24 = vpop.f32.mrb[31].mxu0 }
 0x115   :  { %v1053_v21 = vpack.c.bf16 %v567_v13, %v567_v13  ;;  %v568_v23 = vmax.f32 %v1153_v19, 0.0  ;;  %v493_v25 = vpop.f32.mrb[31].mxu1  ;;  %v1019_v26 = vpack.c.bf16 %v533_v16, %v533_v16  ;;  %v534_v28 = vmax.f32 %v365_v24, 0.0 }
 0x116   :  { %v1051_v27 = vpack.c.bf16 %v565_v17, %v565_v17  ;;  %v566_v29 = vmax.f32 %v493_v25, 0.0  ;;  %856 = vst.msk [vmem:[%s1659_s2 + $0x78] sm:$0xf] %vm825_vm2, %v1021_v20  ;;  %v1022_v30 = vpack.c.bf16 %v536_v22, %v536_v22 }
 0x117   :  { %888 = vst.msk [vmem:[%s1659_s2 + $0xf8] sm:$0xf] %vm825_vm2, %v1053_v21  ;;  %v1054_v31 = vpack.c.bf16 %v568_v23, %v568_v23  ;;  %854 = vst.msk [vmem:[%s1659_s2 + $0x70] sm:$0xf] %vm825_vm2, %v1019_v26  ;;  %v1020_v32 = vpack.c.bf16 %v534_v28, %v534_v28 }
 0x118   :  { %886 = vst.msk [vmem:[%s1659_s2 + $0xf0] sm:$0xf] %vm825_vm2, %v1051_v27  ;;  %v1052_v33 = vpack.c.bf16 %v566_v29, %v566_v29  ;;  %857 = vst.msk [vmem:[%s1659_s2 + $0x7c] sm:$0xf] %vm825_vm2, %v1022_v30 }
 0x119   :  { %889 = vst.msk [vmem:[%s1659_s2 + $0xfc] sm:$0xf] %vm825_vm2, %v1054_v31  ;;  %855 = vst.msk [vmem:[%s1659_s2 + $0x74] sm:$0xf] %vm825_vm2, %v1020_v32 }
 0x11a   :  { %887 = vst.msk [vmem:[%s1659_s2 + $0xf4] sm:$0xf] %vm825_vm2, %v1052_v33 }

// kernel: bridger_forward.34
= control target key start
LH: loop header
LB: loop body
LE: loop exit
PB: predicated region body
PF: predicated region fallthrough
CT: control target
= control target key end

     0   :  { %vm334_vm0 = vcmask 1043456   ;;  %vm237_vm1 = vcmask 64512   ;;  %vm947_vm2 = vcmask 60416   ;;  %s1745_s1 = inlined_call_operand.vmem [shape: bf16[8,8], index: 1, kind: input, shape index: {}]   ;;  %s1746_s0 = inlined_call_operand.vmem [shape: bf16[512,8], index: 0, kind: input, shape index: {}]   ;;  %s1747_s2 = inlined_call_operand.vmem [shape: bf16[512,8], index: 2, kind: output, shape index: {}]  }
   0x1   :  { %v76_v0 = vld [vmem:[%s1745_s1] sm:$0xf]  ;;  %v1313_v4 = vld [vmem:[%s1746_s0 + $0x8] sm:$0xff]   ;;  %v1315_v6 = vld [vmem:[%s1746_s0 + $0x10] sm:$0xff]  }
   0x2   :  { %1309 = vmatprep.subr.msk.bf16.mxu0 %vm334_vm0, %v76_v0  ;;  %1310 = vmatprep.subr.msk.bf16.mxu1 %vm334_vm0, %v76_v0  ;;  %v336_v1 = vsel %vm334_vm0, %v76_v0, 0  ;;  %v1311_v2 = vld [vmem:[%s1746_s0] sm:$0xff]   ;;  %v1314_v5 = vld [vmem:[%s1746_s0 + $0x88] sm:$0xff]   ;;  %v1316_v7 = vld [vmem:[%s1746_s0 + $0x90] sm:$0xff]  }
   0x3   :  { %1242 = vmatpush3.bf16.msra.mxu0 %v336_v1  ;;  %1308 = vmatpush3.bf16.msra.mxu1 %v336_v1  ;;  %v1312_v3 = vld [vmem:[%s1746_s0 + $0x80] sm:$0xff]   ;;  %v1317_v8 = vld [vmem:[%s1746_s0 + $0x18] sm:$0xff]   ;;  %v1321_v12 = vld [vmem:[%s1746_s0 + $0x28] sm:$0xff]  }
   0x4   :  { %1243 = vmatprep.mubr.msk.bf16.mxu0 %vm237_vm1, %v1311_v2  ;;  %1275 = vmatprep.mubr.msk.bf16.mxu1 %vm237_vm1, %v1312_v3  ;;  %v1318_v9 = vld [vmem:[%s1746_s0 + $0x98] sm:$0xff]   ;;  %v1319_v10 = vld [vmem:[%s1746_s0 + $0x20] sm:$0xff]   ;;  %v1322_v13 = vld [vmem:[%s1746_s0 + $0xa8] sm:$0xff]  }
   0x5   :  { %v1320_v11 = vld [vmem:[%s1746_s0 + $0xa0] sm:$0xff]   ;;  %v1323_v14 = vld [vmem:[%s1746_s0 + $0x30] sm:$0xff]   ;;  %v1325_v16 = vld [vmem:[%s1746_s0 + $0x38] sm:$0xff]  }
   0x6   :  { %1244 = vmatmul.mubr.msk.bf16.vlgmr.msra.gmra.mrb[0].mxu0 %vm237_vm1, %v1313_v4  ;;  %1276 = vmatmul.mubr.msk.bf16.vlgmr.msra.gmra.mrb[0].mxu1 %vm237_vm1, %v1314_v5  ;;  %v1324_v15 = vld [vmem:[%s1746_s0 + $0xb0] sm:$0xff]   ;;  %v1326_v17 = vld [vmem:[%s1746_s0 + $0xb8] sm:$0xff]   ;;  %v1327_v18 = vld [vmem:[%s1746_s0 + $0x40] sm:$0xff]  }
   0x7   :  { %1247 = vmatprep.mubr.msk.bf16.mxu0 %vm237_vm1, %v1315_v6  ;;  %1279 = vmatprep.mubr.msk.bf16.mxu1 %vm237_vm1, %v1316_v7  ;;  %v1328_v19 = vld [vmem:[%s1746_s0 + $0xc0] sm:$0xff]   ;;  %v1329_v20 = vld [vmem:[%s1746_s0 + $0x48] sm:$0xff]   ;;  %v1331_v22 = vld [vmem:[%s1746_s0 + $0x50] sm:$0xff]  }
   0x8   :  { %v1330_v21 = vld [vmem:[%s1746_s0 + $0xc8] sm:$0xff]   ;;  %v1332_v23 = vld [vmem:[%s1746_s0 + $0xd0] sm:$0xff]   ;;  %v1333_v24 = vld [vmem:[%s1746_s0 + $0x58] sm:$0xff]  }
   0x9   :  { %v1334_v25 = vld [vmem:[%s1746_s0 + $0xd8] sm:$0xff]   ;;  %v1335_v26 = vld [vmem:[%s1746_s0 + $0x60] sm:$0xff]   ;;  %v1337_v28 = vld [vmem:[%s1746_s0 + $0x68] sm:$0xff]  }
   0xa   :  { %v1336_v27 = vld [vmem:[%s1746_s0 + $0xe0] sm:$0xff]   ;;  %v1338_v29 = vld [vmem:[%s1746_s0 + $0xe8] sm:$0xff]   ;;  %v1339_v30 = vld [vmem:[%s1746_s0 + $0x70] sm:$0xff]  }
   0xb   :  { %v1340_v31 = vld [vmem:[%s1746_s0 + $0xf0] sm:$0xff]   ;;  %v1341_v32 = vld [vmem:[%s1746_s0 + $0x78] sm:$0xff]  }
   0xc   :  { %v1342_v33 = vld [vmem:[%s1746_s0 + $0xf8] sm:$0xff]  }
   0xe   :  { %1248 = vmatmul.mubr.msk.bf16.gmra.mrb[4].mxu0 %vm237_vm1, %v1317_v8  ;;  %1280 = vmatmul.mubr.msk.bf16.gmra.mrb[4].mxu1 %vm237_vm1, %v1318_v9 }
   0xf   :  { %1251 = vmatprep.mubr.msk.bf16.mxu0 %vm237_vm1, %v1319_v10  ;;  %1283 = vmatprep.mubr.msk.bf16.mxu1 %vm237_vm1, %v1320_v11 }
  0x16   :  { %1252 = vmatmul.mubr.msk.bf16.gmra.mrb[8].mxu0 %vm237_vm1, %v1321_v12  ;;  %1284 = vmatmul.mubr.msk.bf16.gmra.mrb[8].mxu1 %vm237_vm1, %v1322_v13 }
  0x17   :  { %1255 = vmatprep.mubr.msk.bf16.mxu0 %vm237_vm1, %v1323_v14  ;;  %1287 = vmatprep.mubr.msk.bf16.mxu1 %vm237_vm1, %v1324_v15 }
  0x1e   :  { %1256 = vmatmul.mubr.msk.bf16.gmra.mrb[12].mxu0 %vm237_vm1, %v1325_v16  ;;  %1288 = vmatmul.mubr.msk.bf16.gmra.mrb[12].mxu1 %vm237_vm1, %v1326_v17 }
  0x1f   :  { %1259 = vmatprep.mubr.msk.bf16.mxu0 %vm237_vm1, %v1327_v18  ;;  %1291 = vmatprep.mubr.msk.bf16.mxu1 %vm237_vm1, %v1328_v19 }
  0x26   :  { %1260 = vmatmul.mubr.msk.bf16.gmra.mrb[16].mxu0 %vm237_vm1, %v1329_v20  ;;  %1292 = vmatmul.mubr.msk.bf16.gmra.mrb[16].mxu1 %vm237_vm1, %v1330_v21 }
  0x27   :  { %1263 = vmatprep.mubr.msk.bf16.mxu0 %vm237_vm1, %v1331_v22  ;;  %1295 = vmatprep.mubr.msk.bf16.mxu1 %vm237_vm1, %v1332_v23 }
  0x2e   :  { %1264 = vmatmul.mubr.msk.bf16.gmra.mrb[20].mxu0 %vm237_vm1, %v1333_v24  ;;  %1296 = vmatmul.mubr.msk.bf16.gmra.mrb[20].mxu1 %vm237_vm1, %v1334_v25 }
  0x2f   :  { %1267 = vmatprep.mubr.msk.bf16.mxu0 %vm237_vm1, %v1335_v26  ;;  %1299 = vmatprep.mubr.msk.bf16.mxu1 %vm237_vm1, %v1336_v27 }
  0x36   :  { %1268 = vmatmul.mubr.msk.bf16.gmra.mrb[24].mxu0 %vm237_vm1, %v1337_v28  ;;  %1300 = vmatmul.mubr.msk.bf16.gmra.mrb[24].mxu1 %vm237_vm1, %v1338_v29 }
  0x37   :  { %1271 = vmatprep.mubr.msk.bf16.mxu0 %vm237_vm1, %v1339_v30  ;;  %1303 = vmatprep.mubr.msk.bf16.mxu1 %vm237_vm1, %v1340_v31 }
  0x3e   :  { %1272 = vmatmul.mubr.msk.bf16.gmra.mrb[28].mxu0 %vm237_vm1, %v1341_v32  ;;  %1304 = vmatmul.mubr.msk.bf16.gmra.mrb[28].mxu1 %vm237_vm1, %v1342_v33 }
  0xd9   :  { %v1245_v34 = vpop.f32.mrb[0].mxu0  ;;  %v1277_v36 = vpop.f32.mrb[0].mxu1 }
  0xda   :  { %v629_v35 = vmax.f32 %v1245_v34, 0.0  ;;  %v372_v37 = vpop.f32.mrb[1].mxu0  ;;  %v661_v38 = vmax.f32 %v1277_v36, 0.0  ;;  %v500_v40 = vpop.f32.mrb[1].mxu1 }
  0xdb   :  { %v627_v39 = vmax.f32 %v372_v37, 0.0  ;;  %v1246_v41 = vpop.f32.mrb[2].mxu0  ;;  %v659_v43 = vmax.f32 %v500_v40, 0.0  ;;  %v1278_v45 = vpop.f32.mrb[2].mxu1 }
  0xdc   :  { %v1146_v42 = vpack.c.bf16 %v629_v35, %v629_v35  ;;  %v630_v44 = vmax.f32 %v1246_v41, 0.0  ;;  %v375_v46 = vpop.f32.mrb[3].mxu0  ;;  %v1178_v47 = vpack.c.bf16 %v661_v38, %v661_v38  ;;  %v662_v49 = vmax.f32 %v1278_v45, 0.0  ;;  %v503_v51 = vpop.f32.mrb[3].mxu1 }
  0xdd   :  { %v1144_v48 = vpack.c.bf16 %v627_v39, %v627_v39  ;;  %v628_v50 = vmax.f32 %v375_v46, 0.0  ;;  %v1176_v52 = vpack.c.bf16 %v659_v43, %v659_v43  ;;  %v660_v54 = vmax.f32 %v503_v51, 0.0 }
  0xde   :  { %950 = vst.msk [vmem:[%s1747_s2 + $0x8] sm:$0xf] %vm947_vm2, %v1146_v42  ;;  %v1147_v53 = vpack.c.bf16 %v630_v44, %v630_v44  ;;  %982 = vst.msk [vmem:[%s1747_s2 + $0x88] sm:$0xf] %vm947_vm2, %v1178_v47  ;;  %v1179_v55 = vpack.c.bf16 %v662_v49, %v662_v49 }
  0xdf   :  { %948 = vst.msk [vmem:[%s1747_s2] sm:$0xf] %vm947_vm2, %v1144_v48  ;;  %v1145_v56 = vpack.c.bf16 %v628_v50, %v628_v50  ;;  %980 = vst.msk [vmem:[%s1747_s2 + $0x80] sm:$0xf] %vm947_vm2, %v1176_v52  ;;  %v1177_v57 = vpack.c.bf16 %v660_v54, %v660_v54 }
  0xe0   :  { %951 = vst.msk [vmem:[%s1747_s2 + $0xc] sm:$0xf] %vm947_vm2, %v1147_v53  ;;  %983 = vst.msk [vmem:[%s1747_s2 + $0x8c] sm:$0xf] %vm947_vm2, %v1179_v55 }
  0xe1   :  { %949 = vst.msk [vmem:[%s1747_s2 + $0x4] sm:$0xf] %vm947_vm2, %v1145_v56  ;;  %v1249_v58 = vpop.f32.mrb[4].mxu0  ;;  %981 = vst.msk [vmem:[%s1747_s2 + $0x84] sm:$0xf] %vm947_vm2, %v1177_v57  ;;  %v1281_v60 = vpop.f32.mrb[4].mxu1 }
  0xe2   :  { %v633_v59 = vmax.f32 %v1249_v58, 0.0  ;;  %v388_v61 = vpop.f32.mrb[5].mxu0  ;;  %v665_v62 = vmax.f32 %v1281_v60, 0.0  ;;  %v516_v0 = vpop.f32.mrb[5].mxu1 }
  0xe3   :  { %v631_v63 = vmax.f32 %v388_v61, 0.0  ;;  %v1250_v1 = vpop.f32.mrb[6].mxu0  ;;  %v663_v3 = vmax.f32 %v516_v0, 0.0  ;;  %v1282_v5 = vpop.f32.mrb[6].mxu1 }
  0xe4   :  { %v1150_v2 = vpack.c.bf16 %v633_v59, %v633_v59  ;;  %v634_v4 = vmax.f32 %v1250_v1, 0.0  ;;  %v391_v6 = vpop.f32.mrb[7].mxu0  ;;  %v1182_v7 = vpack.c.bf16 %v665_v62, %v665_v62  ;;  %v666_v9 = vmax.f32 %v1282_v5, 0.0  ;;  %v519_v11 = vpop.f32.mrb[7].mxu1 }
  0xe5   :  { %v1148_v8 = vpack.c.bf16 %v631_v63, %v631_v63  ;;  %v632_v10 = vmax.f32 %v391_v6, 0.0  ;;  %v1180_v12 = vpack.c.bf16 %v663_v3, %v663_v3  ;;  %v664_v14 = vmax.f32 %v519_v11, 0.0 }
  0xe6   :  { %954 = vst.msk [vmem:[%s1747_s2 + $0x18] sm:$0xf] %vm947_vm2, %v1150_v2  ;;  %v1151_v13 = vpack.c.bf16 %v634_v4, %v634_v4  ;;  %986 = vst.msk [vmem:[%s1747_s2 + $0x98] sm:$0xf] %vm947_vm2, %v1182_v7  ;;  %v1183_v15 = vpack.c.bf16 %v666_v9, %v666_v9 }
  0xe7   :  { %952 = vst.msk [vmem:[%s1747_s2 + $0x10] sm:$0xf] %vm947_vm2, %v1148_v8  ;;  %v1149_v16 = vpack.c.bf16 %v632_v10, %v632_v10  ;;  %984 = vst.msk [vmem:[%s1747_s2 + $0x90] sm:$0xf] %vm947_vm2, %v1180_v12  ;;  %v1181_v17 = vpack.c.bf16 %v664_v14, %v664_v14 }
  0xe8   :  { %955 = vst.msk [vmem:[%s1747_s2 + $0x1c] sm:$0xf] %vm947_vm2, %v1151_v13  ;;  %987 = vst.msk [vmem:[%s1747_s2 + $0x9c] sm:$0xf] %vm947_vm2, %v1183_v15 }
  0xe9   :  { %953 = vst.msk [vmem:[%s1747_s2 + $0x14] sm:$0xf] %vm947_vm2, %v1149_v16  ;;  %v1253_v18 = vpop.f32.mrb[8].mxu0  ;;  %985 = vst.msk [vmem:[%s1747_s2 + $0x94] sm:$0xf] %vm947_vm2, %v1181_v17  ;;  %v1285_v20 = vpop.f32.mrb[8].mxu1 }
  0xea   :  { %v637_v19 = vmax.f32 %v1253_v18, 0.0  ;;  %v404_v21 = vpop.f32.mrb[9].mxu0  ;;  %v669_v22 = vmax.f32 %v1285_v20, 0.0  ;;  %v532_v24 = vpop.f32.mrb[9].mxu1 }
  0xeb   :  { %v635_v23 = vmax.f32 %v404_v21, 0.0  ;;  %v1254_v25 = vpop.f32.mrb[10].mxu0  ;;  %v667_v27 = vmax.f32 %v532_v24, 0.0  ;;  %v1286_v29 = vpop.f32.mrb[10].mxu1 }
  0xec   :  { %v1154_v26 = vpack.c.bf16 %v637_v19, %v637_v19  ;;  %v638_v28 = vmax.f32 %v1254_v25, 0.0  ;;  %v407_v30 = vpop.f32.mrb[11].mxu0  ;;  %v1186_v31 = vpack.c.bf16 %v669_v22, %v669_v22  ;;  %v670_v33 = vmax.f32 %v1286_v29, 0.0  ;;  %v535_v35 = vpop.f32.mrb[11].mxu1 }
  0xed   :  { %v1152_v32 = vpack.c.bf16 %v635_v23, %v635_v23  ;;  %v636_v34 = vmax.f32 %v407_v30, 0.0  ;;  %v1184_v36 = vpack.c.bf16 %v667_v27, %v667_v27  ;;  %v668_v38 = vmax.f32 %v535_v35, 0.0 }
  0xee   :  { %958 = vst.msk [vmem:[%s1747_s2 + $0x28] sm:$0xf] %vm947_vm2, %v1154_v26  ;;  %v1155_v37 = vpack.c.bf16 %v638_v28, %v638_v28  ;;  %990 = vst.msk [vmem:[%s1747_s2 + $0xa8] sm:$0xf] %vm947_vm2, %v1186_v31  ;;  %v1187_v39 = vpack.c.bf16 %v670_v33, %v670_v33 }
  0xef   :  { %956 = vst.msk [vmem:[%s1747_s2 + $0x20] sm:$0xf] %vm947_vm2, %v1152_v32  ;;  %v1153_v40 = vpack.c.bf16 %v636_v34, %v636_v34  ;;  %988 = vst.msk [vmem:[%s1747_s2 + $0xa0] sm:$0xf] %vm947_vm2, %v1184_v36  ;;  %v1185_v41 = vpack.c.bf16 %v668_v38, %v668_v38 }
  0xf0   :  { %959 = vst.msk [vmem:[%s1747_s2 + $0x2c] sm:$0xf] %vm947_vm2, %v1155_v37  ;;  %991 = vst.msk [vmem:[%s1747_s2 + $0xac] sm:$0xf] %vm947_vm2, %v1187_v39 }
  0xf1   :  { %957 = vst.msk [vmem:[%s1747_s2 + $0x24] sm:$0xf] %vm947_vm2, %v1153_v40  ;;  %v1257_v42 = vpop.f32.mrb[12].mxu0  ;;  %989 = vst.msk [vmem:[%s1747_s2 + $0xa4] sm:$0xf] %vm947_vm2, %v1185_v41  ;;  %v1289_v44 = vpop.f32.mrb[12].mxu1 }
  0xf2   :  { %v641_v43 = vmax.f32 %v1257_v42, 0.0  ;;  %v420_v45 = vpop.f32.mrb[13].mxu0  ;;  %v673_v46 = vmax.f32 %v1289_v44, 0.0  ;;  %v548_v48 = vpop.f32.mrb[13].mxu1 }
  0xf3   :  { %v639_v47 = vmax.f32 %v420_v45, 0.0  ;;  %v1258_v49 = vpop.f32.mrb[14].mxu0  ;;  %v671_v51 = vmax.f32 %v548_v48, 0.0  ;;  %v1290_v53 = vpop.f32.mrb[14].mxu1 }
  0xf4   :  { %v1158_v50 = vpack.c.bf16 %v641_v43, %v641_v43  ;;  %v642_v52 = vmax.f32 %v1258_v49, 0.0  ;;  %v423_v54 = vpop.f32.mrb[15].mxu0  ;;  %v1190_v55 = vpack.c.bf16 %v673_v46, %v673_v46  ;;  %v674_v57 = vmax.f32 %v1290_v53, 0.0  ;;  %v551_v59 = vpop.f32.mrb[15].mxu1 }
  0xf5   :  { %v1156_v56 = vpack.c.bf16 %v639_v47, %v639_v47  ;;  %v640_v58 = vmax.f32 %v423_v54, 0.0  ;;  %v1188_v60 = vpack.c.bf16 %v671_v51, %v671_v51  ;;  %v672_v62 = vmax.f32 %v551_v59, 0.0 }
  0xf6   :  { %962 = vst.msk [vmem:[%s1747_s2 + $0x38] sm:$0xf] %vm947_vm2, %v1158_v50  ;;  %v1159_v61 = vpack.c.bf16 %v642_v52, %v642_v52  ;;  %994 = vst.msk [vmem:[%s1747_s2 + $0xb8] sm:$0xf] %vm947_vm2, %v1190_v55  ;;  %v1191_v63 = vpack.c.bf16 %v674_v57, %v674_v57 }
  0xf7   :  { %960 = vst.msk [vmem:[%s1747_s2 + $0x30] sm:$0xf] %vm947_vm2, %v1156_v56  ;;  %v1157_v0 = vpack.c.bf16 %v640_v58, %v640_v58  ;;  %992 = vst.msk [vmem:[%s1747_s2 + $0xb0] sm:$0xf] %vm947_vm2, %v1188_v60  ;;  %v1189_v1 = vpack.c.bf16 %v672_v62, %v672_v62 }
  0xf8   :  { %963 = vst.msk [vmem:[%s1747_s2 + $0x3c] sm:$0xf] %vm947_vm2, %v1159_v61  ;;  %995 = vst.msk [vmem:[%s1747_s2 + $0xbc] sm:$0xf] %vm947_vm2, %v1191_v63 }
  0xf9   :  { %961 = vst.msk [vmem:[%s1747_s2 + $0x34] sm:$0xf] %vm947_vm2, %v1157_v0  ;;  %v1261_v2 = vpop.f32.mrb[16].mxu0  ;;  %993 = vst.msk [vmem:[%s1747_s2 + $0xb4] sm:$0xf] %vm947_vm2, %v1189_v1  ;;  %v1293_v4 = vpop.f32.mrb[16].mxu1 }
  0xfa   :  { %v645_v3 = vmax.f32 %v1261_v2, 0.0  ;;  %v436_v5 = vpop.f32.mrb[17].mxu0  ;;  %v677_v6 = vmax.f32 %v1293_v4, 0.0  ;;  %v564_v8 = vpop.f32.mrb[17].mxu1 }
  0xfb   :  { %v643_v7 = vmax.f32 %v436_v5, 0.0  ;;  %v1262_v9 = vpop.f32.mrb[18].mxu0  ;;  %v675_v11 = vmax.f32 %v564_v8, 0.0  ;;  %v1294_v13 = vpop.f32.mrb[18].mxu1 }
  0xfc   :  { %v1162_v10 = vpack.c.bf16 %v645_v3, %v645_v3  ;;  %v646_v12 = vmax.f32 %v1262_v9, 0.0  ;;  %v439_v14 = vpop.f32.mrb[19].mxu0  ;;  %v1194_v15 = vpack.c.bf16 %v677_v6, %v677_v6  ;;  %v678_v17 = vmax.f32 %v1294_v13, 0.0  ;;  %v567_v19 = vpop.f32.mrb[19].mxu1 }
  0xfd   :  { %v1160_v16 = vpack.c.bf16 %v643_v7, %v643_v7  ;;  %v644_v18 = vmax.f32 %v439_v14, 0.0  ;;  %v1192_v20 = vpack.c.bf16 %v675_v11, %v675_v11  ;;  %v676_v22 = vmax.f32 %v567_v19, 0.0 }
  0xfe   :  { %966 = vst.msk [vmem:[%s1747_s2 + $0x48] sm:$0xf] %vm947_vm2, %v1162_v10  ;;  %v1163_v21 = vpack.c.bf16 %v646_v12, %v646_v12  ;;  %998 = vst.msk [vmem:[%s1747_s2 + $0xc8] sm:$0xf] %vm947_vm2, %v1194_v15  ;;  %v1195_v23 = vpack.c.bf16 %v678_v17, %v678_v17 }
  0xff   :  { %964 = vst.msk [vmem:[%s1747_s2 + $0x40] sm:$0xf] %vm947_vm2, %v1160_v16  ;;  %v1161_v24 = vpack.c.bf16 %v644_v18, %v644_v18  ;;  %996 = vst.msk [vmem:[%s1747_s2 + $0xc0] sm:$0xf] %vm947_vm2, %v1192_v20  ;;  %v1193_v25 = vpack.c.bf16 %v676_v22, %v676_v22 }
 0x100   :  { %967 = vst.msk [vmem:[%s1747_s2 + $0x4c] sm:$0xf] %vm947_vm2, %v1163_v21  ;;  %999 = vst.msk [vmem:[%s1747_s2 + $0xcc] sm:$0xf] %vm947_vm2, %v1195_v23 }
 0x101   :  { %965 = vst.msk [vmem:[%s1747_s2 + $0x44] sm:$0xf] %vm947_vm2, %v1161_v24  ;;  %v1265_v26 = vpop.f32.mrb[20].mxu0  ;;  %997 = vst.msk [vmem:[%s1747_s2 + $0xc4] sm:$0xf] %vm947_vm2, %v1193_v25  ;;  %v1297_v28 = vpop.f32.mrb[20].mxu1 }
 0x102   :  { %v649_v27 = vmax.f32 %v1265_v26, 0.0  ;;  %v452_v29 = vpop.f32.mrb[21].mxu0  ;;  %v681_v30 = vmax.f32 %v1297_v28, 0.0  ;;  %v580_v32 = vpop.f32.mrb[21].mxu1 }
 0x103   :  { %v647_v31 = vmax.f32 %v452_v29, 0.0  ;;  %v1266_v33 = vpop.f32.mrb[22].mxu0  ;;  %v679_v35 = vmax.f32 %v580_v32, 0.0  ;;  %v1298_v37 = vpop.f32.mrb[22].mxu1 }
 0x104   :  { %v1166_v34 = vpack.c.bf16 %v649_v27, %v649_v27  ;;  %v650_v36 = vmax.f32 %v1266_v33, 0.0  ;;  %v455_v38 = vpop.f32.mrb[23].mxu0  ;;  %v1198_v39 = vpack.c.bf16 %v681_v30, %v681_v30  ;;  %v682_v41 = vmax.f32 %v1298_v37, 0.0  ;;  %v583_v43 = vpop.f32.mrb[23].mxu1 }
 0x105   :  { %v1164_v40 = vpack.c.bf16 %v647_v31, %v647_v31  ;;  %v648_v42 = vmax.f32 %v455_v38, 0.0  ;;  %v1196_v44 = vpack.c.bf16 %v679_v35, %v679_v35  ;;  %v680_v46 = vmax.f32 %v583_v43, 0.0 }
 0x106   :  { %970 = vst.msk [vmem:[%s1747_s2 + $0x58] sm:$0xf] %vm947_vm2, %v1166_v34  ;;  %v1167_v45 = vpack.c.bf16 %v650_v36, %v650_v36  ;;  %1002 = vst.msk [vmem:[%s1747_s2 + $0xd8] sm:$0xf] %vm947_vm2, %v1198_v39  ;;  %v1199_v47 = vpack.c.bf16 %v682_v41, %v682_v41 }
 0x107   :  { %968 = vst.msk [vmem:[%s1747_s2 + $0x50] sm:$0xf] %vm947_vm2, %v1164_v40  ;;  %v1165_v48 = vpack.c.bf16 %v648_v42, %v648_v42  ;;  %1000 = vst.msk [vmem:[%s1747_s2 + $0xd0] sm:$0xf] %vm947_vm2, %v1196_v44  ;;  %v1197_v49 = vpack.c.bf16 %v680_v46, %v680_v46 }
 0x108   :  { %971 = vst.msk [vmem:[%s1747_s2 + $0x5c] sm:$0xf] %vm947_vm2, %v1167_v45  ;;  %1003 = vst.msk [vmem:[%s1747_s2 + $0xdc] sm:$0xf] %vm947_vm2, %v1199_v47 }
 0x109   :  { %969 = vst.msk [vmem:[%s1747_s2 + $0x54] sm:$0xf] %vm947_vm2, %v1165_v48  ;;  %v1269_v50 = vpop.f32.mrb[24].mxu0  ;;  %1001 = vst.msk [vmem:[%s1747_s2 + $0xd4] sm:$0xf] %vm947_vm2, %v1197_v49  ;;  %v1301_v52 = vpop.f32.mrb[24].mxu1 }
 0x10a   :  { %v653_v51 = vmax.f32 %v1269_v50, 0.0  ;;  %v468_v53 = vpop.f32.mrb[25].mxu0  ;;  %v685_v54 = vmax.f32 %v1301_v52, 0.0  ;;  %v596_v56 = vpop.f32.mrb[25].mxu1 }
 0x10b   :  { %v651_v55 = vmax.f32 %v468_v53, 0.0  ;;  %v1270_v57 = vpop.f32.mrb[26].mxu0  ;;  %v683_v59 = vmax.f32 %v596_v56, 0.0  ;;  %v1302_v61 = vpop.f32.mrb[26].mxu1 }
 0x10c   :  { %v1170_v58 = vpack.c.bf16 %v653_v51, %v653_v51  ;;  %v654_v60 = vmax.f32 %v1270_v57, 0.0  ;;  %v471_v62 = vpop.f32.mrb[27].mxu0  ;;  %v1202_v63 = vpack.c.bf16 %v685_v54, %v685_v54  ;;  %v686_v1 = vmax.f32 %v1302_v61, 0.0  ;;  %v599_v3 = vpop.f32.mrb[27].mxu1 }
 0x10d   :  { %v1168_v0 = vpack.c.bf16 %v651_v55, %v651_v55  ;;  %v652_v2 = vmax.f32 %v471_v62, 0.0  ;;  %v1200_v4 = vpack.c.bf16 %v683_v59, %v683_v59  ;;  %v684_v6 = vmax.f32 %v599_v3, 0.0 }
 0x10e   :  { %974 = vst.msk [vmem:[%s1747_s2 + $0x68] sm:$0xf] %vm947_vm2, %v1170_v58  ;;  %v1171_v5 = vpack.c.bf16 %v654_v60, %v654_v60  ;;  %1006 = vst.msk [vmem:[%s1747_s2 + $0xe8] sm:$0xf] %vm947_vm2, %v1202_v63  ;;  %v1203_v7 = vpack.c.bf16 %v686_v1, %v686_v1 }
 0x10f   :  { %972 = vst.msk [vmem:[%s1747_s2 + $0x60] sm:$0xf] %vm947_vm2, %v1168_v0  ;;  %v1169_v8 = vpack.c.bf16 %v652_v2, %v652_v2  ;;  %1004 = vst.msk [vmem:[%s1747_s2 + $0xe0] sm:$0xf] %vm947_vm2, %v1200_v4  ;;  %v1201_v9 = vpack.c.bf16 %v684_v6, %v684_v6 }
 0x110   :  { %975 = vst.msk [vmem:[%s1747_s2 + $0x6c] sm:$0xf] %vm947_vm2, %v1171_v5  ;;  %1007 = vst.msk [vmem:[%s1747_s2 + $0xec] sm:$0xf] %vm947_vm2, %v1203_v7 }
 0x111   :  { %973 = vst.msk [vmem:[%s1747_s2 + $0x64] sm:$0xf] %vm947_vm2, %v1169_v8  ;;  %v1273_v10 = vpop.f32.mrb[28].mxu0  ;;  %1005 = vst.msk [vmem:[%s1747_s2 + $0xe4] sm:$0xf] %vm947_vm2, %v1201_v9  ;;  %v1305_v12 = vpop.f32.mrb[28].mxu1 }
 0x112   :  { %v657_v11 = vmax.f32 %v1273_v10, 0.0  ;;  %v484_v13 = vpop.f32.mrb[29].mxu0  ;;  %v689_v14 = vmax.f32 %v1305_v12, 0.0  ;;  %v612_v16 = vpop.f32.mrb[29].mxu1 }
 0x113   :  { %v655_v15 = vmax.f32 %v484_v13, 0.0  ;;  %v1274_v17 = vpop.f32.mrb[30].mxu0  ;;  %v687_v19 = vmax.f32 %v612_v16, 0.0  ;;  %v1306_v21 = vpop.f32.mrb[30].mxu1 }
 0x114   :  { %v1174_v18 = vpack.c.bf16 %v657_v11, %v657_v11  ;;  %v658_v20 = vmax.f32 %v1274_v17, 0.0  ;;  %v487_v22 = vpop.f32.mrb[31].mxu0  ;;  %v1206_v23 = vpack.c.bf16 %v689_v14, %v689_v14  ;;  %v690_v25 = vmax.f32 %v1306_v21, 0.0  ;;  %v615_v27 = vpop.f32.mrb[31].mxu1 }
 0x115   :  { %v1172_v24 = vpack.c.bf16 %v655_v15, %v655_v15  ;;  %v656_v26 = vmax.f32 %v487_v22, 0.0  ;;  %v1204_v28 = vpack.c.bf16 %v687_v19, %v687_v19  ;;  %v688_v30 = vmax.f32 %v615_v27, 0.0 }
 0x116   :  { %978 = vst.msk [vmem:[%s1747_s2 + $0x78] sm:$0xf] %vm947_vm2, %v1174_v18  ;;  %v1175_v29 = vpack.c.bf16 %v658_v20, %v658_v20  ;;  %1010 = vst.msk [vmem:[%s1747_s2 + $0xf8] sm:$0xf] %vm947_vm2, %v1206_v23  ;;  %v1207_v31 = vpack.c.bf16 %v690_v25, %v690_v25 }
 0x117   :  { %976 = vst.msk [vmem:[%s1747_s2 + $0x70] sm:$0xf] %vm947_vm2, %v1172_v24  ;;  %v1173_v32 = vpack.c.bf16 %v656_v26, %v656_v26  ;;  %1008 = vst.msk [vmem:[%s1747_s2 + $0xf0] sm:$0xf] %vm947_vm2, %v1204_v28  ;;  %v1205_v33 = vpack.c.bf16 %v688_v30, %v688_v30 }
 0x118   :  { %979 = vst.msk [vmem:[%s1747_s2 + $0x7c] sm:$0xf] %vm947_vm2, %v1175_v29  ;;  %1011 = vst.msk [vmem:[%s1747_s2 + $0xfc] sm:$0xf] %vm947_vm2, %v1207_v31 }
 0x119   :  { %977 = vst.msk [vmem:[%s1747_s2 + $0x74] sm:$0xf] %vm947_vm2, %v1173_v32  ;;  %1009 = vst.msk [vmem:[%s1747_s2 + $0xf4] sm:$0xf] %vm947_vm2, %v1205_v33 }

// kernel: bridger_forward.36
= control target key start
LH: loop header
LB: loop body
LE: loop exit
PB: predicated region body
PF: predicated region fallthrough
CT: control target
= control target key end

     0   :  { %vm76_vm0 = vcmask 130048   ;;  %vm262_vm1 = vcmask 125952   ;;  %s484_s1 = inlined_call_operand.vmem [shape: bf16[16,16], index: 1, kind: input, shape index: {}]   ;;  %s485_s0 = inlined_call_operand.vmem [shape: bf16[128,16], index: 0, kind: input, shape index: {}]   ;;  %s486_s2 = inlined_call_operand.vmem [shape: bf16[128,16], index: 2, kind: output, shape index: {}]  }
   0x1   :  { %v361_v0 = vld [vmem:[%s484_s1] sm:$0xff]   ;;  %v364_v3 = vld [vmem:[%s485_s0 + $0x8] sm:$0xff]   ;;  %v366_v5 = vld [vmem:[%s485_s0 + $0x10] sm:$0xff]  }
   0x2   :  { %v362_v1 = vld [vmem:[%s485_s0] sm:$0xff]   ;;  %341 = vmatprep.subr.bf16.mxu0 %v361_v0  ;;  %359 = vmatprep.subr.bf16.mxu1 %v361_v0  ;;  %v365_v4 = vld [vmem:[%s485_s0 + $0x28] sm:$0xff]   ;;  %v367_v6 = vld [vmem:[%s485_s0 + $0x30] sm:$0xff]  }
   0x3   :  { %v363_v2 = vld [vmem:[%s485_s0 + $0x20] sm:$0xff]   ;;  %342 = vmatpush3.bf16.msra.mxu0 %v361_v0  ;;  %360 = vmatpush3.bf16.msra.mxu1 %v361_v0  ;;  %v368_v7 = vld [vmem:[%s485_s0 + $0x18] sm:$0xff]  }
   0x4   :  { %343 = vmatprep.mubr.msk.bf16.mxu0 %vm76_vm0, %v362_v1  ;;  %351 = vmatprep.mubr.msk.bf16.mxu1 %vm76_vm0, %v363_v2  ;;  %v369_v8 = vld [vmem:[%s485_s0 + $0x38] sm:$0xff]  }
   0x6   :  { %344 = vmatmul.mubr.msk.bf16.vlgmr.msra.gmra.mrb[0].mxu0 %vm76_vm0, %v364_v3  ;;  %352 = vmatmul.mubr.msk.bf16.vlgmr.msra.gmra.mrb[0].mxu1 %vm76_vm0, %v365_v4 }
   0x7   :  { %347 = vmatprep.mubr.msk.bf16.mxu0 %vm76_vm0, %v366_v5  ;;  %355 = vmatprep.mubr.msk.bf16.mxu1 %vm76_vm0, %v367_v6 }
   0xe   :  { %348 = vmatmul.mubr.msk.bf16.gmra.mrb[4].mxu0 %vm76_vm0, %v368_v7  ;;  %356 = vmatmul.mubr.msk.bf16.gmra.mrb[4].mxu1 %vm76_vm0, %v369_v8 }
  0xd9   :  { %v345_v9 = vpop.f32.mrb[0].mxu0  ;;  %v353_v10 = vpop.f32.mrb[0].mxu1 }
  0xda   :  { %v318_v11 = vpack.c.bf16 %v345_v9, %v345_v9  ;;  %v326_v12 = vpack.c.bf16 %v353_v10, %v353_v10  ;;  %v135_v13 = vpop.f32.mrb[1].mxu0  ;;  %v167_v14 = vpop.f32.mrb[1].mxu1 }
  0xdb   :  { %v316_v15 = vpack.c.bf16 %v135_v13, %v135_v13  ;;  %v324_v16 = vpack.c.bf16 %v167_v14, %v167_v14  ;;  %v346_v17 = vpop.f32.mrb[2].mxu0  ;;  %v354_v18 = vpop.f32.mrb[2].mxu1 }
  0xdc   :  { %265 = vst.msk [vmem:[%s486_s2 + $0x8] sm:$0xf] %vm262_vm1, %v318_v11  ;;  %273 = vst.msk [vmem:[%s486_s2 + $0x28] sm:$0xf] %vm262_vm1, %v326_v12  ;;  %v319_v19 = vpack.c.bf16 %v346_v17, %v346_v17  ;;  %v327_v20 = vpack.c.bf16 %v354_v18, %v354_v18  ;;  %v138_v21 = vpop.f32.mrb[3].mxu0  ;;  %v170_v22 = vpop.f32.mrb[3].mxu1 }
  0xdd   :  { %263 = vst.msk [vmem:[%s486_s2] sm:$0xf] %vm262_vm1, %v316_v15  ;;  %271 = vst.msk [vmem:[%s486_s2 + $0x20] sm:$0xf] %vm262_vm1, %v324_v16  ;;  %v317_v23 = vpack.c.bf16 %v138_v21, %v138_v21  ;;  %v325_v24 = vpack.c.bf16 %v170_v22, %v170_v22 }
  0xde   :  { %266 = vst.msk [vmem:[%s486_s2 + $0xc] sm:$0xf] %vm262_vm1, %v319_v19  ;;  %274 = vst.msk [vmem:[%s486_s2 + $0x2c] sm:$0xf] %vm262_vm1, %v327_v20 }
  0xdf   :  { %264 = vst.msk [vmem:[%s486_s2 + $0x4] sm:$0xf] %vm262_vm1, %v317_v23  ;;  %272 = vst.msk [vmem:[%s486_s2 + $0x24] sm:$0xf] %vm262_vm1, %v325_v24 }
  0xe1   :  { %v349_v25 = vpop.f32.mrb[4].mxu0  ;;  %v357_v26 = vpop.f32.mrb[4].mxu1 }
  0xe2   :  { %v322_v27 = vpack.c.bf16 %v349_v25, %v349_v25  ;;  %v330_v28 = vpack.c.bf16 %v357_v26, %v357_v26  ;;  %v151_v29 = vpop.f32.mrb[5].mxu0  ;;  %v183_v30 = vpop.f32.mrb[5].mxu1 }
  0xe3   :  { %v320_v31 = vpack.c.bf16 %v151_v29, %v151_v29  ;;  %v328_v32 = vpack.c.bf16 %v183_v30, %v183_v30  ;;  %v350_v33 = vpop.f32.mrb[6].mxu0  ;;  %v358_v34 = vpop.f32.mrb[6].mxu1 }
  0xe4   :  { %269 = vst.msk [vmem:[%s486_s2 + $0x18] sm:$0xf] %vm262_vm1, %v322_v27  ;;  %277 = vst.msk [vmem:[%s486_s2 + $0x38] sm:$0xf] %vm262_vm1, %v330_v28  ;;  %v323_v35 = vpack.c.bf16 %v350_v33, %v350_v33  ;;  %v331_v36 = vpack.c.bf16 %v358_v34, %v358_v34  ;;  %v154_v37 = vpop.f32.mrb[7].mxu0  ;;  %v186_v38 = vpop.f32.mrb[7].mxu1 }
  0xe5   :  { %267 = vst.msk [vmem:[%s486_s2 + $0x10] sm:$0xf] %vm262_vm1, %v320_v31  ;;  %275 = vst.msk [vmem:[%s486_s2 + $0x30] sm:$0xf] %vm262_vm1, %v328_v32  ;;  %v321_v39 = vpack.c.bf16 %v154_v37, %v154_v37  ;;  %v329_v40 = vpack.c.bf16 %v186_v38, %v186_v38 }
  0xe6   :  { %270 = vst.msk [vmem:[%s486_s2 + $0x1c] sm:$0xf] %vm262_vm1, %v323_v35  ;;  %278 = vst.msk [vmem:[%s486_s2 + $0x3c] sm:$0xf] %vm262_vm1, %v331_v36 }
  0xe7   :  { %268 = vst.msk [vmem:[%s486_s2 + $0x14] sm:$0xf] %vm262_vm1, %v321_v39  ;;  %276 = vst.msk [vmem:[%s486_s2 + $0x34] sm:$0xf] %vm262_vm1, %v329_v40 }

// kernel: bridger_forward.35
= control target key start
LH: loop header
LB: loop body
LE: loop exit
PB: predicated region body
PF: predicated region fallthrough
CT: control target
= control target key end

     0   :  { %vm334_vm0 = vcmask 1043456   ;;  %vm237_vm1 = vcmask 64512   ;;  %vm947_vm2 = vcmask 125952   ;;  %s1745_s1 = inlined_call_operand.vmem [shape: bf16[8,16], index: 1, kind: input, shape index: {}]   ;;  %s1746_s0 = inlined_call_operand.vmem [shape: bf16[512,8], index: 0, kind: input, shape index: {}]   ;;  %s1747_s2 = inlined_call_operand.vmem [shape: bf16[512,16], index: 2, kind: output, shape index: {}]  }
   0x1   :  { %v76_v0 = vld [vmem:[%s1745_s1] sm:$0xf]  ;;  %v1313_v4 = vld [vmem:[%s1746_s0 + $0x8] sm:$0xff]   ;;  %v1315_v6 = vld [vmem:[%s1746_s0 + $0x10] sm:$0xff]  }
   0x2   :  { %1309 = vmatprep.subr.msk.bf16.mxu0 %vm334_vm0, %v76_v0  ;;  %1310 = vmatprep.subr.msk.bf16.mxu1 %vm334_vm0, %v76_v0  ;;  %v336_v1 = vsel %vm334_vm0, %v76_v0, 0  ;;  %v1311_v2 = vld [vmem:[%s1746_s0] sm:$0xff]   ;;  %v1314_v5 = vld [vmem:[%s1746_s0 + $0x88] sm:$0xff]   ;;  %v1316_v7 = vld [vmem:[%s1746_s0 + $0x90] sm:$0xff]  }
   0x3   :  { %1242 = vmatpush3.bf16.msra.mxu0 %v336_v1  ;;  %1308 = vmatpush3.bf16.msra.mxu1 %v336_v1  ;;  %v1312_v3 = vld [vmem:[%s1746_s0 + $0x80] sm:$0xff]   ;;  %v1317_v8 = vld [vmem:[%s1746_s0 + $0x18] sm:$0xff]   ;;  %v1321_v12 = vld [vmem:[%s1746_s0 + $0x28] sm:$0xff]  }
   0x4   :  { %1243 = vmatprep.mubr.msk.bf16.mxu0 %vm237_vm1, %v1311_v2  ;;  %1275 = vmatprep.mubr.msk.bf16.mxu1 %vm237_vm1, %v1312_v3  ;;  %v1318_v9 = vld [vmem:[%s1746_s0 + $0x98] sm:$0xff]   ;;  %v1319_v10 = vld [vmem:[%s1746_s0 + $0x20] sm:$0xff]   ;;  %v1322_v13 = vld [vmem:[%s1746_s0 + $0xa8] sm:$0xff]  }
   0x5   :  { %v1320_v11 = vld [vmem:[%s1746_s0 + $0xa0] sm:$0xff]   ;;  %v1323_v14 = vld [vmem:[%s1746_s0 + $0x30] sm:$0xff]   ;;  %v1325_v16 = vld [vmem:[%s1746_s0 + $0x38] sm:$0xff]  }
   0x6   :  { %1244 = vmatmul.mubr.msk.bf16.vlgmr.msra.gmra.mrb[0].mxu0 %vm237_vm1, %v1313_v4  ;;  %1276 = vmatmul.mubr.msk.bf16.vlgmr.msra.gmra.mrb[0].mxu1 %vm237_vm1, %v1314_v5  ;;  %v1324_v15 = vld [vmem:[%s1746_s0 + $0xb0] sm:$0xff]   ;;  %v1326_v17 = vld [vmem:[%s1746_s0 + $0xb8] sm:$0xff]   ;;  %v1327_v18 = vld [vmem:[%s1746_s0 + $0x40] sm:$0xff]  }
   0x7   :  { %1247 = vmatprep.mubr.msk.bf16.mxu0 %vm237_vm1, %v1315_v6  ;;  %1279 = vmatprep.mubr.msk.bf16.mxu1 %vm237_vm1, %v1316_v7  ;;  %v1328_v19 = vld [vmem:[%s1746_s0 + $0xc0] sm:$0xff]   ;;  %v1329_v20 = vld [vmem:[%s1746_s0 + $0x48] sm:$0xff]   ;;  %v1331_v22 = vld [vmem:[%s1746_s0 + $0x50] sm:$0xff]  }
   0x8   :  { %v1330_v21 = vld [vmem:[%s1746_s0 + $0xc8] sm:$0xff]   ;;  %v1332_v23 = vld [vmem:[%s1746_s0 + $0xd0] sm:$0xff]   ;;  %v1333_v24 = vld [vmem:[%s1746_s0 + $0x58] sm:$0xff]  }
   0x9   :  { %v1334_v25 = vld [vmem:[%s1746_s0 + $0xd8] sm:$0xff]   ;;  %v1335_v26 = vld [vmem:[%s1746_s0 + $0x60] sm:$0xff]   ;;  %v1337_v28 = vld [vmem:[%s1746_s0 + $0x68] sm:$0xff]  }
   0xa   :  { %v1336_v27 = vld [vmem:[%s1746_s0 + $0xe0] sm:$0xff]   ;;  %v1338_v29 = vld [vmem:[%s1746_s0 + $0xe8] sm:$0xff]   ;;  %v1339_v30 = vld [vmem:[%s1746_s0 + $0x70] sm:$0xff]  }
   0xb   :  { %v1340_v31 = vld [vmem:[%s1746_s0 + $0xf0] sm:$0xff]   ;;  %v1341_v32 = vld [vmem:[%s1746_s0 + $0x78] sm:$0xff]  }
   0xc   :  { %v1342_v33 = vld [vmem:[%s1746_s0 + $0xf8] sm:$0xff]  }
   0xe   :  { %1248 = vmatmul.mubr.msk.bf16.gmra.mrb[4].mxu0 %vm237_vm1, %v1317_v8  ;;  %1280 = vmatmul.mubr.msk.bf16.gmra.mrb[4].mxu1 %vm237_vm1, %v1318_v9 }
   0xf   :  { %1251 = vmatprep.mubr.msk.bf16.mxu0 %vm237_vm1, %v1319_v10  ;;  %1283 = vmatprep.mubr.msk.bf16.mxu1 %vm237_vm1, %v1320_v11 }
  0x16   :  { %1252 = vmatmul.mubr.msk.bf16.gmra.mrb[8].mxu0 %vm237_vm1, %v1321_v12  ;;  %1284 = vmatmul.mubr.msk.bf16.gmra.mrb[8].mxu1 %vm237_vm1, %v1322_v13 }
  0x17   :  { %1255 = vmatprep.mubr.msk.bf16.mxu0 %vm237_vm1, %v1323_v14  ;;  %1287 = vmatprep.mubr.msk.bf16.mxu1 %vm237_vm1, %v1324_v15 }
  0x1e   :  { %1256 = vmatmul.mubr.msk.bf16.gmra.mrb[12].mxu0 %vm237_vm1, %v1325_v16  ;;  %1288 = vmatmul.mubr.msk.bf16.gmra.mrb[12].mxu1 %vm237_vm1, %v1326_v17 }
  0x1f   :  { %1259 = vmatprep.mubr.msk.bf16.mxu0 %vm237_vm1, %v1327_v18  ;;  %1291 = vmatprep.mubr.msk.bf16.mxu1 %vm237_vm1, %v1328_v19 }
  0x26   :  { %1260 = vmatmul.mubr.msk.bf16.gmra.mrb[16].mxu0 %vm237_vm1, %v1329_v20  ;;  %1292 = vmatmul.mubr.msk.bf16.gmra.mrb[16].mxu1 %vm237_vm1, %v1330_v21 }
  0x27   :  { %1263 = vmatprep.mubr.msk.bf16.mxu0 %vm237_vm1, %v1331_v22  ;;  %1295 = vmatprep.mubr.msk.bf16.mxu1 %vm237_vm1, %v1332_v23 }
  0x2e   :  { %1264 = vmatmul.mubr.msk.bf16.gmra.mrb[20].mxu0 %vm237_vm1, %v1333_v24  ;;  %1296 = vmatmul.mubr.msk.bf16.gmra.mrb[20].mxu1 %vm237_vm1, %v1334_v25 }
  0x2f   :  { %1267 = vmatprep.mubr.msk.bf16.mxu0 %vm237_vm1, %v1335_v26  ;;  %1299 = vmatprep.mubr.msk.bf16.mxu1 %vm237_vm1, %v1336_v27 }
  0x36   :  { %1268 = vmatmul.mubr.msk.bf16.gmra.mrb[24].mxu0 %vm237_vm1, %v1337_v28  ;;  %1300 = vmatmul.mubr.msk.bf16.gmra.mrb[24].mxu1 %vm237_vm1, %v1338_v29 }
  0x37   :  { %1271 = vmatprep.mubr.msk.bf16.mxu0 %vm237_vm1, %v1339_v30  ;;  %1303 = vmatprep.mubr.msk.bf16.mxu1 %vm237_vm1, %v1340_v31 }
  0x3e   :  { %1272 = vmatmul.mubr.msk.bf16.gmra.mrb[28].mxu0 %vm237_vm1, %v1341_v32  ;;  %1304 = vmatmul.mubr.msk.bf16.gmra.mrb[28].mxu1 %vm237_vm1, %v1342_v33 }
  0xd9   :  { %v1245_v34 = vpop.f32.mrb[0].mxu0  ;;  %v1277_v36 = vpop.f32.mrb[0].mxu1 }
  0xda   :  { %v629_v35 = vmax.f32 %v1245_v34, 0.0  ;;  %v372_v37 = vpop.f32.mrb[1].mxu0  ;;  %v661_v38 = vmax.f32 %v1277_v36, 0.0  ;;  %v500_v40 = vpop.f32.mrb[1].mxu1 }
  0xdb   :  { %v627_v39 = vmax.f32 %v372_v37, 0.0  ;;  %v1246_v41 = vpop.f32.mrb[2].mxu0  ;;  %v659_v43 = vmax.f32 %v500_v40, 0.0  ;;  %v1278_v45 = vpop.f32.mrb[2].mxu1 }
  0xdc   :  { %v1146_v42 = vpack.c.bf16 %v629_v35, %v629_v35  ;;  %v630_v44 = vmax.f32 %v1246_v41, 0.0  ;;  %v375_v46 = vpop.f32.mrb[3].mxu0  ;;  %v1178_v47 = vpack.c.bf16 %v661_v38, %v661_v38  ;;  %v662_v49 = vmax.f32 %v1278_v45, 0.0  ;;  %v503_v51 = vpop.f32.mrb[3].mxu1 }
  0xdd   :  { %v1144_v48 = vpack.c.bf16 %v627_v39, %v627_v39  ;;  %v628_v50 = vmax.f32 %v375_v46, 0.0  ;;  %v1176_v52 = vpack.c.bf16 %v659_v43, %v659_v43  ;;  %v660_v54 = vmax.f32 %v503_v51, 0.0 }
  0xde   :  { %950 = vst.msk [vmem:[%s1747_s2 + $0x8] sm:$0xf] %vm947_vm2, %v1146_v42  ;;  %v1147_v53 = vpack.c.bf16 %v630_v44, %v630_v44  ;;  %982 = vst.msk [vmem:[%s1747_s2 + $0x88] sm:$0xf] %vm947_vm2, %v1178_v47  ;;  %v1179_v55 = vpack.c.bf16 %v662_v49, %v662_v49 }
  0xdf   :  { %948 = vst.msk [vmem:[%s1747_s2] sm:$0xf] %vm947_vm2, %v1144_v48  ;;  %v1145_v56 = vpack.c.bf16 %v628_v50, %v628_v50  ;;  %980 = vst.msk [vmem:[%s1747_s2 + $0x80] sm:$0xf] %vm947_vm2, %v1176_v52  ;;  %v1177_v57 = vpack.c.bf16 %v660_v54, %v660_v54 }
  0xe0   :  { %951 = vst.msk [vmem:[%s1747_s2 + $0xc] sm:$0xf] %vm947_vm2, %v1147_v53  ;;  %983 = vst.msk [vmem:[%s1747_s2 + $0x8c] sm:$0xf] %vm947_vm2, %v1179_v55 }
  0xe1   :  { %949 = vst.msk [vmem:[%s1747_s2 + $0x4] sm:$0xf] %vm947_vm2, %v1145_v56  ;;  %v1249_v58 = vpop.f32.mrb[4].mxu0  ;;  %981 = vst.msk [vmem:[%s1747_s2 + $0x84] sm:$0xf] %vm947_vm2, %v1177_v57  ;;  %v1281_v60 = vpop.f32.mrb[4].mxu1 }
  0xe2   :  { %v633_v59 = vmax.f32 %v1249_v58, 0.0  ;;  %v388_v61 = vpop.f32.mrb[5].mxu0  ;;  %v665_v62 = vmax.f32 %v1281_v60, 0.0  ;;  %v516_v0 = vpop.f32.mrb[5].mxu1 }
  0xe3   :  { %v631_v63 = vmax.f32 %v388_v61, 0.0  ;;  %v1250_v1 = vpop.f32.mrb[6].mxu0  ;;  %v663_v3 = vmax.f32 %v516_v0, 0.0  ;;  %v1282_v5 = vpop.f32.mrb[6].mxu1 }
  0xe4   :  { %v1150_v2 = vpack.c.bf16 %v633_v59, %v633_v59  ;;  %v634_v4 = vmax.f32 %v1250_v1, 0.0  ;;  %v391_v6 = vpop.f32.mrb[7].mxu0  ;;  %v1182_v7 = vpack.c.bf16 %v665_v62, %v665_v62  ;;  %v666_v9 = vmax.f32 %v1282_v5, 0.0  ;;  %v519_v11 = vpop.f32.mrb[7].mxu1 }
  0xe5   :  { %v1148_v8 = vpack.c.bf16 %v631_v63, %v631_v63  ;;  %v632_v10 = vmax.f32 %v391_v6, 0.0  ;;  %v1180_v12 = vpack.c.bf16 %v663_v3, %v663_v3  ;;  %v664_v14 = vmax.f32 %v519_v11, 0.0 }
  0xe6   :  { %954 = vst.msk [vmem:[%s1747_s2 + $0x18] sm:$0xf] %vm947_vm2, %v1150_v2  ;;  %v1151_v13 = vpack.c.bf16 %v634_v4, %v634_v4  ;;  %986 = vst.msk [vmem:[%s1747_s2 + $0x98] sm:$0xf] %vm947_vm2, %v1182_v7  ;;  %v1183_v15 = vpack.c.bf16 %v666_v9, %v666_v9 }
  0xe7   :  { %952 = vst.msk [vmem:[%s1747_s2 + $0x10] sm:$0xf] %vm947_vm2, %v1148_v8  ;;  %v1149_v16 = vpack.c.bf16 %v632_v10, %v632_v10  ;;  %984 = vst.msk [vmem:[%s1747_s2 + $0x90] sm:$0xf] %vm947_vm2, %v1180_v12  ;;  %v1181_v17 = vpack.c.bf16 %v664_v14, %v664_v14 }
  0xe8   :  { %955 = vst.msk [vmem:[%s1747_s2 + $0x1c] sm:$0xf] %vm947_vm2, %v1151_v13  ;;  %987 = vst.msk [vmem:[%s1747_s2 + $0x9c] sm:$0xf] %vm947_vm2, %v1183_v15 }
  0xe9   :  { %953 = vst.msk [vmem:[%s1747_s2 + $0x14] sm:$0xf] %vm947_vm2, %v1149_v16  ;;  %v1253_v18 = vpop.f32.mrb[8].mxu0  ;;  %985 = vst.msk [vmem:[%s1747_s2 + $0x94] sm:$0xf] %vm947_vm2, %v1181_v17  ;;  %v1285_v20 = vpop.f32.mrb[8].mxu1 }
  0xea   :  { %v637_v19 = vmax.f32 %v1253_v18, 0.0  ;;  %v404_v21 = vpop.f32.mrb[9].mxu0  ;;  %v669_v22 = vmax.f32 %v1285_v20, 0.0  ;;  %v532_v24 = vpop.f32.mrb[9].mxu1 }
  0xeb   :  { %v635_v23 = vmax.f32 %v404_v21, 0.0  ;;  %v1254_v25 = vpop.f32.mrb[10].mxu0  ;;  %v667_v27 = vmax.f32 %v532_v24, 0.0  ;;  %v1286_v29 = vpop.f32.mrb[10].mxu1 }
  0xec   :  { %v1154_v26 = vpack.c.bf16 %v637_v19, %v637_v19  ;;  %v638_v28 = vmax.f32 %v1254_v25, 0.0  ;;  %v407_v30 = vpop.f32.mrb[11].mxu0  ;;  %v1186_v31 = vpack.c.bf16 %v669_v22, %v669_v22  ;;  %v670_v33 = vmax.f32 %v1286_v29, 0.0  ;;  %v535_v35 = vpop.f32.mrb[11].mxu1 }
  0xed   :  { %v1152_v32 = vpack.c.bf16 %v635_v23, %v635_v23  ;;  %v636_v34 = vmax.f32 %v407_v30, 0.0  ;;  %v1184_v36 = vpack.c.bf16 %v667_v27, %v667_v27  ;;  %v668_v38 = vmax.f32 %v535_v35, 0.0 }
  0xee   :  { %958 = vst.msk [vmem:[%s1747_s2 + $0x28] sm:$0xf] %vm947_vm2, %v1154_v26  ;;  %v1155_v37 = vpack.c.bf16 %v638_v28, %v638_v28  ;;  %990 = vst.msk [vmem:[%s1747_s2 + $0xa8] sm:$0xf] %vm947_vm2, %v1186_v31  ;;  %v1187_v39 = vpack.c.bf16 %v670_v33, %v670_v33 }
  0xef   :  { %956 = vst.msk [vmem:[%s1747_s2 + $0x20] sm:$0xf] %vm947_vm2, %v1152_v32  ;;  %v1153_v40 = vpack.c.bf16 %v636_v34, %v636_v34  ;;  %988 = vst.msk [vmem:[%s1747_s2 + $0xa0] sm:$0xf] %vm947_vm2, %v1184_v36  ;;  %v1185_v41 = vpack.c.bf16 %v668_v38, %v668_v38 }
  0xf0   :  { %959 = vst.msk [vmem:[%s1747_s2 + $0x2c] sm:$0xf] %vm947_vm2, %v1155_v37  ;;  %991 = vst.msk [vmem:[%s1747_s2 + $0xac] sm:$0xf] %vm947_vm2, %v1187_v39 }
  0xf1   :  { %957 = vst.msk [vmem:[%s1747_s2 + $0x24] sm:$0xf] %vm947_vm2, %v1153_v40  ;;  %v1257_v42 = vpop.f32.mrb[12].mxu0  ;;  %989 = vst.msk [vmem:[%s1747_s2 + $0xa4] sm:$0xf] %vm947_vm2, %v1185_v41  ;;  %v1289_v44 = vpop.f32.mrb[12].mxu1 }
  0xf2   :  { %v641_v43 = vmax.f32 %v1257_v42, 0.0  ;;  %v420_v45 = vpop.f32.mrb[13].mxu0  ;;  %v673_v46 = vmax.f32 %v1289_v44, 0.0  ;;  %v548_v48 = vpop.f32.mrb[13].mxu1 }
  0xf3   :  { %v639_v47 = vmax.f32 %v420_v45, 0.0  ;;  %v1258_v49 = vpop.f32.mrb[14].mxu0  ;;  %v671_v51 = vmax.f32 %v548_v48, 0.0  ;;  %v1290_v53 = vpop.f32.mrb[14].mxu1 }
  0xf4   :  { %v1158_v50 = vpack.c.bf16 %v641_v43, %v641_v43  ;;  %v642_v52 = vmax.f32 %v1258_v49, 0.0  ;;  %v423_v54 = vpop.f32.mrb[15].mxu0  ;;  %v1190_v55 = vpack.c.bf16 %v673_v46, %v673_v46  ;;  %v674_v57 = vmax.f32 %v1290_v53, 0.0  ;;  %v551_v59 = vpop.f32.mrb[15].mxu1 }
  0xf5   :  { %v1156_v56 = vpack.c.bf16 %v639_v47, %v639_v47  ;;  %v640_v58 = vmax.f32 %v423_v54, 0.0  ;;  %v1188_v60 = vpack.c.bf16 %v671_v51, %v671_v51  ;;  %v672_v62 = vmax.f32 %v551_v59, 0.0 }
  0xf6   :  { %962 = vst.msk [vmem:[%s1747_s2 + $0x38] sm:$0xf] %vm947_vm2, %v1158_v50  ;;  %v1159_v61 = vpack.c.bf16 %v642_v52, %v642_v52  ;;  %994 = vst.msk [vmem:[%s1747_s2 + $0xb8] sm:$0xf] %vm947_vm2, %v1190_v55  ;;  %v1191_v63 = vpack.c.bf16 %v674_v57, %v674_v57 }
  0xf7   :  { %960 = vst.msk [vmem:[%s1747_s2 + $0x30] sm:$0xf] %vm947_vm2, %v1156_v56  ;;  %v1157_v0 = vpack.c.bf16 %v640_v58, %v640_v58  ;;  %992 = vst.msk [vmem:[%s1747_s2 + $0xb0] sm:$0xf] %vm947_vm2, %v1188_v60  ;;  %v1189_v1 = vpack.c.bf16 %v672_v62, %v672_v62 }
  0xf8   :  { %963 = vst.msk [vmem:[%s1747_s2 + $0x3c] sm:$0xf] %vm947_vm2, %v1159_v61  ;;  %995 = vst.msk [vmem:[%s1747_s2 + $0xbc] sm:$0xf] %vm947_vm2, %v1191_v63 }
  0xf9   :  { %961 = vst.msk [vmem:[%s1747_s2 + $0x34] sm:$0xf] %vm947_vm2, %v1157_v0  ;;  %v1261_v2 = vpop.f32.mrb[16].mxu0  ;;  %993 = vst.msk [vmem:[%s1747_s2 + $0xb4] sm:$0xf] %vm947_vm2, %v1189_v1  ;;  %v1293_v4 = vpop.f32.mrb[16].mxu1 }
  0xfa   :  { %v645_v3 = vmax.f32 %v1261_v2, 0.0  ;;  %v436_v5 = vpop.f32.mrb[17].mxu0  ;;  %v677_v6 = vmax.f32 %v1293_v4, 0.0  ;;  %v564_v8 = vpop.f32.mrb[17].mxu1 }
  0xfb   :  { %v643_v7 = vmax.f32 %v436_v5, 0.0  ;;  %v1262_v9 = vpop.f32.mrb[18].mxu0  ;;  %v675_v11 = vmax.f32 %v564_v8, 0.0  ;;  %v1294_v13 = vpop.f32.mrb[18].mxu1 }
  0xfc   :  { %v1162_v10 = vpack.c.bf16 %v645_v3, %v645_v3  ;;  %v646_v12 = vmax.f32 %v1262_v9, 0.0  ;;  %v439_v14 = vpop.f32.mrb[19].mxu0  ;;  %v1194_v15 = vpack.c.bf16 %v677_v6, %v677_v6  ;;  %v678_v17 = vmax.f32 %v1294_v13, 0.0  ;;  %v567_v19 = vpop.f32.mrb[19].mxu1 }
  0xfd   :  { %v1160_v16 = vpack.c.bf16 %v643_v7, %v643_v7  ;;  %v644_v18 = vmax.f32 %v439_v14, 0.0  ;;  %v1192_v20 = vpack.c.bf16 %v675_v11, %v675_v11  ;;  %v676_v22 = vmax.f32 %v567_v19, 0.0 }
  0xfe   :  { %966 = vst.msk [vmem:[%s1747_s2 + $0x48] sm:$0xf] %vm947_vm2, %v1162_v10  ;;  %v1163_v21 = vpack.c.bf16 %v646_v12, %v646_v12  ;;  %998 = vst.msk [vmem:[%s1747_s2 + $0xc8] sm:$0xf] %vm947_vm2, %v1194_v15  ;;  %v1195_v23 = vpack.c.bf16 %v678_v17, %v678_v17 }
  0xff   :  { %964 = vst.msk [vmem:[%s1747_s2 + $0x40] sm:$0xf] %vm947_vm2, %v1160_v16  ;;  %v1161_v24 = vpack.c.bf16 %v644_v18, %v644_v18  ;;  %996 = vst.msk [vmem:[%s1747_s2 + $0xc0] sm:$0xf] %vm947_vm2, %v1192_v20  ;;  %v1193_v25 = vpack.c.bf16 %v676_v22, %v676_v22 }
 0x100   :  { %967 = vst.msk [vmem:[%s1747_s2 + $0x4c] sm:$0xf] %vm947_vm2, %v1163_v21  ;;  %999 = vst.msk [vmem:[%s1747_s2 + $0xcc] sm:$0xf] %vm947_vm2, %v1195_v23 }
 0x101   :  { %965 = vst.msk [vmem:[%s1747_s2 + $0x44] sm:$0xf] %vm947_vm2, %v1161_v24  ;;  %v1265_v26 = vpop.f32.mrb[20].mxu0  ;;  %997 = vst.msk [vmem:[%s1747_s2 + $0xc4] sm:$0xf] %vm947_vm2, %v1193_v25  ;;  %v1297_v28 = vpop.f32.mrb[20].mxu1 }
 0x102   :  { %v649_v27 = vmax.f32 %v1265_v26, 0.0  ;;  %v452_v29 = vpop.f32.mrb[21].mxu0  ;;  %v681_v30 = vmax.f32 %v1297_v28, 0.0  ;;  %v580_v32 = vpop.f32.mrb[21].mxu1 }
 0x103   :  { %v647_v31 = vmax.f32 %v452_v29, 0.0  ;;  %v1266_v33 = vpop.f32.mrb[22].mxu0  ;;  %v679_v35 = vmax.f32 %v580_v32, 0.0  ;;  %v1298_v37 = vpop.f32.mrb[22].mxu1 }
 0x104   :  { %v1166_v34 = vpack.c.bf16 %v649_v27, %v649_v27  ;;  %v650_v36 = vmax.f32 %v1266_v33, 0.0  ;;  %v455_v38 = vpop.f32.mrb[23].mxu0  ;;  %v1198_v39 = vpack.c.bf16 %v681_v30, %v681_v30  ;;  %v682_v41 = vmax.f32 %v1298_v37, 0.0  ;;  %v583_v43 = vpop.f32.mrb[23].mxu1 }
 0x105   :  { %v1164_v40 = vpack.c.bf16 %v647_v31, %v647_v31  ;;  %v648_v42 = vmax.f32 %v455_v38, 0.0  ;;  %v1196_v44 = vpack.c.bf16 %v679_v35, %v679_v35  ;;  %v680_v46 = vmax.f32 %v583_v43, 0.0 }
 0x106   :  { %970 = vst.msk [vmem:[%s1747_s2 + $0x58] sm:$0xf] %vm947_vm2, %v1166_v34  ;;  %v1167_v45 = vpack.c.bf16 %v650_v36, %v650_v36  ;;  %1002 = vst.msk [vmem:[%s1747_s2 + $0xd8] sm:$0xf] %vm947_vm2, %v1198_v39  ;;  %v1199_v47 = vpack.c.bf16 %v682_v41, %v682_v41 }
 0x107   :  { %968 = vst.msk [vmem:[%s1747_s2 + $0x50] sm:$0xf] %vm947_vm2, %v1164_v40  ;;  %v1165_v48 = vpack.c.bf16 %v648_v42, %v648_v42  ;;  %1000 = vst.msk [vmem:[%s1747_s2 + $0xd0] sm:$0xf] %vm947_vm2, %v1196_v44  ;;  %v1197_v49 = vpack.c.bf16 %v680_v46, %v680_v46 }
 0x108   :  { %971 = vst.msk [vmem:[%s1747_s2 + $0x5c] sm:$0xf] %vm947_vm2, %v1167_v45  ;;  %1003 = vst.msk [vmem:[%s1747_s2 + $0xdc] sm:$0xf] %vm947_vm2, %v1199_v47 }
 0x109   :  { %969 = vst.msk [vmem:[%s1747_s2 + $0x54] sm:$0xf] %vm947_vm2, %v1165_v48  ;;  %v1269_v50 = vpop.f32.mrb[24].mxu0  ;;  %1001 = vst.msk [vmem:[%s1747_s2 + $0xd4] sm:$0xf] %vm947_vm2, %v1197_v49  ;;  %v1301_v52 = vpop.f32.mrb[24].mxu1 }
 0x10a   :  { %v653_v51 = vmax.f32 %v1269_v50, 0.0  ;;  %v468_v53 = vpop.f32.mrb[25].mxu0  ;;  %v685_v54 = vmax.f32 %v1301_v52, 0.0  ;;  %v596_v56 = vpop.f32.mrb[25].mxu1 }
 0x10b   :  { %v651_v55 = vmax.f32 %v468_v53, 0.0  ;;  %v1270_v57 = vpop.f32.mrb[26].mxu0  ;;  %v683_v59 = vmax.f32 %v596_v56, 0.0  ;;  %v1302_v61 = vpop.f32.mrb[26].mxu1 }
 0x10c   :  { %v1170_v58 = vpack.c.bf16 %v653_v51, %v653_v51  ;;  %v654_v60 = vmax.f32 %v1270_v57, 0.0  ;;  %v471_v62 = vpop.f32.mrb[27].mxu0  ;;  %v1202_v63 = vpack.c.bf16 %v685_v54, %v685_v54  ;;  %v686_v1 = vmax.f32 %v1302_v61, 0.0  ;;  %v599_v3 = vpop.f32.mrb[27].mxu1 }
 0x10d   :  { %v1168_v0 = vpack.c.bf16 %v651_v55, %v651_v55  ;;  %v652_v2 = vmax.f32 %v471_v62, 0.0  ;;  %v1200_v4 = vpack.c.bf16 %v683_v59, %v683_v59  ;;  %v684_v6 = vmax.f32 %v599_v3, 0.0 }
 0x10e   :  { %974 = vst.msk [vmem:[%s1747_s2 + $0x68] sm:$0xf] %vm947_vm2, %v1170_v58  ;;  %v1171_v5 = vpack.c.bf16 %v654_v60, %v654_v60  ;;  %1006 = vst.msk [vmem:[%s1747_s2 + $0xe8] sm:$0xf] %vm947_vm2, %v1202_v63  ;;  %v1203_v7 = vpack.c.bf16 %v686_v1, %v686_v1 }
 0x10f   :  { %972 = vst.msk [vmem:[%s1747_s2 + $0x60] sm:$0xf] %vm947_vm2, %v1168_v0  ;;  %v1169_v8 = vpack.c.bf16 %v652_v2, %v652_v2  ;;  %1004 = vst.msk [vmem:[%s1747_s2 + $0xe0] sm:$0xf] %vm947_vm2, %v1200_v4  ;;  %v1201_v9 = vpack.c.bf16 %v684_v6, %v684_v6 }
 0x110   :  { %975 = vst.msk [vmem:[%s1747_s2 + $0x6c] sm:$0xf] %vm947_vm2, %v1171_v5  ;;  %1007 = vst.msk [vmem:[%s1747_s2 + $0xec] sm:$0xf] %vm947_vm2, %v1203_v7 }
 0x111   :  { %973 = vst.msk [vmem:[%s1747_s2 + $0x64] sm:$0xf] %vm947_vm2, %v1169_v8  ;;  %v1273_v10 = vpop.f32.mrb[28].mxu0  ;;  %1005 = vst.msk [vmem:[%s1747_s2 + $0xe4] sm:$0xf] %vm947_vm2, %v1201_v9  ;;  %v1305_v12 = vpop.f32.mrb[28].mxu1 }
 0x112   :  { %v657_v11 = vmax.f32 %v1273_v10, 0.0  ;;  %v484_v13 = vpop.f32.mrb[29].mxu0  ;;  %v689_v14 = vmax.f32 %v1305_v12, 0.0  ;;  %v612_v16 = vpop.f32.mrb[29].mxu1 }
 0x113   :  { %v655_v15 = vmax.f32 %v484_v13, 0.0  ;;  %v1274_v17 = vpop.f32.mrb[30].mxu0  ;;  %v687_v19 = vmax.f32 %v612_v16, 0.0  ;;  %v1306_v21 = vpop.f32.mrb[30].mxu1 }
 0x114   :  { %v1174_v18 = vpack.c.bf16 %v657_v11, %v657_v11  ;;  %v658_v20 = vmax.f32 %v1274_v17, 0.0  ;;  %v487_v22 = vpop.f32.mrb[31].mxu0  ;;  %v1206_v23 = vpack.c.bf16 %v689_v14, %v689_v14  ;;  %v690_v25 = vmax.f32 %v1306_v21, 0.0  ;;  %v615_v27 = vpop.f32.mrb[31].mxu1 }
 0x115   :  { %v1172_v24 = vpack.c.bf16 %v655_v15, %v655_v15  ;;  %v656_v26 = vmax.f32 %v487_v22, 0.0  ;;  %v1204_v28 = vpack.c.bf16 %v687_v19, %v687_v19  ;;  %v688_v30 = vmax.f32 %v615_v27, 0.0 }
 0x116   :  { %978 = vst.msk [vmem:[%s1747_s2 + $0x78] sm:$0xf] %vm947_vm2, %v1174_v18  ;;  %v1175_v29 = vpack.c.bf16 %v658_v20, %v658_v20  ;;  %1010 = vst.msk [vmem:[%s1747_s2 + $0xf8] sm:$0xf] %vm947_vm2, %v1206_v23  ;;  %v1207_v31 = vpack.c.bf16 %v690_v25, %v690_v25 }
 0x117   :  { %976 = vst.msk [vmem:[%s1747_s2 + $0x70] sm:$0xf] %vm947_vm2, %v1172_v24  ;;  %v1173_v32 = vpack.c.bf16 %v656_v26, %v656_v26  ;;  %1008 = vst.msk [vmem:[%s1747_s2 + $0xf0] sm:$0xf] %vm947_vm2, %v1204_v28  ;;  %v1205_v33 = vpack.c.bf16 %v688_v30, %v688_v30 }
 0x118   :  { %979 = vst.msk [vmem:[%s1747_s2 + $0x7c] sm:$0xf] %vm947_vm2, %v1175_v29  ;;  %1011 = vst.msk [vmem:[%s1747_s2 + $0xfc] sm:$0xf] %vm947_vm2, %v1207_v31 }
 0x119   :  { %977 = vst.msk [vmem:[%s1747_s2 + $0x74] sm:$0xf] %vm947_vm2, %v1173_v32  ;;  %1009 = vst.msk [vmem:[%s1747_s2 + $0xf4] sm:$0xf] %vm947_vm2, %v1205_v33 }

// kernel: bridger_forward.38
= control target key start
LH: loop header
LB: loop body
LE: loop exit
PB: predicated region body
PF: predicated region fallthrough
CT: control target
= control target key end

     0   :  { %vm58_vm0 = vcmask 523264   ;;  %vm134_vm1 = vcmask 257024   ;;  %s228_s1 = inlined_call_operand.vmem [shape: bf16[64,32], index: 1, kind: input, shape index: {}]   ;;  %s229_s0 = inlined_call_operand.vmem [shape: bf16[32,64], index: 0, kind: input, shape index: {}]   ;;  %s230_s2 = inlined_call_operand.vmem [shape: bf16[32,32], index: 2, kind: output, shape index: {}]  }
   0x1   :  { %v177_v0 = vld [vmem:[%s228_s1] sm:$0xff]   ;;  %v178_v1 = vld [vmem:[%s228_s1 + $0x8] sm:$0xff]   ;;  %v179_v2 = vld [vmem:[%s228_s1 + $0x10] sm:$0xff]  }
   0x2   :  { %165 = vmatprep.subr.bf16.mxu0 %v177_v0  ;;  %v181_v3 = vld [vmem:[%s229_s0] sm:$0xff]   ;;  %v180_v4 = vld [vmem:[%s228_s1 + $0x18] sm:$0xff]   ;;  %v182_v5 = vld [vmem:[%s229_s0 + $0x8] sm:$0xff]  }
   0x3   :  { %166 = vmatpush3.bf16.msra.mxu0 %v177_v0  ;;  %173 = vmatprep.mubr.msk.bf16.mxu0 %vm58_vm0, %v181_v3 }
   0x4   :  { %167 = vmatprep.subr.bf16.mxu0 %v178_v1 }
   0x7   :  { %168 = vmatpush3.bf16.msra.mxu0 %v178_v1 }
   0x8   :  { %169 = vmatprep.subr.bf16.mxu0 %v179_v2 }
   0xb   :  { %170 = vmatpush3.bf16.msra.mxu0 %v179_v2 }
   0xc   :  { %171 = vmatprep.subr.bf16.mxu0 %v180_v4 }
   0xf   :  { %172 = vmatpush3.bf16.msra.mxu0 %v180_v4 }
  0x12   :  { %174 = vmatmul.mubr.msk.bf16.vlgmr.msra.gmra.mrb[0].mxu0 %vm58_vm0, %v182_v5 }
  0xe5   :  { %v175_v6 = vpop.f32.mrb[0].mxu0 }
  0xe6   :  { %v116_v7 = vmax.f32 %v175_v6, 0.0  ;;  %v99_v8 = vpop.f32.mrb[1].mxu0 }
  0xe7   :  { %v114_v9 = vmax.f32 %v99_v8, 0.0  ;;  %v176_v10 = vpop.f32.mrb[2].mxu0 }
  0xe8   :  { %v157_v11 = vpack.c.bf16 %v116_v7, %v116_v7  ;;  %v117_v12 = vmax.f32 %v176_v10, 0.0  ;;  %v102_v13 = vpop.f32.mrb[3].mxu0 }
  0xe9   :  { %v155_v14 = vpack.c.bf16 %v114_v9, %v114_v9  ;;  %v115_v15 = vmax.f32 %v102_v13, 0.0 }
  0xea   :  { %137 = vst.msk [vmem:[%s230_s2 + $0x8] sm:$0xf] %vm134_vm1, %v157_v11  ;;  %v158_v16 = vpack.c.bf16 %v117_v12, %v117_v12 }
  0xeb   :  { %135 = vst.msk [vmem:[%s230_s2] sm:$0xf] %vm134_vm1, %v155_v14  ;;  %v156_v17 = vpack.c.bf16 %v115_v15, %v115_v15 }
  0xec   :  { %138 = vst.msk [vmem:[%s230_s2 + $0xc] sm:$0xf] %vm134_vm1, %v158_v16 }
  0xed   :  { %136 = vst.msk [vmem:[%s230_s2 + $0x4] sm:$0xf] %vm134_vm1, %v156_v17 }

// kernel: bridger_forward.39
= control target key start
LH: loop header
LB: loop body
LE: loop exit
PB: predicated region body
PF: predicated region fallthrough
CT: control target
= control target key end

     0   :  { %v171_v0 = vmov 0.0   ;;  %vm172_vm0 = vmmov 0   ;;  %vm118_vm1 = vcmask 257024   ;;  %s218_s1 = inlined_call_operand.vmem [shape: bf16[128,32], index: 1, kind: input, shape index: {}]   ;;  %s219_s0 = inlined_call_operand.vmem [shape: bf16[8,128], index: 0, kind: input, shape index: {}]   ;;  %s220_s2 = inlined_call_operand.vmem [shape: bf16[8,32], index: 2, kind: output, shape index: {}]  }
   0x1   :  { %141 = vmatprep.subr.bf16.mxu0 %v171_v0  ;;  %v163_v1 = vld [vmem:[%s218_s1] sm:$0xff]   ;;  %157 = vmatprep.mubr.msk.bf16.mxu0 %vm172_vm0, %v171_v0  ;;  %v164_v2 = vld [vmem:[%s218_s1 + $0x8] sm:$0xff]   ;;  %v165_v3 = vld [vmem:[%s218_s1 + $0x10] sm:$0xff]  }
   0x2   :  { %142 = vmatpush3.bf16.msra.mxu0 %v163_v1  ;;  %v166_v4 = vld [vmem:[%s218_s1 + $0x18] sm:$0xff]   ;;  %v167_v5 = vld [vmem:[%s218_s1 + $0x20] sm:$0xff]   ;;  %v168_v6 = vld [vmem:[%s218_s1 + $0x28] sm:$0xff]  }
   0x3   :  { %143 = vmatprep.subr.bf16.mxu0 %v171_v0  ;;  %v169_v7 = vld [vmem:[%s218_s1 + $0x30] sm:$0xff]   ;;  %v170_v8 = vld [vmem:[%s218_s1 + $0x38] sm:$0xff]   ;;  %v12_v9 = vld [vmem:[%s219_s0] sm:$0xf] }
   0x6   :  { %144 = vmatpush3.bf16.msra.mxu0 %v164_v2 }
   0x7   :  { %145 = vmatprep.subr.bf16.mxu0 %v171_v0 }
   0xa   :  { %146 = vmatpush3.bf16.msra.mxu0 %v165_v3 }
   0xb   :  { %147 = vmatprep.subr.bf16.mxu0 %v171_v0 }
   0xe   :  { %148 = vmatpush3.bf16.msra.mxu0 %v166_v4 }
   0xf   :  { %149 = vmatprep.subr.bf16.mxu0 %v171_v0 }
  0x12   :  { %150 = vmatpush3.bf16.msra.mxu0 %v167_v5 }
  0x13   :  { %151 = vmatprep.subr.bf16.mxu0 %v171_v0 }
  0x16   :  { %152 = vmatpush3.bf16.msra.mxu0 %v168_v6 }
  0x17   :  { %153 = vmatprep.subr.bf16.mxu0 %v171_v0 }
  0x1a   :  { %154 = vmatpush3.bf16.msra.mxu0 %v169_v7 }
  0x1b   :  { %155 = vmatprep.subr.bf16.mxu0 %v171_v0 }
  0x1e   :  { %156 = vmatpush3.bf16.msra.mxu0 %v170_v8 }
  0x21   :  { %158 = vmatmul.mubr.bf16.vlgmr.msra.gmra.mrb[0].mxu0 %v12_v9 }
  0xf4   :  { %v111_v10 = vpop.f32.mrb[0].mxu0 }
  0xf5   :  { %v117_v11 = vpack.c.bf16 %v111_v10, %v111_v10  ;;  %v159_v12 = vpop.f32.mrb[1].mxu0 }
  0xf6   :  { %v114_v13 = vpop.f32.mrb[2].mxu0 }
  0xf7   :  { %119 = vst.msk [vmem:[%s220_s2] sm:$0xf] %vm118_vm1, %v117_v11  ;;  %v160_v14 = vpop.f32.mrb[3].mxu0 }

// kernel: bridger_forward.40
= control target key start
LH: loop header
LB: loop body
LE: loop exit
PB: predicated region body
PF: predicated region fallthrough
CT: control target
= control target key end

     0   :  { %9 = vsyncpa [#allocation3], 0  ;;  %s200_s0 = inlined_call_operand.vmem [shape: bf16[8,32], index: 0, kind: input, shape index: {}]   ;;  %s201_s1 = inlined_call_operand.vmem [shape: f32[8,32], index: 1, kind: input, shape index: {}]   ;;  %s202_s2 = inlined_call_operand.hbm [shape: f32[1,32], index: 2, kind: input, shape index: {}]   ;;  %s203_s3 = inlined_call_operand.hbm [shape: f32[1,32], index: 3, kind: input, shape index: {}]   ;;  %s204_s4 = inlined_call_operand.vmem [shape: f32[8,32], index: 4, kind: output, shape index: {}]  }
   0x1   :  { %10 = vsyncpa [#allocation5], 0  ;;  %s137_s15 = smov [#allocation2]   ;;  %s138_s17 = smov [#allocation4]  }
   0x2   :  { %s21_s16 = sshll.u32 %s137_s15, 4  ;;  %s31_s18 = sshll.u32 %s138_s17, 4  ;;  %s22_s16 = int_to_ptr.vmem [resolvable:$true] %s21_s16  ;;  %s32_s18 = int_to_ptr.vmem [resolvable:$true] %s31_s18 }
   0x3   :  { %s89_s21 = scalar_lea.hbm %s202_s2, 16 }
   0x4   :  { %p90_p0 = scmp.ne.s32.totalorder %s202_s2, %s89_s21  ;;  %p93_p1 = scmp.lt.u32.totalorder %s89_s21, %s202_s2 }
   0x6   :  { %p95_p2 = pnand %p93_p1, %p90_p0 }
   0x8   :  { %98 = shalt.err (!%p95_p2)
}
   0x9   :  { %s99_s26 = scalar_lea.vmem %s22_s16, 16  ;;  %s103_s27 = scalar_lea.vmem %s22_s16, 32 }
   0xa   :  { %p100_p3 = scmp.ne.s32.totalorder %s22_s16, %s99_s26  ;;  %p104_p4 = scmp.lt.s32.totalorder %s22_s16, %s22_s16 }
   0xb   :  { %p105_p5 = scmp.lt.s32.totalorder %s103_s27, %s99_s26 }
   0xd   :  { %p106_p6 = por %p105_p5, %p104_p4 }
   0xf   :  { %p107_p7 = pnand %p106_p6, %p100_p3 }
  0x11   :  { %110 = shalt.err (!%p107_p7)
}
  0x12   :  { %24 = dma.hbm_to_vmem [thread:$0]  %s202_s2, 16, %s22_s16, [#allocation3]  }
  0x13   :  { %s111_s6 = scalar_lea.hbm %s203_s3, 16 }
  0x14   :  { %p112_p8 = scmp.ne.s32.totalorder %s203_s3, %s111_s6  ;;  %p115_p9 = scmp.lt.u32.totalorder %s111_s6, %s203_s3 }
  0x16   :  { %p117_p10 = pnand %p115_p9, %p112_p8 }
  0x18   :  { %120 = shalt.err (!%p117_p10)
}
  0x19   :  { %s121_s11 = scalar_lea.vmem %s32_s18, 16  ;;  %s125_s12 = scalar_lea.vmem %s32_s18, 32 }
  0x1a   :  { %p122_p11 = scmp.ne.s32.totalorder %s32_s18, %s121_s11  ;;  %p126_p12 = scmp.lt.s32.totalorder %s32_s18, %s32_s18 }
  0x1b   :  { %p127_p13 = scmp.lt.s32.totalorder %s125_s12, %s121_s11 }
  0x1d   :  { %p128_p0 = por %p127_p13, %p126_p12 }
  0x1f   :  { %p129_p1 = pnand %p128_p0, %p122_p11 }
  0x21   :  { %132 = shalt.err (!%p129_p1)
}
  0x22   :  { %34 = dma.hbm_to_vmem [thread:$0]  %s203_s3, 16, %s32_s18, [#allocation5]  }
  0x23   :  { %133 = dma.done.wait [#allocation3], 16  }
  0x24   :  { %134 = vsyncadd [#allocation3], 4294967280 }
  0x25   :  { %135 = dma.done.wait [#allocation5], 16  }
  0x26   :  { %136 = vsyncadd [#allocation5], 4294967280  ;;  %v41_v0 = vld [vmem:[%s200_s0] sm:$0xf]  ;;  %vm47_vm0 = vcmask 261120  }
  0x27   :  { %v43_v1 = vld [vmem:[%s201_s1] sm:$0xff]  ;;  %v42_v2 = vunpack.c.l.bf16 %v41_v0 }
  0x28   :  { %v83_v14 = vld [vmem:[#allocation2] ss:$0 sm:$0xff]  ;;  %v84_v16 = vld [vmem:[#allocation4] ss:$0 sm:$0xff] }
  0x29   :  { %v44_v3 = vadd.f32 %v43_v1, %v42_v2 }
  0x2b   :  { %v48_v4 = vsel %vm47_vm0, %v44_v3, 0.0 }
  0x2c   :  { %49 = vadd.xlane.f32.xlu0 %v48_v4 }
  0xb9   :  { %v50_v5 = vpop.xlane.xlu0 %49 }
  0xba   :  { %v52_v6 = vmul.f32 0.03125, %v50_v5 }
  0xbc   :  { %v53_v7 = vsub.f32 %v44_v3, %v52_v6 }
  0xbe   :  { %v54_v8 = vmul.f32 %v53_v7, %v53_v7 }
  0xc0   :  { %v55_v9 = vsel %vm47_vm0, %v54_v8, 0.0 }
  0xc1   :  { %56 = vadd.xlane.f32.xlu0 %v55_v9 }
 0x14e   :  { %v57_v10 = vpop.xlane.xlu0 %56 }
 0x14f   :  { %v58_v11 = vmul.f32 0.03125, %v57_v10 }
 0x151   :  { %v59_v12 = vadd.f32 1e-05, %v58_v11 }
 0x153   :  { %87 = vrsqrt.f32 %v59_v12 }
 0x15d   :  { %v88_v13 = vpop.eup %87 }
 0x15e   :  { %v61_v15 = vmul.f32 %v88_v13, %v53_v7 }
 0x160   :  { %v68_v17 = vmul.f32 %v83_v14, %v61_v15 }
 0x162   :  { %v75_v18 = vadd.f32 %v84_v16, %v68_v17 }
 0x164   :  { %76 = vst.msk [vmem:[%s204_s4] sm:$0xff] %vm47_vm0, %v75_v18 }
 0x165   :  { %81 = vsyncpa [#allocation3], 1 }
 0x166   :  { %82 = vsyncpa [#allocation5], 1 }

// kernel: bridger_forward.41
= control target key start
LH: loop header
LB: loop body
LE: loop exit
PB: predicated region body
PF: predicated region fallthrough
CT: control target
= control target key end

     0   :  { %10 = vsyncpa [#allocation3], 0  ;;  %s374_s0 = inlined_call_operand.vmem [shape: f32[16,32], index: 0, kind: input, shape index: {}]   ;;  %s375_s1 = inlined_call_operand.vmem [shape: bf16[32,32], index: 1, kind: input, shape index: {}]   ;;  %s376_s2 = inlined_call_operand.hbm [shape: f32[1,32], index: 2, kind: input, shape index: {}]   ;;  %s377_s3 = inlined_call_operand.hbm [shape: f32[1,32], index: 3, kind: input, shape index: {}]   ;;  %s378_s4 = inlined_call_operand.hbm [shape: f32[1,32], index: 4, kind: input, shape index: {}]   ;;  %s379_s5 = inlined_call_operand.vmem [shape: f32[16,32], index: 5, kind: output, shape index: {}]  }
   0x1   :  { %11 = vsyncpa [#allocation5], 0  ;;  %s278_s18 = smov [#allocation4]   ;;  %s279_s20 = smov [#allocation2]  }
   0x2   :  { %s32_s19 = sshll.u32 %s278_s18, 4  ;;  %s22_s21 = sshll.u32 %s279_s20, 4  ;;  %s33_s19 = int_to_ptr.vmem [resolvable:$true] %s32_s19  ;;  %s23_s21 = int_to_ptr.vmem [resolvable:$true] %s22_s21 }
   0x3   :  { %s208_s24 = scalar_lea.hbm %s377_s3, 16 }
   0x4   :  { %p209_p0 = scmp.ne.s32.totalorder %s377_s3, %s208_s24  ;;  %p212_p1 = scmp.lt.u32.totalorder %s208_s24, %s377_s3 }
   0x6   :  { %p214_p2 = pnand %p212_p1, %p209_p0 }
   0x8   :  { %217 = shalt.err (!%p214_p2)
}
   0x9   :  { %s218_s29 = scalar_lea.vmem %s33_s19, 16  ;;  %s222_s30 = scalar_lea.vmem %s33_s19, 32 }
   0xa   :  { %p219_p3 = scmp.ne.s32.totalorder %s33_s19, %s218_s29  ;;  %p223_p4 = scmp.lt.s32.totalorder %s33_s19, %s33_s19 }
   0xb   :  { %p224_p5 = scmp.lt.s32.totalorder %s222_s30, %s218_s29 }
   0xd   :  { %p225_p6 = por %p224_p5, %p223_p4 }
   0xf   :  { %p226_p7 = pnand %p225_p6, %p219_p3 }
  0x11   :  { %229 = shalt.err (!%p226_p7)
}
  0x12   :  { %35 = dma.hbm_to_vmem [thread:$0]  %s377_s3, 16, %s33_s19, [#allocation5]  }
  0x13   :  { %s230_s10 = scalar_lea.hbm %s376_s2, 16 }
  0x14   :  { %p231_p8 = scmp.ne.s32.totalorder %s376_s2, %s230_s10  ;;  %p234_p9 = scmp.lt.u32.totalorder %s230_s10, %s376_s2 }
  0x16   :  { %p236_p10 = pnand %p234_p9, %p231_p8 }
  0x18   :  { %239 = shalt.err (!%p236_p10)
}
  0x19   :  { %s240_s15 = scalar_lea.vmem %s23_s21, 16  ;;  %s244_s16 = scalar_lea.vmem %s23_s21, 32 }
  0x1a   :  { %p241_p11 = scmp.ne.s32.totalorder %s23_s21, %s240_s15  ;;  %p245_p12 = scmp.lt.s32.totalorder %s23_s21, %s23_s21 }
  0x1b   :  { %p246_p13 = scmp.lt.s32.totalorder %s244_s16, %s240_s15 }
  0x1d   :  { %p247_p0 = por %p246_p13, %p245_p12 }
  0x1f   :  { %p248_p1 = pnand %p247_p0, %p241_p11 }
  0x21   :  { %251 = shalt.err (!%p248_p1)
}
  0x22   :  { %25 = dma.hbm_to_vmem [thread:$0]  %s376_s2, 16, %s23_s21, [#allocation3]  }
  0x23   :  { %s280_s18 = smov [#allocation6]   ;;  %s252_s23 = scalar_lea.hbm %s378_s4, 16 }
  0x24   :  { %s42_s19 = sshll.u32 %s280_s18, 4  ;;  %p253_p2 = scmp.ne.s32.totalorder %s378_s4, %s252_s23  ;;  %s43_s19 = int_to_ptr.vmem [resolvable:$true] %s42_s19 }
  0x25   :  { %p256_p3 = scmp.lt.u32.totalorder %s252_s23, %s378_s4 }
  0x27   :  { %p258_p4 = pnand %p256_p3, %p253_p2 }
  0x29   :  { %261 = shalt.err (!%p258_p4)
}
  0x2a   :  { %s262_s28 = scalar_lea.vmem %s43_s19, 16  ;;  %s266_s2 = scalar_lea.vmem %s43_s19, 32 }
  0x2b   :  { %p263_p5 = scmp.ne.s32.totalorder %s43_s19, %s262_s28  ;;  %p267_p6 = scmp.lt.s32.totalorder %s43_s19, %s43_s19 }
  0x2c   :  { %p268_p7 = scmp.lt.s32.totalorder %s266_s2, %s262_s28 }
  0x2e   :  { %p269_p8 = por %p268_p7, %p267_p6 }
  0x30   :  { %p270_p9 = pnand %p269_p8, %p263_p5 }
  0x32   :  { %273 = shalt.err (!%p270_p9)
}
  0x33   :  { %45 = dma.hbm_to_vmem [thread:$0]  %s378_s4, 16, %s43_s19, [#allocation5]  }
  0x34   :  { %274 = dma.done.wait [#allocation3], 16  }
  0x35   :  { %275 = vsyncadd [#allocation3], 4294967280 }
  0x36   :  { %276 = dma.done.wait [#allocation5], 32  }
  0x37   :  { %277 = vsyncadd [#allocation5], 4294967264  ;;  %v281_v0 = vmov 0.0   ;;  %vm282_vm0 = vmmov 0   ;;  %v202_v1 = vld [vmem:[%s375_s1] sm:$0xff]   ;;  %v203_v2 = vld [vmem:[%s375_s1 + $0x8] sm:$0xff]  }
  0x38   :  { %189 = vmatprep.subr.bf16.mxu0 %v281_v0  ;;  %193 = vmatprep.mubr.msk.bf16.mxu0 %vm282_vm0, %v281_v0  ;;  %v56_v3 = vld [vmem:[%s374_s0] sm:$0xff]  ;;  %v57_v4 = vld [vmem:[%s374_s0 + $0x8] sm:$0xff]  ;;  %vm82_vm1 = vcmask 261120  }
  0x39   :  { %190 = vmatpush3.bf16.msra.mxu0 %v202_v1  ;;  %v62_v5 = vpack.c.bf16 %v57_v4, %v56_v3  ;;  %v180_v6 = vld [vmem:[#allocation2] ss:$0 sm:$0xff]  ;;  %v184_v32 = vld [vmem:[#allocation4] ss:$0 sm:$0xff]  ;;  %v185_v34 = vld [vmem:[#allocation6] ss:$0 sm:$0xff] }
  0x3a   :  { %191 = vmatprep.subr.bf16.mxu0 %v281_v0 }
  0x3d   :  { %192 = vmatpush3.bf16.msra.mxu0 %v203_v2 }
  0x40   :  { %194 = vmatmul.mubr.msk.bf16.vlgmr.msra.gmra.mrb[0].mxu0 %vm82_vm1, %v62_v5 }
 0x113   :  { %v120_v7 = vpop.f32.mrb[0].mxu0 }
 0x114   :  { %v121_v8 = vadd.f32 %v180_v6, %v120_v7  ;;  %v195_v9 = vpop.f32.mrb[1].mxu0 }
 0x115   :  { %v123_v10 = vpop.f32.mrb[2].mxu0 }
 0x116   :  { %v124_v11 = vadd.f32 %v180_v6, %v123_v10  ;;  %v196_v12 = vpop.f32.mrb[3].mxu0  ;;  %v129_v13 = vsel %vm82_vm1, %v121_v8, 0.0 }
 0x117   :  { %130 = vadd.xlane.f32.xlu0 %v129_v13 }
 0x118   :  { %v132_v14 = vsel %vm82_vm1, %v124_v11, 0.0 }
 0x11b   :  { %133 = vadd.xlane.f32.xlu0 %v132_v14 }
 0x1a4   :  { %v131_v15 = vpop.xlane.xlu0 %130 }
 0x1a5   :  { %v136_v16 = vmul.f32 0.03125, %v131_v15 }
 0x1a7   :  { %v138_v17 = vsub.f32 %v121_v8, %v136_v16 }
 0x1a8   :  { %v134_v18 = vpop.xlane.xlu0 %133 }
 0x1a9   :  { %v137_v19 = vmul.f32 0.03125, %v134_v18  ;;  %v140_v20 = vmul.f32 %v138_v17, %v138_v17 }
 0x1ab   :  { %v139_v21 = vsub.f32 %v124_v11, %v137_v19  ;;  %v142_v22 = vsel %vm82_vm1, %v140_v20, 0.0 }
 0x1ac   :  { %143 = vadd.xlane.f32.xlu1 %v142_v22 }
 0x1ad   :  { %v141_v23 = vmul.f32 %v139_v21, %v139_v21 }
 0x1af   :  { %v145_v24 = vsel %vm82_vm1, %v141_v23, 0.0 }
 0x1b0   :  { %146 = vadd.xlane.f32.xlu1 %v145_v24 }
 0x239   :  { %v144_v25 = vpop.xlane.xlu1 %143 }
 0x23a   :  { %v148_v26 = vmul.f32 0.03125, %v144_v25 }
 0x23c   :  { %v150_v27 = vadd.f32 1e-05, %v148_v26 }
 0x23d   :  { %v147_v28 = vpop.xlane.xlu1 %146 }
 0x23e   :  { %204 = vrsqrt.f32 %v150_v27  ;;  %v149_v29 = vmul.f32 0.03125, %v147_v28 }
 0x240   :  { %v151_v30 = vadd.f32 1e-05, %v149_v29 }
 0x242   :  { %206 = vrsqrt.f32 %v151_v30 }
 0x248   :  { %v205_v31 = vpop.eup %204 }
 0x249   :  { %v154_v33 = vmul.f32 %v205_v31, %v138_v17 }
 0x24b   :  { %v162_v35 = vmul.f32 %v184_v32, %v154_v33 }
 0x24c   :  { %v207_v36 = vpop.eup %206 }
 0x24d   :  { %v170_v37 = vadd.f32 %v185_v34, %v162_v35  ;;  %v155_v38 = vmul.f32 %v207_v36, %v139_v21 }
 0x24f   :  { %172 = vst.msk [vmem:[%s379_s5] sm:$0xff] %vm82_vm1, %v170_v37  ;;  %v163_v39 = vmul.f32 %v184_v32, %v155_v38 }
 0x251   :  { %v171_v40 = vadd.f32 %v185_v34, %v163_v39 }
 0x253   :  { %173 = vst.msk [vmem:[%s379_s5 + $0x8] sm:$0xff] %vm82_vm1, %v171_v40 }
 0x254   :  { %178 = vsyncpa [#allocation3], 1 }
 0x255   :  { %179 = vsyncpa [#allocation5], 1 }

// kernel: bridger_forward.37
= control target key start
LH: loop header
LB: loop body
LE: loop exit
PB: predicated region body
PF: predicated region fallthrough
CT: control target
= control target key end

     0   :  { %s663_s18 = smov 0   ;;  %s665_s19 = smov 0   ;;  %s754_s0 = inlined_call_operand.vmem [shape: f32[16,32], index: 0, kind: input, shape index: {}]   ;;  %s755_s1 = inlined_call_operand.vmem [shape: bf16[12,32,32], index: 1, kind: input, shape index: {}]   ;;  %s756_s2 = inlined_call_operand.vmem [shape: f32[12,1,32], index: 2, kind: input, shape index: {}]   ;;  %s757_s3 = inlined_call_operand.vmem [shape: f32[12,1,32], index: 3, kind: input, shape index: {}]   ;;  %s758_s4 = inlined_call_operand.vmem [shape: f32[12,1,32], index: 4, kind: input, shape index: {}]   ;;  %s759_s5 = inlined_call_operand.vmem [shape: f32[16,32], index: 5, kind: output, shape index: {}]  }
   0x1   :  { %s667_s20 = smov 0  }
   0x2 LB: > { %s24_s21 = sadd.s32 1, %s625_s19  ;;  %p548_p0 = scmp.ge.s32.totalorder %s629_s20, 1  ;;  %s629_s20 = sphi %s667_s20, %s15_s20   ;;  %s625_s19 = sphi %s665_s19, %s761_s19   ;;  %s621_s18 = sphi %s663_s18, %s760_s18  }
   0x3   : > { %p25_p1 = scmp.ge.s32.totalorder %s24_s21, 4  ;;  %p234_p2 = scmp.lt.s32.totalorder %s629_s20, 5 }
   0x5   : > { %s763_s21 = smov (%p25_p1, %s24_s21), 0  ;;  %p235_p3 = pnand %p548_p0, %p234_p2 }
   0x6   : > { %p282_p4 = scmp.lt.s32.totalorder (!%p235_p3), %s621_s18, 11  ;;  %p551_p5 = scmp.ne.s32.totalorder (!%p235_p3), %s621_s18, 0 }
   0x7   : > { %238 = sbr.rel (%p235_p3) target bundleno = 570 (0x23a), region = 40 }
   0xe   : > { %s685_s22 = scalar_select %p282_p4, %s621_s18, 11 }
   0xf   : > { %306 = sbr.rel (%p551_p5) target bundleno = 22 (0x16), region = 44  ;;  %v307_v0 = vld [vmem:[%s754_s0] sm:$0xff] (!%p551_p5)  ;;  %vm309_vm0 = vcmask (!%p551_p5), 261120   ;;  %v308_v1 = vld [vmem:[%s754_s0 + $0x8] sm:$0xff] (!%p551_p5) }
  0x10   : > { %s563_s23 = sshll.u32 %s685_s22, 4  ;;  %s289_s26 = scalar_lea.vmem %s756_s2, %s685_s22  ;;  %310 = vst.msk [vmem:[#allocation2] sm:$0xff] (!%p551_p5), %vm309_vm0, %v307_v0  ;;  %311 = vst.msk [vmem:[#allocation2 + $0x8] sm:$0xff] (!%p551_p5), %vm309_vm0, %v308_v1 }
  0x11   : > { %s695_s29 = scalar_lea.vmem %s755_s1, %s563_s23  ;;  %s292_s7 = scalar_lea.vmem %s757_s3, %s685_s22 }
  0x12   : > { %s295_s10 = scalar_lea.vmem %s758_s4, %s685_s22 }
  0x16 PF: > { %vm316_vm1 = vcmask 261120   ;;  %v601_v16 = vld [vmem:[%s695_s29] sm:$0xff]   ;;  %v631_v17 = vmov 0.0   ;;  %v602_v18 = vld [vmem:[%s695_s29 + $0x8] sm:$0xff]   ;;  %vm632_vm2 = vmmov 0   ;;  %p558_p6 = scmp.ne.s32.totalorder %s621_s18, 3 }
  0x17   : > { %v312_v2 = vld [vmem:[#allocation2] sm:$0xff]  ;;  %v313_v3 = vld [vmem:[#allocation2 + $0x8] sm:$0xff]  ;;  %567 = vmatprep.subr.bf16.mxu0 %v631_v17  ;;  %571 = vmatprep.mubr.msk.bf16.mxu0 %vm632_vm2, %v631_v17 }
  0x18   : > { %v317_v4 = vsel %vm316_vm1, %v312_v2, 0.0  ;;  %v320_v5 = vsel %vm316_vm1, %v313_v3, 0.0  ;;  %568 = vmatpush3.bf16.msra.mxu0 %v601_v16  ;;  %v552_v27 = vld [vmem:[%s292_s7] ss:$0 sm:$0xff] }
  0x19   : > { %318 = vadd.xlane.f32.xlu0 %v317_v4  ;;  %569 = vmatprep.subr.bf16.mxu0 %v631_v17  ;;  %v553_v31 = vld [vmem:[%s295_s10] ss:$0 sm:$0xff] }
  0x1a   : > { %v554_v36 = vld [vmem:[%s289_s26] ss:$0 sm:$0xff] }
  0x1c   : > { %570 = vmatpush3.bf16.msra.mxu0 %v602_v18 }
  0x1d   : > { %321 = vadd.xlane.f32.xlu0 %v320_v5 }
  0xa6   : > { %v319_v6 = vpop.xlane.xlu0 %318 }
  0xa7   : > { %v324_v7 = vmul.f32 0.03125, %v319_v6 }
  0xa9   : > { %v326_v8 = vsub.f32 %v312_v2, %v324_v7 }
  0xaa   : > { %v322_v9 = vpop.xlane.xlu0 %321 }
  0xab   : > { %v325_v10 = vmul.f32 0.03125, %v322_v9  ;;  %v328_v11 = vmul.f32 %v326_v8, %v326_v8 }
  0xad   : > { %v327_v12 = vsub.f32 %v313_v3, %v325_v10  ;;  %v330_v13 = vsel %vm316_vm1, %v328_v11, 0.0 }
  0xae   : > { %331 = vadd.xlane.f32.xlu1 %v330_v13 }
  0xaf   : > { %v329_v14 = vmul.f32 %v327_v12, %v327_v12 }
  0xb1   : > { %v333_v15 = vsel %vm316_vm1, %v329_v14, 0.0 }
  0xb2   : > { %334 = vadd.xlane.f32.xlu1 %v333_v15 }
 0x13b   : > { %v332_v19 = vpop.xlane.xlu1 %331 }
 0x13c   : > { %v336_v20 = vmul.f32 0.03125, %v332_v19 }
 0x13e   : > { %v338_v21 = vadd.f32 1e-05, %v336_v20 }
 0x13f   : > { %v335_v22 = vpop.xlane.xlu1 %334 }
 0x140   : > { %603 = vrsqrt.f32 %v338_v21  ;;  %v337_v23 = vmul.f32 0.03125, %v335_v22 }
 0x142   : > { %v339_v24 = vadd.f32 1e-05, %v337_v23 }
 0x144   : > { %605 = vrsqrt.f32 %v339_v24 }
 0x14a   : > { %v604_v25 = vpop.eup %603 }
 0x14b   : > { %v342_v26 = vmul.f32 %v604_v25, %v326_v8 }
 0x14d   : > { %v350_v30 = vmul.f32 %v552_v27, %v342_v26 }
 0x14e   : > { %v606_v28 = vpop.eup %605 }
 0x14f   : > { %v343_v29 = vmul.f32 %v606_v28, %v327_v12  ;;  %v358_v33 = vadd.f32 %v553_v31, %v350_v30 }
 0x151   : > { %v351_v32 = vmul.f32 %v552_v27, %v343_v29 }
 0x153   : > { %v359_v34 = vadd.f32 %v553_v31, %v351_v32 }
 0x155   : > { %v360_v35 = vpack.c.bf16 %v359_v34, %v358_v33 }
 0x157   : > { %572 = vmatmul.mubr.msk.bf16.vlgmr.msra.gmra.mrb[0].mxu0 %vm316_vm1, %v360_v35 }
 0x22a   : > { %v421_v37 = vpop.f32.mrb[0].mxu0 }
 0x22b   : > { %v422_v38 = vadd.f32 %v554_v36, %v421_v37  ;;  %v573_v39 = vpop.f32.mrb[1].mxu0  ;;  %435 = sbr.rel (%p558_p6) target bundleno = 570 (0x23a), region = 48 }
 0x22c   : > { %v424_v40 = vpop.f32.mrb[2].mxu0 }
 0x22d   : > { %v428_v41 = vadd.f32 %v422_v38, %v312_v2  ;;  %v425_v42 = vadd.f32 %v554_v36, %v424_v40  ;;  %v574_v43 = vpop.f32.mrb[3].mxu0 }
 0x22f   : > { %430 = vst.msk [vmem:[#allocation2] sm:$0xff] %vm316_vm1, %v428_v41  ;;  %v429_v44 = vadd.f32 %v425_v42, %v313_v3 }
 0x231   : > { %431 = vst.msk [vmem:[#allocation2 + $0x8] sm:$0xff] %vm316_vm1, %v429_v44 }
 0x236   : > { %v436_v45 = vld [vmem:[#allocation2] sm:$0xff] }
 0x237   : > { %438 = vst.msk [vmem:[%s759_s5] sm:$0xff] %vm316_vm1, %v436_v45 }
 0x238   : > { %v437_v46 = vld [vmem:[#allocation2 + $0x8] sm:$0xff] }
 0x239   : > { %439 = vst.msk [vmem:[%s759_s5 + $0x8] sm:$0xff] %vm316_vm1, %v437_v46 }
 0x23a PF: > { %s15_s20 = sadd.s32 1, %s629_s20   ;;  %s760_s18 = smov %s625_s19 }
 0x23b   : > { %p12_p7 = scmp.ge.s32.totalorder %s15_s20, 6   ;;  %s761_s19 = smov %s763_s21 }
 0x23d   :  { %14 = sbr.rel (!%p12_p7) target bundleno = 2 (0x2), region = 90 }

// kernel: bridger_forward.43
= control target key start
LH: loop header
LB: loop body
LE: loop exit
PB: predicated region body
PF: predicated region fallthrough
CT: control target
= control target key end

     0   :  { %v98_v0 = vmov 0.0   ;;  %vm99_vm0 = vmmov 0   ;;  %vm30_vm1 = vcmask 261120   ;;  %s127_s1 = inlined_call_operand.vmem [shape: bf16[32,128], index: 1, kind: input, shape index: {}]   ;;  %s128_s0 = inlined_call_operand.vmem [shape: f32[8,32], index: 0, kind: input, shape index: {}]   ;;  %s129_s2 = inlined_call_operand.vmem [shape: bf16[8,128], index: 2, kind: output, shape index: {}]  }
   0x1   :  { %86 = vmatprep.subr.bf16.mxu0 %v98_v0  ;;  %v96_v1 = vld [vmem:[%s127_s1] sm:$0xff]   ;;  %90 = vmatprep.mubr.msk.bf16.mxu0 %vm99_vm0, %v98_v0  ;;  %v97_v2 = vld [vmem:[%s127_s1 + $0x8] sm:$0xff]  }
   0x2   :  { %87 = vmatpush3.bf16.msra.mxu0 %v96_v1  ;;  %v12_v3 = vld [vmem:[%s128_s0] sm:$0xff] }
   0x3   :  { %88 = vmatprep.subr.bf16.mxu0 %v98_v0  ;;  %v17_v4 = vpack.c.bf16 %v12_v3, %v12_v3 }
   0x6   :  { %89 = vmatpush3.bf16.msra.mxu0 %v97_v2 }
   0x9   :  { %91 = vmatmul.mubr.msk.bf16.vlgmr.msra.gmra.mrb[0].mxu0 %vm30_vm1, %v17_v4 }
  0xdc   :  { %v68_v5 = vpop.f32.mrb[0].mxu0 }
  0xdd   :  { %v74_v6 = vpack.c.bf16 %v68_v5, %v68_v5  ;;  %v92_v7 = vpop.f32.mrb[1].mxu0 }
  0xde   :  { %v71_v8 = vpop.f32.mrb[2].mxu0 }
  0xdf   :  { %75 = vst [vmem:[%s129_s2] sm:$0xf] %v74_v6  ;;  %v93_v9 = vpop.f32.mrb[3].mxu0 }

// kernel: bridger_forward.46
= control target key start
LH: loop header
LB: loop body
LE: loop exit
PB: predicated region body
PF: predicated region fallthrough
CT: control target
= control target key end

     0   :  { %v172_v0 = vmov 0.0   ;;  %vm173_vm0 = vmmov 0   ;;  %vm119_vm1 = vcmask 519168   ;;  %s219_s1 = inlined_call_operand.vmem [shape: bf16[128,64], index: 1, kind: input, shape index: {}]   ;;  %s220_s0 = inlined_call_operand.vmem [shape: bf16[8,128], index: 0, kind: input, shape index: {}]   ;;  %s221_s2 = inlined_call_operand.vmem [shape: bf16[8,64], index: 2, kind: output, shape index: {}]  }
   0x1   :  { %142 = vmatprep.subr.bf16.mxu0 %v172_v0  ;;  %v164_v1 = vld [vmem:[%s219_s1] sm:$0xff]   ;;  %158 = vmatprep.mubr.msk.bf16.mxu0 %vm173_vm0, %v172_v0  ;;  %v165_v2 = vld [vmem:[%s219_s1 + $0x8] sm:$0xff]   ;;  %v166_v3 = vld [vmem:[%s219_s1 + $0x10] sm:$0xff]  }
   0x2   :  { %143 = vmatpush3.bf16.msra.mxu0 %v164_v1  ;;  %v167_v4 = vld [vmem:[%s219_s1 + $0x18] sm:$0xff]   ;;  %v168_v5 = vld [vmem:[%s219_s1 + $0x20] sm:$0xff]   ;;  %v169_v6 = vld [vmem:[%s219_s1 + $0x28] sm:$0xff]  }
   0x3   :  { %144 = vmatprep.subr.bf16.mxu0 %v172_v0  ;;  %v170_v7 = vld [vmem:[%s219_s1 + $0x30] sm:$0xff]   ;;  %v171_v8 = vld [vmem:[%s219_s1 + $0x38] sm:$0xff]   ;;  %v12_v9 = vld [vmem:[%s220_s0] sm:$0xf] }
   0x6   :  { %145 = vmatpush3.bf16.msra.mxu0 %v165_v2 }
   0x7   :  { %146 = vmatprep.subr.bf16.mxu0 %v172_v0 }
   0xa   :  { %147 = vmatpush3.bf16.msra.mxu0 %v166_v3 }
   0xb   :  { %148 = vmatprep.subr.bf16.mxu0 %v172_v0 }
   0xe   :  { %149 = vmatpush3.bf16.msra.mxu0 %v167_v4 }
   0xf   :  { %150 = vmatprep.subr.bf16.mxu0 %v172_v0 }
  0x12   :  { %151 = vmatpush3.bf16.msra.mxu0 %v168_v5 }
  0x13   :  { %152 = vmatprep.subr.bf16.mxu0 %v172_v0 }
  0x16   :  { %153 = vmatpush3.bf16.msra.mxu0 %v169_v6 }
  0x17   :  { %154 = vmatprep.subr.bf16.mxu0 %v172_v0 }
  0x1a   :  { %155 = vmatpush3.bf16.msra.mxu0 %v170_v7 }
  0x1b   :  { %156 = vmatprep.subr.bf16.mxu0 %v172_v0 }
  0x1e   :  { %157 = vmatpush3.bf16.msra.mxu0 %v171_v8 }
  0x21   :  { %159 = vmatmul.mubr.bf16.vlgmr.msra.gmra.mrb[0].mxu0 %v12_v9 }
  0xf4   :  { %v111_v10 = vpop.f32.mrb[0].mxu0 }
  0xf5   :  { %v117_v11 = vmax.f32 %v111_v10, 0.0  ;;  %v160_v12 = vpop.f32.mrb[1].mxu0 }
  0xf6   :  { %v114_v13 = vpop.f32.mrb[2].mxu0 }
  0xf7   :  { %v118_v14 = vpack.c.bf16 %v117_v11, %v117_v11  ;;  %v161_v15 = vpop.f32.mrb[3].mxu0 }
  0xf9   :  { %120 = vst.msk [vmem:[%s221_s2] sm:$0xf] %vm119_vm1, %v118_v14 }

// kernel: bridger_forward.47
= control target key start
LH: loop header
LB: loop body
LE: loop exit
PB: predicated region body
PF: predicated region fallthrough
CT: control target
= control target key end

     0   :  { %v124_v0 = vmov 0.0   ;;  %vm125_vm0 = vmmov 0   ;;  %vm45_vm1 = vcmask 523264   ;;  %vm90_vm2 = vcmask 257024   ;;  %s159_s1 = inlined_call_operand.vmem [shape: bf16[64,32], index: 1, kind: input, shape index: {}]   ;;  %s160_s0 = inlined_call_operand.vmem [shape: bf16[8,64], index: 0, kind: input, shape index: {}]   ;;  %s161_s2 = inlined_call_operand.vmem [shape: bf16[8,32], index: 2, kind: output, shape index: {}]  }
   0x1   :  { %106 = vmatprep.subr.bf16.mxu0 %v124_v0  ;;  %v120_v1 = vld [vmem:[%s159_s1] sm:$0xff]   ;;  %114 = vmatprep.mubr.msk.bf16.mxu0 %vm125_vm0, %v124_v0  ;;  %v121_v2 = vld [vmem:[%s159_s1 + $0x8] sm:$0xff]   ;;  %v122_v3 = vld [vmem:[%s159_s1 + $0x10] sm:$0xff]  }
   0x2   :  { %107 = vmatpush3.bf16.msra.mxu0 %v120_v1  ;;  %v123_v4 = vld [vmem:[%s159_s1 + $0x18] sm:$0xff]   ;;  %v12_v5 = vld [vmem:[%s160_s0] sm:$0xf] }
   0x3   :  { %108 = vmatprep.subr.bf16.mxu0 %v124_v0 }
   0x6   :  { %109 = vmatpush3.bf16.msra.mxu0 %v121_v2 }
   0x7   :  { %110 = vmatprep.subr.bf16.mxu0 %v124_v0 }
   0xa   :  { %111 = vmatpush3.bf16.msra.mxu0 %v122_v3 }
   0xb   :  { %112 = vmatprep.subr.bf16.mxu0 %v124_v0 }
   0xe   :  { %113 = vmatpush3.bf16.msra.mxu0 %v123_v4 }
  0x11   :  { %115 = vmatmul.mubr.msk.bf16.vlgmr.msra.gmra.mrb[0].mxu0 %vm45_vm1, %v12_v5 }
  0xe4   :  { %v83_v6 = vpop.f32.mrb[0].mxu0 }
  0xe5   :  { %v89_v7 = vpack.c.bf16 %v83_v6, %v83_v6  ;;  %v116_v8 = vpop.f32.mrb[1].mxu0 }
  0xe6   :  { %v86_v9 = vpop.f32.mrb[2].mxu0 }
  0xe7   :  { %91 = vst.msk [vmem:[%s161_s2] sm:$0xf] %vm90_vm2, %v89_v7  ;;  %v117_v10 = vpop.f32.mrb[3].mxu0 }

// kernel: bridger_forward.42
= control target key start
LH: loop header
LB: loop body
LE: loop exit
PB: predicated region body
PF: predicated region fallthrough
CT: control target
= control target key end

     0   :  { %s2140_s30 = smov 0   ;;  %s2498_s0 = inlined_call_operand.vmem [shape: f32[2,4,32], index: 0, kind: input, shape index: {}]   ;;  %s2499_s1 = inlined_call_operand.vmem [shape: f32[2,8,32], index: 1, kind: input, shape index: {}]   ;;  %s2500_s2 = inlined_call_operand.vmem [shape: f32[1,32], index: 2, kind: input, shape index: {}]   ;;  %s2501_s3 = inlined_call_operand.vmem [shape: f32[1,32], index: 3, kind: input, shape index: {}]   ;;  %s2502_s4 = inlined_call_operand.vmem [shape: bf16[32,96], index: 4, kind: input, shape index: {}]   ;;  %s2503_s5 = inlined_call_operand.vmem [shape: f32[1,96], index: 5, kind: input, shape index: {}]   ;;  %s2504_s6 = inlined_call_operand.vmem [shape: bf16[32,32], index: 6, kind: input, shape index: {}]   ;;  %s2505_s7 = inlined_call_operand.vmem [shape: f32[1,32], index: 7, kind: input, shape index: {}]   ;;  %s2506_s8 = inlined_call_operand.vmem [shape: f32[2,4,32], index: 8, kind: output, shape index: {0}]   ;;  %s2507_s9 = inlined_call_operand.vmem [shape: f32[2,8,32], index: 9, kind: output, shape index: {1}]  }
   0x1 LB: > { %s1716_s10 = sadd.s32 4294967295, %s2056_s30   ;;  %p1720_p0 = scmp.ge.s32.totalorder %s2056_s30, 1  ;;  %s2056_s30 = sphi %s2140_s30, %s20_s30  }
   0x2   : > { %p298_p1 = scmp.lt.s32.totalorder %s2056_s30, 3 }
   0x4   : > { %p299_p2 = pnand %p1720_p0, %p298_p1 }
   0x5   : > { %p340_p3 = scmp.lt.s32.totalorder (!%p299_p2), %s1716_s10, 1  ;;  %vm362_vm0 = vcmask (!%p299_p2), 1043456   ;;  %vm366_vm1 = vcmask (!%p299_p2), 261120   ;;  %vm370_vm2 = vcmask (!%p299_p2), 257024   ;;  %v1978_v16 = vld [vmem:[%s2502_s4] sm:$0xff] (!%p299_p2)   ;;  %v2058_v17 = vmov (!%p299_p2), 0.0  }
   0x6   : > { %302 = sbr.rel (%p299_p2) target bundleno = 1857 (0x741), region = 52  ;;  %1791 = vmatprep.subr.bf16.mxu0 (!%p299_p2), %v2058_v17  ;;  %1799 = vmatprep.subr.bf16.mxu1 (!%p299_p2), %v2058_v17  ;;  %v1979_v18 = vld [vmem:[%s2502_s4 + $0x8] sm:$0xff] (!%p299_p2)   ;;  %vm2059_vm3 = vmmov (!%p299_p2), 0   ;;  %v1725_v27 = vld [vmem:[%s2500_s2] ss:$0 sm:$0xff] (!%p299_p2)  ;;  %s2060_s29 = smov (!%p299_p2), 92  }
   0x7   : > { %1792 = vmatpush3.bf16.msra.mxu0 (!%p299_p2), %v1978_v16  ;;  %1795 = vmatprep.mubr.msk.bf16.mxu0 (!%p299_p2), %vm2059_vm3, %v2058_v17  ;;  %v1726_v31 = vld [vmem:[%s2501_s3] ss:$0 sm:$0xff] (!%p299_p2)  ;;  %s2061_s13 = smov (!%p299_p2), 96   ;;  %s2062_s14 = smov (!%p299_p2), 120   ;;  %vm486_vm4 = vcmask (!%p299_p2), 31744   ;;  %vm564_vm5 = vcmask (!%p299_p2), 1045504  }
   0x8   : > { %1793 = vmatprep.subr.bf16.mxu0 (!%p299_p2), %v2058_v17  ;;  %1801 = vmatprep.mubr.msk.bf16.mxu1 (!%p299_p2), %vm2059_vm3, %v2058_v17  ;;  %v1727_v36 = vld [vmem:[%s2503_s5] ss:$0 sm:$0xff] (!%p299_p2)  ;;  %s2064_s16 = smov (!%p299_p2), 116   ;;  %s2065_s17 = smov (!%p299_p2), 88   ;;  %vm534_vm6 = vcmask (!%p299_p2), 97280   ;;  %vm538_vm7 = vcmask (!%p299_p2), 93184  }
   0x9   : > { %s2067_s19 = smov (!%p299_p2), 84   ;;  %s2068_s20 = smov (!%p299_p2), 108   ;;  %vm1529_vm8 = vcmask (!%p299_p2), 64512   ;;  %vm1534_vm9 = vcmask (!%p299_p2), 130048   ;;  %vm1537_vm10 = vcmask (!%p299_p2), 162816   ;;  %vm1540_vm11 = vcmask (!%p299_p2), 195584  }
   0xa   : > { %s2069_s21 = smov (!%p299_p2), 80   ;;  %s2070_s22 = smov (!%p299_p2), 104   ;;  %vm1543_vm12 = vcmask (!%p299_p2), 228352   ;;  %vm1617_vm13 = vcmask (!%p299_p2), 261124  }
   0xb   : > { %1794 = vmatpush3.bf16.msra.mxu0 (!%p299_p2), %v1979_v18  ;;  %s2071_s23 = smov (!%p299_p2), 76   ;;  %s2072_s24 = smov (!%p299_p2), 100  }
   0xc   : > { %1805 = vmatprep.subr.bf16.mxu0 (!%p299_p2), %v2058_v17  ;;  %s2073_s25 = smov (!%p299_p2), 72   ;;  %s2074_s26 = smov (!%p299_p2), 68  }
   0xd   : > { %s2509_s10 = smov (!%p340_p3, %s1716_s10), 1  ;;  %s2075_s27 = smov 64  }
   0xe   : > { %s1721_s11 = sshll.u32 %s2509_s10, 2  ;;  %s1722_s12 = sshll.u32 %s2509_s10, 3 }
   0xf   : > { %s343_s15 = scalar_lea.vmem %s2498_s0, %s1721_s11  ;;  %s347_s18 = scalar_lea.vmem %s2499_s1, %s1722_s12 }
  0x10   : > { %v357_v0 = vld [vmem:[%s343_s15] sm:$0xf]  ;;  %s2063_s15 = smov 124   ;;  %s2076_s28 = smov 56  }
  0x11   : > { %v358_v1 = vld [vmem:[%s347_s18] sm:$0xff]  ;;  %s2066_s18 = smov 112  }
  0x12   : > { %v2162_v2 = vrot.slane %v358_v1, 4 }
  0x14   : > { %v2165_v3 = vsel %vm362_vm0, %v357_v0, %v2162_v2  ;;  %v371_v5 = vsel %vm370_vm2, %v2162_v2, 0.0 }
  0x15   : > { %v367_v4 = vsel %vm366_vm1, %v2165_v3, 0.0 }
  0x16   : > { %368 = vadd.xlane.f32.xlu0 %v367_v4 }
  0x1a   : > { %372 = vadd.xlane.f32.xlu0 %v371_v5 }
  0xa3   : > { %v369_v6 = vpop.xlane.xlu0 %368 }
  0xa4   : > { %v375_v7 = vmul.f32 0.03125, %v369_v6 }
  0xa6   : > { %v377_v8 = vsub.f32 %v2165_v3, %v375_v7 }
  0xa7   : > { %v373_v9 = vpop.xlane.xlu0 %372 }
  0xa8   : > { %v376_v10 = vmul.f32 0.03125, %v373_v9  ;;  %v379_v11 = vmul.f32 %v377_v8, %v377_v8 }
  0xaa   : > { %v378_v12 = vsub.f32 %v2162_v2, %v376_v10  ;;  %v381_v13 = vsel %vm366_vm1, %v379_v11, 0.0 }
  0xab   : > { %382 = vadd.xlane.f32.xlu1 %v381_v13 }
  0xac   : > { %v380_v14 = vmul.f32 %v378_v12, %v378_v12 }
  0xae   : > { %v384_v15 = vsel %vm370_vm2, %v380_v14, 0.0 }
  0xaf   : > { %385 = vadd.xlane.f32.xlu1 %v384_v15 }
 0x138   : > { %v383_v19 = vpop.xlane.xlu1 %382 }
 0x139   : > { %v387_v20 = vmul.f32 0.03125, %v383_v19 }
 0x13b   : > { %v389_v21 = vadd.f32 1e-05, %v387_v20 }
 0x13c   : > { %v386_v22 = vpop.xlane.xlu1 %385 }
 0x13d   : > { %1982 = vrsqrt.f32 %v389_v21  ;;  %v388_v23 = vmul.f32 0.03125, %v386_v22 }
 0x13f   : > { %v390_v24 = vadd.f32 1e-05, %v388_v23 }
 0x141   : > { %1984 = vrsqrt.f32 %v390_v24 }
 0x147   : > { %v1983_v25 = vpop.eup %1982 }
 0x148   : > { %v393_v26 = vmul.f32 %v1983_v25, %v377_v8 }
 0x14a   : > { %v401_v30 = vmul.f32 %v1725_v27, %v393_v26 }
 0x14b   : > { %v1985_v28 = vpop.eup %1984 }
 0x14c   : > { %v394_v29 = vmul.f32 %v1985_v28, %v378_v12  ;;  %v409_v33 = vadd.f32 %v1726_v31, %v401_v30 }
 0x14e   : > { %v402_v32 = vmul.f32 %v1725_v27, %v394_v29 }
 0x150   : > { %v410_v34 = vadd.f32 %v1726_v31, %v402_v32 }
 0x152   : > { %v411_v35 = vpack.c.bf16 %v410_v34, %v409_v33 }
 0x154   : > { %1796 = vmatmul.mubr.msk.bf16.vlgmr.msra.gmra.mrb[0].mxu0 %vm366_vm1, %v411_v35 }
 0x155   : > { %1807 = vmatprep.mubr.msk.bf16.mxu0 %vm2059_vm3, %v2058_v17 }
 0x227   : > { %v472_v37 = vpop.f32.mrb[0].mxu0 }
 0x228   : > { %v473_v38 = vadd.f32 %v1727_v36, %v472_v37  ;;  %v1797_v39 = vpop.f32.mrb[1].mxu0 }
 0x229   : > { %v475_v40 = vpop.f32.mrb[2].mxu0 }
 0x22a   : > { %v476_v41 = vadd.f32 %v1727_v36, %v475_v40  ;;  %v1798_v42 = vpop.f32.mrb[3].mxu0  ;;  %v479_v43 = vmul.f32 0.5, %v473_v38 }
 0x22c   : > { %v480_v44 = vmul.f32 0.5, %v476_v41  ;;  %v2201_v45 = vpack.c.bf16 %v476_v41, %v473_v38 }
 0x22e   : > { %v481_v46 = vpack.c.bf16 %v480_v44, %v479_v43  ;;  %612 = vrot.lane.b32.xlu1 %v2201_v45, %s2060_s29  ;;  %484 = vrot.lane.b32.xlu0 %v2201_v45, %s2061_s13  ;;  %s2077_s29 = smov 60   ;;  %s2078_s13 = smov 52  }
 0x232   : > { %733 = vrot.lane.b32.xlu0 %v481_v46, %s2062_s14  ;;  %610 = vrot.lane.b32.xlu1 %v481_v46, %s2063_s15  ;;  %s2079_s14 = smov 48   ;;  %s2080_s15 = smov 44  }
 0x236   : > { %856 = vrot.lane.b32.xlu0 %v481_v46, %s2064_s16  ;;  %735 = vrot.lane.b32.xlu1 %v2201_v45, %s2065_s17  ;;  %s2081_s16 = smov 40   ;;  %s2082_s17 = smov 36  }
 0x23a   : > { %979 = vrot.lane.b32.xlu0 %v481_v46, %s2066_s18  ;;  %858 = vrot.lane.b32.xlu1 %v2201_v45, %s2067_s19  ;;  %s2083_s18 = smov 4   ;;  %s2084_s19 = smov 8  }
 0x23e   : > { %1102 = vrot.lane.b32.xlu0 %v481_v46, %s2068_s20  ;;  %981 = vrot.lane.b32.xlu1 %v2201_v45, %s2069_s21  ;;  %s2085_s20 = smov 12   ;;  %s2086_s21 = smov 16  }
 0x242   : > { %1225 = vrot.lane.b32.xlu0 %v481_v46, %s2070_s22  ;;  %1104 = vrot.lane.b32.xlu1 %v2201_v45, %s2071_s23 }
 0x246   : > { %1348 = vrot.lane.b32.xlu0 %v481_v46, %s2072_s24  ;;  %1227 = vrot.lane.b32.xlu1 %v2201_v45, %s2073_s25  ;;  %s2087_s24 = smov 20   ;;  %s2088_s25 = smov 24  }
 0x24a   : > { %1350 = vrot.lane.b32.xlu1 %v2201_v45, %s2074_s26 }
 0x24e   : > { %559 = vrot.lane.b32.xlu1 %v2201_v45, %s2075_s27 }
 0x2a0   : > { %v613_v47 = vpop.permute.xlu1 %612  ;;  %v485_v48 = vpop.permute.xlu0 %484 }
 0x2a1   : > { %v491_v49 = vsel %vm486_vm4, %v485_v48, 0  ;;  %v618_v52 = vsel %vm486_vm4, %v613_v47, 0 }
 0x2a2   : > { %1800 = vmatpush3.bf16.xpose.msra.mxu1 %v491_v49 }
 0x2a3   : > { %1811 = vmatprep.subr.bf16.mxu1 %v2058_v17 }
 0x2a4   : > { %v611_v50 = vpop.permute.xlu1 %610  ;;  %v734_v57 = vpop.permute.xlu0 %733 }
 0x2a8   : > { %v736_v51 = vpop.permute.xlu1 %735  ;;  %v857_v61 = vpop.permute.xlu0 %856 }
 0x2a9   : > { %1802 = vmatmul.mubr.msk.bf16.vlgmr.msra.gmra.mrb[0].mxu1 %vm486_vm4, %v481_v46  ;;  %v741_v55 = vsel %vm486_vm4, %v736_v51, 0 }
 0x2aa   : > { %1812 = vmatpush3.bf16.xpose.msra.mxu1 %v618_v52  ;;  %1813 = vmatprep.mubr.msk.bf16.mxu1 %vm2059_vm3, %v2058_v17 }
 0x2ab   : > { %1823 = vmatprep.subr.bf16.mxu1 %v2058_v17 }
 0x2ac   : > { %v859_v53 = vpop.permute.xlu1 %858  ;;  %v980_v1 = vpop.permute.xlu0 %979 }
 0x2ad   : > { %v864_v59 = vsel %vm486_vm4, %v859_v53, 0 }
 0x2b0   : > { %v982_v54 = vpop.permute.xlu1 %981  ;;  %v1103_v5 = vpop.permute.xlu0 %1102 }
 0x2b1   : > { %1814 = vmatmul.mubr.msk.bf16.vlgmr.msra.gmra.mrb[4].mxu1 %vm486_vm4, %v611_v50  ;;  %v987_v63 = vsel %vm486_vm4, %v982_v54, 0 }
 0x2b2   : > { %1824 = vmatpush3.bf16.xpose.msra.mxu1 %v741_v55  ;;  %1825 = vmatprep.mubr.msk.bf16.mxu1 %vm2059_vm3, %v2058_v17 }
 0x2b3   : > { %1835 = vmatprep.subr.bf16.mxu1 %v2058_v17 }
 0x2b4   : > { %v1105_v56 = vpop.permute.xlu1 %1104  ;;  %v1226_v7 = vpop.permute.xlu0 %1225 }
 0x2b5   : > { %v1110_v4 = vsel %vm486_vm4, %v1105_v56, 0 }
 0x2b8   : > { %v1228_v58 = vpop.permute.xlu1 %1227  ;;  %v1349_v9 = vpop.permute.xlu0 %1348 }
 0x2b9   : > { %1826 = vmatmul.mubr.msk.bf16.vlgmr.msra.gmra.mrb[8].mxu1 %vm486_vm4, %v734_v57  ;;  %v1233_v6 = vsel %vm486_vm4, %v1228_v58, 0 }
 0x2ba   : > { %1836 = vmatpush3.bf16.xpose.msra.mxu1 %v864_v59  ;;  %1837 = vmatprep.mubr.msk.bf16.mxu1 %vm2059_vm3, %v2058_v17 }
 0x2bb   : > { %1847 = vmatprep.subr.bf16.mxu1 %v2058_v17 }
 0x2bc   : > { %v1351_v60 = vpop.permute.xlu1 %1350 }
 0x2bd   : > { %v1356_v8 = vsel %vm486_vm4, %v1351_v60, 0 }
 0x2c0   : > { %v560_v62 = vpop.permute.xlu1 %559 }
 0x2c1   : > { %v566_v0 = vsel %vm564_vm5, %v560_v62, 0  ;;  %1838 = vmatmul.mubr.msk.bf16.vlgmr.msra.gmra.mrb[12].mxu1 %vm486_vm4, %v857_v61 }
 0x2c2   : > { %1806 = vmatpush3.bf16.msra.mxu0 %v566_v0  ;;  %1848 = vmatpush3.bf16.xpose.msra.mxu1 %v987_v63 }
 0x2c3   : > { %1849 = vmatprep.mubr.msk.bf16.mxu1 %vm2059_vm3, %v2058_v17  ;;  %1859 = vmatprep.subr.bf16.mxu1 %v2058_v17 }
 0x2c4   : > { %1817 = vmatprep.subr.bf16.mxu0 %v2058_v17 }
 0x2c9   : > { %1850 = vmatmul.mubr.msk.bf16.vlgmr.msra.gmra.mrb[16].mxu1 %vm486_vm4, %v980_v1 }
 0x2ca   : > { %1860 = vmatpush3.bf16.xpose.msra.mxu1 %v1110_v4  ;;  %1861 = vmatprep.mubr.msk.bf16.mxu1 %vm2059_vm3, %v2058_v17 }
 0x2cb   : > { %1871 = vmatprep.subr.bf16.mxu1 %v2058_v17 }
 0x2d1   : > { %1862 = vmatmul.mubr.msk.bf16.vlgmr.msra.gmra.mrb[20].mxu1 %vm486_vm4, %v1103_v5 }
 0x2d2   : > { %1872 = vmatpush3.bf16.xpose.msra.mxu1 %v1233_v6  ;;  %1873 = vmatprep.mubr.msk.bf16.mxu1 %vm2059_vm3, %v2058_v17 }
 0x2d3   : > { %1883 = vmatprep.subr.bf16.mxu1 %v2058_v17 }
 0x2d9   : > { %1874 = vmatmul.mubr.msk.bf16.vlgmr.msra.gmra.mrb[24].mxu1 %vm486_vm4, %v1226_v7 }
 0x2da   : > { %1884 = vmatpush3.bf16.xpose.msra.mxu1 %v1356_v8  ;;  %1885 = vmatprep.mubr.msk.bf16.mxu1 %vm2059_vm3, %v2058_v17 }
 0x2db   : > { %1895 = vmatprep.subr.bf16.mxu1 %v2058_v17 }
 0x2e1   : > { %1886 = vmatmul.mubr.msk.bf16.vlgmr.msra.gmra.mrb[28].mxu1 %vm486_vm4, %v1349_v9 }
 0x2e2   : > { %1899 = vmatprep.mubr.msk.bf16.mxu1 %vm2059_vm3, %v2058_v17 }
 0x37c   : > { %v2254_v10 = vpop.f32.mrb[0].mxu1 }
 0x37d   : > { %v1803_v11 = vpop.f32.mrb[1].mxu1  ;;  %v535_v12 = vsel %vm534_vm6, %v2254_v10, -inf }
 0x37e   : > { %536 = vmax.xlane.f32.xlu1 %v535_v12  ;;  %v2258_v13 = vpop.f32.mrb[2].mxu1 }
 0x37f   : > { %v1804_v14 = vpop.f32.mrb[3].mxu1  ;;  %v539_v15 = vsel %vm538_vm7, %v2258_v13, -inf }
 0x380   : > { %540 = vmax.xlane.f32.xlu0 %v539_v15 }
 0x384   : > { %v2262_v16 = vpop.f32.mrb[4].mxu1 }
 0x385   : > { %v1815_v18 = vpop.f32.mrb[5].mxu1  ;;  %v661_v19 = vsel %vm534_vm6, %v2262_v16, -inf }
 0x386   : > { %662 = vmax.xlane.f32.xlu0 %v661_v19  ;;  %v2266_v20 = vpop.f32.mrb[6].mxu1 }
 0x387   : > { %v1816_v21 = vpop.f32.mrb[7].mxu1  ;;  %v664_v22 = vsel %vm538_vm7, %v2266_v20, -inf }
 0x38a   : > { %665 = vmax.xlane.f32.xlu0 %v664_v22 }
 0x38c   : > { %v2270_v23 = vpop.f32.mrb[8].mxu1 }
 0x38d   : > { %v1827_v24 = vpop.f32.mrb[9].mxu1  ;;  %v784_v25 = vsel %vm534_vm6, %v2270_v23, -inf }
 0x38e   : > { %785 = vmax.xlane.f32.xlu1 %v784_v25  ;;  %v2274_v26 = vpop.f32.mrb[10].mxu1 }
 0x38f   : > { %v1828_v27 = vpop.f32.mrb[11].mxu1  ;;  %v787_v28 = vsel %vm538_vm7, %v2274_v26, -inf }
 0x390   : > { %788 = vmax.xlane.f32.xlu0 %v787_v28 }
 0x394   : > { %v2278_v29 = vpop.f32.mrb[12].mxu1 }
 0x395   : > { %v1839_v30 = vpop.f32.mrb[13].mxu1  ;;  %v907_v31 = vsel %vm534_vm6, %v2278_v29, -inf }
 0x396   : > { %908 = vmax.xlane.f32.xlu1 %v907_v31  ;;  %v2282_v32 = vpop.f32.mrb[14].mxu1 }
 0x397   : > { %v1840_v33 = vpop.f32.mrb[15].mxu1  ;;  %v910_v34 = vsel %vm538_vm7, %v2282_v32, -inf }
 0x398   : > { %911 = vmax.xlane.f32.xlu0 %v910_v34 }
 0x39c   : > { %v2286_v35 = vpop.f32.mrb[16].mxu1 }
 0x39d   : > { %v1851_v36 = vpop.f32.mrb[17].mxu1  ;;  %v1030_v37 = vsel %vm534_vm6, %v2286_v35, -inf }
 0x39e   : > { %1031 = vmax.xlane.f32.xlu1 %v1030_v37  ;;  %v2290_v38 = vpop.f32.mrb[18].mxu1 }
 0x39f   : > { %v1852_v39 = vpop.f32.mrb[19].mxu1  ;;  %v1033_v40 = vsel %vm538_vm7, %v2290_v38, -inf }
 0x3a0   : > { %1034 = vmax.xlane.f32.xlu0 %v1033_v40 }
 0x3a4   : > { %v2294_v41 = vpop.f32.mrb[20].mxu1 }
 0x3a5   : > { %v1863_v42 = vpop.f32.mrb[21].mxu1  ;;  %v1153_v43 = vsel %vm534_vm6, %v2294_v41, -inf }
 0x3a6   : > { %1154 = vmax.xlane.f32.xlu1 %v1153_v43  ;;  %v2298_v44 = vpop.f32.mrb[22].mxu1 }
 0x3a7   : > { %v1864_v46 = vpop.f32.mrb[23].mxu1  ;;  %v1156_v47 = vsel %vm538_vm7, %v2298_v44, -inf }
 0x3a8   : > { %1157 = vmax.xlane.f32.xlu0 %v1156_v47 }
 0x3ac   : > { %v2302_v48 = vpop.f32.mrb[24].mxu1 }
 0x3ad   : > { %v1875_v49 = vpop.f32.mrb[25].mxu1  ;;  %v1276_v50 = vsel %vm534_vm6, %v2302_v48, -inf }
 0x3ae   : > { %1277 = vmax.xlane.f32.xlu1 %v1276_v50  ;;  %v2306_v51 = vpop.f32.mrb[26].mxu1 }
 0x3af   : > { %v1876_v52 = vpop.f32.mrb[27].mxu1  ;;  %v1279_v53 = vsel %vm538_vm7, %v2306_v51, -inf }
 0x3b0   : > { %1280 = vmax.xlane.f32.xlu0 %v1279_v53 }
 0x3b4   : > { %v2310_v54 = vpop.f32.mrb[28].mxu1 }
 0x3b5   : > { %v1887_v55 = vpop.f32.mrb[29].mxu1  ;;  %v1399_v56 = vsel %vm534_vm6, %v2310_v54, -inf }
 0x3b6   : > { %1400 = vmax.xlane.f32.xlu1 %v1399_v56  ;;  %v2314_v57 = vpop.f32.mrb[30].mxu1 }
 0x3b7   : > { %v1888_v58 = vpop.f32.mrb[31].mxu1  ;;  %v1402_v59 = vsel %vm538_vm7, %v2314_v57, -inf }
 0x3b8   : > { %1403 = vmax.xlane.f32.xlu0 %v1402_v59 }
 0x3c7   : > { %807 = vrot.lane.b32.xlu1 %v2201_v45, %s2076_s28  ;;  %s2089_s28 = smov 28  }
 0x3ce   : > { %684 = vrot.lane.b32.xlu0 %v2201_v45, %s2077_s29 }
 0x40b   : > { %v537_v60 = vpop.xlane.xlu1 %536 }
 0x40c   : > { %v542_v61 = vsub.f32 %v2254_v10, %v537_v60 }
 0x40d   : > { %v541_v62 = vpop.xlane.xlu0 %540 }
 0x40e   : > { %v544_v63 = vmul.f32 1.442695, %v542_v61  ;;  %v543_v0 = vsub.f32 %v2258_v13, %v541_v62 }
 0x410   : > { %1986 = vpow2.f32 %v544_v63  ;;  %v546_v1 = vmul.f32 1.442695, %v543_v0 }
 0x412   : > { %1988 = vpow2.f32 %v546_v1 }
 0x413   : > { %v663_v4 = vpop.xlane.xlu0 %662 }
 0x414   : > { %v667_v5 = vsub.f32 %v2262_v16, %v663_v4 }
 0x416   : > { %v669_v6 = vmul.f32 1.442695, %v667_v5 }
 0x417   : > { %v666_v7 = vpop.xlane.xlu0 %665 }
 0x418   : > { %1990 = vpow2.f32 %v669_v6  ;;  %v668_v8 = vsub.f32 %v2266_v20, %v666_v7 }
 0x41a   : > { %v2324_v9 = vpop.eup %1986  ;;  %v671_v11 = vmul.f32 1.442695, %v668_v8 }
 0x41b   : > { %v786_v12 = vpop.xlane.xlu1 %785  ;;  %v548_v10 = vsel %vm534_vm6, %v2324_v9, 0.0 }
 0x41c   : > { %v2328_v14 = vpop.eup %1988  ;;  %1992 = vpow2.f32 %v671_v11  ;;  %v790_v13 = vsub.f32 %v2270_v23, %v786_v12  ;;  %549 = vadd.xlane.f32.xlu1 %v548_v10 }
 0x41d   : > { %v789_v15 = vpop.xlane.xlu0 %788  ;;  %v551_v16 = vsel %vm538_vm7, %v2328_v14, 0.0 }
 0x41e   : > { %v792_v18 = vmul.f32 1.442695, %v790_v13  ;;  %v791_v19 = vsub.f32 %v2274_v26, %v789_v15  ;;  %552 = vadd.xlane.f32.xlu0 %v551_v16 }
 0x420   : > { %1994 = vpow2.f32 %v792_v18  ;;  %v794_v20 = vmul.f32 1.442695, %v791_v19 }
 0x422   : > { %v2334_v21 = vpop.eup %1990  ;;  %1996 = vpow2.f32 %v794_v20 }
 0x423   : > { %v909_v22 = vpop.xlane.xlu1 %908  ;;  %v673_v24 = vsel %vm534_vm6, %v2334_v21, 0.0 }
 0x424   : > { %v913_v23 = vsub.f32 %v2278_v29, %v909_v22  ;;  %674 = vadd.xlane.f32.xlu1 %v673_v24 }
 0x425   : > { %v912_v25 = vpop.xlane.xlu0 %911 }
 0x426   : > { %v2339_v27 = vpop.eup %1992  ;;  %v915_v28 = vmul.f32 1.442695, %v913_v23  ;;  %v914_v30 = vsub.f32 %v2282_v32, %v912_v25 }
 0x427   : > { %v676_v26 = vsel %vm538_vm7, %v2339_v27, 0.0 }
 0x428   : > { %1998 = vpow2.f32 %v915_v28  ;;  %v917_v31 = vmul.f32 1.442695, %v914_v30  ;;  %677 = vadd.xlane.f32.xlu0 %v676_v26 }
 0x42a   : > { %v2344_v33 = vpop.eup %1994  ;;  %2000 = vpow2.f32 %v917_v31 }
 0x42b   : > { %v1032_v34 = vpop.xlane.xlu1 %1031  ;;  %v796_v29 = vsel %vm534_vm6, %v2344_v33, 0.0 }
 0x42c   : > { %v2348_v36 = vpop.eup %1996  ;;  %v1036_v37 = vsub.f32 %v2286_v35, %v1032_v34  ;;  %797 = vadd.xlane.f32.xlu1 %v796_v29 }
 0x42d   : > { %v1035_v39 = vpop.xlane.xlu0 %1034  ;;  %v799_v32 = vsel %vm538_vm7, %v2348_v36, 0.0 }
 0x42e   : > { %v1038_v40 = vmul.f32 1.442695, %v1036_v37  ;;  %v1037_v42 = vsub.f32 %v2290_v38, %v1035_v39  ;;  %800 = vadd.xlane.f32.xlu0 %v799_v32 }
 0x430   : > { %2002 = vpow2.f32 %v1038_v40  ;;  %v1040_v43 = vmul.f32 1.442695, %v1037_v42 }
 0x432   : > { %v2354_v46 = vpop.eup %1998  ;;  %2004 = vpow2.f32 %v1040_v43 }
 0x433   : > { %v1155_v47 = vpop.xlane.xlu1 %1154  ;;  %v919_v49 = vsel %vm534_vm6, %v2354_v46, 0.0 }
 0x434   : > { %v2358_v50 = vpop.eup %2000  ;;  %v1159_v35 = vsub.f32 %v2294_v41, %v1155_v47  ;;  %920 = vadd.xlane.f32.xlu1 %v919_v49 }
 0x435   : > { %v1158_v52 = vpop.xlane.xlu0 %1157  ;;  %v922_v53 = vsel %vm538_vm7, %v2358_v50, 0.0 }
 0x436   : > { %v1161_v38 = vmul.f32 1.442695, %v1159_v35  ;;  %v1160_v55 = vsub.f32 %v2298_v44, %v1158_v52  ;;  %923 = vadd.xlane.f32.xlu0 %v922_v53 }
 0x438   : > { %2006 = vpow2.f32 %v1161_v38  ;;  %v1163_v56 = vmul.f32 1.442695, %v1160_v55 }
 0x43a   : > { %v2364_v58 = vpop.eup %2002  ;;  %2008 = vpow2.f32 %v1163_v56 }
 0x43b   : > { %v1278_v59 = vpop.xlane.xlu1 %1277  ;;  %v1042_v60 = vsel %vm534_vm6, %v2364_v58, 0.0 }
 0x43c   : > { %v2368_v61 = vpop.eup %2004  ;;  %v1282_v41 = vsub.f32 %v2302_v48, %v1278_v59  ;;  %1043 = vadd.xlane.f32.xlu0 %v1042_v60 }
 0x43d   : > { %v1281_v62 = vpop.xlane.xlu0 %1280  ;;  %v1045_v44 = vsel %vm538_vm7, %v2368_v61, 0.0 }
 0x43e   : > { %v1284_v63 = vmul.f32 1.442695, %v1282_v41  ;;  %v1283_v0 = vsub.f32 %v2306_v51, %v1281_v62 }
 0x440   : > { %2010 = vpow2.f32 %v1284_v63  ;;  %v1286_v1 = vmul.f32 1.442695, %v1283_v0  ;;  %1046 = vadd.xlane.f32.xlu0 %v1045_v44 }
 0x442   : > { %v2374_v4 = vpop.eup %2006  ;;  %2012 = vpow2.f32 %v1286_v1 }
 0x443   : > { %v1401_v5 = vpop.xlane.xlu1 %1400  ;;  %v1165_v6 = vsel %vm534_vm6, %v2374_v4, 0.0 }
 0x444   : > { %v2378_v7 = vpop.eup %2008  ;;  %v1405_v48 = vsub.f32 %v2310_v54, %v1401_v5  ;;  %1166 = vadd.xlane.f32.xlu1 %v1165_v6 }
 0x445   : > { %v1168_v51 = vsel %vm538_vm7, %v2378_v7, 0.0  ;;  %v1404_v16 = vpop.xlane.xlu0 %1403 }
 0x446   : > { %v1407_v8 = vmul.f32 1.442695, %v1405_v48  ;;  %1169 = vadd.xlane.f32.xlu0 %v1168_v51  ;;  %v1406_v18 = vsub.f32 %v2314_v57, %v1404_v16 }
 0x447   : > { %v808_v57 = vpop.permute.xlu1 %807 }
 0x448   : > { %2014 = vpow2.f32 %v1407_v8  ;;  %v1409_v19 = vmul.f32 1.442695, %v1406_v18  ;;  %v813_v35 = vsel %vm564_vm5, %v808_v57, 0 }
 0x449   : > { %v685_v24 = vpop.permute.xlu0 %684 }
 0x44a   : > { %v2383_v11 = vpop.eup %2010  ;;  %2016 = vpow2.f32 %v1409_v19  ;;  %v690_v39 = vsel %vm564_vm5, %v685_v24, 0 }
 0x44b   : > { %v1288_v12 = vsel %vm534_vm6, %v2383_v11, 0.0 }
 0x44c   : > { %v2387_v10 = vpop.eup %2012  ;;  %1289 = vadd.xlane.f32.xlu0 %v1288_v12 }
 0x44d   : > { %v1291_v13 = vsel %vm538_vm7, %v2387_v10, 0.0 }
 0x450   : > { %1292 = vadd.xlane.f32.xlu0 %v1291_v13 }
 0x452   : > { %v2391_v54 = vpop.eup %2014 }
 0x453   : > { %v1411_v15 = vsel %vm534_vm6, %v2391_v54, 0.0 }
 0x454   : > { %1412 = vadd.xlane.f32.xlu0 %v1411_v15  ;;  %v2400_v20 = vpop.eup %2016 }
 0x455   : > { %930 = vrot.lane.b32.xlu1 %v2201_v45, %s2078_s13  ;;  %v1414_v22 = vsel %vm538_vm7, %v2400_v20, 0.0 }
 0x46a   : > { %1053 = vrot.lane.b32.xlu0 %v2201_v45, %s2079_s14 }
 0x46e   : > { %1176 = vrot.lane.b32.xlu0 %v2201_v45, %s2080_s15 }
 0x472   : > { %1299 = vrot.lane.b32.xlu0 %v2201_v45, %s2081_s16  ;;  %s351_s16 = scalar_lea.vmem %s2506_s8, %s1721_s11 }
 0x476   : > { %1422 = vrot.lane.b32.xlu0 %v2201_v45, %s2082_s17 }
 0x479   : > { %1415 = vadd.xlane.f32.xlu1 %v1414_v22 }
 0x4a9   : > { %v550_v23 = vpop.xlane.xlu1 %549 }
 0x4aa   : > { %2018 = vrcp.f32 %v550_v23 }
 0x4ab   : > { %v553_v25 = vpop.xlane.xlu0 %552 }
 0x4ac   : > { %2020 = vrcp.f32 %v553_v25 }
 0x4b1   : > { %v675_v28 = vpop.xlane.xlu1 %674 }
 0x4b2   : > { %2022 = vrcp.f32 %v675_v28 }
 0x4b4   : > { %v2019_v30 = vpop.eup %2018 }
 0x4b5   : > { %v678_v26 = vpop.xlane.xlu0 %677  ;;  %v556_v34 = vmul.f32 %v2019_v30, %v2324_v9 }
 0x4b6   : > { %v2021_v31 = vpop.eup %2020  ;;  %2024 = vrcp.f32 %v678_v26 }
 0x4b7   : > { %v557_v45 = vmul.f32 %v2021_v31, %v2328_v14 }
 0x4b9   : > { %v798_v29 = vpop.xlane.xlu1 %797  ;;  %v558_v37 = vpack.c.bf16 %v557_v45, %v556_v34 }
 0x4ba   : > { %2026 = vrcp.f32 %v798_v29 }
 0x4bb   : > { %1808 = vmatmul.mubr.msk.bf16.vlgmr.msra.gmra.mrb[4].mxu0 %vm534_vm6, %v558_v37  ;;  %v801_v32 = vpop.xlane.xlu0 %800 }
 0x4bc   : > { %1818 = vmatpush3.bf16.msra.mxu0 %v690_v39  ;;  %2028 = vrcp.f32 %v801_v32  ;;  %1819 = vmatprep.mubr.msk.bf16.mxu0 %vm2059_vm3, %v2058_v17  ;;  %v2023_v40 = vpop.eup %2022 }
 0x4bd   : > { %1829 = vmatprep.subr.bf16.mxu0 %v2058_v17  ;;  %v681_v9 = vmul.f32 %v2023_v40, %v2334_v21 }
 0x4c0   : > { %v2025_v42 = vpop.eup %2024 }
 0x4c1   : > { %v682_v14 = vmul.f32 %v2025_v42, %v2339_v27  ;;  %v921_v53 = vpop.xlane.xlu1 %920 }
 0x4c3   : > { %v683_v43 = vpack.c.bf16 %v682_v14, %v681_v9  ;;  %v924_v47 = vpop.xlane.xlu0 %923 }
 0x4c4   : > { %v2027_v49 = vpop.eup %2026  ;;  %2030 = vrcp.f32 %v924_v47 }
 0x4c5   : > { %1820 = vmatmul.mubr.msk.bf16.vlgmr.msra.gmra.mrb[8].mxu0 %vm534_vm6, %v683_v43  ;;  %v804_v21 = vmul.f32 %v2027_v49, %v2344_v33  ;;  %2032 = vrcp.f32 %v921_v53 }
 0x4c6   : > { %v2029_v52 = vpop.eup %2028  ;;  %1830 = vmatpush3.bf16.msra.mxu0 %v813_v35  ;;  %1831 = vmatprep.mubr.msk.bf16.mxu0 %vm2059_vm3, %v2058_v17 }
 0x4c7   : > { %v805_v38 = vmul.f32 %v2029_v52, %v2348_v36  ;;  %1841 = vmatprep.subr.bf16.mxu0 %v2058_v17 }
 0x4c9   : > { %v1044_v27 = vpop.xlane.xlu0 %1043  ;;  %v806_v55 = vpack.c.bf16 %v805_v38, %v804_v21 }
 0x4cd   : > { %1832 = vmatmul.mubr.msk.bf16.vlgmr.msra.gmra.mrb[12].mxu0 %vm534_vm6, %v806_v55  ;;  %v1047_v59 = vpop.xlane.xlu0 %1046 }
 0x4ce   : > { %1843 = vmatprep.mubr.msk.bf16.mxu0 %vm2059_vm3, %v2058_v17  ;;  %v2031_v56 = vpop.eup %2030  ;;  %2034 = vrcp.f32 %v1047_v59 }
 0x4cf   : > { %v2033_v41 = vpop.eup %2032  ;;  %v928_v62 = vmul.f32 %v2031_v56, %v2358_v50  ;;  %2036 = vrcp.f32 %v1044_v27 }
 0x4d0   : > { %v927_v0 = vmul.f32 %v2033_v41, %v2354_v46 }
 0x4d1   : > { %v1167_v60 = vpop.xlane.xlu1 %1166 }
 0x4d2   : > { %v929_v44 = vpack.c.bf16 %v928_v62, %v927_v0 }
 0x4d3   : > { %v1170_v36 = vpop.xlane.xlu0 %1169 }
 0x4d4   : > { %2038 = vrcp.f32 %v1170_v36 }
 0x4d5   : > { %v931_v63 = vpop.permute.xlu1 %930  ;;  %2040 = vrcp.f32 %v1167_v60 }
 0x4d6   : > { %v936_v33 = vsel %vm564_vm5, %v931_v63, 0 }
 0x4d7   : > { %1842 = vmatpush3.bf16.msra.mxu0 %v936_v33  ;;  %v1980_v33 = vld [vmem:[%s2504_s6] sm:$0xff]  }
 0x4d8   : > { %1853 = vmatprep.subr.bf16.mxu0 %v2058_v17  ;;  %v2035_v50 = vpop.eup %2034  ;;  %1896 = vmatpush3.bf16.msra.mxu1 %v1980_v33 }
 0x4d9   : > { %v1290_v1 = vpop.xlane.xlu0 %1289  ;;  %v2037_v46 = vpop.eup %2036  ;;  %v1051_v48 = vmul.f32 %v2035_v50, %v2368_v61  ;;  %1897 = vmatprep.subr.bf16.mxu1 %v2058_v17 }
 0x4da   : > { %1844 = vmatmul.mubr.msk.bf16.vlgmr.msra.gmra.mrb[16].mxu0 %vm534_vm6, %v929_v44  ;;  %v1050_v8 = vmul.f32 %v2037_v46, %v2364_v58 }
 0x4db   : > { %1855 = vmatprep.mubr.msk.bf16.mxu0 %vm2059_vm3, %v2058_v17 }
 0x4dc   : > { %v1052_v13 = vpack.c.bf16 %v1051_v48, %v1050_v8 }
 0x4dd   : > { %v1293_v5 = vpop.xlane.xlu0 %1292 }
 0x4de   : > { %2042 = vrcp.f32 %v1293_v5  ;;  %v2039_v15 = vpop.eup %2038 }
 0x4df   : > { %2044 = vrcp.f32 %v1290_v1  ;;  %v2041_v19 = vpop.eup %2040  ;;  %v1174_v58 = vmul.f32 %v2039_v15, %v2378_v7 }
 0x4e0   : > { %v1173_v61 = vmul.f32 %v2041_v19, %v2374_v4 }
 0x4e1   : > { %v1413_v6 = vpop.xlane.xlu0 %1412 }
 0x4e2   : > { %v1175_v57 = vpack.c.bf16 %v1174_v58, %v1173_v61  ;;  %2046 = vrcp.f32 %v1413_v6 }
 0x4e5   : > { %v1054_v51 = vpop.permute.xlu0 %1053 }
 0x4e6   : > { %v1059_v12 = vsel %vm564_vm5, %v1054_v51, 0  ;;  %v1981_v51 = vld [vmem:[%s2504_s6 + $0x8] sm:$0xff]  }
 0x4e7   : > { %1854 = vmatpush3.bf16.msra.mxu0 %v1059_v12  ;;  %1898 = vmatpush3.bf16.msra.mxu1 %v1981_v51 }
 0x4e8   : > { %1865 = vmatprep.subr.bf16.mxu0 %v2058_v17  ;;  %v2043_v24 = vpop.eup %2042 }
 0x4e9   : > { %v1177_v16 = vpop.permute.xlu0 %1176  ;;  %v2045_v25 = vpop.eup %2044  ;;  %v1297_v28 = vmul.f32 %v2043_v24, %v2387_v10 }
 0x4ea   : > { %v1182_v18 = vsel %vm564_vm5, %v1177_v16, 0  ;;  %1856 = vmatmul.mubr.msk.bf16.vlgmr.msra.gmra.mrb[20].mxu0 %vm534_vm6, %v1052_v13  ;;  %v1296_v7 = vmul.f32 %v2045_v25, %v2383_v11 }
 0x4eb   : > { %1866 = vmatpush3.bf16.msra.mxu0 %v1182_v18  ;;  %1867 = vmatprep.mubr.msk.bf16.mxu0 %vm2059_vm3, %v2058_v17 }
 0x4ec   : > { %1877 = vmatprep.subr.bf16.mxu0 %v2058_v17  ;;  %v1298_v4 = vpack.c.bf16 %v1297_v28, %v1296_v7  ;;  %v2047_v34 = vpop.eup %2046 }
 0x4ed   : > { %v1300_v22 = vpop.permute.xlu0 %1299  ;;  %v1419_v10 = vmul.f32 %v2047_v34, %v2391_v54 }
 0x4ee   : > { %v1305_v23 = vsel %vm564_vm5, %v1300_v22, 0 }
 0x4f1   : > { %v1423_v30 = vpop.permute.xlu0 %1422 }
 0x4f2   : > { %1868 = vmatmul.mubr.msk.bf16.vlgmr.msra.gmra.mrb[24].mxu0 %vm534_vm6, %v1175_v57  ;;  %v1428_v26 = vsel %vm564_vm5, %v1423_v30, 0 }
 0x4f3   : > { %1878 = vmatpush3.bf16.msra.mxu0 %v1305_v23  ;;  %1879 = vmatprep.mubr.msk.bf16.mxu0 %vm2059_vm3, %v2058_v17 }
 0x4f4   : > { %1889 = vmatprep.subr.bf16.mxu0 %v2058_v17 }
 0x4fa   : > { %1880 = vmatmul.mubr.msk.bf16.vlgmr.msra.gmra.mrb[28].mxu0 %vm534_vm6, %v1298_v4 }
 0x4fb   : > { %1890 = vmatpush3.bf16.msra.mxu0 %v1428_v26  ;;  %1891 = vmatprep.mubr.msk.bf16.mxu0 %vm2059_vm3, %v2058_v17 }
 0x506   : > { %v1416_v31 = vpop.xlane.xlu1 %1415 }
 0x507   : > { %2048 = vrcp.f32 %v1416_v31 }
 0x511   : > { %v2049_v45 = vpop.eup %2048 }
 0x512   : > { %v1420_v29 = vmul.f32 %v2049_v45, %v2400_v20 }
 0x514   : > { %v1421_v11 = vpack.c.bf16 %v1420_v29, %v1419_v10 }
 0x516   : > { %1892 = vmatmul.mubr.msk.bf16.vlgmr.msra.gmra.mrb[32].mxu0 %vm534_vm6, %v1421_v11 }
 0x58e   : > { %v2456_v37 = vpop.f32.mrb[4].mxu0 }
 0x58f   : > { %v1809_v39 = vpop.f32.mrb[5].mxu0 }
 0x590   : > { %v2458_v32 = vpop.f32.mrb[6].mxu0 }
 0x591   : > { %v1810_v40 = vpop.f32.mrb[7].mxu0 }
 0x598   : > { %v726_v42 = vpop.f32.mrb[8].mxu0 }
 0x599   : > { %v1821_v9 = vpop.f32.mrb[9].mxu0 }
 0x59a   : > { %v729_v14 = vpop.f32.mrb[10].mxu0 }
 0x59b   : > { %v1943_v43 = vpack.i.bf16 %v729_v14, %v726_v42  ;;  %v1822_v47 = vpop.f32.mrb[11].mxu0 }
 0x59d   : > { %1944 = vrot.lane.b32.xlu1 %v1943_v43, %s2083_s18 }
 0x5a0   : > { %v849_v49 = vpop.f32.mrb[12].mxu0 }
 0x5a1   : > { %v1833_v54 = vpop.f32.mrb[13].mxu0 }
 0x5a2   : > { %v852_v35 = vpop.f32.mrb[14].mxu0 }
 0x5a3   : > { %v1948_v20 = vpack.i.bf16 %v852_v35, %v849_v49  ;;  %v1834_v52 = vpop.f32.mrb[15].mxu0 }
 0x5a5   : > { %1949 = vrot.lane.b32.xlu0 %v1948_v20, %s2084_s19  ;;  %s355_s19 = scalar_lea.vmem %s2507_s9, %s1722_s12 }
 0x5ad   : > { %v972_v53 = vpop.f32.mrb[16].mxu0 }
 0x5ae   : > { %v1845_v38 = vpop.f32.mrb[17].mxu0 }
 0x5af   : > { %v975_v21 = vpop.f32.mrb[18].mxu0  ;;  %v1747_v38 = vld [vmem:[%s2505_s7] ss:$0 sm:$0xff] }
 0x5b0   : > { %v1953_v27 = vpack.i.bf16 %v975_v21, %v972_v53  ;;  %v1846_v55 = vpop.f32.mrb[19].mxu0 }
 0x5b2   : > { %1954 = vrot.lane.b32.xlu0 %v1953_v27, %s2085_s20 }
 0x5bd   : > { %v1095_v56 = vpop.f32.mrb[20].mxu0 }
 0x5be   : > { %v1857_v59 = vpop.f32.mrb[21].mxu0 }
 0x5bf   : > { %v1098_v60 = vpop.f32.mrb[22].mxu0 }
 0x5c0   : > { %v1958_v41 = vpack.i.bf16 %v1098_v60, %v1095_v56  ;;  %v1858_v62 = vpop.f32.mrb[23].mxu0 }
 0x5c2   : > { %1959 = vrot.lane.b32.xlu0 %v1958_v41, %s2086_s21 }
 0x5c5   : > { %v1218_v36 = vpop.f32.mrb[24].mxu0 }
 0x5c6   : > { %v1869_v63 = vpop.f32.mrb[25].mxu0 }
 0x5c7   : > { %v1221_v0 = vpop.f32.mrb[26].mxu0 }
 0x5c8   : > { %v1963_v44 = vpack.i.bf16 %v1221_v0, %v1218_v36  ;;  %v1870_v1 = vpop.f32.mrb[27].mxu0 }
 0x5ca   : > { %1964 = vrot.lane.b32.xlu0 %v1963_v44, %s2087_s24 }
 0x5cd   : > { %v1341_v5 = vpop.f32.mrb[28].mxu0 }
 0x5ce   : > { %v1881_v50 = vpop.f32.mrb[29].mxu0 }
 0x5cf   : > { %v1344_v6 = vpop.f32.mrb[30].mxu0 }
 0x5d0   : > { %v1968_v46 = vpack.i.bf16 %v1344_v6, %v1341_v5  ;;  %v1882_v48 = vpop.f32.mrb[31].mxu0 }
 0x5d2   : > { %1969 = vrot.lane.b32.xlu0 %v1968_v46, %s2088_s25 }
 0x5e9   : > { %v1464_v8 = vpop.f32.mrb[32].mxu0 }
 0x5ea   : > { %v1893_v12 = vpop.f32.mrb[33].mxu0 }
 0x5eb   : > { %v1467_v13 = vpop.f32.mrb[34].mxu0 }
 0x5ec   : > { %v1973_v15 = vpack.i.bf16 %v1467_v13, %v1464_v8  ;;  %v1894_v16 = vpop.f32.mrb[35].mxu0 }
 0x5ee   : > { %1974 = vrot.lane.b32.xlu1 %v1973_v15, %s2089_s28 }
 0x60f   : > { %v1945_v58 = vpop.permute.xlu1 %1944 }
 0x610   : > { %v1947_v22 = vunpack.i.h.bf16 %v1945_v58  ;;  %v1946_v57 = vunpack.i.l.bf16 %v1945_v58 }
 0x612   : > { %v1528_v26 = vsel %vm486_vm4, %v2458_v32, %v1947_v22  ;;  %v1527_v31 = vsel %vm486_vm4, %v2456_v37, %v1946_v57 }
 0x617   : > { %v1950_v17 = vpop.permute.xlu0 %1949 }
 0x618   : > { %v1952_v24 = vunpack.i.h.bf16 %v1950_v17  ;;  %v1951_v23 = vunpack.i.l.bf16 %v1950_v17 }
 0x61a   : > { %v1531_v10 = vsel %vm1529_vm8, %v1528_v26, %v1952_v24  ;;  %v1530_v29 = vsel %vm1529_vm8, %v1527_v31, %v1951_v23 }
 0x624   : > { %v1955_v18 = vpop.permute.xlu0 %1954 }
 0x625   : > { %v1957_v25 = vunpack.i.h.bf16 %v1955_v18  ;;  %v1956_v28 = vunpack.i.l.bf16 %v1955_v18 }
 0x627   : > { %v1533_v40 = vsel %vm534_vm6, %v1531_v10, %v1957_v25  ;;  %v1532_v42 = vsel %vm534_vm6, %v1530_v29, %v1956_v28 }
 0x634   : > { %v1960_v19 = vpop.permute.xlu0 %1959 }
 0x635   : > { %v1962_v30 = vunpack.i.h.bf16 %v1960_v19  ;;  %v1961_v4 = vunpack.i.l.bf16 %v1960_v19 }
 0x637   : > { %v1536_v9 = vsel %vm1534_vm9, %v1533_v40, %v1962_v30  ;;  %v1535_v14 = vsel %vm1534_vm9, %v1532_v42, %v1961_v4 }
 0x63c   : > { %v1965_v61 = vpop.permute.xlu0 %1964 }
 0x63d   : > { %v1967_v34 = vunpack.i.h.bf16 %v1965_v61  ;;  %v1966_v45 = vunpack.i.l.bf16 %v1965_v61 }
 0x63f   : > { %v1539_v37 = vsel %vm1537_vm10, %v1536_v9, %v1967_v34  ;;  %v1538_v43 = vsel %vm1537_vm10, %v1535_v14, %v1966_v45 }
 0x644   : > { %v1970_v7 = vpop.permute.xlu0 %1969 }
 0x645   : > { %v1972_v11 = vunpack.i.h.bf16 %v1970_v7  ;;  %v1971_v39 = vunpack.i.l.bf16 %v1970_v7 }
 0x647   : > { %v1542_v54 = vsel %vm1540_vm11, %v1539_v37, %v1972_v11  ;;  %v1541_v35 = vsel %vm1540_vm11, %v1538_v43, %v1971_v39 }
 0x660   : > { %v1975_v32 = vpop.permute.xlu1 %1974 }
 0x661   : > { %v1977_v47 = vunpack.i.h.bf16 %v1975_v32  ;;  %v1976_v49 = vunpack.i.l.bf16 %v1975_v32 }
 0x663   : > { %v1545_v20 = vsel %vm1543_vm12, %v1542_v54, %v1977_v47  ;;  %v1544_v52 = vsel %vm1543_vm12, %v1541_v35, %v1976_v49 }
 0x664   : > { %v1546_v53 = vpack.c.bf16 %v1545_v20, %v1544_v52 }
 0x666   : > { %1900 = vmatmul.mubr.msk.bf16.vlgmr.msra.gmra.mrb[32].mxu1 %vm366_vm1, %v1546_v53 }
 0x739   : > { %v1607_v21 = vpop.f32.mrb[32].mxu1 }
 0x73a   : > { %v1608_v27 = vadd.f32 %v1747_v38, %v1607_v21  ;;  %v1901_v55 = vpop.f32.mrb[33].mxu1 }
 0x73b   : > { %v1610_v56 = vpop.f32.mrb[34].mxu1 }
 0x73c   : > { %v1614_v59 = vadd.f32 %v1608_v27, %v2165_v3  ;;  %v1611_v60 = vadd.f32 %v1747_v38, %v1610_v56  ;;  %v1902_v41 = vpop.f32.mrb[35].mxu1 }
 0x73e   : > { %1616 = vst.msk [vmem:[%s351_s16] sm:$0xf] %vm370_vm2, %v1614_v59  ;;  %v1615_v62 = vadd.f32 %v1611_v60, %v2162_v2 }
 0x73f   : > { %1618 = vst.msk [vmem:[%s355_s19 - $0x4] sm:$0xf0] %vm1617_vm13, %v1614_v59 }
 0x740   : > { %1619 = vst.msk [vmem:[%s355_s19 + $0x4] sm:$0xf] %vm370_vm2, %v1615_v62 }
 0x741 PF: > { %s20_s30 = sadd.s32 1, %s2056_s30  }
 0x742   : > { %p17_p4 = scmp.ge.s32.totalorder %s20_s30, 4  }
 0x744   :  { %19 = sbr.rel (!%p17_p4) target bundleno = 1 (0x1), region = 97 }

// kernel: bridger_forward.44
= control target key start
LH: loop header
LB: loop body
LE: loop exit
PB: predicated region body
PF: predicated region fallthrough
CT: control target
= control target key end

     0   :  { %v118_v0 = vmov 0.0   ;;  %vm119_vm0 = vmmov 0   ;;  %vm44_vm1 = vcmask 261120   ;;  %s175_s1 = inlined_call_operand.vmem [shape: bf16[32,32], index: 1, kind: input, shape index: {}]   ;;  %s176_s0 = inlined_call_operand.vmem [shape: f32[16,32], index: 0, kind: input, shape index: {}]   ;;  %s177_s2 = inlined_call_operand.vmem [shape: f32[1,32], index: 2, kind: input, shape index: {}]   ;;  %s178_s3 = inlined_call_operand.vmem [shape: f32[16,32], index: 3, kind: input, shape index: {}]   ;;  %s179_s4 = inlined_call_operand.vmem [shape: f32[16,32], index: 4, kind: output, shape index: {}]  }
   0x1   :  { %106 = vmatprep.subr.bf16.mxu0 %v118_v0  ;;  %v116_v1 = vld [vmem:[%s175_s1] sm:$0xff]   ;;  %110 = vmatprep.mubr.msk.bf16.mxu0 %vm119_vm0, %v118_v0  ;;  %v117_v2 = vld [vmem:[%s175_s1 + $0x8] sm:$0xff]  }
   0x2   :  { %107 = vmatpush3.bf16.msra.mxu0 %v116_v1  ;;  %v18_v3 = vld [vmem:[%s176_s0] sm:$0xff]  ;;  %v19_v4 = vld [vmem:[%s176_s0 + $0x8] sm:$0xff] }
   0x3   :  { %108 = vmatprep.subr.bf16.mxu0 %v118_v0  ;;  %v24_v5 = vpack.c.bf16 %v19_v4, %v18_v3  ;;  %v99_v6 = vld [vmem:[%s177_s2] ss:$0 sm:$0xff]  ;;  %v90_v12 = vld [vmem:[%s178_s3 + $0x8] sm:$0xff] }
   0x4   :  { %v89_v8 = vld [vmem:[%s178_s3] sm:$0xff] }
   0x6   :  { %109 = vmatpush3.bf16.msra.mxu0 %v117_v2 }
   0x9   :  { %111 = vmatmul.mubr.msk.bf16.vlgmr.msra.gmra.mrb[0].mxu0 %vm44_vm1, %v24_v5 }
  0xdc   :  { %v82_v7 = vpop.f32.mrb[0].mxu0 }
  0xdd   :  { %v83_v9 = vadd.f32 %v99_v6, %v82_v7  ;;  %v112_v10 = vpop.f32.mrb[1].mxu0 }
  0xde   :  { %v85_v11 = vpop.f32.mrb[2].mxu0 }
  0xdf   :  { %v91_v13 = vadd.f32 %v89_v8, %v83_v9  ;;  %v86_v14 = vadd.f32 %v99_v6, %v85_v11  ;;  %v113_v15 = vpop.f32.mrb[3].mxu0 }
  0xe1   :  { %93 = vst.msk [vmem:[%s179_s4] sm:$0xff] %vm44_vm1, %v91_v13  ;;  %v92_v16 = vadd.f32 %v90_v12, %v86_v14 }
  0xe3   :  { %94 = vst.msk [vmem:[%s179_s4 + $0x8] sm:$0xff] %vm44_vm1, %v92_v16 }

// kernel: bridger_forward.45
= control target key start
LH: loop header
LB: loop body
LE: loop exit
PB: predicated region body
PF: predicated region fallthrough
CT: control target
= control target key end

     0   :  { %s691_s18 = smov 0   ;;  %s693_s19 = smov 0   ;;  %s781_s0 = inlined_call_operand.vmem [shape: f32[16,32], index: 0, kind: input, shape index: {}]   ;;  %s782_s1 = inlined_call_operand.vmem [shape: bf16[12,32,32], index: 1, kind: input, shape index: {}]   ;;  %s783_s2 = inlined_call_operand.vmem [shape: f32[12,1,32], index: 2, kind: input, shape index: {}]   ;;  %s784_s3 = inlined_call_operand.vmem [shape: f32[12,1,32], index: 3, kind: input, shape index: {}]   ;;  %s785_s4 = inlined_call_operand.vmem [shape: f32[12,1,32], index: 4, kind: input, shape index: {}]   ;;  %s786_s5 = inlined_call_operand.vmem [shape: f32[16,32], index: 5, kind: output, shape index: {}]  }
   0x1   :  { %s695_s20 = smov 0  }
   0x2 LB: > { %s24_s21 = sadd.s32 1, %s653_s19  ;;  %p576_p0 = scmp.ge.s32.totalorder %s657_s20, 1  ;;  %s657_s20 = sphi %s695_s20, %s15_s20   ;;  %s653_s19 = sphi %s693_s19, %s788_s19   ;;  %s649_s18 = sphi %s691_s18, %s787_s18  }
   0x3   : > { %p25_p1 = scmp.ge.s32.totalorder %s24_s21, 4  ;;  %p250_p2 = scmp.lt.s32.totalorder %s657_s20, 5 }
   0x5   : > { %s790_s21 = smov (%p25_p1, %s24_s21), 0  ;;  %p251_p3 = pnand %p576_p0, %p250_p2 }
   0x6   : > { %s302_s22 = sadd.s32 (!%p251_p3), 4, %s649_s18  ;;  %p579_p5 = scmp.ne.s32.totalorder (!%p251_p3), %s649_s18, 0 }
   0x7   : > { %254 = sbr.rel (%p251_p3) target bundleno = 570 (0x23a), region = 40  ;;  %p303_p4 = scmp.lt.s32.totalorder (!%p251_p3), %s302_s22, 11 }
   0xe   : > { %s792_s22 = smov (!%p303_p4, %s302_s22), 11  ;;  %334 = sbr.rel (%p579_p5) target bundleno = 21 (0x15), region = 44 }
   0xf   : > { %s591_s23 = sshll.u32 %s792_s22, 4  ;;  %s312_s26 = scalar_lea.vmem %s783_s2, %s792_s22  ;;  %v335_v0 = vld [vmem:[%s781_s0] sm:$0xff] (!%p579_p5)  ;;  %vm337_vm0 = vcmask (!%p579_p5), 261120   ;;  %v336_v1 = vld [vmem:[%s781_s0 + $0x8] sm:$0xff] (!%p579_p5) }
  0x10   : > { %s722_s29 = scalar_lea.vmem %s782_s1, %s591_s23  ;;  %s317_s7 = scalar_lea.vmem %s784_s3, %s792_s22  ;;  %338 = vst.msk [vmem:[#allocation2] sm:$0xff] (!%p579_p5), %vm337_vm0, %v335_v0  ;;  %339 = vst.msk [vmem:[#allocation2 + $0x8] sm:$0xff] (!%p579_p5), %vm337_vm0, %v336_v1 }
  0x11   : > { %s322_s10 = scalar_lea.vmem %s785_s4, %s792_s22 }
  0x15 PF: > { %vm344_vm1 = vcmask 261120   ;;  %v629_v16 = vld [vmem:[%s722_s29] sm:$0xff]   ;;  %v659_v17 = vmov 0.0   ;;  %v630_v18 = vld [vmem:[%s722_s29 + $0x8] sm:$0xff]   ;;  %vm660_vm2 = vmmov 0   ;;  %p586_p6 = scmp.ne.s32.totalorder %s649_s18, 3 }
  0x16   : > { %595 = vmatprep.subr.bf16.mxu0 %v659_v17  ;;  %599 = vmatprep.mubr.msk.bf16.mxu0 %vm660_vm2, %v659_v17  ;;  %v580_v27 = vld [vmem:[%s317_s7] ss:$0 sm:$0xff] }
  0x17   : > { %v340_v2 = vld [vmem:[#allocation2] sm:$0xff]  ;;  %v341_v3 = vld [vmem:[#allocation2 + $0x8] sm:$0xff]  ;;  %596 = vmatpush3.bf16.msra.mxu0 %v629_v16 }
  0x18   : > { %v345_v4 = vsel %vm344_vm1, %v340_v2, 0.0  ;;  %v348_v5 = vsel %vm344_vm1, %v341_v3, 0.0  ;;  %597 = vmatprep.subr.bf16.mxu0 %v659_v17  ;;  %v581_v31 = vld [vmem:[%s322_s10] ss:$0 sm:$0xff] }
  0x19   : > { %346 = vadd.xlane.f32.xlu0 %v345_v4  ;;  %v582_v36 = vld [vmem:[%s312_s26] ss:$0 sm:$0xff] }
  0x1b   : > { %598 = vmatpush3.bf16.msra.mxu0 %v630_v18 }
  0x1d   : > { %349 = vadd.xlane.f32.xlu0 %v348_v5 }
  0xa6   : > { %v347_v6 = vpop.xlane.xlu0 %346 }
  0xa7   : > { %v352_v7 = vmul.f32 0.03125, %v347_v6 }
  0xa9   : > { %v354_v8 = vsub.f32 %v340_v2, %v352_v7 }
  0xaa   : > { %v350_v9 = vpop.xlane.xlu0 %349 }
  0xab   : > { %v353_v10 = vmul.f32 0.03125, %v350_v9  ;;  %v356_v11 = vmul.f32 %v354_v8, %v354_v8 }
  0xad   : > { %v355_v12 = vsub.f32 %v341_v3, %v353_v10  ;;  %v358_v13 = vsel %vm344_vm1, %v356_v11, 0.0 }
  0xae   : > { %359 = vadd.xlane.f32.xlu1 %v358_v13 }
  0xaf   : > { %v357_v14 = vmul.f32 %v355_v12, %v355_v12 }
  0xb1   : > { %v361_v15 = vsel %vm344_vm1, %v357_v14, 0.0 }
  0xb2   : > { %362 = vadd.xlane.f32.xlu1 %v361_v15 }
 0x13b   : > { %v360_v19 = vpop.xlane.xlu1 %359 }
 0x13c   : > { %v364_v20 = vmul.f32 0.03125, %v360_v19 }
 0x13e   : > { %v366_v21 = vadd.f32 1e-05, %v364_v20 }
 0x13f   : > { %v363_v22 = vpop.xlane.xlu1 %362 }
 0x140   : > { %631 = vrsqrt.f32 %v366_v21  ;;  %v365_v23 = vmul.f32 0.03125, %v363_v22 }
 0x142   : > { %v367_v24 = vadd.f32 1e-05, %v365_v23 }
 0x144   : > { %633 = vrsqrt.f32 %v367_v24 }
 0x14a   : > { %v632_v25 = vpop.eup %631 }
 0x14b   : > { %v370_v26 = vmul.f32 %v632_v25, %v354_v8 }
 0x14d   : > { %v378_v30 = vmul.f32 %v580_v27, %v370_v26 }
 0x14e   : > { %v634_v28 = vpop.eup %633 }
 0x14f   : > { %v371_v29 = vmul.f32 %v634_v28, %v355_v12  ;;  %v386_v33 = vadd.f32 %v581_v31, %v378_v30 }
 0x151   : > { %v379_v32 = vmul.f32 %v580_v27, %v371_v29 }
 0x153   : > { %v387_v34 = vadd.f32 %v581_v31, %v379_v32 }
 0x155   : > { %v388_v35 = vpack.c.bf16 %v387_v34, %v386_v33 }
 0x157   : > { %600 = vmatmul.mubr.msk.bf16.vlgmr.msra.gmra.mrb[0].mxu0 %vm344_vm1, %v388_v35 }
 0x22a   : > { %v449_v37 = vpop.f32.mrb[0].mxu0 }
 0x22b   : > { %v450_v38 = vadd.f32 %v582_v36, %v449_v37  ;;  %v601_v39 = vpop.f32.mrb[1].mxu0  ;;  %463 = sbr.rel (%p586_p6) target bundleno = 570 (0x23a), region = 48 }
 0x22c   : > { %v452_v40 = vpop.f32.mrb[2].mxu0 }
 0x22d   : > { %v456_v41 = vadd.f32 %v450_v38, %v340_v2  ;;  %v453_v42 = vadd.f32 %v582_v36, %v452_v40  ;;  %v602_v43 = vpop.f32.mrb[3].mxu0 }
 0x22f   : > { %458 = vst.msk [vmem:[#allocation2] sm:$0xff] %vm344_vm1, %v456_v41  ;;  %v457_v44 = vadd.f32 %v453_v42, %v341_v3 }
 0x231   : > { %459 = vst.msk [vmem:[#allocation2 + $0x8] sm:$0xff] %vm344_vm1, %v457_v44 }
 0x236   : > { %v464_v45 = vld [vmem:[#allocation2] sm:$0xff] }
 0x237   : > { %466 = vst.msk [vmem:[%s786_s5] sm:$0xff] %vm344_vm1, %v464_v45 }
 0x238   : > { %v465_v46 = vld [vmem:[#allocation2 + $0x8] sm:$0xff] }
 0x239   : > { %467 = vst.msk [vmem:[%s786_s5 + $0x8] sm:$0xff] %vm344_vm1, %v465_v46 }
 0x23a PF: > { %s15_s20 = sadd.s32 1, %s657_s20   ;;  %s787_s18 = smov %s653_s19 }
 0x23b   : > { %p12_p7 = scmp.ge.s32.totalorder %s15_s20, 6   ;;  %s788_s19 = smov %s790_s21 }
 0x23d   :  { %14 = sbr.rel (!%p12_p7) target bundleno = 2 (0x2), region = 90 }

// kernel: bridger_forward.49
= control target key start
LH: loop header
LB: loop body
LE: loop exit
PB: predicated region body
PF: predicated region fallthrough
CT: control target
= control target key end

     0   :  { %11 = vsyncpa [#allocation3], 0  ;;  %s392_s0 = inlined_call_operand.vmem [shape: f32[16,32], index: 0, kind: input, shape index: {}]   ;;  %s393_s1 = inlined_call_operand.vmem [shape: bf16[32,32], index: 1, kind: input, shape index: {}]   ;;  %s394_s2 = inlined_call_operand.hbm [shape: f32[1,32], index: 2, kind: input, shape index: {}]   ;;  %s395_s3 = inlined_call_operand.vmem [shape: f32[16,32], index: 3, kind: input, shape index: {}]   ;;  %s396_s4 = inlined_call_operand.hbm [shape: f32[1,32], index: 4, kind: input, shape index: {}]   ;;  %s397_s5 = inlined_call_operand.hbm [shape: f32[1,32], index: 5, kind: input, shape index: {}]   ;;  %s398_s6 = inlined_call_operand.vmem [shape: f32[16,32], index: 6, kind: output, shape index: {}]  }
   0x1   :  { %12 = vsyncpa [#allocation5], 0  ;;  %s285_s21 = smov [#allocation4]   ;;  %s286_s23 = smov [#allocation2]  }
   0x2   :  { %s35_s22 = sshll.u32 %s285_s21, 4  ;;  %s23_s24 = sshll.u32 %s286_s23, 4  ;;  %s36_s22 = int_to_ptr.vmem [resolvable:$true] %s35_s22  ;;  %s24_s24 = int_to_ptr.vmem [resolvable:$true] %s23_s24 }
   0x3   :  { %s215_s27 = scalar_lea.hbm %s396_s4, 16 }
   0x4   :  { %p216_p0 = scmp.ne.s32.totalorder %s396_s4, %s215_s27  ;;  %p219_p1 = scmp.lt.u32.totalorder %s215_s27, %s396_s4 }
   0x6   :  { %p221_p2 = pnand %p219_p1, %p216_p0 }
   0x8   :  { %224 = shalt.err (!%p221_p2)
}
   0x9   :  { %s225_s8 = scalar_lea.vmem %s36_s22, 16  ;;  %s229_s9 = scalar_lea.vmem %s36_s22, 32 }
   0xa   :  { %p226_p3 = scmp.ne.s32.totalorder %s36_s22, %s225_s8  ;;  %p230_p4 = scmp.lt.s32.totalorder %s36_s22, %s36_s22 }
   0xb   :  { %p231_p5 = scmp.lt.s32.totalorder %s229_s9, %s225_s8 }
   0xd   :  { %p232_p6 = por %p231_p5, %p230_p4 }
   0xf   :  { %p233_p7 = pnand %p232_p6, %p226_p3 }
  0x11   :  { %236 = shalt.err (!%p233_p7)
}
  0x12   :  { %38 = dma.hbm_to_vmem [thread:$0]  %s396_s4, 16, %s36_s22, [#allocation5]  }
  0x13   :  { %s237_s14 = scalar_lea.hbm %s394_s2, 16 }
  0x14   :  { %p238_p8 = scmp.ne.s32.totalorder %s394_s2, %s237_s14  ;;  %p241_p9 = scmp.lt.u32.totalorder %s237_s14, %s394_s2 }
  0x16   :  { %p243_p10 = pnand %p241_p9, %p238_p8 }
  0x18   :  { %246 = shalt.err (!%p243_p10)
}
  0x19   :  { %s247_s19 = scalar_lea.vmem %s24_s24, 16  ;;  %s251_s20 = scalar_lea.vmem %s24_s24, 32 }
  0x1a   :  { %p248_p11 = scmp.ne.s32.totalorder %s24_s24, %s247_s19  ;;  %p252_p12 = scmp.lt.s32.totalorder %s24_s24, %s24_s24 }
  0x1b   :  { %p253_p13 = scmp.lt.s32.totalorder %s251_s20, %s247_s19 }
  0x1d   :  { %p254_p0 = por %p253_p13, %p252_p12 }
  0x1f   :  { %p255_p1 = pnand %p254_p0, %p248_p11 }
  0x21   :  { %258 = shalt.err (!%p255_p1)
}
  0x22   :  { %26 = dma.hbm_to_vmem [thread:$0]  %s394_s2, 16, %s24_s24, [#allocation3]  }
  0x23   :  { %s287_s22 = smov [#allocation6]   ;;  %s259_s27 = scalar_lea.hbm %s397_s5, 16 }
  0x24   :  { %s45_s23 = sshll.u32 %s287_s22, 4  ;;  %p260_p2 = scmp.ne.s32.totalorder %s397_s5, %s259_s27  ;;  %s46_s23 = int_to_ptr.vmem [resolvable:$true] %s45_s23 }
  0x25   :  { %p263_p3 = scmp.lt.u32.totalorder %s259_s27, %s397_s5 }
  0x27   :  { %p265_p4 = pnand %p263_p3, %p260_p2 }
  0x29   :  { %268 = shalt.err (!%p265_p4)
}
  0x2a   :  { %s269_s8 = scalar_lea.vmem %s46_s23, 16  ;;  %s273_s2 = scalar_lea.vmem %s46_s23, 32 }
  0x2b   :  { %p270_p5 = scmp.ne.s32.totalorder %s46_s23, %s269_s8  ;;  %p274_p6 = scmp.lt.s32.totalorder %s46_s23, %s46_s23 }
  0x2c   :  { %p275_p7 = scmp.lt.s32.totalorder %s273_s2, %s269_s8 }
  0x2e   :  { %p276_p8 = por %p275_p7, %p274_p6 }
  0x30   :  { %p277_p9 = pnand %p276_p8, %p270_p5 }
  0x32   :  { %280 = shalt.err (!%p277_p9)
}
  0x33   :  { %48 = dma.hbm_to_vmem [thread:$0]  %s397_s5, 16, %s46_s23, [#allocation5]  }
  0x34   :  { %281 = dma.done.wait [#allocation3], 16  }
  0x35   :  { %282 = vsyncadd [#allocation3], 4294967280 }
  0x36   :  { %283 = dma.done.wait [#allocation5], 32  }
  0x37   :  { %284 = vsyncadd [#allocation5], 4294967264  ;;  %v288_v0 = vmov 0.0   ;;  %vm289_vm0 = vmmov 0   ;;  %v209_v1 = vld [vmem:[%s393_s1] sm:$0xff]   ;;  %v210_v2 = vld [vmem:[%s393_s1 + $0x8] sm:$0xff]  }
  0x38   :  { %196 = vmatprep.subr.bf16.mxu0 %v288_v0  ;;  %200 = vmatprep.mubr.msk.bf16.mxu0 %vm289_vm0, %v288_v0  ;;  %v59_v3 = vld [vmem:[%s392_s0] sm:$0xff]  ;;  %v60_v4 = vld [vmem:[%s392_s0 + $0x8] sm:$0xff]  ;;  %vm85_vm1 = vcmask 261120  }
  0x39   :  { %197 = vmatpush3.bf16.msra.mxu0 %v209_v1  ;;  %v65_v5 = vpack.c.bf16 %v60_v4, %v59_v3  ;;  %v187_v6 = vld [vmem:[#allocation2] ss:$0 sm:$0xff]  ;;  %v131_v12 = vld [vmem:[%s395_s3 + $0x8] sm:$0xff]  ;;  %v191_v36 = vld [vmem:[#allocation4] ss:$0 sm:$0xff] }
  0x3a   :  { %198 = vmatprep.subr.bf16.mxu0 %v288_v0  ;;  %v130_v8 = vld [vmem:[%s395_s3] sm:$0xff] }
  0x3b   :  { %v192_v38 = vld [vmem:[#allocation6] ss:$0 sm:$0xff] }
  0x3d   :  { %199 = vmatpush3.bf16.msra.mxu0 %v210_v2 }
  0x40   :  { %201 = vmatmul.mubr.msk.bf16.vlgmr.msra.gmra.mrb[0].mxu0 %vm85_vm1, %v65_v5 }
 0x113   :  { %v123_v7 = vpop.f32.mrb[0].mxu0 }
 0x114   :  { %v124_v9 = vadd.f32 %v187_v6, %v123_v7  ;;  %v202_v10 = vpop.f32.mrb[1].mxu0 }
 0x115   :  { %v126_v11 = vpop.f32.mrb[2].mxu0 }
 0x116   :  { %v127_v13 = vadd.f32 %v187_v6, %v126_v11  ;;  %v203_v14 = vpop.f32.mrb[3].mxu0  ;;  %v132_v15 = vadd.f32 %v130_v8, %v124_v9 }
 0x118   :  { %v136_v16 = vsel %vm85_vm1, %v132_v15, 0.0  ;;  %v133_v17 = vadd.f32 %v131_v12, %v127_v13 }
 0x119   :  { %137 = vadd.xlane.f32.xlu0 %v136_v16 }
 0x11a   :  { %v139_v18 = vsel %vm85_vm1, %v133_v17, 0.0 }
 0x11d   :  { %140 = vadd.xlane.f32.xlu0 %v139_v18 }
 0x1a6   :  { %v138_v19 = vpop.xlane.xlu0 %137 }
 0x1a7   :  { %v143_v20 = vmul.f32 0.03125, %v138_v19 }
 0x1a9   :  { %v145_v21 = vsub.f32 %v132_v15, %v143_v20 }
 0x1aa   :  { %v141_v22 = vpop.xlane.xlu0 %140 }
 0x1ab   :  { %v144_v23 = vmul.f32 0.03125, %v141_v22  ;;  %v147_v24 = vmul.f32 %v145_v21, %v145_v21 }
 0x1ad   :  { %v146_v25 = vsub.f32 %v133_v17, %v144_v23  ;;  %v149_v26 = vsel %vm85_vm1, %v147_v24, 0.0 }
 0x1ae   :  { %150 = vadd.xlane.f32.xlu1 %v149_v26 }
 0x1af   :  { %v148_v27 = vmul.f32 %v146_v25, %v146_v25 }
 0x1b1   :  { %v152_v28 = vsel %vm85_vm1, %v148_v27, 0.0 }
 0x1b2   :  { %153 = vadd.xlane.f32.xlu1 %v152_v28 }
 0x23b   :  { %v151_v29 = vpop.xlane.xlu1 %150 }
 0x23c   :  { %v155_v30 = vmul.f32 0.03125, %v151_v29 }
 0x23e   :  { %v157_v31 = vadd.f32 1e-05, %v155_v30 }
 0x23f   :  { %v154_v32 = vpop.xlane.xlu1 %153 }
 0x240   :  { %211 = vrsqrt.f32 %v157_v31  ;;  %v156_v33 = vmul.f32 0.03125, %v154_v32 }
 0x242   :  { %v158_v34 = vadd.f32 1e-05, %v156_v33 }
 0x244   :  { %213 = vrsqrt.f32 %v158_v34 }
 0x24a   :  { %v212_v35 = vpop.eup %211 }
 0x24b   :  { %v161_v37 = vmul.f32 %v212_v35, %v145_v21 }
 0x24d   :  { %v169_v39 = vmul.f32 %v191_v36, %v161_v37 }
 0x24e   :  { %v214_v40 = vpop.eup %213 }
 0x24f   :  { %v177_v41 = vadd.f32 %v192_v38, %v169_v39  ;;  %v162_v42 = vmul.f32 %v214_v40, %v146_v25 }
 0x251   :  { %179 = vst.msk [vmem:[%s398_s6] sm:$0xff] %vm85_vm1, %v177_v41  ;;  %v170_v43 = vmul.f32 %v191_v36, %v162_v42 }
 0x253   :  { %v178_v44 = vadd.f32 %v192_v38, %v170_v43 }
 0x255   :  { %180 = vst.msk [vmem:[%s398_s6 + $0x8] sm:$0xff] %vm85_vm1, %v178_v44 }
 0x256   :  { %185 = vsyncpa [#allocation3], 1 }
 0x257   :  { %186 = vsyncpa [#allocation5], 1 }

// kernel: bridger_forward.51
= control target key start
LH: loop header
LB: loop body
LE: loop exit
PB: predicated region body
PF: predicated region fallthrough
CT: control target
= control target key end

     0   :  { %v99_v0 = vmov 0.0   ;;  %vm100_vm0 = vmmov 0   ;;  %vm30_vm1 = vcmask 261120   ;;  %vm75_vm2 = vcmask 519168   ;;  %s128_s1 = inlined_call_operand.vmem [shape: bf16[32,64], index: 1, kind: input, shape index: {}]   ;;  %s129_s0 = inlined_call_operand.vmem [shape: f32[8,32], index: 0, kind: input, shape index: {}]   ;;  %s130_s2 = inlined_call_operand.vmem [shape: bf16[8,64], index: 2, kind: output, shape index: {}]  }
   0x1   :  { %87 = vmatprep.subr.bf16.mxu0 %v99_v0  ;;  %v97_v1 = vld [vmem:[%s128_s1] sm:$0xff]   ;;  %91 = vmatprep.mubr.msk.bf16.mxu0 %vm100_vm0, %v99_v0  ;;  %v98_v2 = vld [vmem:[%s128_s1 + $0x8] sm:$0xff]  }
   0x2   :  { %88 = vmatpush3.bf16.msra.mxu0 %v97_v1  ;;  %v12_v3 = vld [vmem:[%s129_s0] sm:$0xff] }
   0x3   :  { %89 = vmatprep.subr.bf16.mxu0 %v99_v0  ;;  %v17_v4 = vpack.c.bf16 %v12_v3, %v12_v3 }
   0x6   :  { %90 = vmatpush3.bf16.msra.mxu0 %v98_v2 }
   0x9   :  { %92 = vmatmul.mubr.msk.bf16.vlgmr.msra.gmra.mrb[0].mxu0 %vm30_vm1, %v17_v4 }
  0xdc   :  { %v68_v5 = vpop.f32.mrb[0].mxu0 }
  0xdd   :  { %v74_v6 = vpack.c.bf16 %v68_v5, %v68_v5  ;;  %v93_v7 = vpop.f32.mrb[1].mxu0 }
  0xde   :  { %v71_v8 = vpop.f32.mrb[2].mxu0 }
  0xdf   :  { %76 = vst.msk [vmem:[%s130_s2] sm:$0xf] %vm75_vm2, %v74_v6  ;;  %v94_v9 = vpop.f32.mrb[3].mxu0 }

// kernel: bridger_forward.54
= control target key start
LH: loop header
LB: loop body
LE: loop exit
PB: predicated region body
PF: predicated region fallthrough
CT: control target
= control target key end

     0   :  { %s322_s1 = inlined_call_operand.vmem [shape: bf16[256,128], index: 1, kind: input, shape index: {}]   ;;  %s323_s0 = inlined_call_operand.vmem [shape: bf16[8,256], index: 0, kind: input, shape index: {}]   ;;  %s324_s2 = inlined_call_operand.vmem [shape: bf16[8,128], index: 2, kind: output, shape index: {}]  }
   0x1   :  { %v235_v0 = vld [vmem:[%s322_s1 + $0x40] sm:$0xff]   ;;  %v237_v2 = vld [vmem:[%s322_s1 + $0x48] sm:$0xff]   ;;  %v239_v4 = vld [vmem:[%s322_s1 + $0x50] sm:$0xff]  }
   0x2   :  { %v236_v1 = vld [vmem:[%s322_s1] sm:$0xff]   ;;  %213 = vmatprep.subr.bf16.mxu0 %v235_v0  ;;  %v238_v3 = vld [vmem:[%s322_s1 + $0x8] sm:$0xff]   ;;  %v240_v5 = vld [vmem:[%s322_s1 + $0x10] sm:$0xff]  }
   0x3   :  { %214 = vmatpush3.bf16.msra.mxu0 %v236_v1  ;;  %v241_v6 = vld [vmem:[%s322_s1 + $0x58] sm:$0xff]   ;;  %v243_v8 = vld [vmem:[%s322_s1 + $0x60] sm:$0xff]   ;;  %v245_v10 = vld [vmem:[%s322_s1 + $0x68] sm:$0xff]  }
   0x4   :  { %215 = vmatprep.subr.bf16.mxu0 %v237_v2  ;;  %v242_v7 = vld [vmem:[%s322_s1 + $0x18] sm:$0xff]   ;;  %v244_v9 = vld [vmem:[%s322_s1 + $0x20] sm:$0xff]   ;;  %v246_v13 = vld [vmem:[%s322_s1 + $0x28] sm:$0xff]  }
   0x5   :  { %v12_v11 = vld [vmem:[%s323_s0] sm:$0xff]  ;;  %v247_v14 = vld [vmem:[%s322_s1 + $0x70] sm:$0xff]   ;;  %v249_v16 = vld [vmem:[%s322_s1 + $0x78] sm:$0xff]  }
   0x6   :  { %v196_v12 = vcombine.high %v12_v11, %v12_v11  ;;  %v248_v15 = vld [vmem:[%s322_s1 + $0x30] sm:$0xff]   ;;  %v250_v17 = vld [vmem:[%s322_s1 + $0x38] sm:$0xff]   ;;  %v195_v18 = vcombine.low %v12_v11, %v12_v11 }
   0x7   :  { %216 = vmatpush3.bf16.msra.mxu0 %v238_v3 }
   0x8   :  { %217 = vmatprep.subr.bf16.mxu0 %v239_v4  ;;  %180 = vmatprep.mubr.bf16.mxu0 %v196_v12 }
   0xb   :  { %218 = vmatpush3.bf16.msra.mxu0 %v240_v5 }
   0xc   :  { %219 = vmatprep.subr.bf16.mxu0 %v241_v6 }
   0xf   :  { %220 = vmatpush3.bf16.msra.mxu0 %v242_v7 }
  0x10   :  { %221 = vmatprep.subr.bf16.mxu0 %v243_v8 }
  0x13   :  { %222 = vmatpush3.bf16.msra.mxu0 %v244_v9 }
  0x14   :  { %223 = vmatprep.subr.bf16.mxu0 %v245_v10 }
  0x17   :  { %224 = vmatpush3.bf16.msra.mxu0 %v246_v13 }
  0x18   :  { %225 = vmatprep.subr.bf16.mxu0 %v247_v14 }
  0x1b   :  { %226 = vmatpush3.bf16.msra.mxu0 %v248_v15 }
  0x1c   :  { %227 = vmatprep.subr.bf16.mxu0 %v249_v16 }
  0x1f   :  { %228 = vmatpush3.bf16.msra.mxu0 %v250_v17 }
  0x22   :  { %181 = vmatmul.mubr.bf16.vlgmr.msra.gmra.mrb[0].mxu0 %v195_v18 }
  0xf5   :  { %v229_v19 = vpop.f32.mrb[0].mxu0 }
  0xf6   :  { %v230_v20 = vpop.f32.mrb[1].mxu0 }
  0xf7   :  { %v231_v21 = vadd.f32 %v230_v20, %v229_v19  ;;  %v232_v22 = vpop.f32.mrb[2].mxu0 }
  0xf8   :  { %v233_v23 = vpop.f32.mrb[3].mxu0 }
  0xf9   :  { %v188_v24 = vmax.f32 %v231_v21, 0.0 }
  0xfb   :  { %v189_v25 = vpack.c.bf16 %v188_v24, %v188_v24 }
  0xfd   :  { %190 = vst [vmem:[%s324_s2] sm:$0xf] %v189_v25 }

// kernel: bridger_forward.55
= control target key start
LH: loop header
LB: loop body
LE: loop exit
PB: predicated region body
PF: predicated region fallthrough
CT: control target
= control target key end

     0   :  { %v170_v0 = vmov 0.0   ;;  %vm171_vm0 = vmmov 0   ;;  %s217_s1 = inlined_call_operand.vmem [shape: bf16[128,128], index: 1, kind: input, shape index: {}]   ;;  %s218_s0 = inlined_call_operand.vmem [shape: bf16[8,128], index: 0, kind: input, shape index: {}]   ;;  %s219_s2 = inlined_call_operand.vmem [shape: bf16[8,128], index: 2, kind: output, shape index: {}]  }
   0x1   :  { %140 = vmatprep.subr.bf16.mxu0 %v170_v0  ;;  %v162_v1 = vld [vmem:[%s217_s1] sm:$0xff]   ;;  %156 = vmatprep.mubr.msk.bf16.mxu0 %vm171_vm0, %v170_v0  ;;  %v163_v2 = vld [vmem:[%s217_s1 + $0x8] sm:$0xff]   ;;  %v164_v3 = vld [vmem:[%s217_s1 + $0x10] sm:$0xff]  }
   0x2   :  { %141 = vmatpush3.bf16.msra.mxu0 %v162_v1  ;;  %v165_v4 = vld [vmem:[%s217_s1 + $0x18] sm:$0xff]   ;;  %v166_v5 = vld [vmem:[%s217_s1 + $0x20] sm:$0xff]   ;;  %v167_v6 = vld [vmem:[%s217_s1 + $0x28] sm:$0xff]  }
   0x3   :  { %142 = vmatprep.subr.bf16.mxu0 %v170_v0  ;;  %v168_v7 = vld [vmem:[%s217_s1 + $0x30] sm:$0xff]   ;;  %v169_v8 = vld [vmem:[%s217_s1 + $0x38] sm:$0xff]   ;;  %v12_v9 = vld [vmem:[%s218_s0] sm:$0xf] }
   0x6   :  { %143 = vmatpush3.bf16.msra.mxu0 %v163_v2 }
   0x7   :  { %144 = vmatprep.subr.bf16.mxu0 %v170_v0 }
   0xa   :  { %145 = vmatpush3.bf16.msra.mxu0 %v164_v3 }
   0xb   :  { %146 = vmatprep.subr.bf16.mxu0 %v170_v0 }
   0xe   :  { %147 = vmatpush3.bf16.msra.mxu0 %v165_v4 }
   0xf   :  { %148 = vmatprep.subr.bf16.mxu0 %v170_v0 }
  0x12   :  { %149 = vmatpush3.bf16.msra.mxu0 %v166_v5 }
  0x13   :  { %150 = vmatprep.subr.bf16.mxu0 %v170_v0 }
  0x16   :  { %151 = vmatpush3.bf16.msra.mxu0 %v167_v6 }
  0x17   :  { %152 = vmatprep.subr.bf16.mxu0 %v170_v0 }
  0x1a   :  { %153 = vmatpush3.bf16.msra.mxu0 %v168_v7 }
  0x1b   :  { %154 = vmatprep.subr.bf16.mxu0 %v170_v0 }
  0x1e   :  { %155 = vmatpush3.bf16.msra.mxu0 %v169_v8 }
  0x21   :  { %157 = vmatmul.mubr.bf16.vlgmr.msra.gmra.mrb[0].mxu0 %v12_v9 }
  0xf4   :  { %v111_v10 = vpop.f32.mrb[0].mxu0 }
  0xf5   :  { %v117_v11 = vpack.c.bf16 %v111_v10, %v111_v10  ;;  %v158_v12 = vpop.f32.mrb[1].mxu0 }
  0xf6   :  { %v114_v13 = vpop.f32.mrb[2].mxu0 }
  0xf7   :  { %118 = vst [vmem:[%s219_s2] sm:$0xf] %v117_v11  ;;  %v159_v14 = vpop.f32.mrb[3].mxu0 }

// kernel: bridger_forward.50
= control target key start
LH: loop header
LB: loop body
LE: loop exit
PB: predicated region body
PF: predicated region fallthrough
CT: control target
= control target key end

     0   :  { %15 = vsyncpa [#allocation3], 0  ;;  %s2793_s0 = inlined_call_operand.vmem [shape: f32[2,4,32], index: 0, kind: input, shape index: {}]   ;;  %s2794_s1 = inlined_call_operand.vmem [shape: f32[2,8,32], index: 1, kind: input, shape index: {}]   ;;  %s2795_s2 = inlined_call_operand.vmem [shape: f32[1,32], index: 2, kind: input, shape index: {}]   ;;  %s2796_s3 = inlined_call_operand.hbm [shape: f32[1,32], index: 3, kind: input, shape index: {}]   ;;  %s2797_s4 = inlined_call_operand.vmem [shape: bf16[32,96], index: 4, kind: input, shape index: {}]   ;;  %s2798_s5 = inlined_call_operand.hbm [shape: f32[1,96], index: 5, kind: input, shape index: {}]   ;;  %s2799_s6 = inlined_call_operand.vmem [shape: bf16[32,32], index: 6, kind: input, shape index: {}]   ;;  %s2800_s7 = inlined_call_operand.hbm [shape: f32[1,32], index: 7, kind: input, shape index: {}]   ;;  %s2801_s8 = inlined_call_operand.vmem [shape: f32[2,4,32], index: 8, kind: output, shape index: {0}]   ;;  %s2802_s9 = inlined_call_operand.vmem [shape: f32[2,8,32], index: 9, kind: output, shape index: {1}]  }
   0x1   :  { %16 = vsyncpa [#allocation5], 0  ;;  %s2341_s30 = smov 0  }
   0x2 LB: > { %s2347_s10 = sadd.s32 4294967295, %s2254_s30   ;;  %p1787_p0 = scmp.ge.s32.totalorder %s2254_s30, 1  ;;  %s2254_s30 = sphi %s2341_s30, %s22_s30  }
   0x3   : > { %p257_p1 = scmp.lt.s32.totalorder %s2254_s30, 3  ;;  %p2803_p2 = scmp.eq.s32.totalorder %s2347_s10, 0 }
   0x4   : > { %s2256_s12 = smov [#allocation4]   ;;  %s2257_s14 = smov [#allocation2]  }
   0x5   : > { %p2352_p3 = pnand %p1787_p0, %p257_p1  ;;  %s287_s13 = sshll.u32 %s2256_s12, 4  ;;  %s288_s13 = int_to_ptr.vmem [resolvable:$true] %s287_s13 }
   0x6   : > { %s273_s15 = sshll.u32 %s2257_s14, 4  ;;  %s2258_s16 = smov [#allocation6]   ;;  %s2364_s15 = int_to_ptr.vmem [resolvable:$true] %s273_s15 }
   0x7   : > { %s2805_s11 = scalar_select %p2352_p3, 1, 0 }
   0x8   : > { %p1990_p4 = pneg %p2352_p3  ;;  %s301_s17 = sshll.u32 %s2258_s16, 4  ;;  %s2366_s17 = int_to_ptr.vmem [resolvable:$true] %s301_s17 }
   0x9   : > { %s2156_s21 = scalar_lea.hbm %s2798_s5, 16 }
   0xa   : > { %p2360_p5 = pnand %p2803_p2, %p1990_p4  ;;  %p2157_p6 = scmp.ne.s32.totalorder %s2798_s5, %s2156_s21 }
   0xb   : > { %p2163_p10 = scmp.lt.u32.totalorder %s2156_s21, %s2798_s5 }
   0xc   : > { %p2376_p7 = pneg %p2360_p5 }
   0xe   : > { %p2159_p8 = pnand %p2376_p7, %p2157_p6 }
  0x10   : > { %p2160_p9 = pneg %p2159_p8 }
  0x12   : > { %p2165_p11 = pnand %p2163_p10, %p2160_p9 }
  0x14   : > { %2168 = shalt.err (!%p2165_p11)
}
  0x15   : > { %s2169_s27 = scalar_lea.vmem %s288_s13, 16  ;;  %s2176_s28 = scalar_lea.vmem %s288_s13, 32 }
  0x16   : > { %p2170_p12 = scmp.ne.s32.totalorder %s288_s13, %s2169_s27  ;;  %p2177_p1 = scmp.lt.s32.totalorder %s288_s13, %s288_s13 }
  0x17   : > { %p2178_p4 = scmp.lt.s32.totalorder %s2176_s28, %s2169_s27 }
  0x18   : > { %p2172_p13 = pnand %p2170_p12, %p2376_p7 }
  0x19   : > { %p2179_p2 = por %p2178_p4, %p2177_p1 }
  0x1a   : > { %p2173_p0 = pneg %p2172_p13 }
  0x1c   : > { %p2180_p3 = pnand %p2179_p2, %p2173_p0 }
  0x1e   : > { %2183 = shalt.err (!%p2180_p3)
}
  0x1f   : > { %1996 = dma.hbm_to_vmem [thread:$0]  (!%p2360_p5), %s2798_s5, 16, %s288_s13, [#allocation5]  }
  0x20   : > { %s2184_s19 = scalar_lea.hbm %s2796_s3, 16 }
  0x21   : > { %p2185_p6 = scmp.ne.s32.totalorder %s2796_s3, %s2184_s19  ;;  %p2191_p2 = scmp.lt.u32.totalorder %s2184_s19, %s2796_s3 }
  0x23   : > { %p2187_p8 = pnand %p2185_p6, %p2376_p7 }
  0x25   : > { %p2188_p9 = pneg %p2187_p8 }
  0x27   : > { %p2193_p3 = pnand %p2191_p2, %p2188_p9 }
  0x29   : > { %2196 = shalt.err (!%p2193_p3)
}
  0x2a   : > { %s2197_s13 = scalar_lea.vmem %s2364_s15, 16  ;;  %s2204_s25 = scalar_lea.vmem %s2364_s15, 32 }
  0x2b   : > { %p2198_p10 = scmp.ne.s32.totalorder %s2364_s15, %s2197_s13  ;;  %p2205_p13 = scmp.lt.s32.totalorder %s2364_s15, %s2364_s15 }
  0x2c   : > { %p2206_p0 = scmp.lt.s32.totalorder %s2204_s25, %s2197_s13 }
  0x2d   : > { %p2200_p11 = pnand %p2198_p10, %p2376_p7 }
  0x2e   : > { %p2207_p1 = por %p2206_p0, %p2205_p13 }
  0x2f   : > { %p2201_p12 = pneg %p2200_p11 }
  0x31   : > { %p2208_p4 = pnand %p2207_p1, %p2201_p12 }
  0x33   : > { %2211 = shalt.err (!%p2208_p4)
}
  0x34   : > { %1993 = dma.hbm_to_vmem [thread:$0]  (!%p2360_p5), %s2796_s3, 16, %s2364_s15, [#allocation3]  }
  0x35   : > { %s2212_s12 = scalar_lea.hbm %s2800_s7, 16 }
  0x36   : > { %p2213_p6 = scmp.ne.s32.totalorder %s2800_s7, %s2212_s12  ;;  %p2219_p2 = scmp.lt.u32.totalorder %s2212_s12, %s2800_s7 }
  0x38   : > { %p2215_p8 = pnand %p2213_p6, %p2376_p7 }
  0x3a   : > { %p2216_p9 = pneg %p2215_p8 }
  0x3c   : > { %p2221_p3 = pnand %p2219_p2, %p2216_p9 }
  0x3e   : > { %2224 = shalt.err (!%p2221_p3)
}
  0x3f   : > { %s2225_s15 = scalar_lea.vmem %s2366_s17, 16  ;;  %s2232_s21 = scalar_lea.vmem %s2366_s17, 32 }
  0x40   : > { %p2226_p10 = scmp.ne.s32.totalorder %s2366_s17, %s2225_s15  ;;  %p2233_p13 = scmp.lt.s32.totalorder %s2366_s17, %s2366_s17 }
  0x41   : > { %p2234_p0 = scmp.lt.s32.totalorder %s2232_s21, %s2225_s15 }
  0x42   : > { %p2228_p11 = pnand %p2226_p10, %p2376_p7 }
  0x43   : > { %p2235_p1 = por %p2234_p0, %p2233_p13 }
  0x44   : > { %p2229_p12 = pneg %p2228_p11 }
  0x46   : > { %p2236_p4 = pnand %p2235_p1, %p2229_p12 }
  0x48   : > { %2239 = shalt.err (!%p2236_p4)
}
  0x49   : > { %1999 = dma.hbm_to_vmem [thread:$0]  (!%p2360_p5), %s2800_s7, 16, %s2366_s17, [#allocation5]  }
  0x4a   : > { %p2808_p6 = scmp.ne.s32.totalorder %s2805_s11, 0 }
  0x4b   : > { %p2809_p7 = scmp.eq.s32.totalorder (!%p2808_p6), %s2347_s10, 0 }
  0x4c   : > { %328 = sbr.rel (%p2808_p6) target bundleno = 1933 (0x78d), region = 52 }
  0x53   : > { %2245 = dma.done.wait (%p2809_p7), [#allocation3], 16   ;;  %p2810_p8 = pmov %p2809_p7 }
  0x54   : > { %p2811_p9 = pmov %p2809_p7 }
  0x55   : > { %2247 = vsyncadd (%p2810_p8), [#allocation3], 4294967280 }
  0x56   : > { %2249 = dma.done.wait (%p2811_p9), [#allocation5], 32   ;;  %p2812_p2 = pmov %p2809_p7 }
  0x57   : > { %p378_p3 = scmp.lt.s32.totalorder %s2347_s10, 1  ;;  %vm400_vm0 = vcmask 1043456   ;;  %vm404_vm1 = vcmask 261120   ;;  %vm408_vm2 = vcmask 257024   ;;  %v2084_v16 = vld [vmem:[%s2797_s4] sm:$0xff]   ;;  %v2259_v17 = vmov 0.0  }
  0x58   : > { %2251 = vsyncadd (%p2812_p2), [#allocation5], 4294967264  ;;  %1866 = vmatprep.subr.bf16.mxu0 %v2259_v17  ;;  %1874 = vmatprep.subr.bf16.mxu1 %v2259_v17  ;;  %v2085_v18 = vld [vmem:[%s2797_s4 + $0x8] sm:$0xff]   ;;  %vm2260_vm3 = vmmov 0   ;;  %v1800_v27 = vld [vmem:[%s2795_s2] ss:$0 sm:$0xff] }
  0x59   : > { %s2814_s10 = smov (!%p378_p3, %s2347_s10), 1  ;;  %1867 = vmatpush3.bf16.msra.mxu0 %v2084_v16  ;;  %1870 = vmatprep.mubr.msk.bf16.mxu0 %vm2260_vm3, %v2259_v17  ;;  %v1801_v31 = vld [vmem:[#allocation2] ss:$0 sm:$0xff]  ;;  %v1802_v36 = vld [vmem:[#allocation4] ss:$0 sm:$0xff]  ;;  %s2261_s20 = smov 92  }
  0x5a   : > { %s1796_s11 = sshll.u32 %s2814_s10, 2  ;;  %s1797_s17 = sshll.u32 %s2814_s10, 3  ;;  %1868 = vmatprep.subr.bf16.mxu0 %v2259_v17  ;;  %1876 = vmatprep.mubr.msk.bf16.mxu1 %vm2260_vm3, %v2259_v17  ;;  %vm524_vm4 = vcmask 31744   ;;  %vm602_vm5 = vcmask 1045504   ;;  %vm572_vm6 = vcmask 97280   ;;  %vm576_vm7 = vcmask 93184  }
  0x5b   : > { %s381_s13 = scalar_lea.vmem %s2793_s0, %s1796_s11  ;;  %s385_s27 = scalar_lea.vmem %s2794_s1, %s1797_s17  ;;  %vm1567_vm8 = vcmask 64512   ;;  %vm1572_vm9 = vcmask 130048   ;;  %vm1575_vm10 = vcmask 162816   ;;  %vm1578_vm11 = vcmask 195584  }
  0x5c   : > { %v395_v0 = vld [vmem:[%s381_s13] sm:$0xf]  ;;  %s2262_s15 = smov 96   ;;  %s2263_s21 = smov 120   ;;  %vm1581_vm12 = vcmask 228352   ;;  %vm1655_vm13 = vcmask 261124  }
  0x5d   : > { %v396_v1 = vld [vmem:[%s385_s27] sm:$0xff]  ;;  %1869 = vmatpush3.bf16.msra.mxu0 %v2085_v18  ;;  %s2264_s22 = smov 124   ;;  %s2265_s23 = smov 116  }
  0x5e   : > { %v2466_v2 = vrot.slane %v396_v1, 4  ;;  %1880 = vmatprep.subr.bf16.mxu0 %v2259_v17  ;;  %s2266_s18 = smov 88   ;;  %s2267_s24 = smov 112  }
  0x5f   : > { %s2268_s13 = smov 84   ;;  %s2269_s25 = smov 108  }
  0x60   : > { %v2469_v3 = vsel %vm400_vm0, %v395_v0, %v2466_v2  ;;  %v409_v5 = vsel %vm408_vm2, %v2466_v2, 0.0  ;;  %s2270_s26 = smov 80   ;;  %s2271_s27 = smov 104  }
  0x61   : > { %v405_v4 = vsel %vm404_vm1, %v2469_v3, 0.0  ;;  %s2272_s28 = smov 76   ;;  %s2273_s29 = smov 100  }
  0x62   : > { %406 = vadd.xlane.f32.xlu0 %v405_v4  ;;  %s2274_s12 = smov 72   ;;  %s2275_s14 = smov 68  }
  0x63   : > { %s2276_s16 = smov 64   ;;  %s2277_s19 = smov 56  }
  0x66   : > { %410 = vadd.xlane.f32.xlu0 %v409_v5 }
  0xef   : > { %v407_v6 = vpop.xlane.xlu0 %406 }
  0xf0   : > { %v413_v7 = vmul.f32 0.03125, %v407_v6 }
  0xf2   : > { %v415_v8 = vsub.f32 %v2469_v3, %v413_v7 }
  0xf3   : > { %v411_v9 = vpop.xlane.xlu0 %410 }
  0xf4   : > { %v414_v10 = vmul.f32 0.03125, %v411_v9  ;;  %v417_v11 = vmul.f32 %v415_v8, %v415_v8 }
  0xf6   : > { %v416_v12 = vsub.f32 %v2466_v2, %v414_v10  ;;  %v419_v13 = vsel %vm404_vm1, %v417_v11, 0.0 }
  0xf7   : > { %420 = vadd.xlane.f32.xlu1 %v419_v13 }
  0xf8   : > { %v418_v14 = vmul.f32 %v416_v12, %v416_v12 }
  0xfa   : > { %v422_v15 = vsel %vm408_vm2, %v418_v14, 0.0 }
  0xfb   : > { %423 = vadd.xlane.f32.xlu1 %v422_v15 }
 0x184   : > { %v421_v19 = vpop.xlane.xlu1 %420 }
 0x185   : > { %v425_v20 = vmul.f32 0.03125, %v421_v19 }
 0x187   : > { %v427_v21 = vadd.f32 1e-05, %v425_v20 }
 0x188   : > { %v424_v22 = vpop.xlane.xlu1 %423 }
 0x189   : > { %2088 = vrsqrt.f32 %v427_v21  ;;  %v426_v23 = vmul.f32 0.03125, %v424_v22 }
 0x18b   : > { %v428_v24 = vadd.f32 1e-05, %v426_v23 }
 0x18d   : > { %2090 = vrsqrt.f32 %v428_v24 }
 0x193   : > { %v2089_v25 = vpop.eup %2088 }
 0x194   : > { %v431_v26 = vmul.f32 %v2089_v25, %v415_v8 }
 0x196   : > { %v439_v30 = vmul.f32 %v1800_v27, %v431_v26 }
 0x197   : > { %v2091_v28 = vpop.eup %2090 }
 0x198   : > { %v432_v29 = vmul.f32 %v2091_v28, %v416_v12  ;;  %v447_v33 = vadd.f32 %v1801_v31, %v439_v30 }
 0x19a   : > { %v440_v32 = vmul.f32 %v1800_v27, %v432_v29 }
 0x19c   : > { %v448_v34 = vadd.f32 %v1801_v31, %v440_v32 }
 0x19e   : > { %v449_v35 = vpack.c.bf16 %v448_v34, %v447_v33 }
 0x1a0   : > { %1871 = vmatmul.mubr.msk.bf16.vlgmr.msra.gmra.mrb[0].mxu0 %vm404_vm1, %v449_v35 }
 0x1a1   : > { %1882 = vmatprep.mubr.msk.bf16.mxu0 %vm2260_vm3, %v2259_v17 }
 0x273   : > { %v510_v37 = vpop.f32.mrb[0].mxu0 }
 0x274   : > { %v511_v38 = vadd.f32 %v1802_v36, %v510_v37  ;;  %v1872_v39 = vpop.f32.mrb[1].mxu0 }
 0x275   : > { %v513_v40 = vpop.f32.mrb[2].mxu0 }
 0x276   : > { %v514_v41 = vadd.f32 %v1802_v36, %v513_v40  ;;  %v1873_v42 = vpop.f32.mrb[3].mxu0  ;;  %v517_v43 = vmul.f32 0.5, %v511_v38 }
 0x278   : > { %v518_v44 = vmul.f32 0.5, %v514_v41  ;;  %v2499_v45 = vpack.c.bf16 %v514_v41, %v511_v38 }
 0x27a   : > { %v519_v46 = vpack.c.bf16 %v518_v44, %v517_v43  ;;  %650 = vrot.lane.b32.xlu1 %v2499_v45, %s2261_s20  ;;  %522 = vrot.lane.b32.xlu0 %v2499_v45, %s2262_s15  ;;  %s2278_s20 = smov 60   ;;  %s2279_s15 = smov 52  }
 0x27e   : > { %771 = vrot.lane.b32.xlu0 %v519_v46, %s2263_s21  ;;  %648 = vrot.lane.b32.xlu1 %v519_v46, %s2264_s22  ;;  %s2280_s21 = smov 48   ;;  %s2281_s22 = smov 44  }
 0x282   : > { %894 = vrot.lane.b32.xlu0 %v519_v46, %s2265_s23  ;;  %773 = vrot.lane.b32.xlu1 %v2499_v45, %s2266_s18  ;;  %s2282_s23 = smov 40   ;;  %s2283_s18 = smov 36  }
 0x286   : > { %1017 = vrot.lane.b32.xlu0 %v519_v46, %s2267_s24  ;;  %896 = vrot.lane.b32.xlu1 %v2499_v45, %s2268_s13  ;;  %s2284_s24 = smov 4   ;;  %s2285_s13 = smov 8  }
 0x28a   : > { %1140 = vrot.lane.b32.xlu0 %v519_v46, %s2269_s25  ;;  %1019 = vrot.lane.b32.xlu1 %v2499_v45, %s2270_s26  ;;  %s2286_s25 = smov 12   ;;  %s2287_s26 = smov 16  }
 0x28e   : > { %1263 = vrot.lane.b32.xlu0 %v519_v46, %s2271_s27  ;;  %1142 = vrot.lane.b32.xlu1 %v2499_v45, %s2272_s28 }
 0x292   : > { %1386 = vrot.lane.b32.xlu0 %v519_v46, %s2273_s29  ;;  %1265 = vrot.lane.b32.xlu1 %v2499_v45, %s2274_s12  ;;  %s2288_s29 = smov 20   ;;  %s2289_s12 = smov 24  }
 0x296   : > { %1388 = vrot.lane.b32.xlu1 %v2499_v45, %s2275_s14 }
 0x29a   : > { %597 = vrot.lane.b32.xlu1 %v2499_v45, %s2276_s16 }
 0x2ec   : > { %v651_v47 = vpop.permute.xlu1 %650  ;;  %v523_v48 = vpop.permute.xlu0 %522 }
 0x2ed   : > { %v529_v49 = vsel %vm524_vm4, %v523_v48, 0  ;;  %v656_v52 = vsel %vm524_vm4, %v651_v47, 0 }
 0x2ee   : > { %1875 = vmatpush3.bf16.xpose.msra.mxu1 %v529_v49 }
 0x2ef   : > { %1886 = vmatprep.subr.bf16.mxu1 %v2259_v17 }
 0x2f0   : > { %v649_v50 = vpop.permute.xlu1 %648  ;;  %v772_v57 = vpop.permute.xlu0 %771 }
 0x2f4   : > { %v774_v51 = vpop.permute.xlu1 %773  ;;  %v895_v61 = vpop.permute.xlu0 %894 }
 0x2f5   : > { %1877 = vmatmul.mubr.msk.bf16.vlgmr.msra.gmra.mrb[0].mxu1 %vm524_vm4, %v519_v46  ;;  %v779_v55 = vsel %vm524_vm4, %v774_v51, 0 }
 0x2f6   : > { %1887 = vmatpush3.bf16.xpose.msra.mxu1 %v656_v52  ;;  %1888 = vmatprep.mubr.msk.bf16.mxu1 %vm2260_vm3, %v2259_v17 }
 0x2f7   : > { %1898 = vmatprep.subr.bf16.mxu1 %v2259_v17 }
 0x2f8   : > { %v897_v53 = vpop.permute.xlu1 %896  ;;  %v1018_v1 = vpop.permute.xlu0 %1017 }
 0x2f9   : > { %v902_v59 = vsel %vm524_vm4, %v897_v53, 0 }
 0x2fc   : > { %v1020_v54 = vpop.permute.xlu1 %1019  ;;  %v1141_v5 = vpop.permute.xlu0 %1140 }
 0x2fd   : > { %1889 = vmatmul.mubr.msk.bf16.vlgmr.msra.gmra.mrb[4].mxu1 %vm524_vm4, %v649_v50  ;;  %v1025_v63 = vsel %vm524_vm4, %v1020_v54, 0 }
 0x2fe   : > { %1899 = vmatpush3.bf16.xpose.msra.mxu1 %v779_v55  ;;  %1900 = vmatprep.mubr.msk.bf16.mxu1 %vm2260_vm3, %v2259_v17 }
 0x2ff   : > { %1910 = vmatprep.subr.bf16.mxu1 %v2259_v17 }
 0x300   : > { %v1143_v56 = vpop.permute.xlu1 %1142  ;;  %v1264_v7 = vpop.permute.xlu0 %1263 }
 0x301   : > { %v1148_v4 = vsel %vm524_vm4, %v1143_v56, 0 }
 0x304   : > { %v1266_v58 = vpop.permute.xlu1 %1265  ;;  %v1387_v9 = vpop.permute.xlu0 %1386 }
 0x305   : > { %1901 = vmatmul.mubr.msk.bf16.vlgmr.msra.gmra.mrb[8].mxu1 %vm524_vm4, %v772_v57  ;;  %v1271_v6 = vsel %vm524_vm4, %v1266_v58, 0 }
 0x306   : > { %1911 = vmatpush3.bf16.xpose.msra.mxu1 %v902_v59  ;;  %1912 = vmatprep.mubr.msk.bf16.mxu1 %vm2260_vm3, %v2259_v17 }
 0x307   : > { %1922 = vmatprep.subr.bf16.mxu1 %v2259_v17 }
 0x308   : > { %v1389_v60 = vpop.permute.xlu1 %1388 }
 0x309   : > { %v1394_v8 = vsel %vm524_vm4, %v1389_v60, 0 }
 0x30c   : > { %v598_v62 = vpop.permute.xlu1 %597 }
 0x30d   : > { %v604_v0 = vsel %vm602_vm5, %v598_v62, 0  ;;  %1913 = vmatmul.mubr.msk.bf16.vlgmr.msra.gmra.mrb[12].mxu1 %vm524_vm4, %v895_v61 }
 0x30e   : > { %1881 = vmatpush3.bf16.msra.mxu0 %v604_v0  ;;  %1923 = vmatpush3.bf16.xpose.msra.mxu1 %v1025_v63 }
 0x30f   : > { %1924 = vmatprep.mubr.msk.bf16.mxu1 %vm2260_vm3, %v2259_v17  ;;  %1934 = vmatprep.subr.bf16.mxu1 %v2259_v17 }
 0x310   : > { %1892 = vmatprep.subr.bf16.mxu0 %v2259_v17 }
 0x315   : > { %1925 = vmatmul.mubr.msk.bf16.vlgmr.msra.gmra.mrb[16].mxu1 %vm524_vm4, %v1018_v1 }
 0x316   : > { %1935 = vmatpush3.bf16.xpose.msra.mxu1 %v1148_v4  ;;  %1936 = vmatprep.mubr.msk.bf16.mxu1 %vm2260_vm3, %v2259_v17 }
 0x317   : > { %1946 = vmatprep.subr.bf16.mxu1 %v2259_v17 }
 0x31d   : > { %1937 = vmatmul.mubr.msk.bf16.vlgmr.msra.gmra.mrb[20].mxu1 %vm524_vm4, %v1141_v5 }
 0x31e   : > { %1947 = vmatpush3.bf16.xpose.msra.mxu1 %v1271_v6  ;;  %1948 = vmatprep.mubr.msk.bf16.mxu1 %vm2260_vm3, %v2259_v17 }
 0x31f   : > { %1958 = vmatprep.subr.bf16.mxu1 %v2259_v17 }
 0x325   : > { %1949 = vmatmul.mubr.msk.bf16.vlgmr.msra.gmra.mrb[24].mxu1 %vm524_vm4, %v1264_v7 }
 0x326   : > { %1959 = vmatpush3.bf16.xpose.msra.mxu1 %v1394_v8  ;;  %1960 = vmatprep.mubr.msk.bf16.mxu1 %vm2260_vm3, %v2259_v17 }
 0x327   : > { %1970 = vmatprep.subr.bf16.mxu1 %v2259_v17 }
 0x32d   : > { %1961 = vmatmul.mubr.msk.bf16.vlgmr.msra.gmra.mrb[28].mxu1 %vm524_vm4, %v1387_v9 }
 0x32e   : > { %1974 = vmatprep.mubr.msk.bf16.mxu1 %vm2260_vm3, %v2259_v17 }
 0x3c8   : > { %v2552_v10 = vpop.f32.mrb[0].mxu1 }
 0x3c9   : > { %v1878_v11 = vpop.f32.mrb[1].mxu1  ;;  %v573_v12 = vsel %vm572_vm6, %v2552_v10, -inf }
 0x3ca   : > { %574 = vmax.xlane.f32.xlu1 %v573_v12  ;;  %v2556_v13 = vpop.f32.mrb[2].mxu1 }
 0x3cb   : > { %v1879_v14 = vpop.f32.mrb[3].mxu1  ;;  %v577_v15 = vsel %vm576_vm7, %v2556_v13, -inf }
 0x3cc   : > { %578 = vmax.xlane.f32.xlu0 %v577_v15 }
 0x3d0   : > { %v2560_v16 = vpop.f32.mrb[4].mxu1 }
 0x3d1   : > { %v1890_v18 = vpop.f32.mrb[5].mxu1  ;;  %v699_v19 = vsel %vm572_vm6, %v2560_v16, -inf }
 0x3d2   : > { %700 = vmax.xlane.f32.xlu0 %v699_v19  ;;  %v2564_v20 = vpop.f32.mrb[6].mxu1 }
 0x3d3   : > { %v1891_v21 = vpop.f32.mrb[7].mxu1  ;;  %v702_v22 = vsel %vm576_vm7, %v2564_v20, -inf }
 0x3d6   : > { %703 = vmax.xlane.f32.xlu0 %v702_v22 }
 0x3d8   : > { %v2568_v23 = vpop.f32.mrb[8].mxu1 }
 0x3d9   : > { %v1902_v24 = vpop.f32.mrb[9].mxu1  ;;  %v822_v25 = vsel %vm572_vm6, %v2568_v23, -inf }
 0x3da   : > { %823 = vmax.xlane.f32.xlu1 %v822_v25  ;;  %v2572_v26 = vpop.f32.mrb[10].mxu1 }
 0x3db   : > { %v1903_v27 = vpop.f32.mrb[11].mxu1  ;;  %v825_v28 = vsel %vm576_vm7, %v2572_v26, -inf }
 0x3dc   : > { %826 = vmax.xlane.f32.xlu0 %v825_v28 }
 0x3e0   : > { %v2576_v29 = vpop.f32.mrb[12].mxu1 }
 0x3e1   : > { %v1914_v30 = vpop.f32.mrb[13].mxu1  ;;  %v945_v31 = vsel %vm572_vm6, %v2576_v29, -inf }
 0x3e2   : > { %946 = vmax.xlane.f32.xlu1 %v945_v31  ;;  %v2580_v32 = vpop.f32.mrb[14].mxu1 }
 0x3e3   : > { %v1915_v33 = vpop.f32.mrb[15].mxu1  ;;  %v948_v34 = vsel %vm576_vm7, %v2580_v32, -inf }
 0x3e4   : > { %949 = vmax.xlane.f32.xlu0 %v948_v34 }
 0x3e8   : > { %v2584_v35 = vpop.f32.mrb[16].mxu1 }
 0x3e9   : > { %v1926_v36 = vpop.f32.mrb[17].mxu1  ;;  %v1068_v37 = vsel %vm572_vm6, %v2584_v35, -inf }
 0x3ea   : > { %1069 = vmax.xlane.f32.xlu1 %v1068_v37  ;;  %v2588_v38 = vpop.f32.mrb[18].mxu1 }
 0x3eb   : > { %v1927_v39 = vpop.f32.mrb[19].mxu1  ;;  %v1071_v40 = vsel %vm576_vm7, %v2588_v38, -inf }
 0x3ec   : > { %1072 = vmax.xlane.f32.xlu0 %v1071_v40 }
 0x3f0   : > { %v2592_v41 = vpop.f32.mrb[20].mxu1 }
 0x3f1   : > { %v1938_v42 = vpop.f32.mrb[21].mxu1  ;;  %v1191_v43 = vsel %vm572_vm6, %v2592_v41, -inf }
 0x3f2   : > { %1192 = vmax.xlane.f32.xlu1 %v1191_v43  ;;  %v2596_v44 = vpop.f32.mrb[22].mxu1 }
 0x3f3   : > { %v1939_v46 = vpop.f32.mrb[23].mxu1  ;;  %v1194_v47 = vsel %vm576_vm7, %v2596_v44, -inf }
 0x3f4   : > { %1195 = vmax.xlane.f32.xlu0 %v1194_v47 }
 0x3f8   : > { %v2600_v48 = vpop.f32.mrb[24].mxu1 }
 0x3f9   : > { %v1950_v49 = vpop.f32.mrb[25].mxu1  ;;  %v1314_v50 = vsel %vm572_vm6, %v2600_v48, -inf }
 0x3fa   : > { %1315 = vmax.xlane.f32.xlu1 %v1314_v50  ;;  %v2604_v51 = vpop.f32.mrb[26].mxu1 }
 0x3fb   : > { %v1951_v52 = vpop.f32.mrb[27].mxu1  ;;  %v1317_v53 = vsel %vm576_vm7, %v2604_v51, -inf }
 0x3fc   : > { %1318 = vmax.xlane.f32.xlu0 %v1317_v53 }
 0x400   : > { %v2608_v54 = vpop.f32.mrb[28].mxu1 }
 0x401   : > { %v1962_v55 = vpop.f32.mrb[29].mxu1  ;;  %v1437_v56 = vsel %vm572_vm6, %v2608_v54, -inf }
 0x402   : > { %1438 = vmax.xlane.f32.xlu1 %v1437_v56  ;;  %v2612_v57 = vpop.f32.mrb[30].mxu1 }
 0x403   : > { %v1963_v58 = vpop.f32.mrb[31].mxu1  ;;  %v1440_v59 = vsel %vm576_vm7, %v2612_v57, -inf }
 0x404   : > { %1441 = vmax.xlane.f32.xlu0 %v1440_v59 }
 0x413   : > { %845 = vrot.lane.b32.xlu1 %v2499_v45, %s2277_s19  ;;  %s2290_s19 = smov 28  }
 0x41a   : > { %722 = vrot.lane.b32.xlu0 %v2499_v45, %s2278_s20 }
 0x457   : > { %v575_v60 = vpop.xlane.xlu1 %574 }
 0x458   : > { %v580_v61 = vsub.f32 %v2552_v10, %v575_v60 }
 0x459   : > { %v579_v62 = vpop.xlane.xlu0 %578 }
 0x45a   : > { %v582_v63 = vmul.f32 1.442695, %v580_v61  ;;  %v581_v0 = vsub.f32 %v2556_v13, %v579_v62 }
 0x45c   : > { %2092 = vpow2.f32 %v582_v63  ;;  %v584_v1 = vmul.f32 1.442695, %v581_v0 }
 0x45e   : > { %2094 = vpow2.f32 %v584_v1 }
 0x45f   : > { %v701_v4 = vpop.xlane.xlu0 %700 }
 0x460   : > { %v705_v5 = vsub.f32 %v2560_v16, %v701_v4 }
 0x462   : > { %v707_v6 = vmul.f32 1.442695, %v705_v5 }
 0x463   : > { %v704_v7 = vpop.xlane.xlu0 %703 }
 0x464   : > { %2096 = vpow2.f32 %v707_v6  ;;  %v706_v8 = vsub.f32 %v2564_v20, %v704_v7 }
 0x466   : > { %v2622_v9 = vpop.eup %2092  ;;  %v709_v11 = vmul.f32 1.442695, %v706_v8 }
 0x467   : > { %v824_v12 = vpop.xlane.xlu1 %823  ;;  %v586_v10 = vsel %vm572_vm6, %v2622_v9, 0.0 }
 0x468   : > { %v2626_v14 = vpop.eup %2094  ;;  %2098 = vpow2.f32 %v709_v11  ;;  %v828_v13 = vsub.f32 %v2568_v23, %v824_v12  ;;  %587 = vadd.xlane.f32.xlu1 %v586_v10 }
 0x469   : > { %v827_v15 = vpop.xlane.xlu0 %826  ;;  %v589_v16 = vsel %vm576_vm7, %v2626_v14, 0.0 }
 0x46a   : > { %v830_v18 = vmul.f32 1.442695, %v828_v13  ;;  %v829_v19 = vsub.f32 %v2572_v26, %v827_v15  ;;  %590 = vadd.xlane.f32.xlu0 %v589_v16 }
 0x46c   : > { %2100 = vpow2.f32 %v830_v18  ;;  %v832_v20 = vmul.f32 1.442695, %v829_v19 }
 0x46e   : > { %v2632_v21 = vpop.eup %2096  ;;  %2102 = vpow2.f32 %v832_v20 }
 0x46f   : > { %v947_v22 = vpop.xlane.xlu1 %946  ;;  %v711_v24 = vsel %vm572_vm6, %v2632_v21, 0.0 }
 0x470   : > { %v951_v23 = vsub.f32 %v2576_v29, %v947_v22  ;;  %712 = vadd.xlane.f32.xlu1 %v711_v24 }
 0x471   : > { %v950_v25 = vpop.xlane.xlu0 %949 }
 0x472   : > { %v2637_v27 = vpop.eup %2098  ;;  %v953_v28 = vmul.f32 1.442695, %v951_v23  ;;  %v952_v30 = vsub.f32 %v2580_v32, %v950_v25 }
 0x473   : > { %v714_v26 = vsel %vm576_vm7, %v2637_v27, 0.0 }
 0x474   : > { %2104 = vpow2.f32 %v953_v28  ;;  %v955_v31 = vmul.f32 1.442695, %v952_v30  ;;  %715 = vadd.xlane.f32.xlu0 %v714_v26 }
 0x476   : > { %v2642_v33 = vpop.eup %2100  ;;  %2106 = vpow2.f32 %v955_v31 }
 0x477   : > { %v1070_v34 = vpop.xlane.xlu1 %1069  ;;  %v834_v29 = vsel %vm572_vm6, %v2642_v33, 0.0 }
 0x478   : > { %v2646_v36 = vpop.eup %2102  ;;  %v1074_v37 = vsub.f32 %v2584_v35, %v1070_v34  ;;  %835 = vadd.xlane.f32.xlu1 %v834_v29 }
 0x479   : > { %v1073_v39 = vpop.xlane.xlu0 %1072  ;;  %v837_v32 = vsel %vm576_vm7, %v2646_v36, 0.0 }
 0x47a   : > { %v1076_v40 = vmul.f32 1.442695, %v1074_v37  ;;  %v1075_v42 = vsub.f32 %v2588_v38, %v1073_v39  ;;  %838 = vadd.xlane.f32.xlu0 %v837_v32 }
 0x47c   : > { %2108 = vpow2.f32 %v1076_v40  ;;  %v1078_v43 = vmul.f32 1.442695, %v1075_v42 }
 0x47e   : > { %v2652_v46 = vpop.eup %2104  ;;  %2110 = vpow2.f32 %v1078_v43 }
 0x47f   : > { %v1193_v47 = vpop.xlane.xlu1 %1192  ;;  %v957_v49 = vsel %vm572_vm6, %v2652_v46, 0.0 }
 0x480   : > { %v2656_v50 = vpop.eup %2106  ;;  %v1197_v35 = vsub.f32 %v2592_v41, %v1193_v47  ;;  %958 = vadd.xlane.f32.xlu1 %v957_v49 }
 0x481   : > { %v1196_v52 = vpop.xlane.xlu0 %1195  ;;  %v960_v53 = vsel %vm576_vm7, %v2656_v50, 0.0 }
 0x482   : > { %v1199_v38 = vmul.f32 1.442695, %v1197_v35  ;;  %v1198_v55 = vsub.f32 %v2596_v44, %v1196_v52  ;;  %961 = vadd.xlane.f32.xlu0 %v960_v53 }
 0x484   : > { %2112 = vpow2.f32 %v1199_v38  ;;  %v1201_v56 = vmul.f32 1.442695, %v1198_v55 }
 0x486   : > { %v2662_v58 = vpop.eup %2108  ;;  %2114 = vpow2.f32 %v1201_v56 }
 0x487   : > { %v1316_v59 = vpop.xlane.xlu1 %1315  ;;  %v1080_v60 = vsel %vm572_vm6, %v2662_v58, 0.0 }
 0x488   : > { %v2666_v61 = vpop.eup %2110  ;;  %v1320_v41 = vsub.f32 %v2600_v48, %v1316_v59  ;;  %1081 = vadd.xlane.f32.xlu0 %v1080_v60 }
 0x489   : > { %v1319_v62 = vpop.xlane.xlu0 %1318  ;;  %v1083_v44 = vsel %vm576_vm7, %v2666_v61, 0.0 }
 0x48a   : > { %v1322_v63 = vmul.f32 1.442695, %v1320_v41  ;;  %v1321_v0 = vsub.f32 %v2604_v51, %v1319_v62 }
 0x48c   : > { %2116 = vpow2.f32 %v1322_v63  ;;  %v1324_v1 = vmul.f32 1.442695, %v1321_v0  ;;  %1084 = vadd.xlane.f32.xlu0 %v1083_v44 }
 0x48e   : > { %v2672_v4 = vpop.eup %2112  ;;  %2118 = vpow2.f32 %v1324_v1 }
 0x48f   : > { %v1439_v5 = vpop.xlane.xlu1 %1438  ;;  %v1203_v6 = vsel %vm572_vm6, %v2672_v4, 0.0 }
 0x490   : > { %v2676_v7 = vpop.eup %2114  ;;  %v1443_v48 = vsub.f32 %v2608_v54, %v1439_v5  ;;  %1204 = vadd.xlane.f32.xlu1 %v1203_v6 }
 0x491   : > { %v1206_v51 = vsel %vm576_vm7, %v2676_v7, 0.0  ;;  %v1442_v16 = vpop.xlane.xlu0 %1441 }
 0x492   : > { %v1445_v8 = vmul.f32 1.442695, %v1443_v48  ;;  %1207 = vadd.xlane.f32.xlu0 %v1206_v51  ;;  %v1444_v18 = vsub.f32 %v2612_v57, %v1442_v16 }
 0x493   : > { %v846_v57 = vpop.permute.xlu1 %845 }
 0x494   : > { %2120 = vpow2.f32 %v1445_v8  ;;  %v1447_v19 = vmul.f32 1.442695, %v1444_v18  ;;  %v851_v35 = vsel %vm602_vm5, %v846_v57, 0 }
 0x495   : > { %v723_v24 = vpop.permute.xlu0 %722 }
 0x496   : > { %v2681_v11 = vpop.eup %2116  ;;  %2122 = vpow2.f32 %v1447_v19  ;;  %v728_v39 = vsel %vm602_vm5, %v723_v24, 0 }
 0x497   : > { %v1326_v12 = vsel %vm572_vm6, %v2681_v11, 0.0 }
 0x498   : > { %v2685_v10 = vpop.eup %2118  ;;  %1327 = vadd.xlane.f32.xlu0 %v1326_v12 }
 0x499   : > { %v1329_v13 = vsel %vm576_vm7, %v2685_v10, 0.0 }
 0x49c   : > { %1330 = vadd.xlane.f32.xlu0 %v1329_v13 }
 0x49e   : > { %v2689_v54 = vpop.eup %2120 }
 0x49f   : > { %v1449_v15 = vsel %vm572_vm6, %v2689_v54, 0.0 }
 0x4a0   : > { %1450 = vadd.xlane.f32.xlu0 %v1449_v15  ;;  %v2698_v20 = vpop.eup %2122 }
 0x4a1   : > { %968 = vrot.lane.b32.xlu1 %v2499_v45, %s2279_s15  ;;  %v1452_v22 = vsel %vm576_vm7, %v2698_v20, 0.0 }
 0x4b6   : > { %1091 = vrot.lane.b32.xlu0 %v2499_v45, %s2280_s21  ;;  %s389_s21 = scalar_lea.vmem %s2801_s8, %s1796_s11 }
 0x4ba   : > { %1214 = vrot.lane.b32.xlu0 %v2499_v45, %s2281_s22 }
 0x4be   : > { %1337 = vrot.lane.b32.xlu0 %v2499_v45, %s2282_s23 }
 0x4c2   : > { %1460 = vrot.lane.b32.xlu0 %v2499_v45, %s2283_s18  ;;  %s393_s18 = scalar_lea.vmem %s2802_s9, %s1797_s17 }
 0x4c5   : > { %1453 = vadd.xlane.f32.xlu1 %v1452_v22 }
 0x4f5   : > { %v588_v23 = vpop.xlane.xlu1 %587 }
 0x4f6   : > { %2124 = vrcp.f32 %v588_v23 }
 0x4f7   : > { %v591_v25 = vpop.xlane.xlu0 %590 }
 0x4f8   : > { %2126 = vrcp.f32 %v591_v25 }
 0x4fd   : > { %v713_v28 = vpop.xlane.xlu1 %712 }
 0x4fe   : > { %2128 = vrcp.f32 %v713_v28 }
 0x500   : > { %v2125_v30 = vpop.eup %2124 }
 0x501   : > { %v716_v26 = vpop.xlane.xlu0 %715  ;;  %v594_v34 = vmul.f32 %v2125_v30, %v2622_v9 }
 0x502   : > { %v2127_v31 = vpop.eup %2126  ;;  %2130 = vrcp.f32 %v716_v26 }
 0x503   : > { %v595_v45 = vmul.f32 %v2127_v31, %v2626_v14 }
 0x505   : > { %v836_v29 = vpop.xlane.xlu1 %835  ;;  %v596_v37 = vpack.c.bf16 %v595_v45, %v594_v34 }
 0x506   : > { %2132 = vrcp.f32 %v836_v29 }
 0x507   : > { %1883 = vmatmul.mubr.msk.bf16.vlgmr.msra.gmra.mrb[4].mxu0 %vm572_vm6, %v596_v37  ;;  %v839_v32 = vpop.xlane.xlu0 %838 }
 0x508   : > { %1893 = vmatpush3.bf16.msra.mxu0 %v728_v39  ;;  %2134 = vrcp.f32 %v839_v32  ;;  %1894 = vmatprep.mubr.msk.bf16.mxu0 %vm2260_vm3, %v2259_v17  ;;  %v2129_v40 = vpop.eup %2128 }
 0x509   : > { %1904 = vmatprep.subr.bf16.mxu0 %v2259_v17  ;;  %v719_v9 = vmul.f32 %v2129_v40, %v2632_v21 }
 0x50c   : > { %v2131_v42 = vpop.eup %2130 }
 0x50d   : > { %v720_v14 = vmul.f32 %v2131_v42, %v2637_v27  ;;  %v959_v53 = vpop.xlane.xlu1 %958 }
 0x50f   : > { %v721_v43 = vpack.c.bf16 %v720_v14, %v719_v9  ;;  %v962_v47 = vpop.xlane.xlu0 %961 }
 0x510   : > { %v2133_v49 = vpop.eup %2132  ;;  %2136 = vrcp.f32 %v962_v47 }
 0x511   : > { %1895 = vmatmul.mubr.msk.bf16.vlgmr.msra.gmra.mrb[8].mxu0 %vm572_vm6, %v721_v43  ;;  %v842_v21 = vmul.f32 %v2133_v49, %v2642_v33  ;;  %2138 = vrcp.f32 %v959_v53 }
 0x512   : > { %v2135_v52 = vpop.eup %2134  ;;  %1905 = vmatpush3.bf16.msra.mxu0 %v851_v35  ;;  %1906 = vmatprep.mubr.msk.bf16.mxu0 %vm2260_vm3, %v2259_v17 }
 0x513   : > { %v843_v38 = vmul.f32 %v2135_v52, %v2646_v36  ;;  %1916 = vmatprep.subr.bf16.mxu0 %v2259_v17 }
 0x515   : > { %v1082_v27 = vpop.xlane.xlu0 %1081  ;;  %v844_v55 = vpack.c.bf16 %v843_v38, %v842_v21 }
 0x519   : > { %1907 = vmatmul.mubr.msk.bf16.vlgmr.msra.gmra.mrb[12].mxu0 %vm572_vm6, %v844_v55  ;;  %v1085_v59 = vpop.xlane.xlu0 %1084 }
 0x51a   : > { %1918 = vmatprep.mubr.msk.bf16.mxu0 %vm2260_vm3, %v2259_v17  ;;  %v2137_v56 = vpop.eup %2136  ;;  %2140 = vrcp.f32 %v1085_v59 }
 0x51b   : > { %v2139_v41 = vpop.eup %2138  ;;  %v966_v62 = vmul.f32 %v2137_v56, %v2656_v50  ;;  %2142 = vrcp.f32 %v1082_v27 }
 0x51c   : > { %v965_v0 = vmul.f32 %v2139_v41, %v2652_v46 }
 0x51d   : > { %v1205_v60 = vpop.xlane.xlu1 %1204 }
 0x51e   : > { %v967_v44 = vpack.c.bf16 %v966_v62, %v965_v0 }
 0x51f   : > { %v1208_v36 = vpop.xlane.xlu0 %1207 }
 0x520   : > { %2144 = vrcp.f32 %v1208_v36 }
 0x521   : > { %v969_v63 = vpop.permute.xlu1 %968  ;;  %2146 = vrcp.f32 %v1205_v60 }
 0x522   : > { %v974_v33 = vsel %vm602_vm5, %v969_v63, 0 }
 0x523   : > { %1917 = vmatpush3.bf16.msra.mxu0 %v974_v33  ;;  %v2086_v33 = vld [vmem:[%s2799_s6] sm:$0xff]  }
 0x524   : > { %1928 = vmatprep.subr.bf16.mxu0 %v2259_v17  ;;  %v2141_v50 = vpop.eup %2140  ;;  %1971 = vmatpush3.bf16.msra.mxu1 %v2086_v33 }
 0x525   : > { %v1328_v1 = vpop.xlane.xlu0 %1327  ;;  %v2143_v46 = vpop.eup %2142  ;;  %v1089_v48 = vmul.f32 %v2141_v50, %v2666_v61  ;;  %1972 = vmatprep.subr.bf16.mxu1 %v2259_v17 }
 0x526   : > { %1919 = vmatmul.mubr.msk.bf16.vlgmr.msra.gmra.mrb[16].mxu0 %vm572_vm6, %v967_v44  ;;  %v1088_v8 = vmul.f32 %v2143_v46, %v2662_v58 }
 0x527   : > { %1930 = vmatprep.mubr.msk.bf16.mxu0 %vm2260_vm3, %v2259_v17 }
 0x528   : > { %v1090_v13 = vpack.c.bf16 %v1089_v48, %v1088_v8 }
 0x529   : > { %v1331_v5 = vpop.xlane.xlu0 %1330 }
 0x52a   : > { %2148 = vrcp.f32 %v1331_v5  ;;  %v2145_v15 = vpop.eup %2144 }
 0x52b   : > { %2150 = vrcp.f32 %v1328_v1  ;;  %v2147_v19 = vpop.eup %2146  ;;  %v1212_v58 = vmul.f32 %v2145_v15, %v2676_v7 }
 0x52c   : > { %v1211_v61 = vmul.f32 %v2147_v19, %v2672_v4 }
 0x52d   : > { %v1451_v6 = vpop.xlane.xlu0 %1450 }
 0x52e   : > { %v1213_v57 = vpack.c.bf16 %v1212_v58, %v1211_v61  ;;  %2152 = vrcp.f32 %v1451_v6 }
 0x531   : > { %v1092_v51 = vpop.permute.xlu0 %1091 }
 0x532   : > { %v1097_v12 = vsel %vm602_vm5, %v1092_v51, 0  ;;  %v2087_v51 = vld [vmem:[%s2799_s6 + $0x8] sm:$0xff]  }
 0x533   : > { %1929 = vmatpush3.bf16.msra.mxu0 %v1097_v12  ;;  %1973 = vmatpush3.bf16.msra.mxu1 %v2087_v51 }
 0x534   : > { %1940 = vmatprep.subr.bf16.mxu0 %v2259_v17  ;;  %v2149_v24 = vpop.eup %2148 }
 0x535   : > { %v1215_v16 = vpop.permute.xlu0 %1214  ;;  %v2151_v25 = vpop.eup %2150  ;;  %v1335_v28 = vmul.f32 %v2149_v24, %v2685_v10 }
 0x536   : > { %v1220_v18 = vsel %vm602_vm5, %v1215_v16, 0  ;;  %1931 = vmatmul.mubr.msk.bf16.vlgmr.msra.gmra.mrb[20].mxu0 %vm572_vm6, %v1090_v13  ;;  %v1334_v7 = vmul.f32 %v2151_v25, %v2681_v11 }
 0x537   : > { %1941 = vmatpush3.bf16.msra.mxu0 %v1220_v18  ;;  %1942 = vmatprep.mubr.msk.bf16.mxu0 %vm2260_vm3, %v2259_v17 }
 0x538   : > { %1952 = vmatprep.subr.bf16.mxu0 %v2259_v17  ;;  %v1336_v4 = vpack.c.bf16 %v1335_v28, %v1334_v7  ;;  %v2153_v34 = vpop.eup %2152 }
 0x539   : > { %v1338_v22 = vpop.permute.xlu0 %1337  ;;  %v1457_v10 = vmul.f32 %v2153_v34, %v2689_v54 }
 0x53a   : > { %v1343_v23 = vsel %vm602_vm5, %v1338_v22, 0 }
 0x53d   : > { %v1461_v30 = vpop.permute.xlu0 %1460 }
 0x53e   : > { %1943 = vmatmul.mubr.msk.bf16.vlgmr.msra.gmra.mrb[24].mxu0 %vm572_vm6, %v1213_v57  ;;  %v1466_v26 = vsel %vm602_vm5, %v1461_v30, 0 }
 0x53f   : > { %1953 = vmatpush3.bf16.msra.mxu0 %v1343_v23  ;;  %1954 = vmatprep.mubr.msk.bf16.mxu0 %vm2260_vm3, %v2259_v17 }
 0x540   : > { %1964 = vmatprep.subr.bf16.mxu0 %v2259_v17 }
 0x546   : > { %1955 = vmatmul.mubr.msk.bf16.vlgmr.msra.gmra.mrb[28].mxu0 %vm572_vm6, %v1336_v4 }
 0x547   : > { %1965 = vmatpush3.bf16.msra.mxu0 %v1466_v26  ;;  %1966 = vmatprep.mubr.msk.bf16.mxu0 %vm2260_vm3, %v2259_v17 }
 0x552   : > { %v1454_v31 = vpop.xlane.xlu1 %1453 }
 0x553   : > { %2154 = vrcp.f32 %v1454_v31 }
 0x55d   : > { %v2155_v45 = vpop.eup %2154 }
 0x55e   : > { %v1458_v29 = vmul.f32 %v2155_v45, %v2698_v20 }
 0x560   : > { %v1459_v11 = vpack.c.bf16 %v1458_v29, %v1457_v10 }
 0x562   : > { %1967 = vmatmul.mubr.msk.bf16.vlgmr.msra.gmra.mrb[32].mxu0 %vm572_vm6, %v1459_v11 }
 0x5da   : > { %v2754_v37 = vpop.f32.mrb[4].mxu0 }
 0x5db   : > { %v1884_v39 = vpop.f32.mrb[5].mxu0 }
 0x5dc   : > { %v2756_v32 = vpop.f32.mrb[6].mxu0 }
 0x5dd   : > { %v1885_v40 = vpop.f32.mrb[7].mxu0 }
 0x5e4   : > { %v764_v42 = vpop.f32.mrb[8].mxu0 }
 0x5e5   : > { %v1896_v9 = vpop.f32.mrb[9].mxu0 }
 0x5e6   : > { %v767_v14 = vpop.f32.mrb[10].mxu0 }
 0x5e7   : > { %v2049_v43 = vpack.i.bf16 %v767_v14, %v764_v42  ;;  %v1897_v47 = vpop.f32.mrb[11].mxu0 }
 0x5e9   : > { %2050 = vrot.lane.b32.xlu1 %v2049_v43, %s2284_s24 }
 0x5ec   : > { %v887_v49 = vpop.f32.mrb[12].mxu0 }
 0x5ed   : > { %v1908_v54 = vpop.f32.mrb[13].mxu0 }
 0x5ee   : > { %v890_v35 = vpop.f32.mrb[14].mxu0 }
 0x5ef   : > { %v2054_v20 = vpack.i.bf16 %v890_v35, %v887_v49  ;;  %v1909_v52 = vpop.f32.mrb[15].mxu0 }
 0x5f1   : > { %2055 = vrot.lane.b32.xlu0 %v2054_v20, %s2285_s13 }
 0x5f9   : > { %v1010_v53 = vpop.f32.mrb[16].mxu0 }
 0x5fa   : > { %v1920_v38 = vpop.f32.mrb[17].mxu0 }
 0x5fb   : > { %v1013_v21 = vpop.f32.mrb[18].mxu0  ;;  %v1822_v38 = vld [vmem:[#allocation6] ss:$0 sm:$0xff] }
 0x5fc   : > { %v2059_v27 = vpack.i.bf16 %v1013_v21, %v1010_v53  ;;  %v1921_v55 = vpop.f32.mrb[19].mxu0 }
 0x5fe   : > { %2060 = vrot.lane.b32.xlu0 %v2059_v27, %s2286_s25 }
 0x609   : > { %v1133_v56 = vpop.f32.mrb[20].mxu0 }
 0x60a   : > { %v1932_v59 = vpop.f32.mrb[21].mxu0 }
 0x60b   : > { %v1136_v60 = vpop.f32.mrb[22].mxu0 }
 0x60c   : > { %v2064_v41 = vpack.i.bf16 %v1136_v60, %v1133_v56  ;;  %v1933_v62 = vpop.f32.mrb[23].mxu0 }
 0x60e   : > { %2065 = vrot.lane.b32.xlu0 %v2064_v41, %s2287_s26 }
 0x611   : > { %v1256_v36 = vpop.f32.mrb[24].mxu0 }
 0x612   : > { %v1944_v63 = vpop.f32.mrb[25].mxu0 }
 0x613   : > { %v1259_v0 = vpop.f32.mrb[26].mxu0 }
 0x614   : > { %v2069_v44 = vpack.i.bf16 %v1259_v0, %v1256_v36  ;;  %v1945_v1 = vpop.f32.mrb[27].mxu0 }
 0x616   : > { %2070 = vrot.lane.b32.xlu0 %v2069_v44, %s2288_s29 }
 0x619   : > { %v1379_v5 = vpop.f32.mrb[28].mxu0 }
 0x61a   : > { %v1956_v50 = vpop.f32.mrb[29].mxu0 }
 0x61b   : > { %v1382_v6 = vpop.f32.mrb[30].mxu0 }
 0x61c   : > { %v2074_v46 = vpack.i.bf16 %v1382_v6, %v1379_v5  ;;  %v1957_v48 = vpop.f32.mrb[31].mxu0 }
 0x61e   : > { %2075 = vrot.lane.b32.xlu0 %v2074_v46, %s2289_s12 }
 0x635   : > { %v1502_v8 = vpop.f32.mrb[32].mxu0 }
 0x636   : > { %v1968_v12 = vpop.f32.mrb[33].mxu0 }
 0x637   : > { %v1505_v13 = vpop.f32.mrb[34].mxu0 }
 0x638   : > { %v2079_v15 = vpack.i.bf16 %v1505_v13, %v1502_v8  ;;  %v1969_v16 = vpop.f32.mrb[35].mxu0 }
 0x63a   : > { %2080 = vrot.lane.b32.xlu1 %v2079_v15, %s2290_s19 }
 0x65b   : > { %v2051_v58 = vpop.permute.xlu1 %2050 }
 0x65c   : > { %v2053_v22 = vunpack.i.h.bf16 %v2051_v58  ;;  %v2052_v57 = vunpack.i.l.bf16 %v2051_v58 }
 0x65e   : > { %v1566_v26 = vsel %vm524_vm4, %v2756_v32, %v2053_v22  ;;  %v1565_v31 = vsel %vm524_vm4, %v2754_v37, %v2052_v57 }
 0x663   : > { %v2056_v17 = vpop.permute.xlu0 %2055 }
 0x664   : > { %v2058_v24 = vunpack.i.h.bf16 %v2056_v17  ;;  %v2057_v23 = vunpack.i.l.bf16 %v2056_v17 }
 0x666   : > { %v1569_v10 = vsel %vm1567_vm8, %v1566_v26, %v2058_v24  ;;  %v1568_v29 = vsel %vm1567_vm8, %v1565_v31, %v2057_v23 }
 0x670   : > { %v2061_v18 = vpop.permute.xlu0 %2060 }
 0x671   : > { %v2063_v25 = vunpack.i.h.bf16 %v2061_v18  ;;  %v2062_v28 = vunpack.i.l.bf16 %v2061_v18 }
 0x673   : > { %v1571_v40 = vsel %vm572_vm6, %v1569_v10, %v2063_v25  ;;  %v1570_v42 = vsel %vm572_vm6, %v1568_v29, %v2062_v28 }
 0x680   : > { %v2066_v19 = vpop.permute.xlu0 %2065 }
 0x681   : > { %v2068_v30 = vunpack.i.h.bf16 %v2066_v19  ;;  %v2067_v4 = vunpack.i.l.bf16 %v2066_v19 }
 0x683   : > { %v1574_v9 = vsel %vm1572_vm9, %v1571_v40, %v2068_v30  ;;  %v1573_v14 = vsel %vm1572_vm9, %v1570_v42, %v2067_v4 }
 0x688   : > { %v2071_v61 = vpop.permute.xlu0 %2070 }
 0x689   : > { %v2073_v34 = vunpack.i.h.bf16 %v2071_v61  ;;  %v2072_v45 = vunpack.i.l.bf16 %v2071_v61 }
 0x68b   : > { %v1577_v37 = vsel %vm1575_vm10, %v1574_v9, %v2073_v34  ;;  %v1576_v43 = vsel %vm1575_vm10, %v1573_v14, %v2072_v45 }
 0x690   : > { %v2076_v7 = vpop.permute.xlu0 %2075 }
 0x691   : > { %v2078_v11 = vunpack.i.h.bf16 %v2076_v7  ;;  %v2077_v39 = vunpack.i.l.bf16 %v2076_v7 }
 0x693   : > { %v1580_v54 = vsel %vm1578_vm11, %v1577_v37, %v2078_v11  ;;  %v1579_v35 = vsel %vm1578_vm11, %v1576_v43, %v2077_v39 }
 0x6ac   : > { %v2081_v32 = vpop.permute.xlu1 %2080 }
 0x6ad   : > { %v2083_v47 = vunpack.i.h.bf16 %v2081_v32  ;;  %v2082_v49 = vunpack.i.l.bf16 %v2081_v32 }
 0x6af   : > { %v1583_v20 = vsel %vm1581_vm12, %v1580_v54, %v2083_v47  ;;  %v1582_v52 = vsel %vm1581_vm12, %v1579_v35, %v2082_v49 }
 0x6b0   : > { %v1584_v53 = vpack.c.bf16 %v1583_v20, %v1582_v52 }
 0x6b2   : > { %1975 = vmatmul.mubr.msk.bf16.vlgmr.msra.gmra.mrb[32].mxu1 %vm404_vm1, %v1584_v53 }
 0x785   : > { %v1645_v21 = vpop.f32.mrb[32].mxu1 }
 0x786   : > { %v1646_v27 = vadd.f32 %v1822_v38, %v1645_v21  ;;  %v1976_v55 = vpop.f32.mrb[33].mxu1 }
 0x787   : > { %v1648_v56 = vpop.f32.mrb[34].mxu1 }
 0x788   : > { %v1652_v59 = vadd.f32 %v1646_v27, %v2469_v3  ;;  %v1649_v60 = vadd.f32 %v1822_v38, %v1648_v56  ;;  %v1977_v41 = vpop.f32.mrb[35].mxu1 }
 0x78a   : > { %1654 = vst.msk [vmem:[%s389_s21] sm:$0xf] %vm408_vm2, %v1652_v59  ;;  %v1653_v62 = vadd.f32 %v1649_v60, %v2466_v2 }
 0x78b   : > { %1656 = vst.msk [vmem:[%s393_s18 - $0x4] sm:$0xf0] %vm1655_vm13, %v1652_v59 }
 0x78c   : > { %1657 = vst.msk [vmem:[%s393_s18 + $0x4] sm:$0xf] %vm408_vm2, %v1653_v62 }
 0x78d PF: > { %s22_s30 = sadd.s32 1, %s2254_s30  }
 0x78e   : > { %p19_p5 = scmp.ge.s32.totalorder %s22_s30, 4  }
 0x790   :  { %21 = sbr.rel (!%p19_p5) target bundleno = 2 (0x2), region = 110 }
 0x797   :  { %1691 = vsyncpa [#allocation3], 1 }
 0x798   :  { %1693 = vsyncpa [#allocation3 + $0x1], 1 }
 0x799   :  { %1694 = vsyncpa [#allocation5], 1 }

// kernel: bridger_forward.52
= control target key start
LH: loop header
LB: loop body
LE: loop exit
PB: predicated region body
PF: predicated region fallthrough
CT: control target
= control target key end

     0   :  { %9 = vsyncpa [#allocation3], 0  ;;  %s156_s15 = smov [#allocation2]   ;;  %s220_s0 = inlined_call_operand.vmem [shape: f32[16,32], index: 0, kind: input, shape index: {}]   ;;  %s221_s1 = inlined_call_operand.vmem [shape: bf16[32,32], index: 1, kind: input, shape index: {}]   ;;  %s222_s2 = inlined_call_operand.hbm [shape: f32[1,32], index: 2, kind: input, shape index: {}]   ;;  %s223_s3 = inlined_call_operand.vmem [shape: f32[16,32], index: 3, kind: input, shape index: {}]   ;;  %s224_s4 = inlined_call_operand.vmem [shape: f32[16,32], index: 4, kind: output, shape index: {}]  }
   0x1   :  { %s20_s16 = sshll.u32 %s156_s15, 4  ;;  %s132_s19 = scalar_lea.hbm %s222_s2, 16  ;;  %s21_s16 = int_to_ptr.vmem [resolvable:$true] %s20_s16 }
   0x2   :  { %p133_p0 = scmp.ne.s32.totalorder %s222_s2, %s132_s19  ;;  %p136_p1 = scmp.lt.u32.totalorder %s132_s19, %s222_s2 }
   0x4   :  { %p138_p2 = pnand %p136_p1, %p133_p0 }
   0x6   :  { %141 = shalt.err (!%p138_p2)
}
   0x7   :  { %s142_s24 = scalar_lea.vmem %s21_s16, 16  ;;  %s146_s25 = scalar_lea.vmem %s21_s16, 32 }
   0x8   :  { %p143_p3 = scmp.ne.s32.totalorder %s21_s16, %s142_s24  ;;  %p147_p4 = scmp.lt.s32.totalorder %s21_s16, %s21_s16 }
   0x9   :  { %p148_p5 = scmp.lt.s32.totalorder %s146_s25, %s142_s24 }
   0xb   :  { %p149_p6 = por %p148_p5, %p147_p4 }
   0xd   :  { %p150_p7 = pnand %p149_p6, %p143_p3 }
   0xf   :  { %153 = shalt.err (!%p150_p7)
}
  0x10   :  { %23 = dma.hbm_to_vmem [thread:$0]  %s222_s2, 16, %s21_s16, [#allocation3]  }
  0x11   :  { %154 = dma.done.wait [#allocation3], 16  }
  0x12   :  { %155 = vsyncadd [#allocation3], 4294967280  ;;  %v157_v0 = vmov 0.0   ;;  %vm158_vm0 = vmmov 0   ;;  %v130_v1 = vld [vmem:[%s221_s1] sm:$0xff]   ;;  %v131_v2 = vld [vmem:[%s221_s1 + $0x8] sm:$0xff]  }
  0x13   :  { %119 = vmatprep.subr.bf16.mxu0 %v157_v0  ;;  %123 = vmatprep.mubr.msk.bf16.mxu0 %vm158_vm0, %v157_v0  ;;  %v30_v3 = vld [vmem:[%s220_s0] sm:$0xff]  ;;  %v31_v4 = vld [vmem:[%s220_s0 + $0x8] sm:$0xff]  ;;  %vm56_vm1 = vcmask 261120  }
  0x14   :  { %120 = vmatpush3.bf16.msra.mxu0 %v130_v1  ;;  %v36_v5 = vpack.c.bf16 %v31_v4, %v30_v3  ;;  %v112_v6 = vld [vmem:[#allocation2] ss:$0 sm:$0xff]  ;;  %v102_v12 = vld [vmem:[%s223_s3 + $0x8] sm:$0xff] }
  0x15   :  { %121 = vmatprep.subr.bf16.mxu0 %v157_v0  ;;  %v101_v8 = vld [vmem:[%s223_s3] sm:$0xff] }
  0x18   :  { %122 = vmatpush3.bf16.msra.mxu0 %v131_v2 }
  0x1b   :  { %124 = vmatmul.mubr.msk.bf16.vlgmr.msra.gmra.mrb[0].mxu0 %vm56_vm1, %v36_v5 }
  0xee   :  { %v94_v7 = vpop.f32.mrb[0].mxu0 }
  0xef   :  { %v95_v9 = vadd.f32 %v112_v6, %v94_v7  ;;  %v125_v10 = vpop.f32.mrb[1].mxu0 }
  0xf0   :  { %v97_v11 = vpop.f32.mrb[2].mxu0 }
  0xf1   :  { %v103_v13 = vadd.f32 %v101_v8, %v95_v9  ;;  %v98_v14 = vadd.f32 %v112_v6, %v97_v11  ;;  %v126_v15 = vpop.f32.mrb[3].mxu0 }
  0xf3   :  { %105 = vst.msk [vmem:[%s224_s4] sm:$0xff] %vm56_vm1, %v103_v13  ;;  %v104_v16 = vadd.f32 %v102_v12, %v98_v14 }
  0xf5   :  { %106 = vst.msk [vmem:[%s224_s4 + $0x8] sm:$0xff] %vm56_vm1, %v104_v16 }
  0xf6   :  { %111 = vsyncpa [#allocation3], 1 }

// kernel: bridger_forward.53
= control target key start
LH: loop header
LB: loop body
LE: loop exit
PB: predicated region body
PF: predicated region fallthrough
CT: control target
= control target key end

     0   :  { %s691_s18 = smov 0   ;;  %s693_s19 = smov 0   ;;  %s781_s0 = inlined_call_operand.vmem [shape: f32[16,32], index: 0, kind: input, shape index: {}]   ;;  %s782_s1 = inlined_call_operand.vmem [shape: bf16[12,32,32], index: 1, kind: input, shape index: {}]   ;;  %s783_s2 = inlined_call_operand.vmem [shape: f32[12,1,32], index: 2, kind: input, shape index: {}]   ;;  %s784_s3 = inlined_call_operand.vmem [shape: f32[12,1,32], index: 3, kind: input, shape index: {}]   ;;  %s785_s4 = inlined_call_operand.vmem [shape: f32[12,1,32], index: 4, kind: input, shape index: {}]   ;;  %s786_s5 = inlined_call_operand.vmem [shape: f32[16,32], index: 5, kind: output, shape index: {}]  }
   0x1   :  { %s695_s20 = smov 0  }
   0x2 LB: > { %s24_s21 = sadd.s32 1, %s653_s19  ;;  %p576_p0 = scmp.ge.s32.totalorder %s657_s20, 1  ;;  %s657_s20 = sphi %s695_s20, %s15_s20   ;;  %s653_s19 = sphi %s693_s19, %s788_s19   ;;  %s649_s18 = sphi %s691_s18, %s787_s18  }
   0x3   : > { %p25_p1 = scmp.ge.s32.totalorder %s24_s21, 4  ;;  %p250_p2 = scmp.lt.s32.totalorder %s657_s20, 5 }
   0x5   : > { %s790_s21 = smov (%p25_p1, %s24_s21), 0  ;;  %p251_p3 = pnand %p576_p0, %p250_p2 }
   0x6   : > { %s302_s22 = sadd.s32 (!%p251_p3), 8, %s649_s18  ;;  %p579_p5 = scmp.ne.s32.totalorder (!%p251_p3), %s649_s18, 0 }
   0x7   : > { %254 = sbr.rel (%p251_p3) target bundleno = 570 (0x23a), region = 40  ;;  %p303_p4 = scmp.lt.s32.totalorder (!%p251_p3), %s302_s22, 11 }
   0xe   : > { %s792_s22 = smov (!%p303_p4, %s302_s22), 11  ;;  %334 = sbr.rel (%p579_p5) target bundleno = 21 (0x15), region = 44 }
   0xf   : > { %s591_s23 = sshll.u32 %s792_s22, 4  ;;  %s312_s26 = scalar_lea.vmem %s783_s2, %s792_s22  ;;  %v335_v0 = vld [vmem:[%s781_s0] sm:$0xff] (!%p579_p5)  ;;  %vm337_vm0 = vcmask (!%p579_p5), 261120   ;;  %v336_v1 = vld [vmem:[%s781_s0 + $0x8] sm:$0xff] (!%p579_p5) }
  0x10   : > { %s722_s29 = scalar_lea.vmem %s782_s1, %s591_s23  ;;  %s317_s7 = scalar_lea.vmem %s784_s3, %s792_s22  ;;  %338 = vst.msk [vmem:[#allocation2] sm:$0xff] (!%p579_p5), %vm337_vm0, %v335_v0  ;;  %339 = vst.msk [vmem:[#allocation2 + $0x8] sm:$0xff] (!%p579_p5), %vm337_vm0, %v336_v1 }
  0x11   : > { %s322_s10 = scalar_lea.vmem %s785_s4, %s792_s22 }
  0x15 PF: > { %vm344_vm1 = vcmask 261120   ;;  %v629_v16 = vld [vmem:[%s722_s29] sm:$0xff]   ;;  %v659_v17 = vmov 0.0   ;;  %v630_v18 = vld [vmem:[%s722_s29 + $0x8] sm:$0xff]   ;;  %vm660_vm2 = vmmov 0   ;;  %p586_p6 = scmp.ne.s32.totalorder %s649_s18, 3 }
  0x16   : > { %595 = vmatprep.subr.bf16.mxu0 %v659_v17  ;;  %599 = vmatprep.mubr.msk.bf16.mxu0 %vm660_vm2, %v659_v17  ;;  %v580_v27 = vld [vmem:[%s317_s7] ss:$0 sm:$0xff] }
  0x17   : > { %v340_v2 = vld [vmem:[#allocation2] sm:$0xff]  ;;  %v341_v3 = vld [vmem:[#allocation2 + $0x8] sm:$0xff]  ;;  %596 = vmatpush3.bf16.msra.mxu0 %v629_v16 }
  0x18   : > { %v345_v4 = vsel %vm344_vm1, %v340_v2, 0.0  ;;  %v348_v5 = vsel %vm344_vm1, %v341_v3, 0.0  ;;  %597 = vmatprep.subr.bf16.mxu0 %v659_v17  ;;  %v581_v31 = vld [vmem:[%s322_s10] ss:$0 sm:$0xff] }
  0x19   : > { %346 = vadd.xlane.f32.xlu0 %v345_v4  ;;  %v582_v36 = vld [vmem:[%s312_s26] ss:$0 sm:$0xff] }
  0x1b   : > { %598 = vmatpush3.bf16.msra.mxu0 %v630_v18 }
  0x1d   : > { %349 = vadd.xlane.f32.xlu0 %v348_v5 }
  0xa6   : > { %v347_v6 = vpop.xlane.xlu0 %346 }
  0xa7   : > { %v352_v7 = vmul.f32 0.03125, %v347_v6 }
  0xa9   : > { %v354_v8 = vsub.f32 %v340_v2, %v352_v7 }
  0xaa   : > { %v350_v9 = vpop.xlane.xlu0 %349 }
  0xab   : > { %v353_v10 = vmul.f32 0.03125, %v350_v9  ;;  %v356_v11 = vmul.f32 %v354_v8, %v354_v8 }
  0xad   : > { %v355_v12 = vsub.f32 %v341_v3, %v353_v10  ;;  %v358_v13 = vsel %vm344_vm1, %v356_v11, 0.0 }
  0xae   : > { %359 = vadd.xlane.f32.xlu1 %v358_v13 }
  0xaf   : > { %v357_v14 = vmul.f32 %v355_v12, %v355_v12 }
  0xb1   : > { %v361_v15 = vsel %vm344_vm1, %v357_v14, 0.0 }
  0xb2   : > { %362 = vadd.xlane.f32.xlu1 %v361_v15 }
 0x13b   : > { %v360_v19 = vpop.xlane.xlu1 %359 }
 0x13c   : > { %v364_v20 = vmul.f32 0.03125, %v360_v19 }
 0x13e   : > { %v366_v21 = vadd.f32 1e-05, %v364_v20 }
 0x13f   : > { %v363_v22 = vpop.xlane.xlu1 %362 }
 0x140   : > { %631 = vrsqrt.f32 %v366_v21  ;;  %v365_v23 = vmul.f32 0.03125, %v363_v22 }
 0x142   : > { %v367_v24 = vadd.f32 1e-05, %v365_v23 }
 0x144   : > { %633 = vrsqrt.f32 %v367_v24 }
 0x14a   : > { %v632_v25 = vpop.eup %631 }
 0x14b   : > { %v370_v26 = vmul.f32 %v632_v25, %v354_v8 }
 0x14d   : > { %v378_v30 = vmul.f32 %v580_v27, %v370_v26 }
 0x14e   : > { %v634_v28 = vpop.eup %633 }
 0x14f   : > { %v371_v29 = vmul.f32 %v634_v28, %v355_v12  ;;  %v386_v33 = vadd.f32 %v581_v31, %v378_v30 }
 0x151   : > { %v379_v32 = vmul.f32 %v580_v27, %v371_v29 }
 0x153   : > { %v387_v34 = vadd.f32 %v581_v31, %v379_v32 }
 0x155   : > { %v388_v35 = vpack.c.bf16 %v387_v34, %v386_v33 }
 0x157   : > { %600 = vmatmul.mubr.msk.bf16.vlgmr.msra.gmra.mrb[0].mxu0 %vm344_vm1, %v388_v35 }
 0x22a   : > { %v449_v37 = vpop.f32.mrb[0].mxu0 }
 0x22b   : > { %v450_v38 = vadd.f32 %v582_v36, %v449_v37  ;;  %v601_v39 = vpop.f32.mrb[1].mxu0  ;;  %463 = sbr.rel (%p586_p6) target bundleno = 570 (0x23a), region = 48 }
 0x22c   : > { %v452_v40 = vpop.f32.mrb[2].mxu0 }
 0x22d   : > { %v456_v41 = vadd.f32 %v450_v38, %v340_v2  ;;  %v453_v42 = vadd.f32 %v582_v36, %v452_v40  ;;  %v602_v43 = vpop.f32.mrb[3].mxu0 }
 0x22f   : > { %458 = vst.msk [vmem:[#allocation2] sm:$0xff] %vm344_vm1, %v456_v41  ;;  %v457_v44 = vadd.f32 %v453_v42, %v341_v3 }
 0x231   : > { %459 = vst.msk [vmem:[#allocation2 + $0x8] sm:$0xff] %vm344_vm1, %v457_v44 }
 0x236   : > { %v464_v45 = vld [vmem:[#allocation2] sm:$0xff] }
 0x237   : > { %466 = vst.msk [vmem:[%s786_s5] sm:$0xff] %vm344_vm1, %v464_v45 }
 0x238   : > { %v465_v46 = vld [vmem:[#allocation2 + $0x8] sm:$0xff] }
 0x239   : > { %467 = vst.msk [vmem:[%s786_s5 + $0x8] sm:$0xff] %vm344_vm1, %v465_v46 }
 0x23a PF: > { %s15_s20 = sadd.s32 1, %s657_s20   ;;  %s787_s18 = smov %s653_s19 }
 0x23b   : > { %p12_p7 = scmp.ge.s32.totalorder %s15_s20, 6   ;;  %s788_s19 = smov %s790_s21 }
 0x23d   :  { %14 = sbr.rel (!%p12_p7) target bundleno = 2 (0x2), region = 90 }

// kernel: bridger_forward.64
= control target key start
LH: loop header
LB: loop body
LE: loop exit
PB: predicated region body
PF: predicated region fallthrough
CT: control target
= control target key end

     0   :  { %8 = vsyncpa [#allocation3], 0  ;;  %s214_s0 = inlined_call_operand.vmem [shape: f32[16,32], index: 0, kind: input, shape index: {}]   ;;  %s215_s1 = inlined_call_operand.hbm [shape: f32[1,32], index: 1, kind: input, shape index: {}]   ;;  %s216_s2 = inlined_call_operand.hbm [shape: f32[1,32], index: 2, kind: input, shape index: {}]   ;;  %s217_s3 = inlined_call_operand.vmem [shape: f32[16,32], index: 3, kind: output, shape index: {}]  }
   0x1   :  { %9 = vsyncpa [#allocation5], 0  ;;  %s150_s12 = smov [#allocation2]   ;;  %s151_s14 = smov [#allocation4]  }
   0x2   :  { %s18_s13 = sshll.u32 %s150_s12, 4  ;;  %s28_s15 = sshll.u32 %s151_s14, 4  ;;  %s19_s13 = int_to_ptr.vmem [resolvable:$true] %s18_s13  ;;  %s29_s15 = int_to_ptr.vmem [resolvable:$true] %s28_s15 }
   0x3   :  { %s102_s18 = scalar_lea.hbm %s215_s1, 16 }
   0x4   :  { %p103_p0 = scmp.ne.s32.totalorder %s215_s1, %s102_s18  ;;  %p106_p1 = scmp.lt.u32.totalorder %s102_s18, %s215_s1 }
   0x6   :  { %p108_p2 = pnand %p106_p1, %p103_p0 }
   0x8   :  { %111 = shalt.err (!%p108_p2)
}
   0x9   :  { %s112_s23 = scalar_lea.vmem %s19_s13, 16  ;;  %s116_s24 = scalar_lea.vmem %s19_s13, 32 }
   0xa   :  { %p113_p3 = scmp.ne.s32.totalorder %s19_s13, %s112_s23  ;;  %p117_p4 = scmp.lt.s32.totalorder %s19_s13, %s19_s13 }
   0xb   :  { %p118_p5 = scmp.lt.s32.totalorder %s116_s24, %s112_s23 }
   0xd   :  { %p119_p6 = por %p118_p5, %p117_p4 }
   0xf   :  { %p120_p7 = pnand %p119_p6, %p113_p3 }
  0x11   :  { %123 = shalt.err (!%p120_p7)
}
  0x12   :  { %21 = dma.hbm_to_vmem [thread:$0]  %s215_s1, 16, %s19_s13, [#allocation3]  }
  0x13   :  { %s124_s29 = scalar_lea.hbm %s216_s2, 16 }
  0x14   :  { %p125_p8 = scmp.ne.s32.totalorder %s216_s2, %s124_s29  ;;  %p128_p9 = scmp.lt.u32.totalorder %s124_s29, %s216_s2 }
  0x16   :  { %p130_p10 = pnand %p128_p9, %p125_p8 }
  0x18   :  { %133 = shalt.err (!%p130_p10)
}
  0x19   :  { %s134_s7 = scalar_lea.vmem %s29_s15, 16  ;;  %s138_s8 = scalar_lea.vmem %s29_s15, 32 }
  0x1a   :  { %p135_p11 = scmp.ne.s32.totalorder %s29_s15, %s134_s7  ;;  %p139_p12 = scmp.lt.s32.totalorder %s29_s15, %s29_s15 }
  0x1b   :  { %p140_p13 = scmp.lt.s32.totalorder %s138_s8, %s134_s7 }
  0x1d   :  { %p141_p0 = por %p140_p13, %p139_p12 }
  0x1f   :  { %p142_p1 = pnand %p141_p0, %p135_p11 }
  0x21   :  { %145 = shalt.err (!%p142_p1)
}
  0x22   :  { %31 = dma.hbm_to_vmem [thread:$0]  %s216_s2, 16, %s29_s15, [#allocation5]  }
  0x23   :  { %146 = dma.done.wait [#allocation3], 16  }
  0x24   :  { %147 = vsyncadd [#allocation3], 4294967280 }
  0x25   :  { %148 = dma.done.wait [#allocation5], 16  }
  0x26   :  { %149 = vsyncadd [#allocation5], 4294967280  ;;  %vm42_vm0 = vcmask 261120   ;;  %v38_v0 = vld [vmem:[%s214_s0] sm:$0xff]  ;;  %v39_v1 = vld [vmem:[%s214_s0 + $0x8] sm:$0xff] }
  0x27   :  { %v43_v2 = vsel %vm42_vm0, %v38_v0, 0.0  ;;  %v46_v3 = vsel %vm42_vm0, %v39_v1, 0.0  ;;  %v94_v21 = vld [vmem:[#allocation2] ss:$0 sm:$0xff]  ;;  %v95_v23 = vld [vmem:[#allocation4] ss:$0 sm:$0xff] }
  0x28   :  { %44 = vadd.xlane.f32.xlu0 %v43_v2 }
  0x2c   :  { %47 = vadd.xlane.f32.xlu0 %v46_v3 }
  0xb5   :  { %v45_v4 = vpop.xlane.xlu0 %44 }
  0xb6   :  { %v50_v5 = vmul.f32 0.03125, %v45_v4 }
  0xb8   :  { %v52_v6 = vsub.f32 %v38_v0, %v50_v5 }
  0xb9   :  { %v48_v7 = vpop.xlane.xlu0 %47 }
  0xba   :  { %v51_v8 = vmul.f32 0.03125, %v48_v7  ;;  %v54_v9 = vmul.f32 %v52_v6, %v52_v6 }
  0xbc   :  { %v53_v10 = vsub.f32 %v39_v1, %v51_v8  ;;  %v56_v11 = vsel %vm42_vm0, %v54_v9, 0.0 }
  0xbd   :  { %57 = vadd.xlane.f32.xlu1 %v56_v11 }
  0xbe   :  { %v55_v12 = vmul.f32 %v53_v10, %v53_v10 }
  0xc0   :  { %v59_v13 = vsel %vm42_vm0, %v55_v12, 0.0 }
  0xc1   :  { %60 = vadd.xlane.f32.xlu1 %v59_v13 }
 0x14a   :  { %v58_v14 = vpop.xlane.xlu1 %57 }
 0x14b   :  { %v62_v15 = vmul.f32 0.03125, %v58_v14 }
 0x14d   :  { %v64_v16 = vadd.f32 1e-05, %v62_v15 }
 0x14e   :  { %v61_v17 = vpop.xlane.xlu1 %60 }
 0x14f   :  { %98 = vrsqrt.f32 %v64_v16  ;;  %v63_v18 = vmul.f32 0.03125, %v61_v17 }
 0x151   :  { %v65_v19 = vadd.f32 1e-05, %v63_v18 }
 0x153   :  { %100 = vrsqrt.f32 %v65_v19 }
 0x159   :  { %v99_v20 = vpop.eup %98 }
 0x15a   :  { %v68_v22 = vmul.f32 %v99_v20, %v52_v6 }
 0x15c   :  { %v76_v24 = vmul.f32 %v94_v21, %v68_v22 }
 0x15d   :  { %v101_v25 = vpop.eup %100 }
 0x15e   :  { %v84_v26 = vadd.f32 %v95_v23, %v76_v24  ;;  %v69_v27 = vmul.f32 %v101_v25, %v53_v10 }
 0x160   :  { %86 = vst.msk [vmem:[%s217_s3] sm:$0xff] %vm42_vm0, %v84_v26  ;;  %v77_v28 = vmul.f32 %v94_v21, %v69_v27 }
 0x162   :  { %v85_v29 = vadd.f32 %v95_v23, %v77_v28 }
 0x164   :  { %87 = vst.msk [vmem:[%s217_s3 + $0x8] sm:$0xff] %vm42_vm0, %v85_v29 }
 0x165   :  { %92 = vsyncpa [#allocation3], 1 }
 0x166   :  { %93 = vsyncpa [#allocation5], 1 }

// kernel: bridger_forward.65
= control target key start
LH: loop header
LB: loop body
LE: loop exit
PB: predicated region body
PF: predicated region fallthrough
CT: control target
= control target key end

     0   :  { %v97_v0 = vmov 0.0   ;;  %vm98_vm0 = vmmov 0   ;;  %vm30_vm1 = vcmask 261120   ;;  %s126_s1 = inlined_call_operand.vmem [shape: bf16[32,32], index: 1, kind: input, shape index: {}]   ;;  %s127_s0 = inlined_call_operand.vmem [shape: f32[8,32], index: 0, kind: input, shape index: {}]   ;;  %s128_s2 = inlined_call_operand.vmem [shape: f32[8,32], index: 2, kind: output, shape index: {}]  }
   0x1   :  { %85 = vmatprep.subr.bf16.mxu0 %v97_v0  ;;  %v95_v1 = vld [vmem:[%s126_s1] sm:$0xff]   ;;  %89 = vmatprep.mubr.msk.bf16.mxu0 %vm98_vm0, %v97_v0  ;;  %v96_v2 = vld [vmem:[%s126_s1 + $0x8] sm:$0xff]  }
   0x2   :  { %86 = vmatpush3.bf16.msra.mxu0 %v95_v1  ;;  %v12_v3 = vld [vmem:[%s127_s0] sm:$0xff] }
   0x3   :  { %87 = vmatprep.subr.bf16.mxu0 %v97_v0  ;;  %v17_v4 = vpack.c.bf16 %v12_v3, %v12_v3 }
   0x6   :  { %88 = vmatpush3.bf16.msra.mxu0 %v96_v2 }
   0x9   :  { %90 = vmatmul.mubr.msk.bf16.vlgmr.msra.gmra.mrb[0].mxu0 %vm30_vm1, %v17_v4 }
  0xdc   :  { %v68_v5 = vpop.f32.mrb[0].mxu0 }
  0xdd   :  { %74 = vst.msk [vmem:[%s128_s2] sm:$0xff] %vm30_vm1, %v68_v5  ;;  %v91_v6 = vpop.f32.mrb[1].mxu0 }
  0xde   :  { %v71_v7 = vpop.f32.mrb[2].mxu0 }
  0xdf   :  { %v92_v8 = vpop.f32.mrb[3].mxu0 }

// kernel: bridger_forward.58
= control target key start
LH: loop header
LB: loop body
LE: loop exit
PB: predicated region body
PF: predicated region fallthrough
CT: control target
= control target key end

     0   :  { %15 = vsyncpa [#allocation3], 0  ;;  %s2888_s0 = inlined_call_operand.vmem [shape: f32[2,4,32], index: 0, kind: input, shape index: {}]   ;;  %s2889_s1 = inlined_call_operand.vmem [shape: f32[2,8,32], index: 1, kind: input, shape index: {}]   ;;  %s2890_s2 = inlined_call_operand.hbm [shape: f32[1,32], index: 2, kind: input, shape index: {}]   ;;  %s2891_s3 = inlined_call_operand.hbm [shape: f32[1,32], index: 3, kind: input, shape index: {}]   ;;  %s2892_s4 = inlined_call_operand.vmem [shape: bf16[32,96], index: 4, kind: input, shape index: {}]   ;;  %s2893_s5 = inlined_call_operand.hbm [shape: f32[1,96], index: 5, kind: input, shape index: {}]   ;;  %s2894_s6 = inlined_call_operand.vmem [shape: bf16[32,32], index: 6, kind: input, shape index: {}]   ;;  %s2895_s7 = inlined_call_operand.hbm [shape: f32[1,32], index: 7, kind: input, shape index: {}]   ;;  %s2896_s8 = inlined_call_operand.vmem [shape: f32[2,4,32], index: 8, kind: output, shape index: {0}]   ;;  %s2897_s9 = inlined_call_operand.vmem [shape: f32[2,8,32], index: 9, kind: output, shape index: {1}]  }
   0x1   :  { %16 = vsyncpa [#allocation5], 0 }
   0x2   :  { %17 = vsyncpa [#allocation8], 0  ;;  %s2409_s30 = smov 0  }
   0x3 LB: > { %s2415_s10 = sadd.s32 4294967295, %s2321_s30   ;;  %p1810_p0 = scmp.ge.s32.totalorder %s2321_s30, 1  ;;  %s2321_s30 = sphi %s2409_s30, %s23_s30  }
   0x4   : > { %p258_p1 = scmp.lt.s32.totalorder %s2321_s30, 3  ;;  %p2898_p2 = scmp.eq.s32.totalorder %s2415_s10, 0 }
   0x5   : > { %s2323_s11 = smov [#allocation4]   ;;  %s2324_s14 = smov [#allocation2]  }
   0x6   : > { %s282_s12 = sshll.u32 %s2323_s11, 4  ;;  %p2420_p3 = pnand %p1810_p0, %p258_p1  ;;  %s283_s12 = int_to_ptr.vmem [resolvable:$true] %s282_s12 }
   0x7   : > { %s271_s15 = sshll.u32 %s2324_s14, 4  ;;  %s2325_s16 = smov [#allocation6]   ;;  %s2432_s15 = int_to_ptr.vmem [resolvable:$true] %s271_s15 }
   0x8   : > { %s2900_s13 = scalar_select %p2420_p3, 1, 0 }
   0x9   : > { %p2019_p4 = pneg %p2420_p3  ;;  %s296_s17 = sshll.u32 %s2325_s16, 4  ;;  %s2434_s17 = int_to_ptr.vmem [resolvable:$true] %s296_s17 }
   0xa   : > { %s2326_s19 = smov [#allocation7]   ;;  %s2191_s23 = scalar_lea.hbm %s2891_s3, 16 }
   0xb   : > { %p2428_p5 = pnand %p2898_p2, %p2019_p4  ;;  %s310_s20 = sshll.u32 %s2326_s19, 4  ;;  %s2436_s20 = int_to_ptr.vmem [resolvable:$true] %s310_s20 }
   0xc   : > { %p2192_p6 = scmp.ne.s32.totalorder %s2891_s3, %s2191_s23  ;;  %p2198_p10 = scmp.lt.u32.totalorder %s2191_s23, %s2891_s3 }
   0xd   : > { %p2446_p7 = pneg %p2428_p5 }
   0xf   : > { %p2194_p8 = pnand %p2446_p7, %p2192_p6 }
  0x11   : > { %p2195_p9 = pneg %p2194_p8 }
  0x13   : > { %p2200_p11 = pnand %p2198_p10, %p2195_p9 }
  0x15   : > { %2203 = shalt.err (!%p2200_p11)
}
  0x16   : > { %s2204_s29 = scalar_lea.vmem %s283_s12, 16  ;;  %s2211_s11 = scalar_lea.vmem %s283_s12, 32 }
  0x17   : > { %p2205_p12 = scmp.ne.s32.totalorder %s283_s12, %s2204_s29  ;;  %p2212_p1 = scmp.lt.s32.totalorder %s283_s12, %s283_s12 }
  0x18   : > { %p2213_p4 = scmp.lt.s32.totalorder %s2211_s11, %s2204_s29 }
  0x19   : > { %p2207_p13 = pnand %p2205_p12, %p2446_p7 }
  0x1a   : > { %p2214_p2 = por %p2213_p4, %p2212_p1 }
  0x1b   : > { %p2208_p0 = pneg %p2207_p13 }
  0x1d   : > { %p2215_p3 = pnand %p2214_p2, %p2208_p0 }
  0x1f   : > { %2218 = shalt.err (!%p2215_p3)
}
  0x20   : > { %2025 = dma.hbm_to_vmem [thread:$0]  (!%p2428_p5), %s2891_s3, 16, %s283_s12, [#allocation5]  }
  0x21   : > { %s2219_s22 = scalar_lea.hbm %s2890_s2, 16 }
  0x22   : > { %p2220_p6 = scmp.ne.s32.totalorder %s2890_s2, %s2219_s22  ;;  %p2226_p2 = scmp.lt.u32.totalorder %s2219_s22, %s2890_s2 }
  0x24   : > { %p2222_p8 = pnand %p2220_p6, %p2446_p7 }
  0x26   : > { %p2223_p9 = pneg %p2222_p8 }
  0x28   : > { %p2228_p3 = pnand %p2226_p2, %p2223_p9 }
  0x2a   : > { %2231 = shalt.err (!%p2228_p3)
}
  0x2b   : > { %s2232_s12 = scalar_lea.vmem %s2432_s15, 16  ;;  %s2239_s28 = scalar_lea.vmem %s2432_s15, 32 }
  0x2c   : > { %p2233_p10 = scmp.ne.s32.totalorder %s2432_s15, %s2232_s12  ;;  %p2240_p13 = scmp.lt.s32.totalorder %s2432_s15, %s2432_s15 }
  0x2d   : > { %p2241_p0 = scmp.lt.s32.totalorder %s2239_s28, %s2232_s12 }
  0x2e   : > { %p2235_p11 = pnand %p2233_p10, %p2446_p7 }
  0x2f   : > { %p2242_p1 = por %p2241_p0, %p2240_p13 }
  0x30   : > { %p2236_p12 = pneg %p2235_p11 }
  0x32   : > { %p2243_p4 = pnand %p2242_p1, %p2236_p12 }
  0x34   : > { %2246 = shalt.err (!%p2243_p4)
}
  0x35   : > { %2022 = dma.hbm_to_vmem [thread:$0]  (!%p2428_p5), %s2890_s2, 16, %s2432_s15, [#allocation3]  }
  0x36   : > { %s2247_s19 = scalar_lea.hbm %s2893_s5, 16 }
  0x37   : > { %p2248_p6 = scmp.ne.s32.totalorder %s2893_s5, %s2247_s19  ;;  %p2254_p2 = scmp.lt.u32.totalorder %s2247_s19, %s2893_s5 }
  0x39   : > { %p2250_p8 = pnand %p2248_p6, %p2446_p7 }
  0x3b   : > { %p2251_p9 = pneg %p2250_p8 }
  0x3d   : > { %p2256_p3 = pnand %p2254_p2, %p2251_p9 }
  0x3f   : > { %2259 = shalt.err (!%p2256_p3)
}
  0x40   : > { %s2260_s15 = scalar_lea.vmem %s2434_s17, 16  ;;  %s2267_s25 = scalar_lea.vmem %s2434_s17, 32 }
  0x41   : > { %p2261_p10 = scmp.ne.s32.totalorder %s2434_s17, %s2260_s15  ;;  %p2268_p13 = scmp.lt.s32.totalorder %s2434_s17, %s2434_s17 }
  0x42   : > { %p2269_p0 = scmp.lt.s32.totalorder %s2267_s25, %s2260_s15 }
  0x43   : > { %p2263_p11 = pnand %p2261_p10, %p2446_p7 }
  0x44   : > { %p2270_p1 = por %p2269_p0, %p2268_p13 }
  0x45   : > { %p2264_p12 = pneg %p2263_p11 }
  0x47   : > { %p2271_p4 = pnand %p2270_p1, %p2264_p12 }
  0x49   : > { %2274 = shalt.err (!%p2271_p4)
}
  0x4a   : > { %2028 = dma.hbm_to_vmem [thread:$0]  (!%p2428_p5), %s2893_s5, 16, %s2434_s17, [#allocation5]  }
  0x4b   : > { %s2275_s11 = scalar_lea.hbm %s2895_s7, 16 }
  0x4c   : > { %p2276_p6 = scmp.ne.s32.totalorder %s2895_s7, %s2275_s11  ;;  %p2282_p2 = scmp.lt.u32.totalorder %s2275_s11, %s2895_s7 }
  0x4e   : > { %p2278_p8 = pnand %p2276_p6, %p2446_p7 }
  0x50   : > { %p2279_p9 = pneg %p2278_p8 }
  0x52   : > { %p2284_p3 = pnand %p2282_p2, %p2279_p9 }
  0x54   : > { %2287 = shalt.err (!%p2284_p3)
}
  0x55   : > { %s2288_s17 = scalar_lea.vmem %s2436_s20, 16  ;;  %s2295_s22 = scalar_lea.vmem %s2436_s20, 32 }
  0x56   : > { %p2289_p10 = scmp.ne.s32.totalorder %s2436_s20, %s2288_s17  ;;  %p2296_p13 = scmp.lt.s32.totalorder %s2436_s20, %s2436_s20 }
  0x57   : > { %p2297_p0 = scmp.lt.s32.totalorder %s2295_s22, %s2288_s17 }
  0x58   : > { %p2291_p11 = pnand %p2289_p10, %p2446_p7 }
  0x59   : > { %p2298_p1 = por %p2297_p0, %p2296_p13 }
  0x5a   : > { %p2292_p12 = pneg %p2291_p11 }
  0x5c   : > { %p2299_p4 = pnand %p2298_p1, %p2292_p12 }
  0x5e   : > { %2302 = shalt.err (!%p2299_p4)
}
  0x5f   : > { %2031 = dma.hbm_to_vmem [thread:$0]  (!%p2428_p5), %s2895_s7, 16, %s2436_s20, [#allocation8]  }
  0x60   : > { %p2903_p6 = scmp.ne.s32.totalorder %s2900_s13, 0 }
  0x61   : > { %p2904_p7 = scmp.eq.s32.totalorder (!%p2903_p6), %s2415_s10, 0 }
  0x62   : > { %337 = sbr.rel (%p2903_p6) target bundleno = 1959 (0x7a7), region = 52 }
  0x69   : > { %2308 = dma.done.wait (%p2904_p7), [#allocation3], 16   ;;  %p2905_p8 = pmov %p2904_p7 }
  0x6a   : > { %p2906_p9 = pmov %p2904_p7 }
  0x6b   : > { %2310 = vsyncadd (%p2905_p8), [#allocation3], 4294967280 }
  0x6c   : > { %2312 = dma.done.wait (%p2906_p9), [#allocation5], 32   ;;  %p2907_p2 = pmov %p2904_p7 }
  0x6e   : > { %2314 = vsyncadd (%p2907_p2), [#allocation5], 4294967264  ;;  %p2908_p3 = pmov %p2907_p2 }
  0x6f   : > { %p2909_p5 = pmov %p2907_p2 }
  0x70   : > { %2316 = dma.done.wait (%p2908_p3), [#allocation8], 16  }
  0x71   : > { %2318 = vsyncadd (%p2909_p5), [#allocation8], 4294967280  ;;  %p391_p10 = scmp.lt.s32.totalorder %s2415_s10, 1  ;;  %vm413_vm0 = vcmask 1043456   ;;  %vm417_vm1 = vcmask 261120   ;;  %vm421_vm2 = vcmask 257024  }
  0x72   : > { %v2119_v16 = vld [vmem:[%s2892_s4] sm:$0xff]   ;;  %v2327_v17 = vmov 0.0   ;;  %v2120_v18 = vld [vmem:[%s2892_s4 + $0x8] sm:$0xff]   ;;  %vm2328_vm3 = vmmov 0   ;;  %s2329_s16 = smov 92   ;;  %s2330_s19 = smov 96  }
  0x73   : > { %s2911_s10 = smov (!%p391_p10, %s2415_s10), 1  ;;  %1891 = vmatprep.subr.bf16.mxu0 %v2327_v17  ;;  %1899 = vmatprep.subr.bf16.mxu1 %v2327_v17  ;;  %v1825_v27 = vld [vmem:[#allocation2] ss:$0 sm:$0xff]  ;;  %v1826_v31 = vld [vmem:[#allocation4] ss:$0 sm:$0xff]  ;;  %s2331_s21 = smov 120  }
  0x74   : > { %s1821_s13 = sshll.u32 %s2911_s10, 2  ;;  %s1822_s18 = sshll.u32 %s2911_s10, 3  ;;  %1892 = vmatpush3.bf16.msra.mxu0 %v2119_v16  ;;  %1895 = vmatprep.mubr.msk.bf16.mxu0 %vm2328_vm3, %v2327_v17  ;;  %v1827_v36 = vld [vmem:[#allocation6] ss:$0 sm:$0xff]  ;;  %vm537_vm4 = vcmask 31744   ;;  %vm615_vm5 = vcmask 1045504  }
  0x75   : > { %s394_s15 = scalar_lea.vmem %s2888_s0, %s1821_s13  ;;  %s398_s12 = scalar_lea.vmem %s2889_s1, %s1822_s18  ;;  %1893 = vmatprep.subr.bf16.mxu0 %v2327_v17  ;;  %1901 = vmatprep.mubr.msk.bf16.mxu1 %vm2328_vm3, %v2327_v17  ;;  %vm585_vm6 = vcmask 97280   ;;  %vm589_vm7 = vcmask 93184   ;;  %vm1580_vm8 = vcmask 64512   ;;  %vm1585_vm9 = vcmask 130048  }
  0x76   : > { %v408_v0 = vld [vmem:[%s394_s15] sm:$0xf]  ;;  %s2332_s17 = smov 124   ;;  %s2333_s22 = smov 116   ;;  %vm1588_vm10 = vcmask 162816   ;;  %vm1591_vm11 = vcmask 195584  }
  0x77   : > { %v409_v1 = vld [vmem:[%s398_s12] sm:$0xff]  ;;  %s2334_s23 = smov 88   ;;  %s2335_s24 = smov 112   ;;  %vm1594_vm12 = vcmask 228352   ;;  %vm1668_vm13 = vcmask 261124  }
  0x78   : > { %v2564_v2 = vrot.slane %v409_v1, 4  ;;  %1894 = vmatpush3.bf16.msra.mxu0 %v2120_v18  ;;  %s2336_s20 = smov 84   ;;  %s2337_s26 = smov 108  }
  0x79   : > { %1905 = vmatprep.subr.bf16.mxu0 %v2327_v17  ;;  %s2338_s15 = smov 80   ;;  %s2339_s25 = smov 104  }
  0x7a   : > { %v2567_v3 = vsel %vm413_vm0, %v408_v0, %v2564_v2  ;;  %v422_v5 = vsel %vm421_vm2, %v2564_v2, 0.0  ;;  %s2340_s27 = smov 76   ;;  %s2341_s12 = smov 100  }
  0x7b   : > { %v418_v4 = vsel %vm417_vm1, %v2567_v3, 0.0  ;;  %s2342_s28 = smov 72   ;;  %s2343_s29 = smov 68  }
  0x7c   : > { %419 = vadd.xlane.f32.xlu0 %v418_v4  ;;  %s2344_s11 = smov 64   ;;  %s2345_s14 = smov 56  }
  0x80   : > { %423 = vadd.xlane.f32.xlu0 %v422_v5 }
 0x109   : > { %v420_v6 = vpop.xlane.xlu0 %419 }
 0x10a   : > { %v426_v7 = vmul.f32 0.03125, %v420_v6 }
 0x10c   : > { %v428_v8 = vsub.f32 %v2567_v3, %v426_v7 }
 0x10d   : > { %v424_v9 = vpop.xlane.xlu0 %423 }
 0x10e   : > { %v427_v10 = vmul.f32 0.03125, %v424_v9  ;;  %v430_v11 = vmul.f32 %v428_v8, %v428_v8 }
 0x110   : > { %v429_v12 = vsub.f32 %v2564_v2, %v427_v10  ;;  %v432_v13 = vsel %vm417_vm1, %v430_v11, 0.0 }
 0x111   : > { %433 = vadd.xlane.f32.xlu1 %v432_v13 }
 0x112   : > { %v431_v14 = vmul.f32 %v429_v12, %v429_v12 }
 0x114   : > { %v435_v15 = vsel %vm421_vm2, %v431_v14, 0.0 }
 0x115   : > { %436 = vadd.xlane.f32.xlu1 %v435_v15 }
 0x19e   : > { %v434_v19 = vpop.xlane.xlu1 %433 }
 0x19f   : > { %v438_v20 = vmul.f32 0.03125, %v434_v19 }
 0x1a1   : > { %v440_v21 = vadd.f32 1e-05, %v438_v20 }
 0x1a2   : > { %v437_v22 = vpop.xlane.xlu1 %436 }
 0x1a3   : > { %2123 = vrsqrt.f32 %v440_v21  ;;  %v439_v23 = vmul.f32 0.03125, %v437_v22 }
 0x1a5   : > { %v441_v24 = vadd.f32 1e-05, %v439_v23 }
 0x1a7   : > { %2125 = vrsqrt.f32 %v441_v24 }
 0x1ad   : > { %v2124_v25 = vpop.eup %2123 }
 0x1ae   : > { %v444_v26 = vmul.f32 %v2124_v25, %v428_v8 }
 0x1b0   : > { %v452_v30 = vmul.f32 %v1825_v27, %v444_v26 }
 0x1b1   : > { %v2126_v28 = vpop.eup %2125 }
 0x1b2   : > { %v445_v29 = vmul.f32 %v2126_v28, %v429_v12  ;;  %v460_v33 = vadd.f32 %v1826_v31, %v452_v30 }
 0x1b4   : > { %v453_v32 = vmul.f32 %v1825_v27, %v445_v29 }
 0x1b6   : > { %v461_v34 = vadd.f32 %v1826_v31, %v453_v32 }
 0x1b8   : > { %v462_v35 = vpack.c.bf16 %v461_v34, %v460_v33 }
 0x1ba   : > { %1896 = vmatmul.mubr.msk.bf16.vlgmr.msra.gmra.mrb[0].mxu0 %vm417_vm1, %v462_v35 }
 0x1bb   : > { %1907 = vmatprep.mubr.msk.bf16.mxu0 %vm2328_vm3, %v2327_v17 }
 0x28d   : > { %v523_v37 = vpop.f32.mrb[0].mxu0 }
 0x28e   : > { %v524_v38 = vadd.f32 %v1827_v36, %v523_v37  ;;  %v1897_v39 = vpop.f32.mrb[1].mxu0 }
 0x28f   : > { %v526_v40 = vpop.f32.mrb[2].mxu0 }
 0x290   : > { %v527_v41 = vadd.f32 %v1827_v36, %v526_v40  ;;  %v1898_v42 = vpop.f32.mrb[3].mxu0  ;;  %v530_v43 = vmul.f32 0.5, %v524_v38 }
 0x292   : > { %v531_v44 = vmul.f32 0.5, %v527_v41  ;;  %v2594_v45 = vpack.c.bf16 %v527_v41, %v524_v38 }
 0x294   : > { %v532_v46 = vpack.c.bf16 %v531_v44, %v530_v43  ;;  %663 = vrot.lane.b32.xlu1 %v2594_v45, %s2329_s16  ;;  %535 = vrot.lane.b32.xlu0 %v2594_v45, %s2330_s19  ;;  %s2346_s16 = smov 60   ;;  %s2347_s19 = smov 52  }
 0x298   : > { %784 = vrot.lane.b32.xlu0 %v532_v46, %s2331_s21  ;;  %661 = vrot.lane.b32.xlu1 %v532_v46, %s2332_s17  ;;  %s2348_s21 = smov 48   ;;  %s2349_s17 = smov 44  }
 0x29c   : > { %907 = vrot.lane.b32.xlu0 %v532_v46, %s2333_s22  ;;  %786 = vrot.lane.b32.xlu1 %v2594_v45, %s2334_s23  ;;  %s2350_s22 = smov 40   ;;  %s2351_s23 = smov 36  }
 0x2a0   : > { %1030 = vrot.lane.b32.xlu0 %v532_v46, %s2335_s24  ;;  %909 = vrot.lane.b32.xlu1 %v2594_v45, %s2336_s20  ;;  %s2352_s24 = smov 4   ;;  %s2353_s20 = smov 8  }
 0x2a4   : > { %1153 = vrot.lane.b32.xlu0 %v532_v46, %s2337_s26  ;;  %1032 = vrot.lane.b32.xlu1 %v2594_v45, %s2338_s15  ;;  %s2354_s26 = smov 12   ;;  %s2355_s15 = smov 16  }
 0x2a8   : > { %1276 = vrot.lane.b32.xlu0 %v532_v46, %s2339_s25  ;;  %1155 = vrot.lane.b32.xlu1 %v2594_v45, %s2340_s27 }
 0x2ac   : > { %1399 = vrot.lane.b32.xlu0 %v532_v46, %s2341_s12  ;;  %1278 = vrot.lane.b32.xlu1 %v2594_v45, %s2342_s28  ;;  %s2356_s12 = smov 20   ;;  %s2357_s28 = smov 24  }
 0x2b0   : > { %1401 = vrot.lane.b32.xlu1 %v2594_v45, %s2343_s29 }
 0x2b4   : > { %610 = vrot.lane.b32.xlu1 %v2594_v45, %s2344_s11 }
 0x306   : > { %v664_v47 = vpop.permute.xlu1 %663  ;;  %v536_v48 = vpop.permute.xlu0 %535 }
 0x307   : > { %v542_v49 = vsel %vm537_vm4, %v536_v48, 0  ;;  %v669_v52 = vsel %vm537_vm4, %v664_v47, 0 }
 0x308   : > { %1900 = vmatpush3.bf16.xpose.msra.mxu1 %v542_v49 }
 0x309   : > { %1911 = vmatprep.subr.bf16.mxu1 %v2327_v17 }
 0x30a   : > { %v662_v50 = vpop.permute.xlu1 %661  ;;  %v785_v57 = vpop.permute.xlu0 %784 }
 0x30e   : > { %v787_v51 = vpop.permute.xlu1 %786  ;;  %v908_v61 = vpop.permute.xlu0 %907 }
 0x30f   : > { %1902 = vmatmul.mubr.msk.bf16.vlgmr.msra.gmra.mrb[0].mxu1 %vm537_vm4, %v532_v46  ;;  %v792_v55 = vsel %vm537_vm4, %v787_v51, 0 }
 0x310   : > { %1912 = vmatpush3.bf16.xpose.msra.mxu1 %v669_v52  ;;  %1913 = vmatprep.mubr.msk.bf16.mxu1 %vm2328_vm3, %v2327_v17 }
 0x311   : > { %1923 = vmatprep.subr.bf16.mxu1 %v2327_v17 }
 0x312   : > { %v910_v53 = vpop.permute.xlu1 %909  ;;  %v1031_v1 = vpop.permute.xlu0 %1030 }
 0x313   : > { %v915_v59 = vsel %vm537_vm4, %v910_v53, 0 }
 0x316   : > { %v1033_v54 = vpop.permute.xlu1 %1032  ;;  %v1154_v5 = vpop.permute.xlu0 %1153 }
 0x317   : > { %1914 = vmatmul.mubr.msk.bf16.vlgmr.msra.gmra.mrb[4].mxu1 %vm537_vm4, %v662_v50  ;;  %v1038_v63 = vsel %vm537_vm4, %v1033_v54, 0 }
 0x318   : > { %1924 = vmatpush3.bf16.xpose.msra.mxu1 %v792_v55  ;;  %1925 = vmatprep.mubr.msk.bf16.mxu1 %vm2328_vm3, %v2327_v17 }
 0x319   : > { %1935 = vmatprep.subr.bf16.mxu1 %v2327_v17 }
 0x31a   : > { %v1156_v56 = vpop.permute.xlu1 %1155  ;;  %v1277_v7 = vpop.permute.xlu0 %1276 }
 0x31b   : > { %v1161_v4 = vsel %vm537_vm4, %v1156_v56, 0 }
 0x31e   : > { %v1279_v58 = vpop.permute.xlu1 %1278  ;;  %v1400_v9 = vpop.permute.xlu0 %1399 }
 0x31f   : > { %1926 = vmatmul.mubr.msk.bf16.vlgmr.msra.gmra.mrb[8].mxu1 %vm537_vm4, %v785_v57  ;;  %v1284_v6 = vsel %vm537_vm4, %v1279_v58, 0 }
 0x320   : > { %1936 = vmatpush3.bf16.xpose.msra.mxu1 %v915_v59  ;;  %1937 = vmatprep.mubr.msk.bf16.mxu1 %vm2328_vm3, %v2327_v17 }
 0x321   : > { %1947 = vmatprep.subr.bf16.mxu1 %v2327_v17 }
 0x322   : > { %v1402_v60 = vpop.permute.xlu1 %1401 }
 0x323   : > { %v1407_v8 = vsel %vm537_vm4, %v1402_v60, 0 }
 0x326   : > { %v611_v62 = vpop.permute.xlu1 %610 }
 0x327   : > { %v617_v0 = vsel %vm615_vm5, %v611_v62, 0  ;;  %1938 = vmatmul.mubr.msk.bf16.vlgmr.msra.gmra.mrb[12].mxu1 %vm537_vm4, %v908_v61 }
 0x328   : > { %1906 = vmatpush3.bf16.msra.mxu0 %v617_v0  ;;  %1948 = vmatpush3.bf16.xpose.msra.mxu1 %v1038_v63 }
 0x329   : > { %1949 = vmatprep.mubr.msk.bf16.mxu1 %vm2328_vm3, %v2327_v17  ;;  %1959 = vmatprep.subr.bf16.mxu1 %v2327_v17 }
 0x32a   : > { %1917 = vmatprep.subr.bf16.mxu0 %v2327_v17 }
 0x32f   : > { %1950 = vmatmul.mubr.msk.bf16.vlgmr.msra.gmra.mrb[16].mxu1 %vm537_vm4, %v1031_v1 }
 0x330   : > { %1960 = vmatpush3.bf16.xpose.msra.mxu1 %v1161_v4  ;;  %1961 = vmatprep.mubr.msk.bf16.mxu1 %vm2328_vm3, %v2327_v17 }
 0x331   : > { %1971 = vmatprep.subr.bf16.mxu1 %v2327_v17 }
 0x337   : > { %1962 = vmatmul.mubr.msk.bf16.vlgmr.msra.gmra.mrb[20].mxu1 %vm537_vm4, %v1154_v5 }
 0x338   : > { %1972 = vmatpush3.bf16.xpose.msra.mxu1 %v1284_v6  ;;  %1973 = vmatprep.mubr.msk.bf16.mxu1 %vm2328_vm3, %v2327_v17 }
 0x339   : > { %1983 = vmatprep.subr.bf16.mxu1 %v2327_v17 }
 0x33f   : > { %1974 = vmatmul.mubr.msk.bf16.vlgmr.msra.gmra.mrb[24].mxu1 %vm537_vm4, %v1277_v7 }
 0x340   : > { %1984 = vmatpush3.bf16.xpose.msra.mxu1 %v1407_v8  ;;  %1985 = vmatprep.mubr.msk.bf16.mxu1 %vm2328_vm3, %v2327_v17 }
 0x341   : > { %1995 = vmatprep.subr.bf16.mxu1 %v2327_v17 }
 0x347   : > { %1986 = vmatmul.mubr.msk.bf16.vlgmr.msra.gmra.mrb[28].mxu1 %vm537_vm4, %v1400_v9 }
 0x348   : > { %1999 = vmatprep.mubr.msk.bf16.mxu1 %vm2328_vm3, %v2327_v17 }
 0x3e2   : > { %v2647_v10 = vpop.f32.mrb[0].mxu1 }
 0x3e3   : > { %v1903_v11 = vpop.f32.mrb[1].mxu1  ;;  %v586_v12 = vsel %vm585_vm6, %v2647_v10, -inf }
 0x3e4   : > { %587 = vmax.xlane.f32.xlu1 %v586_v12  ;;  %v2651_v13 = vpop.f32.mrb[2].mxu1 }
 0x3e5   : > { %v1904_v14 = vpop.f32.mrb[3].mxu1  ;;  %v590_v15 = vsel %vm589_vm7, %v2651_v13, -inf }
 0x3e6   : > { %591 = vmax.xlane.f32.xlu0 %v590_v15 }
 0x3ea   : > { %v2655_v16 = vpop.f32.mrb[4].mxu1 }
 0x3eb   : > { %v1915_v18 = vpop.f32.mrb[5].mxu1  ;;  %v712_v19 = vsel %vm585_vm6, %v2655_v16, -inf }
 0x3ec   : > { %713 = vmax.xlane.f32.xlu0 %v712_v19  ;;  %v2659_v20 = vpop.f32.mrb[6].mxu1 }
 0x3ed   : > { %v1916_v21 = vpop.f32.mrb[7].mxu1  ;;  %v715_v22 = vsel %vm589_vm7, %v2659_v20, -inf }
 0x3f0   : > { %716 = vmax.xlane.f32.xlu0 %v715_v22 }
 0x3f2   : > { %v2663_v23 = vpop.f32.mrb[8].mxu1 }
 0x3f3   : > { %v1927_v24 = vpop.f32.mrb[9].mxu1  ;;  %v835_v25 = vsel %vm585_vm6, %v2663_v23, -inf }
 0x3f4   : > { %836 = vmax.xlane.f32.xlu1 %v835_v25  ;;  %v2667_v26 = vpop.f32.mrb[10].mxu1 }
 0x3f5   : > { %v1928_v27 = vpop.f32.mrb[11].mxu1  ;;  %v838_v28 = vsel %vm589_vm7, %v2667_v26, -inf }
 0x3f6   : > { %839 = vmax.xlane.f32.xlu0 %v838_v28 }
 0x3fa   : > { %v2671_v29 = vpop.f32.mrb[12].mxu1 }
 0x3fb   : > { %v1939_v30 = vpop.f32.mrb[13].mxu1  ;;  %v958_v31 = vsel %vm585_vm6, %v2671_v29, -inf }
 0x3fc   : > { %959 = vmax.xlane.f32.xlu1 %v958_v31  ;;  %v2675_v32 = vpop.f32.mrb[14].mxu1 }
 0x3fd   : > { %v1940_v33 = vpop.f32.mrb[15].mxu1  ;;  %v961_v34 = vsel %vm589_vm7, %v2675_v32, -inf }
 0x3fe   : > { %962 = vmax.xlane.f32.xlu0 %v961_v34 }
 0x402   : > { %v2679_v35 = vpop.f32.mrb[16].mxu1 }
 0x403   : > { %v1951_v36 = vpop.f32.mrb[17].mxu1  ;;  %v1081_v37 = vsel %vm585_vm6, %v2679_v35, -inf }
 0x404   : > { %1082 = vmax.xlane.f32.xlu1 %v1081_v37  ;;  %v2683_v38 = vpop.f32.mrb[18].mxu1 }
 0x405   : > { %v1952_v39 = vpop.f32.mrb[19].mxu1  ;;  %v1084_v40 = vsel %vm589_vm7, %v2683_v38, -inf }
 0x406   : > { %1085 = vmax.xlane.f32.xlu0 %v1084_v40 }
 0x40a   : > { %v2687_v41 = vpop.f32.mrb[20].mxu1 }
 0x40b   : > { %v1963_v42 = vpop.f32.mrb[21].mxu1  ;;  %v1204_v43 = vsel %vm585_vm6, %v2687_v41, -inf }
 0x40c   : > { %1205 = vmax.xlane.f32.xlu1 %v1204_v43  ;;  %v2691_v44 = vpop.f32.mrb[22].mxu1 }
 0x40d   : > { %v1964_v46 = vpop.f32.mrb[23].mxu1  ;;  %v1207_v47 = vsel %vm589_vm7, %v2691_v44, -inf }
 0x40e   : > { %1208 = vmax.xlane.f32.xlu0 %v1207_v47 }
 0x412   : > { %v2695_v48 = vpop.f32.mrb[24].mxu1 }
 0x413   : > { %v1975_v49 = vpop.f32.mrb[25].mxu1  ;;  %v1327_v50 = vsel %vm585_vm6, %v2695_v48, -inf }
 0x414   : > { %1328 = vmax.xlane.f32.xlu1 %v1327_v50  ;;  %v2699_v51 = vpop.f32.mrb[26].mxu1 }
 0x415   : > { %v1976_v52 = vpop.f32.mrb[27].mxu1  ;;  %v1330_v53 = vsel %vm589_vm7, %v2699_v51, -inf }
 0x416   : > { %1331 = vmax.xlane.f32.xlu0 %v1330_v53 }
 0x41a   : > { %v2703_v54 = vpop.f32.mrb[28].mxu1 }
 0x41b   : > { %v1987_v55 = vpop.f32.mrb[29].mxu1  ;;  %v1450_v56 = vsel %vm585_vm6, %v2703_v54, -inf }
 0x41c   : > { %1451 = vmax.xlane.f32.xlu1 %v1450_v56  ;;  %v2707_v57 = vpop.f32.mrb[30].mxu1 }
 0x41d   : > { %v1988_v58 = vpop.f32.mrb[31].mxu1  ;;  %v1453_v59 = vsel %vm589_vm7, %v2707_v57, -inf }
 0x41e   : > { %1454 = vmax.xlane.f32.xlu0 %v1453_v59 }
 0x42d   : > { %858 = vrot.lane.b32.xlu1 %v2594_v45, %s2345_s14  ;;  %s2358_s14 = smov 28  }
 0x434   : > { %735 = vrot.lane.b32.xlu0 %v2594_v45, %s2346_s16 }
 0x471   : > { %v588_v60 = vpop.xlane.xlu1 %587 }
 0x472   : > { %v593_v61 = vsub.f32 %v2647_v10, %v588_v60 }
 0x473   : > { %v592_v62 = vpop.xlane.xlu0 %591 }
 0x474   : > { %v595_v63 = vmul.f32 1.442695, %v593_v61  ;;  %v594_v0 = vsub.f32 %v2651_v13, %v592_v62 }
 0x476   : > { %2127 = vpow2.f32 %v595_v63  ;;  %v597_v1 = vmul.f32 1.442695, %v594_v0 }
 0x478   : > { %2129 = vpow2.f32 %v597_v1 }
 0x479   : > { %v714_v4 = vpop.xlane.xlu0 %713 }
 0x47a   : > { %v718_v5 = vsub.f32 %v2655_v16, %v714_v4 }
 0x47c   : > { %v720_v6 = vmul.f32 1.442695, %v718_v5 }
 0x47d   : > { %v717_v7 = vpop.xlane.xlu0 %716 }
 0x47e   : > { %2131 = vpow2.f32 %v720_v6  ;;  %v719_v8 = vsub.f32 %v2659_v20, %v717_v7 }
 0x480   : > { %v2717_v9 = vpop.eup %2127  ;;  %v722_v11 = vmul.f32 1.442695, %v719_v8 }
 0x481   : > { %v837_v12 = vpop.xlane.xlu1 %836  ;;  %v599_v10 = vsel %vm585_vm6, %v2717_v9, 0.0 }
 0x482   : > { %v2721_v14 = vpop.eup %2129  ;;  %2133 = vpow2.f32 %v722_v11  ;;  %v841_v13 = vsub.f32 %v2663_v23, %v837_v12  ;;  %600 = vadd.xlane.f32.xlu1 %v599_v10 }
 0x483   : > { %v840_v15 = vpop.xlane.xlu0 %839  ;;  %v602_v16 = vsel %vm589_vm7, %v2721_v14, 0.0 }
 0x484   : > { %v843_v18 = vmul.f32 1.442695, %v841_v13  ;;  %v842_v19 = vsub.f32 %v2667_v26, %v840_v15  ;;  %603 = vadd.xlane.f32.xlu0 %v602_v16 }
 0x486   : > { %2135 = vpow2.f32 %v843_v18  ;;  %v845_v20 = vmul.f32 1.442695, %v842_v19 }
 0x488   : > { %v2727_v21 = vpop.eup %2131  ;;  %2137 = vpow2.f32 %v845_v20 }
 0x489   : > { %v960_v22 = vpop.xlane.xlu1 %959  ;;  %v724_v24 = vsel %vm585_vm6, %v2727_v21, 0.0 }
 0x48a   : > { %v964_v23 = vsub.f32 %v2671_v29, %v960_v22  ;;  %725 = vadd.xlane.f32.xlu1 %v724_v24 }
 0x48b   : > { %v963_v25 = vpop.xlane.xlu0 %962 }
 0x48c   : > { %v2732_v27 = vpop.eup %2133  ;;  %v966_v28 = vmul.f32 1.442695, %v964_v23  ;;  %v965_v30 = vsub.f32 %v2675_v32, %v963_v25 }
 0x48d   : > { %v727_v26 = vsel %vm589_vm7, %v2732_v27, 0.0 }
 0x48e   : > { %2139 = vpow2.f32 %v966_v28  ;;  %v968_v31 = vmul.f32 1.442695, %v965_v30  ;;  %728 = vadd.xlane.f32.xlu0 %v727_v26 }
 0x490   : > { %v2737_v33 = vpop.eup %2135  ;;  %2141 = vpow2.f32 %v968_v31 }
 0x491   : > { %v1083_v34 = vpop.xlane.xlu1 %1082  ;;  %v847_v29 = vsel %vm585_vm6, %v2737_v33, 0.0 }
 0x492   : > { %v2741_v36 = vpop.eup %2137  ;;  %v1087_v37 = vsub.f32 %v2679_v35, %v1083_v34  ;;  %848 = vadd.xlane.f32.xlu1 %v847_v29 }
 0x493   : > { %v1086_v39 = vpop.xlane.xlu0 %1085  ;;  %v850_v32 = vsel %vm589_vm7, %v2741_v36, 0.0 }
 0x494   : > { %v1089_v40 = vmul.f32 1.442695, %v1087_v37  ;;  %v1088_v42 = vsub.f32 %v2683_v38, %v1086_v39  ;;  %851 = vadd.xlane.f32.xlu0 %v850_v32 }
 0x496   : > { %2143 = vpow2.f32 %v1089_v40  ;;  %v1091_v43 = vmul.f32 1.442695, %v1088_v42 }
 0x498   : > { %v2747_v46 = vpop.eup %2139  ;;  %2145 = vpow2.f32 %v1091_v43 }
 0x499   : > { %v1206_v47 = vpop.xlane.xlu1 %1205  ;;  %v970_v49 = vsel %vm585_vm6, %v2747_v46, 0.0 }
 0x49a   : > { %v2751_v50 = vpop.eup %2141  ;;  %v1210_v35 = vsub.f32 %v2687_v41, %v1206_v47  ;;  %971 = vadd.xlane.f32.xlu1 %v970_v49 }
 0x49b   : > { %v1209_v52 = vpop.xlane.xlu0 %1208  ;;  %v973_v53 = vsel %vm589_vm7, %v2751_v50, 0.0 }
 0x49c   : > { %v1212_v38 = vmul.f32 1.442695, %v1210_v35  ;;  %v1211_v55 = vsub.f32 %v2691_v44, %v1209_v52  ;;  %974 = vadd.xlane.f32.xlu0 %v973_v53 }
 0x49e   : > { %2147 = vpow2.f32 %v1212_v38  ;;  %v1214_v56 = vmul.f32 1.442695, %v1211_v55 }
 0x4a0   : > { %v2757_v58 = vpop.eup %2143  ;;  %2149 = vpow2.f32 %v1214_v56 }
 0x4a1   : > { %v1329_v59 = vpop.xlane.xlu1 %1328  ;;  %v1093_v60 = vsel %vm585_vm6, %v2757_v58, 0.0 }
 0x4a2   : > { %v2761_v61 = vpop.eup %2145  ;;  %v1333_v41 = vsub.f32 %v2695_v48, %v1329_v59  ;;  %1094 = vadd.xlane.f32.xlu0 %v1093_v60 }
 0x4a3   : > { %v1332_v62 = vpop.xlane.xlu0 %1331  ;;  %v1096_v44 = vsel %vm589_vm7, %v2761_v61, 0.0 }
 0x4a4   : > { %v1335_v63 = vmul.f32 1.442695, %v1333_v41  ;;  %v1334_v0 = vsub.f32 %v2699_v51, %v1332_v62 }
 0x4a6   : > { %2151 = vpow2.f32 %v1335_v63  ;;  %v1337_v1 = vmul.f32 1.442695, %v1334_v0  ;;  %1097 = vadd.xlane.f32.xlu0 %v1096_v44 }
 0x4a8   : > { %v2767_v4 = vpop.eup %2147  ;;  %2153 = vpow2.f32 %v1337_v1 }
 0x4a9   : > { %v1452_v5 = vpop.xlane.xlu1 %1451  ;;  %v1216_v6 = vsel %vm585_vm6, %v2767_v4, 0.0 }
 0x4aa   : > { %v2771_v7 = vpop.eup %2149  ;;  %v1456_v48 = vsub.f32 %v2703_v54, %v1452_v5  ;;  %1217 = vadd.xlane.f32.xlu1 %v1216_v6 }
 0x4ab   : > { %v1219_v51 = vsel %vm589_vm7, %v2771_v7, 0.0  ;;  %v1455_v16 = vpop.xlane.xlu0 %1454 }
 0x4ac   : > { %v1458_v8 = vmul.f32 1.442695, %v1456_v48  ;;  %1220 = vadd.xlane.f32.xlu0 %v1219_v51  ;;  %v1457_v18 = vsub.f32 %v2707_v57, %v1455_v16 }
 0x4ad   : > { %v859_v57 = vpop.permute.xlu1 %858 }
 0x4ae   : > { %2155 = vpow2.f32 %v1458_v8  ;;  %v1460_v19 = vmul.f32 1.442695, %v1457_v18  ;;  %v864_v35 = vsel %vm615_vm5, %v859_v57, 0 }
 0x4af   : > { %v736_v24 = vpop.permute.xlu0 %735 }
 0x4b0   : > { %v2776_v11 = vpop.eup %2151  ;;  %2157 = vpow2.f32 %v1460_v19  ;;  %v741_v39 = vsel %vm615_vm5, %v736_v24, 0 }
 0x4b1   : > { %v1339_v12 = vsel %vm585_vm6, %v2776_v11, 0.0 }
 0x4b2   : > { %v2780_v10 = vpop.eup %2153  ;;  %1340 = vadd.xlane.f32.xlu0 %v1339_v12 }
 0x4b3   : > { %v1342_v13 = vsel %vm589_vm7, %v2780_v10, 0.0 }
 0x4b6   : > { %1343 = vadd.xlane.f32.xlu0 %v1342_v13 }
 0x4b8   : > { %v2784_v54 = vpop.eup %2155 }
 0x4b9   : > { %v1462_v15 = vsel %vm585_vm6, %v2784_v54, 0.0 }
 0x4ba   : > { %1463 = vadd.xlane.f32.xlu0 %v1462_v15  ;;  %v2793_v20 = vpop.eup %2157 }
 0x4bb   : > { %981 = vrot.lane.b32.xlu1 %v2594_v45, %s2347_s19  ;;  %v1465_v22 = vsel %vm589_vm7, %v2793_v20, 0.0 }
 0x4d0   : > { %1104 = vrot.lane.b32.xlu0 %v2594_v45, %s2348_s21  ;;  %s402_s21 = scalar_lea.vmem %s2896_s8, %s1821_s13 }
 0x4d4   : > { %1227 = vrot.lane.b32.xlu0 %v2594_v45, %s2349_s17 }
 0x4d8   : > { %1350 = vrot.lane.b32.xlu0 %v2594_v45, %s2350_s22 }
 0x4dc   : > { %1473 = vrot.lane.b32.xlu0 %v2594_v45, %s2351_s23  ;;  %s406_s23 = scalar_lea.vmem %s2897_s9, %s1822_s18 }
 0x4df   : > { %1466 = vadd.xlane.f32.xlu1 %v1465_v22 }
 0x50f   : > { %v601_v23 = vpop.xlane.xlu1 %600 }
 0x510   : > { %2159 = vrcp.f32 %v601_v23 }
 0x511   : > { %v604_v25 = vpop.xlane.xlu0 %603 }
 0x512   : > { %2161 = vrcp.f32 %v604_v25 }
 0x517   : > { %v726_v28 = vpop.xlane.xlu1 %725 }
 0x518   : > { %2163 = vrcp.f32 %v726_v28 }
 0x51a   : > { %v2160_v30 = vpop.eup %2159 }
 0x51b   : > { %v729_v26 = vpop.xlane.xlu0 %728  ;;  %v607_v34 = vmul.f32 %v2160_v30, %v2717_v9 }
 0x51c   : > { %v2162_v31 = vpop.eup %2161  ;;  %2165 = vrcp.f32 %v729_v26 }
 0x51d   : > { %v608_v45 = vmul.f32 %v2162_v31, %v2721_v14 }
 0x51f   : > { %v849_v29 = vpop.xlane.xlu1 %848  ;;  %v609_v37 = vpack.c.bf16 %v608_v45, %v607_v34 }
 0x520   : > { %2167 = vrcp.f32 %v849_v29 }
 0x521   : > { %1908 = vmatmul.mubr.msk.bf16.vlgmr.msra.gmra.mrb[4].mxu0 %vm585_vm6, %v609_v37  ;;  %v852_v32 = vpop.xlane.xlu0 %851 }
 0x522   : > { %1918 = vmatpush3.bf16.msra.mxu0 %v741_v39  ;;  %2169 = vrcp.f32 %v852_v32  ;;  %1919 = vmatprep.mubr.msk.bf16.mxu0 %vm2328_vm3, %v2327_v17  ;;  %v2164_v40 = vpop.eup %2163 }
 0x523   : > { %1929 = vmatprep.subr.bf16.mxu0 %v2327_v17  ;;  %v732_v9 = vmul.f32 %v2164_v40, %v2727_v21 }
 0x526   : > { %v2166_v42 = vpop.eup %2165 }
 0x527   : > { %v733_v14 = vmul.f32 %v2166_v42, %v2732_v27  ;;  %v972_v53 = vpop.xlane.xlu1 %971 }
 0x529   : > { %v734_v43 = vpack.c.bf16 %v733_v14, %v732_v9  ;;  %v975_v47 = vpop.xlane.xlu0 %974 }
 0x52a   : > { %v2168_v49 = vpop.eup %2167  ;;  %2171 = vrcp.f32 %v975_v47 }
 0x52b   : > { %1920 = vmatmul.mubr.msk.bf16.vlgmr.msra.gmra.mrb[8].mxu0 %vm585_vm6, %v734_v43  ;;  %v855_v21 = vmul.f32 %v2168_v49, %v2737_v33  ;;  %2173 = vrcp.f32 %v972_v53 }
 0x52c   : > { %v2170_v52 = vpop.eup %2169  ;;  %1930 = vmatpush3.bf16.msra.mxu0 %v864_v35  ;;  %1931 = vmatprep.mubr.msk.bf16.mxu0 %vm2328_vm3, %v2327_v17 }
 0x52d   : > { %v856_v38 = vmul.f32 %v2170_v52, %v2741_v36  ;;  %1941 = vmatprep.subr.bf16.mxu0 %v2327_v17 }
 0x52f   : > { %v1095_v27 = vpop.xlane.xlu0 %1094  ;;  %v857_v55 = vpack.c.bf16 %v856_v38, %v855_v21 }
 0x533   : > { %1932 = vmatmul.mubr.msk.bf16.vlgmr.msra.gmra.mrb[12].mxu0 %vm585_vm6, %v857_v55  ;;  %v1098_v59 = vpop.xlane.xlu0 %1097 }
 0x534   : > { %1943 = vmatprep.mubr.msk.bf16.mxu0 %vm2328_vm3, %v2327_v17  ;;  %v2172_v56 = vpop.eup %2171  ;;  %2175 = vrcp.f32 %v1098_v59 }
 0x535   : > { %v2174_v41 = vpop.eup %2173  ;;  %v979_v62 = vmul.f32 %v2172_v56, %v2751_v50  ;;  %2177 = vrcp.f32 %v1095_v27 }
 0x536   : > { %v978_v0 = vmul.f32 %v2174_v41, %v2747_v46 }
 0x537   : > { %v1218_v60 = vpop.xlane.xlu1 %1217 }
 0x538   : > { %v980_v44 = vpack.c.bf16 %v979_v62, %v978_v0 }
 0x539   : > { %v1221_v36 = vpop.xlane.xlu0 %1220 }
 0x53a   : > { %2179 = vrcp.f32 %v1221_v36 }
 0x53b   : > { %v982_v63 = vpop.permute.xlu1 %981  ;;  %2181 = vrcp.f32 %v1218_v60 }
 0x53c   : > { %v987_v33 = vsel %vm615_vm5, %v982_v63, 0 }
 0x53d   : > { %1942 = vmatpush3.bf16.msra.mxu0 %v987_v33  ;;  %v2121_v33 = vld [vmem:[%s2894_s6] sm:$0xff]  }
 0x53e   : > { %1953 = vmatprep.subr.bf16.mxu0 %v2327_v17  ;;  %v2176_v50 = vpop.eup %2175  ;;  %1996 = vmatpush3.bf16.msra.mxu1 %v2121_v33 }
 0x53f   : > { %v1341_v1 = vpop.xlane.xlu0 %1340  ;;  %v2178_v46 = vpop.eup %2177  ;;  %v1102_v48 = vmul.f32 %v2176_v50, %v2761_v61  ;;  %1997 = vmatprep.subr.bf16.mxu1 %v2327_v17 }
 0x540   : > { %1944 = vmatmul.mubr.msk.bf16.vlgmr.msra.gmra.mrb[16].mxu0 %vm585_vm6, %v980_v44  ;;  %v1101_v8 = vmul.f32 %v2178_v46, %v2757_v58 }
 0x541   : > { %1955 = vmatprep.mubr.msk.bf16.mxu0 %vm2328_vm3, %v2327_v17 }
 0x542   : > { %v1103_v13 = vpack.c.bf16 %v1102_v48, %v1101_v8 }
 0x543   : > { %v1344_v5 = vpop.xlane.xlu0 %1343 }
 0x544   : > { %2183 = vrcp.f32 %v1344_v5  ;;  %v2180_v15 = vpop.eup %2179 }
 0x545   : > { %2185 = vrcp.f32 %v1341_v1  ;;  %v2182_v19 = vpop.eup %2181  ;;  %v1225_v58 = vmul.f32 %v2180_v15, %v2771_v7 }
 0x546   : > { %v1224_v61 = vmul.f32 %v2182_v19, %v2767_v4 }
 0x547   : > { %v1464_v6 = vpop.xlane.xlu0 %1463 }
 0x548   : > { %v1226_v57 = vpack.c.bf16 %v1225_v58, %v1224_v61  ;;  %2187 = vrcp.f32 %v1464_v6 }
 0x54b   : > { %v1105_v51 = vpop.permute.xlu0 %1104 }
 0x54c   : > { %v1110_v12 = vsel %vm615_vm5, %v1105_v51, 0  ;;  %v2122_v51 = vld [vmem:[%s2894_s6 + $0x8] sm:$0xff]  }
 0x54d   : > { %1954 = vmatpush3.bf16.msra.mxu0 %v1110_v12  ;;  %1998 = vmatpush3.bf16.msra.mxu1 %v2122_v51 }
 0x54e   : > { %1965 = vmatprep.subr.bf16.mxu0 %v2327_v17  ;;  %v2184_v24 = vpop.eup %2183 }
 0x54f   : > { %v1228_v16 = vpop.permute.xlu0 %1227  ;;  %v2186_v25 = vpop.eup %2185  ;;  %v1348_v28 = vmul.f32 %v2184_v24, %v2780_v10 }
 0x550   : > { %v1233_v18 = vsel %vm615_vm5, %v1228_v16, 0  ;;  %1956 = vmatmul.mubr.msk.bf16.vlgmr.msra.gmra.mrb[20].mxu0 %vm585_vm6, %v1103_v13  ;;  %v1347_v7 = vmul.f32 %v2186_v25, %v2776_v11 }
 0x551   : > { %1966 = vmatpush3.bf16.msra.mxu0 %v1233_v18  ;;  %1967 = vmatprep.mubr.msk.bf16.mxu0 %vm2328_vm3, %v2327_v17 }
 0x552   : > { %1977 = vmatprep.subr.bf16.mxu0 %v2327_v17  ;;  %v1349_v4 = vpack.c.bf16 %v1348_v28, %v1347_v7  ;;  %v2188_v34 = vpop.eup %2187 }
 0x553   : > { %v1351_v22 = vpop.permute.xlu0 %1350  ;;  %v1470_v10 = vmul.f32 %v2188_v34, %v2784_v54 }
 0x554   : > { %v1356_v23 = vsel %vm615_vm5, %v1351_v22, 0 }
 0x557   : > { %v1474_v30 = vpop.permute.xlu0 %1473 }
 0x558   : > { %1968 = vmatmul.mubr.msk.bf16.vlgmr.msra.gmra.mrb[24].mxu0 %vm585_vm6, %v1226_v57  ;;  %v1479_v26 = vsel %vm615_vm5, %v1474_v30, 0 }
 0x559   : > { %1978 = vmatpush3.bf16.msra.mxu0 %v1356_v23  ;;  %1979 = vmatprep.mubr.msk.bf16.mxu0 %vm2328_vm3, %v2327_v17 }
 0x55a   : > { %1989 = vmatprep.subr.bf16.mxu0 %v2327_v17 }
 0x560   : > { %1980 = vmatmul.mubr.msk.bf16.vlgmr.msra.gmra.mrb[28].mxu0 %vm585_vm6, %v1349_v4 }
 0x561   : > { %1990 = vmatpush3.bf16.msra.mxu0 %v1479_v26  ;;  %1991 = vmatprep.mubr.msk.bf16.mxu0 %vm2328_vm3, %v2327_v17 }
 0x56c   : > { %v1467_v31 = vpop.xlane.xlu1 %1466 }
 0x56d   : > { %2189 = vrcp.f32 %v1467_v31 }
 0x577   : > { %v2190_v45 = vpop.eup %2189 }
 0x578   : > { %v1471_v29 = vmul.f32 %v2190_v45, %v2793_v20 }
 0x57a   : > { %v1472_v11 = vpack.c.bf16 %v1471_v29, %v1470_v10 }
 0x57c   : > { %1992 = vmatmul.mubr.msk.bf16.vlgmr.msra.gmra.mrb[32].mxu0 %vm585_vm6, %v1472_v11 }
 0x5f4   : > { %v2849_v37 = vpop.f32.mrb[4].mxu0 }
 0x5f5   : > { %v1909_v39 = vpop.f32.mrb[5].mxu0 }
 0x5f6   : > { %v2851_v32 = vpop.f32.mrb[6].mxu0 }
 0x5f7   : > { %v1910_v40 = vpop.f32.mrb[7].mxu0 }
 0x5fe   : > { %v777_v42 = vpop.f32.mrb[8].mxu0 }
 0x5ff   : > { %v1921_v9 = vpop.f32.mrb[9].mxu0 }
 0x600   : > { %v780_v14 = vpop.f32.mrb[10].mxu0 }
 0x601   : > { %v2084_v43 = vpack.i.bf16 %v780_v14, %v777_v42  ;;  %v1922_v47 = vpop.f32.mrb[11].mxu0 }
 0x603   : > { %2085 = vrot.lane.b32.xlu1 %v2084_v43, %s2352_s24 }
 0x606   : > { %v900_v49 = vpop.f32.mrb[12].mxu0 }
 0x607   : > { %v1933_v54 = vpop.f32.mrb[13].mxu0 }
 0x608   : > { %v903_v35 = vpop.f32.mrb[14].mxu0 }
 0x609   : > { %v2089_v20 = vpack.i.bf16 %v903_v35, %v900_v49  ;;  %v1934_v52 = vpop.f32.mrb[15].mxu0 }
 0x60b   : > { %2090 = vrot.lane.b32.xlu0 %v2089_v20, %s2353_s20 }
 0x613   : > { %v1023_v53 = vpop.f32.mrb[16].mxu0 }
 0x614   : > { %v1945_v38 = vpop.f32.mrb[17].mxu0 }
 0x615   : > { %v1026_v21 = vpop.f32.mrb[18].mxu0  ;;  %v1847_v38 = vld [vmem:[#allocation7] ss:$0 sm:$0xff] }
 0x616   : > { %v2094_v27 = vpack.i.bf16 %v1026_v21, %v1023_v53  ;;  %v1946_v55 = vpop.f32.mrb[19].mxu0 }
 0x618   : > { %2095 = vrot.lane.b32.xlu0 %v2094_v27, %s2354_s26 }
 0x623   : > { %v1146_v56 = vpop.f32.mrb[20].mxu0 }
 0x624   : > { %v1957_v59 = vpop.f32.mrb[21].mxu0 }
 0x625   : > { %v1149_v60 = vpop.f32.mrb[22].mxu0 }
 0x626   : > { %v2099_v41 = vpack.i.bf16 %v1149_v60, %v1146_v56  ;;  %v1958_v62 = vpop.f32.mrb[23].mxu0 }
 0x628   : > { %2100 = vrot.lane.b32.xlu0 %v2099_v41, %s2355_s15 }
 0x62b   : > { %v1269_v36 = vpop.f32.mrb[24].mxu0 }
 0x62c   : > { %v1969_v63 = vpop.f32.mrb[25].mxu0 }
 0x62d   : > { %v1272_v0 = vpop.f32.mrb[26].mxu0 }
 0x62e   : > { %v2104_v44 = vpack.i.bf16 %v1272_v0, %v1269_v36  ;;  %v1970_v1 = vpop.f32.mrb[27].mxu0 }
 0x630   : > { %2105 = vrot.lane.b32.xlu0 %v2104_v44, %s2356_s12 }
 0x633   : > { %v1392_v5 = vpop.f32.mrb[28].mxu0 }
 0x634   : > { %v1981_v50 = vpop.f32.mrb[29].mxu0 }
 0x635   : > { %v1395_v6 = vpop.f32.mrb[30].mxu0 }
 0x636   : > { %v2109_v46 = vpack.i.bf16 %v1395_v6, %v1392_v5  ;;  %v1982_v48 = vpop.f32.mrb[31].mxu0 }
 0x638   : > { %2110 = vrot.lane.b32.xlu0 %v2109_v46, %s2357_s28 }
 0x64f   : > { %v1515_v8 = vpop.f32.mrb[32].mxu0 }
 0x650   : > { %v1993_v12 = vpop.f32.mrb[33].mxu0 }
 0x651   : > { %v1518_v13 = vpop.f32.mrb[34].mxu0 }
 0x652   : > { %v2114_v15 = vpack.i.bf16 %v1518_v13, %v1515_v8  ;;  %v1994_v16 = vpop.f32.mrb[35].mxu0 }
 0x654   : > { %2115 = vrot.lane.b32.xlu1 %v2114_v15, %s2358_s14 }
 0x675   : > { %v2086_v58 = vpop.permute.xlu1 %2085 }
 0x676   : > { %v2088_v22 = vunpack.i.h.bf16 %v2086_v58  ;;  %v2087_v57 = vunpack.i.l.bf16 %v2086_v58 }
 0x678   : > { %v1579_v26 = vsel %vm537_vm4, %v2851_v32, %v2088_v22  ;;  %v1578_v31 = vsel %vm537_vm4, %v2849_v37, %v2087_v57 }
 0x67d   : > { %v2091_v17 = vpop.permute.xlu0 %2090 }
 0x67e   : > { %v2093_v24 = vunpack.i.h.bf16 %v2091_v17  ;;  %v2092_v23 = vunpack.i.l.bf16 %v2091_v17 }
 0x680   : > { %v1582_v10 = vsel %vm1580_vm8, %v1579_v26, %v2093_v24  ;;  %v1581_v29 = vsel %vm1580_vm8, %v1578_v31, %v2092_v23 }
 0x68a   : > { %v2096_v18 = vpop.permute.xlu0 %2095 }
 0x68b   : > { %v2098_v25 = vunpack.i.h.bf16 %v2096_v18  ;;  %v2097_v28 = vunpack.i.l.bf16 %v2096_v18 }
 0x68d   : > { %v1584_v40 = vsel %vm585_vm6, %v1582_v10, %v2098_v25  ;;  %v1583_v42 = vsel %vm585_vm6, %v1581_v29, %v2097_v28 }
 0x69a   : > { %v2101_v19 = vpop.permute.xlu0 %2100 }
 0x69b   : > { %v2103_v30 = vunpack.i.h.bf16 %v2101_v19  ;;  %v2102_v4 = vunpack.i.l.bf16 %v2101_v19 }
 0x69d   : > { %v1587_v9 = vsel %vm1585_vm9, %v1584_v40, %v2103_v30  ;;  %v1586_v14 = vsel %vm1585_vm9, %v1583_v42, %v2102_v4 }
 0x6a2   : > { %v2106_v61 = vpop.permute.xlu0 %2105 }
 0x6a3   : > { %v2108_v34 = vunpack.i.h.bf16 %v2106_v61  ;;  %v2107_v45 = vunpack.i.l.bf16 %v2106_v61 }
 0x6a5   : > { %v1590_v37 = vsel %vm1588_vm10, %v1587_v9, %v2108_v34  ;;  %v1589_v43 = vsel %vm1588_vm10, %v1586_v14, %v2107_v45 }
 0x6aa   : > { %v2111_v7 = vpop.permute.xlu0 %2110 }
 0x6ab   : > { %v2113_v11 = vunpack.i.h.bf16 %v2111_v7  ;;  %v2112_v39 = vunpack.i.l.bf16 %v2111_v7 }
 0x6ad   : > { %v1593_v54 = vsel %vm1591_vm11, %v1590_v37, %v2113_v11  ;;  %v1592_v35 = vsel %vm1591_vm11, %v1589_v43, %v2112_v39 }
 0x6c6   : > { %v2116_v32 = vpop.permute.xlu1 %2115 }
 0x6c7   : > { %v2118_v47 = vunpack.i.h.bf16 %v2116_v32  ;;  %v2117_v49 = vunpack.i.l.bf16 %v2116_v32 }
 0x6c9   : > { %v1596_v20 = vsel %vm1594_vm12, %v1593_v54, %v2118_v47  ;;  %v1595_v52 = vsel %vm1594_vm12, %v1592_v35, %v2117_v49 }
 0x6ca   : > { %v1597_v53 = vpack.c.bf16 %v1596_v20, %v1595_v52 }
 0x6cc   : > { %2000 = vmatmul.mubr.msk.bf16.vlgmr.msra.gmra.mrb[32].mxu1 %vm417_vm1, %v1597_v53 }
 0x79f   : > { %v1658_v21 = vpop.f32.mrb[32].mxu1 }
 0x7a0   : > { %v1659_v27 = vadd.f32 %v1847_v38, %v1658_v21  ;;  %v2001_v55 = vpop.f32.mrb[33].mxu1 }
 0x7a1   : > { %v1661_v56 = vpop.f32.mrb[34].mxu1 }
 0x7a2   : > { %v1665_v59 = vadd.f32 %v1659_v27, %v2567_v3  ;;  %v1662_v60 = vadd.f32 %v1847_v38, %v1661_v56  ;;  %v2002_v41 = vpop.f32.mrb[35].mxu1 }
 0x7a4   : > { %1667 = vst.msk [vmem:[%s402_s21] sm:$0xf] %vm421_vm2, %v1665_v59  ;;  %v1666_v62 = vadd.f32 %v1662_v60, %v2564_v2 }
 0x7a5   : > { %1669 = vst.msk [vmem:[%s406_s23 - $0x4] sm:$0xf0] %vm1668_vm13, %v1665_v59 }
 0x7a6   : > { %1670 = vst.msk [vmem:[%s406_s23 + $0x4] sm:$0xf] %vm421_vm2, %v1666_v62 }
 0x7a7 PF: > { %s23_s30 = sadd.s32 1, %s2321_s30  }
 0x7a8   : > { %p20_p11 = scmp.ge.s32.totalorder %s23_s30, 4  }
 0x7aa   :  { %22 = sbr.rel (!%p20_p11) target bundleno = 3 (0x3), region = 114 }
 0x7b1   :  { %1704 = vsyncpa [#allocation3], 1 }
 0x7b2   :  { %1706 = vsyncpa [#allocation3 + $0x1], 1 }
 0x7b3   :  { %1707 = vsyncpa [#allocation5], 1 }
 0x7b4   :  { %1708 = vsyncpa [#allocation8], 1 }

// kernel: bridger_forward.59
= control target key start
LH: loop header
LB: loop body
LE: loop exit
PB: predicated region body
PF: predicated region fallthrough
CT: control target
= control target key end

     0   :  { %v171_v0 = vmov 0.0   ;;  %vm172_vm0 = vmmov 0   ;;  %s218_s1 = inlined_call_operand.vmem [shape: bf16[128,128], index: 1, kind: input, shape index: {}]   ;;  %s219_s0 = inlined_call_operand.vmem [shape: f32[8,128], index: 0, kind: input, shape index: {}]   ;;  %s220_s2 = inlined_call_operand.vmem [shape: bf16[8,128], index: 2, kind: output, shape index: {}]  }
   0x1   :  { %141 = vmatprep.subr.bf16.mxu0 %v171_v0  ;;  %v163_v1 = vld [vmem:[%s218_s1] sm:$0xff]   ;;  %157 = vmatprep.mubr.msk.bf16.mxu0 %vm172_vm0, %v171_v0  ;;  %v164_v2 = vld [vmem:[%s218_s1 + $0x8] sm:$0xff]   ;;  %v165_v3 = vld [vmem:[%s218_s1 + $0x10] sm:$0xff]  }
   0x2   :  { %142 = vmatpush3.bf16.msra.mxu0 %v163_v1  ;;  %v166_v4 = vld [vmem:[%s218_s1 + $0x18] sm:$0xff]   ;;  %v167_v5 = vld [vmem:[%s218_s1 + $0x20] sm:$0xff]   ;;  %v168_v6 = vld [vmem:[%s218_s1 + $0x28] sm:$0xff]  }
   0x3   :  { %143 = vmatprep.subr.bf16.mxu0 %v171_v0  ;;  %v169_v7 = vld [vmem:[%s218_s1 + $0x30] sm:$0xff]   ;;  %v170_v8 = vld [vmem:[%s218_s1 + $0x38] sm:$0xff]   ;;  %v12_v9 = vld [vmem:[%s219_s0] sm:$0xff] }
   0x4   :  { %v29_v10 = vpack.c.bf16 %v12_v9, %v12_v9 }
   0x6   :  { %144 = vmatpush3.bf16.msra.mxu0 %v164_v2 }
   0x7   :  { %145 = vmatprep.subr.bf16.mxu0 %v171_v0 }
   0xa   :  { %146 = vmatpush3.bf16.msra.mxu0 %v165_v3 }
   0xb   :  { %147 = vmatprep.subr.bf16.mxu0 %v171_v0 }
   0xe   :  { %148 = vmatpush3.bf16.msra.mxu0 %v166_v4 }
   0xf   :  { %149 = vmatprep.subr.bf16.mxu0 %v171_v0 }
  0x12   :  { %150 = vmatpush3.bf16.msra.mxu0 %v167_v5 }
  0x13   :  { %151 = vmatprep.subr.bf16.mxu0 %v171_v0 }
  0x16   :  { %152 = vmatpush3.bf16.msra.mxu0 %v168_v6 }
  0x17   :  { %153 = vmatprep.subr.bf16.mxu0 %v171_v0 }
  0x1a   :  { %154 = vmatpush3.bf16.msra.mxu0 %v169_v7 }
  0x1b   :  { %155 = vmatprep.subr.bf16.mxu0 %v171_v0 }
  0x1e   :  { %156 = vmatpush3.bf16.msra.mxu0 %v170_v8 }
  0x21   :  { %158 = vmatmul.mubr.bf16.vlgmr.msra.gmra.mrb[0].mxu0 %v29_v10 }
  0xf4   :  { %v112_v11 = vpop.f32.mrb[0].mxu0 }
  0xf5   :  { %v118_v12 = vpack.c.bf16 %v112_v11, %v112_v11  ;;  %v159_v13 = vpop.f32.mrb[1].mxu0 }
  0xf6   :  { %v115_v14 = vpop.f32.mrb[2].mxu0 }
  0xf7   :  { %119 = vst [vmem:[%s220_s2] sm:$0xf] %v118_v12  ;;  %v160_v15 = vpop.f32.mrb[3].mxu0 }

// kernel: bridger_forward.61
= control target key start
LH: loop header
LB: loop body
LE: loop exit
PB: predicated region body
PF: predicated region fallthrough
CT: control target
= control target key end

     0   :  { %v394_v1 = vmov 0   ;;  %s515_s1 = inlined_call_operand.vmem [shape: bf16[128,512], index: 1, kind: input, shape index: {}]   ;;  %s516_s0 = inlined_call_operand.vmem [shape: bf16[8,128], index: 0, kind: input, shape index: {}]   ;;  %s517_s2 = inlined_call_operand.vmem [shape: bf16[8,512], index: 2, kind: output, shape index: {}]  }
   0x1   :  { %v346_v0 = vld [vmem:[%s515_s1 + $0x4] ss:$16 sps:$4 sm:$0xff]   ;;  %237 = vmatprep.mubr.bf16.mxu0 %v394_v1  ;;  %278 = vmatprep.mubr.bf16.mxu1 %v394_v1  ;;  %v348_v2 = vld [vmem:[%s515_s1 + $0xc] ss:$16 sps:$4 sm:$0xff]   ;;  %v350_v3 = vld [vmem:[%s515_s1] ss:$16 sps:$4 sm:$0xff]  }
   0x2   :  { %205 = vmatprep.subr.bf16.mxu0 %v346_v0  ;;  %v351_v4 = vld [vmem:[%s515_s1 + $0x8] ss:$16 sps:$4 sm:$0xff]   ;;  %246 = vmatprep.subr.bf16.mxu1 %v348_v2  ;;  %v352_v5 = vld [vmem:[%s515_s1 + $0x24] ss:$16 sps:$4 sm:$0xff]   ;;  %v354_v6 = vld [vmem:[%s515_s1 + $0x2c] ss:$16 sps:$4 sm:$0xff]  }
   0x3   :  { %206 = vmatpush1.bf16.msra.mxu0 %v350_v3  ;;  %247 = vmatpush1.bf16.msra.mxu1 %v351_v4  ;;  %v356_v7 = vld [vmem:[%s515_s1 + $0x20] ss:$16 sps:$4 sm:$0xff]   ;;  %v357_v8 = vld [vmem:[%s515_s1 + $0x28] ss:$16 sps:$4 sm:$0xff]   ;;  %v358_v9 = vld [vmem:[%s515_s1 + $0x44] ss:$16 sps:$4 sm:$0xff]  }
   0x4   :  { %207 = vmatprep.subr.bf16.mxu0 %v352_v5  ;;  %248 = vmatprep.subr.bf16.mxu1 %v354_v6  ;;  %v360_v10 = vld [vmem:[%s515_s1 + $0x4c] ss:$16 sps:$4 sm:$0xff]   ;;  %v362_v11 = vld [vmem:[%s515_s1 + $0x40] ss:$16 sps:$4 sm:$0xff]   ;;  %v363_v12 = vld [vmem:[%s515_s1 + $0x48] ss:$16 sps:$4 sm:$0xff]  }
   0x5   :  { %v364_v13 = vld [vmem:[%s515_s1 + $0x64] ss:$16 sps:$4 sm:$0xff]   ;;  %v366_v14 = vld [vmem:[%s515_s1 + $0x6c] ss:$16 sps:$4 sm:$0xff]   ;;  %v368_v15 = vld [vmem:[%s515_s1 + $0x60] ss:$16 sps:$4 sm:$0xff]  }
   0x6   :  { %v369_v16 = vld [vmem:[%s515_s1 + $0x68] ss:$16 sps:$4 sm:$0xff]   ;;  %v370_v17 = vld [vmem:[%s515_s1 + $0x84] ss:$16 sps:$4 sm:$0xff]   ;;  %v372_v18 = vld [vmem:[%s515_s1 + $0x8c] ss:$16 sps:$4 sm:$0xff]  }
   0x7   :  { %208 = vmatpush1.bf16.msra.mxu0 %v356_v7  ;;  %249 = vmatpush1.bf16.msra.mxu1 %v357_v8  ;;  %v374_v19 = vld [vmem:[%s515_s1 + $0x80] ss:$16 sps:$4 sm:$0xff]   ;;  %v375_v20 = vld [vmem:[%s515_s1 + $0x88] ss:$16 sps:$4 sm:$0xff]   ;;  %v376_v21 = vld [vmem:[%s515_s1 + $0xa4] ss:$16 sps:$4 sm:$0xff]  }
   0x8   :  { %209 = vmatprep.subr.bf16.mxu0 %v358_v9  ;;  %250 = vmatprep.subr.bf16.mxu1 %v360_v10  ;;  %v378_v22 = vld [vmem:[%s515_s1 + $0xac] ss:$16 sps:$4 sm:$0xff]   ;;  %v380_v23 = vld [vmem:[%s515_s1 + $0xa0] ss:$16 sps:$4 sm:$0xff]   ;;  %v381_v24 = vld [vmem:[%s515_s1 + $0xa8] ss:$16 sps:$4 sm:$0xff]  }
   0x9   :  { %v382_v25 = vld [vmem:[%s515_s1 + $0xc4] ss:$16 sps:$4 sm:$0xff]   ;;  %v384_v26 = vld [vmem:[%s515_s1 + $0xcc] ss:$16 sps:$4 sm:$0xff]   ;;  %v386_v27 = vld [vmem:[%s515_s1 + $0xc0] ss:$16 sps:$4 sm:$0xff]  }
   0xa   :  { %v387_v28 = vld [vmem:[%s515_s1 + $0xc8] ss:$16 sps:$4 sm:$0xff]   ;;  %v388_v29 = vld [vmem:[%s515_s1 + $0xe4] ss:$16 sps:$4 sm:$0xff]   ;;  %v390_v30 = vld [vmem:[%s515_s1 + $0xec] ss:$16 sps:$4 sm:$0xff]  }
   0xb   :  { %210 = vmatpush1.bf16.msra.mxu0 %v362_v11  ;;  %251 = vmatpush1.bf16.msra.mxu1 %v363_v12  ;;  %v392_v31 = vld [vmem:[%s515_s1 + $0xe0] ss:$16 sps:$4 sm:$0xff]   ;;  %v393_v32 = vld [vmem:[%s515_s1 + $0xe8] ss:$16 sps:$4 sm:$0xff]  }
   0xc   :  { %211 = vmatprep.subr.bf16.mxu0 %v364_v13  ;;  %252 = vmatprep.subr.bf16.mxu1 %v366_v14  ;;  %v12_v33 = vld [vmem:[%s516_s0] sm:$0xf] }
   0xf   :  { %212 = vmatpush1.bf16.msra.mxu0 %v368_v15  ;;  %253 = vmatpush1.bf16.msra.mxu1 %v369_v16 }
  0x10   :  { %213 = vmatprep.subr.bf16.mxu0 %v370_v17  ;;  %254 = vmatprep.subr.bf16.mxu1 %v372_v18 }
  0x13   :  { %214 = vmatpush1.bf16.msra.mxu0 %v374_v19  ;;  %255 = vmatpush1.bf16.msra.mxu1 %v375_v20 }
  0x14   :  { %215 = vmatprep.subr.bf16.mxu0 %v376_v21  ;;  %256 = vmatprep.subr.bf16.mxu1 %v378_v22 }
  0x17   :  { %216 = vmatpush1.bf16.msra.mxu0 %v380_v23  ;;  %257 = vmatpush1.bf16.msra.mxu1 %v381_v24 }
  0x18   :  { %217 = vmatprep.subr.bf16.mxu0 %v382_v25  ;;  %258 = vmatprep.subr.bf16.mxu1 %v384_v26 }
  0x1b   :  { %218 = vmatpush1.bf16.msra.mxu0 %v386_v27  ;;  %259 = vmatpush1.bf16.msra.mxu1 %v387_v28 }
  0x1c   :  { %219 = vmatprep.subr.bf16.mxu0 %v388_v29  ;;  %260 = vmatprep.subr.bf16.mxu1 %v390_v30 }
  0x1f   :  { %220 = vmatpush1.bf16.msra.mxu0 %v392_v31  ;;  %261 = vmatpush1.bf16.msra.mxu1 %v393_v32 }
  0x22   :  { %238 = vmatmul.mubr.bf16.vlgmr.msra.gmra.mrb[0].mxu0 %v12_v33  ;;  %279 = vmatmul.mubr.bf16.vlgmr.msra.gmra.mrb[0].mxu1 %v12_v33 }
  0xf5   :  { %v239_v34 = vpop.f32.mrb[0].mxu0  ;;  %v280_v35 = vpop.f32.mrb[0].mxu1 }
  0xf6   :  { %v241_v36 = vpop.f32.mrb[1].mxu0  ;;  %v282_v37 = vpop.f32.mrb[1].mxu1 }
  0xf7   :  { %v343_v38 = vpack.c.bf16 %v241_v36, %v239_v34  ;;  %v344_v39 = vpack.c.bf16 %v282_v37, %v280_v35  ;;  %v243_v40 = vpop.f32.mrb[2].mxu0  ;;  %v284_v41 = vpop.f32.mrb[2].mxu1 }
  0xf8   :  { %v244_v42 = vpop.f32.mrb[3].mxu0  ;;  %v285_v43 = vpop.f32.mrb[3].mxu1 }
  0xf9   :  { %303 = vst [vmem:[%s517_s2] sm:$0xff] %v343_v38  ;;  %304 = vst [vmem:[%s517_s2 + $0x8] sm:$0xff] %v344_v39 }

// kernel: bridger_forward.62
= control target key start
LH: loop header
LB: loop body
LE: loop exit
PB: predicated region body
PF: predicated region fallthrough
CT: control target
= control target key end

     0   :  { %v395_v1 = vmov 0   ;;  %s516_s1 = inlined_call_operand.vmem [shape: bf16[128,512], index: 1, kind: input, shape index: {}]   ;;  %s517_s0 = inlined_call_operand.vmem [shape: f32[8,128], index: 0, kind: input, shape index: {}]   ;;  %s518_s2 = inlined_call_operand.vmem [shape: bf16[8,512], index: 2, kind: output, shape index: {}]  }
   0x1   :  { %v347_v0 = vld [vmem:[%s516_s1 + $0x4] ss:$16 sps:$4 sm:$0xff]   ;;  %238 = vmatprep.mubr.bf16.mxu0 %v395_v1  ;;  %279 = vmatprep.mubr.bf16.mxu1 %v395_v1  ;;  %v349_v2 = vld [vmem:[%s516_s1 + $0xc] ss:$16 sps:$4 sm:$0xff]   ;;  %v351_v3 = vld [vmem:[%s516_s1] ss:$16 sps:$4 sm:$0xff]  }
   0x2   :  { %206 = vmatprep.subr.bf16.mxu0 %v347_v0  ;;  %v352_v4 = vld [vmem:[%s516_s1 + $0x8] ss:$16 sps:$4 sm:$0xff]   ;;  %247 = vmatprep.subr.bf16.mxu1 %v349_v2  ;;  %v353_v5 = vld [vmem:[%s516_s1 + $0x24] ss:$16 sps:$4 sm:$0xff]   ;;  %v355_v6 = vld [vmem:[%s516_s1 + $0x2c] ss:$16 sps:$4 sm:$0xff]  }
   0x3   :  { %207 = vmatpush1.bf16.msra.mxu0 %v351_v3  ;;  %248 = vmatpush1.bf16.msra.mxu1 %v352_v4  ;;  %v357_v7 = vld [vmem:[%s516_s1 + $0x20] ss:$16 sps:$4 sm:$0xff]   ;;  %v358_v8 = vld [vmem:[%s516_s1 + $0x28] ss:$16 sps:$4 sm:$0xff]   ;;  %v359_v9 = vld [vmem:[%s516_s1 + $0x44] ss:$16 sps:$4 sm:$0xff]  }
   0x4   :  { %208 = vmatprep.subr.bf16.mxu0 %v353_v5  ;;  %249 = vmatprep.subr.bf16.mxu1 %v355_v6  ;;  %v361_v10 = vld [vmem:[%s516_s1 + $0x4c] ss:$16 sps:$4 sm:$0xff]   ;;  %v363_v11 = vld [vmem:[%s516_s1 + $0x40] ss:$16 sps:$4 sm:$0xff]   ;;  %v364_v12 = vld [vmem:[%s516_s1 + $0x48] ss:$16 sps:$4 sm:$0xff]  }
   0x5   :  { %v365_v13 = vld [vmem:[%s516_s1 + $0x64] ss:$16 sps:$4 sm:$0xff]   ;;  %v367_v14 = vld [vmem:[%s516_s1 + $0x6c] ss:$16 sps:$4 sm:$0xff]   ;;  %v369_v15 = vld [vmem:[%s516_s1 + $0x60] ss:$16 sps:$4 sm:$0xff]  }
   0x6   :  { %v370_v16 = vld [vmem:[%s516_s1 + $0x68] ss:$16 sps:$4 sm:$0xff]   ;;  %v371_v17 = vld [vmem:[%s516_s1 + $0x84] ss:$16 sps:$4 sm:$0xff]   ;;  %v373_v18 = vld [vmem:[%s516_s1 + $0x8c] ss:$16 sps:$4 sm:$0xff]  }
   0x7   :  { %209 = vmatpush1.bf16.msra.mxu0 %v357_v7  ;;  %250 = vmatpush1.bf16.msra.mxu1 %v358_v8  ;;  %v375_v19 = vld [vmem:[%s516_s1 + $0x80] ss:$16 sps:$4 sm:$0xff]   ;;  %v376_v20 = vld [vmem:[%s516_s1 + $0x88] ss:$16 sps:$4 sm:$0xff]   ;;  %v377_v21 = vld [vmem:[%s516_s1 + $0xa4] ss:$16 sps:$4 sm:$0xff]  }
   0x8   :  { %210 = vmatprep.subr.bf16.mxu0 %v359_v9  ;;  %251 = vmatprep.subr.bf16.mxu1 %v361_v10  ;;  %v379_v22 = vld [vmem:[%s516_s1 + $0xac] ss:$16 sps:$4 sm:$0xff]   ;;  %v381_v23 = vld [vmem:[%s516_s1 + $0xa0] ss:$16 sps:$4 sm:$0xff]   ;;  %v382_v24 = vld [vmem:[%s516_s1 + $0xa8] ss:$16 sps:$4 sm:$0xff]  }
   0x9   :  { %v383_v25 = vld [vmem:[%s516_s1 + $0xc4] ss:$16 sps:$4 sm:$0xff]   ;;  %v385_v26 = vld [vmem:[%s516_s1 + $0xcc] ss:$16 sps:$4 sm:$0xff]   ;;  %v387_v27 = vld [vmem:[%s516_s1 + $0xc0] ss:$16 sps:$4 sm:$0xff]  }
   0xa   :  { %v388_v28 = vld [vmem:[%s516_s1 + $0xc8] ss:$16 sps:$4 sm:$0xff]   ;;  %v389_v29 = vld [vmem:[%s516_s1 + $0xe4] ss:$16 sps:$4 sm:$0xff]   ;;  %v391_v30 = vld [vmem:[%s516_s1 + $0xec] ss:$16 sps:$4 sm:$0xff]  }
   0xb   :  { %211 = vmatpush1.bf16.msra.mxu0 %v363_v11  ;;  %252 = vmatpush1.bf16.msra.mxu1 %v364_v12  ;;  %v393_v31 = vld [vmem:[%s516_s1 + $0xe0] ss:$16 sps:$4 sm:$0xff]   ;;  %v394_v32 = vld [vmem:[%s516_s1 + $0xe8] ss:$16 sps:$4 sm:$0xff]  }
   0xc   :  { %212 = vmatprep.subr.bf16.mxu0 %v365_v13  ;;  %253 = vmatprep.subr.bf16.mxu1 %v367_v14  ;;  %v12_v33 = vld [vmem:[%s517_s0] sm:$0xff] }
   0xd   :  { %v45_v34 = vpack.c.bf16 %v12_v33, %v12_v33 }
   0xf   :  { %213 = vmatpush1.bf16.msra.mxu0 %v369_v15  ;;  %254 = vmatpush1.bf16.msra.mxu1 %v370_v16 }
  0x10   :  { %214 = vmatprep.subr.bf16.mxu0 %v371_v17  ;;  %255 = vmatprep.subr.bf16.mxu1 %v373_v18 }
  0x13   :  { %215 = vmatpush1.bf16.msra.mxu0 %v375_v19  ;;  %256 = vmatpush1.bf16.msra.mxu1 %v376_v20 }
  0x14   :  { %216 = vmatprep.subr.bf16.mxu0 %v377_v21  ;;  %257 = vmatprep.subr.bf16.mxu1 %v379_v22 }
  0x17   :  { %217 = vmatpush1.bf16.msra.mxu0 %v381_v23  ;;  %258 = vmatpush1.bf16.msra.mxu1 %v382_v24 }
  0x18   :  { %218 = vmatprep.subr.bf16.mxu0 %v383_v25  ;;  %259 = vmatprep.subr.bf16.mxu1 %v385_v26 }
  0x1b   :  { %219 = vmatpush1.bf16.msra.mxu0 %v387_v27  ;;  %260 = vmatpush1.bf16.msra.mxu1 %v388_v28 }
  0x1c   :  { %220 = vmatprep.subr.bf16.mxu0 %v389_v29  ;;  %261 = vmatprep.subr.bf16.mxu1 %v391_v30 }
  0x1f   :  { %221 = vmatpush1.bf16.msra.mxu0 %v393_v31  ;;  %262 = vmatpush1.bf16.msra.mxu1 %v394_v32 }
  0x22   :  { %239 = vmatmul.mubr.bf16.vlgmr.msra.gmra.mrb[0].mxu0 %v45_v34  ;;  %280 = vmatmul.mubr.bf16.vlgmr.msra.gmra.mrb[0].mxu1 %v45_v34 }
  0xf5   :  { %v240_v35 = vpop.f32.mrb[0].mxu0  ;;  %v281_v36 = vpop.f32.mrb[0].mxu1 }
  0xf6   :  { %v242_v37 = vpop.f32.mrb[1].mxu0  ;;  %v283_v38 = vpop.f32.mrb[1].mxu1 }
  0xf7   :  { %v344_v39 = vpack.c.bf16 %v242_v37, %v240_v35  ;;  %v345_v40 = vpack.c.bf16 %v283_v38, %v281_v36  ;;  %v244_v41 = vpop.f32.mrb[2].mxu0  ;;  %v285_v42 = vpop.f32.mrb[2].mxu1 }
  0xf8   :  { %v245_v43 = vpop.f32.mrb[3].mxu0  ;;  %v286_v44 = vpop.f32.mrb[3].mxu1 }
  0xf9   :  { %304 = vst [vmem:[%s518_s2] sm:$0xff] %v344_v39  ;;  %305 = vst [vmem:[%s518_s2 + $0x8] sm:$0xff] %v345_v40 }

</bundles_post_ra>
